<compile_context>
chip_gen: v7x
topology: tpu7x:2x2x1
jax: 0.10.0
libtpu: 0.0.40
codegen_flags: <defaults>
</compile_context>

<pallas_src>
import functools

import numpy as np
import jax
import jax.numpy as jnp
from jax.experimental import pallas as pl
from jax.experimental.pallas import tpu as pltpu

LANE = 128  # TPU lane width: conv OC and fc2 N are padded to this.


# ----------------------------- tiling helpers ------------------------------ #

def _largest_div(dim, mult, cap):
    """Largest divisor of `dim` that is a multiple of `mult` and <= cap.
    Falls back to the full dim (allowed by the (8,128) rule) if none exists."""
    if dim % mult != 0:
        return dim
    best = mult
    d = mult
    top = min(dim, cap)
    while d <= top:
        if dim % d == 0:
            best = d
        d += mult
    return best


def _out_hw(s, k, stride):
    return (s - k) // stride + 1


# --------------------------- Pallas GEMM kernels ---------------------------- #

def _gemm_bias_relu_kernel(x_ref, w_ref, b_ref, o_ref, acc_ref):
    # Tiled (tm,tk)@(tk,tn) with f32 accumulator; bias + ReLU fused at the
    # last K step so the output tile is written exactly once (lane-dense).
    @pl.when(pl.program_id(2) == 0)
    def _():
        acc_ref[...] = jnp.zeros_like(acc_ref)

    acc_ref[...] += jnp.dot(x_ref[...], w_ref[...],
                            preferred_element_type=jnp.float32)

    @pl.when(pl.program_id(2) == pl.num_programs(2) - 1)
    def _():
        o_ref[...] = jnp.maximum(acc_ref[...] + b_ref[...],
                                 0.0).astype(o_ref.dtype)


def gemm_bias_relu(x, w, b):
    """relu(x @ w + b); x:(M,K), w:(K,N), b:(1,N), N multiple of 128."""
    M, K = x.shape
    K2, N = w.shape
    assert K == K2 and N % LANE == 0, (x.shape, w.shape)
    tm = _largest_div(M, 8, 512)
    tn = _largest_div(N, LANE, 256)
    tk = _largest_div(K, LANE, 1024)
    grid = (M // tm, N // tn, K // tk)
    return pl.pallas_call(
        _gemm_bias_relu_kernel,
        out_shape=jax.ShapeDtypeStruct((M, N), jnp.float32),
        grid_spec=pltpu.PrefetchScalarGridSpec(
            num_scalar_prefetch=0,
            grid=grid,
            in_specs=[
                pl.BlockSpec((tm, tk), lambda i, j, k: (i, k)),
                pl.BlockSpec((tk, tn), lambda i, j, k: (k, j)),
                pl.BlockSpec((1, tn), lambda i, j, k: (0, j)),
            ],
            out_specs=pl.BlockSpec((tm, tn), lambda i, j, k: (i, j)),
            scratch_shapes=[pltpu.VMEM((tm, tn), jnp.float32)],
        ),
        compiler_params=pltpu.CompilerParams(
            dimension_semantics=("parallel", "parallel", "arbitrary"),
            vmem_limit_bytes=32 * 1024 * 1024,
        ),
    )(x, w, b)


def _fc_fused_kernel(x_ref, w1_ref, b1_ref, w2_ref, b2_ref, o_ref, acc_ref):
    # Step j: h_j = relu(x @ W1[:, j*128:(j+1)*128] + b1_j)   (MXU + VPU)
    #         acc += h_j @ W2[j*128:(j+1)*128, :]
    # Final step adds b2 and stores the single lane-dense output tile.
    j = pl.program_id(0)

    @pl.when(j == 0)
    def _():
        acc_ref[...] = jnp.zeros_like(acc_ref)

    h = jnp.dot(x_ref[...], w1_ref[...], preferred_element_type=jnp.float32)
    h = jnp.maximum(h + b1_ref[...], 0.0)
    acc_ref[...] += jnp.dot(h, w2_ref[...], preferred_element_type=jnp.float32)

    @pl.when(j == pl.num_programs(0) - 1)
    def _():
        o_ref[...] = (acc_ref[...] + b2_ref[...]).astype(o_ref.dtype)


def fc_fused(x, w1, b1, w2, b2):
    """relu(x @ w1 + b1) @ w2 + b2 in one pallas_call.

    The grid streams w1 in 128-wide column blocks (double-buffered against MXU
    work); the hidden activation and the fc2 accumulator live only in VMEM."""
    M, K = x.shape
    K2, H = w1.shape
    H2, N = w2.shape
    assert K == K2 and H == H2 and H % LANE == 0 and N % LANE == 0
    th = LANE
    grid = (H // th,)
    return pl.pallas_call(
        _fc_fused_kernel,
        out_shape=jax.ShapeDtypeStruct((M, N), jnp.float32),
        grid_spec=pltpu.PrefetchScalarGridSpec(
            num_scalar_prefetch=0,
            grid=grid,
            in_specs=[
                pl.BlockSpec((M, K), lambda j: (0, 0)),    # resident across grid
                pl.BlockSpec((K, th), lambda j: (0, j)),   # fc1 weight col block
                pl.BlockSpec((1, th), lambda j: (0, j)),   # fc1 bias block
                pl.BlockSpec((th, N), lambda j: (j, 0)),   # fc2 weight row block
                pl.BlockSpec((1, N), lambda j: (0, 0)),    # fc2 bias (padded)
            ],
            out_specs=pl.BlockSpec((M, N), lambda j: (0, 0)),
            scratch_shapes=[pltpu.VMEM((M, N), jnp.float32)],
        ),
        compiler_params=pltpu.CompilerParams(
            dimension_semantics=("arbitrary",),
            vmem_limit_bytes=32 * 1024 * 1024,
        ),
    )(x, w1, b1, w2, b2)


# ------------------------------ conv wrappers ------------------------------- #

def _im2col_nhwc(x, kh, kw, stride):
    """x: (N,H,W,C) -> patches (N*OH*OW, KH*KW*C); patch col = (i*KW+j)*C + c."""
    # TODO(synk): at training-scale batches, do the KH*KW tap accumulation
    # inside the kernel (shifted matmuls) to avoid materializing patches in HBM.
    n, h, w, c = x.shape
    oh = _out_hw(h, kh, stride)
    ow = _out_hw(w, kw, stride)
    taps = []
    for i in range(kh):
        for j in range(kw):
            taps.append(x[:, i:i + stride * oh:stride, j:j + stride * ow:stride, :])
    p = jnp.stack(taps, axis=3)                      # (N, OH, OW, KH*KW, C)
    return p.reshape(n * oh * ow, kh * kw * c), oh, ow


def conv2d_relu(x, w_prep, b_prep, kh, kw, stride):
    """NHWC conv via im2col + fused Pallas GEMM; output NHWC, OC padded to 128."""
    n = x.shape[0]
    patches, oh, ow = _im2col_nhwc(x, kh, kw, stride)
    out = gemm_bias_relu(patches, w_prep, b_prep)
    return out.reshape(n, oh, ow, LANE)


# ------------------------------ parameter prep ------------------------------ #

def _prep_conv(w, b, in_ch_pad):
    """PyTorch (OC,C,KH,KW) -> (KH*KW*in_ch_pad, 128) with zero padding.

    Row order matches the NHWC im2col patch order (i*KW+j)*C + c; padded input
    channels get zero rows, padded output channels get zero columns/bias."""
    oc, c, kh, kw = w.shape
    wt = jnp.transpose(w, (2, 3, 1, 0))              # (KH, KW, C, OC)
    wt = jnp.pad(wt, ((0, 0), (0, 0), (0, in_ch_pad - c), (0, LANE - oc)))
    wp = wt.reshape(kh * kw * in_ch_pad, LANE)
    bp = jnp.pad(b, (0, LANE - oc)).reshape(1, LANE)
    return wp, bp


def prepare_params(params, input_shape):
    """One-time weight prep (done outside the jitted forward)."""
    c, h, w = input_shape
    h1, w1 = _out_hw(h, 8, 4), _out_hw(w, 8, 4)
    h2, w2 = _out_hw(h1, 4, 2), _out_hw(w1, 4, 2)
    h3, w3 = _out_hw(h2, 3, 1), _out_hw(w2, 3, 1)
    c3 = params["w3"].shape[0]

    p = {}
    p["w1"], p["b1"] = _prep_conv(params["w1"], params["b1"], in_ch_pad=c)
    p["w2"], p["b2"] = _prep_conv(params["w2"], params["b2"], in_ch_pad=LANE)
    p["w3"], p["b3"] = _prep_conv(params["w3"], params["b3"], in_ch_pad=LANE)

    # fc1: fold PyTorch's NCHW flatten order (c*H*W + h*W + w) into an NHWC
    # column permutation and store as (in, out) — no per-forward transpose.
    fc1_w = params["fc1_w"]                                   # (512, c3*h3*w3)
    fc1_w = fc1_w.reshape(-1, c3, h3, w3).transpose(0, 2, 3, 1)
    p["fc1_w"] = fc1_w.reshape(fc1_w.shape[0], -1).T          # (h3*w3*c3, 512)
    p["fc1_b"] = params["fc1_b"].reshape(1, -1)

    # fc2: (num_actions, 512) -> (512, 128) with zero-padded action columns.
    na = params["fc2_w"].shape[0]
    p["fc2_w"] = jnp.pad(params["fc2_w"].T, ((0, 0), (0, LANE - na)))
    p["fc2_b"] = jnp.pad(params["fc2_b"], (0, LANE - na)).reshape(1, LANE)
    return p


# --------------------------------- model ----------------------------------- #

def calc_conv_output(input_shape):
    c, h, w = input_shape
    h1, w1 = _out_hw(h, 8, 4), _out_hw(w, 8, 4)
    h2, w2 = _out_hw(h1, 4, 2), _out_hw(w1, 4, 2)
    h3, w3 = _out_hw(h2, 3, 1), _out_hw(w2, 3, 1)
    return 64 * h3 * w3


def init_params(key, input_shape, num_actions):
    c = input_shape[0]
    conv_out = calc_conv_output(input_shape)
    keys = jax.random.split(key, 10)

    def uni(k, fan_in, shape):
        bound = 1.0 / np.sqrt(fan_in)
        return jax.random.uniform(k, shape, jnp.float32, -bound, bound)

    return {
        "w1": uni(keys[0], c * 8 * 8, (32, c, 8, 8)),
        "b1": uni(keys[1], c * 8 * 8, (32,)),
        "w2": uni(keys[2], 32 * 4 * 4, (64, 32, 4, 4)),
        "b2": uni(keys[3], 32 * 4 * 4, (64,)),
        "w3": uni(keys[4], 64 * 3 * 3, (64, 64, 3, 3)),
        "b3": uni(keys[5], 64 * 3 * 3, (64,)),
        "fc1_w": uni(keys[6], conv_out, (512, conv_out)),   # PyTorch (out, in)
        "fc1_b": uni(keys[7], conv_out, (512,)),
        "fc2_w": uni(keys[8], 512, (num_actions, 512)),
        "fc2_b": uni(keys[9], 512, (num_actions,)),
    }


def convdqn_forward(prepared, x, *, num_actions):
    # x: (N, C, H, W) float32 (PyTorch layout). One transpose to NHWC, then
    # activations stay NHWC with OC padded to 128 through the whole conv stack.
    x = jnp.transpose(x, (0, 2, 3, 1))
    x = conv2d_relu(x, prepared["w1"], prepared["b1"], 8, 8, 4)
    x = conv2d_relu(x, prepared["w2"], prepared["b2"], 4, 4, 2)
    x = conv2d_relu(x, prepared["w3"], prepared["b3"], 3, 3, 1)
    n, h3, w3, _ = x.shape
    c3 = prepared["fc1_w"].shape[0] // (h3 * w3)      # true conv3 channels (64)
    flat = x[:, :, :, :c3].reshape(n, -1)             # NHWC flatten; fc1_w permuted to match
    out = fc_fused(flat, prepared["fc1_w"], prepared["fc1_b"],
                   prepared["fc2_w"], prepared["fc2_b"])
    return out[:, :num_actions]


# ------------------------------- reference ---------------------------------- #

def convdqn_reference(params, x):
    """Pure-JAX NCHW reference mirroring the PyTorch module."""
    hp = jax.lax.Precision.HIGHEST

    def conv(x, w, b, s):
        y = jax.lax.conv_general_dilated(
            x, w, (s, s), "VALID",
            dimension_numbers=("NCHW", "OIHW", "NCHW"), precision=hp)
        return jax.nn.relu(y + b[None, :, None, None])

    x = conv(x, params["w1"], params["b1"], 4)
    x = conv(x, params["w2"], params["b2"], 2)
    x = conv(x, params["w3"], params["b3"], 1)
    flat = x.reshape(x.shape[0], -1)
    h = jax.nn.relu(jnp.dot(flat, params["fc1_w"].T, precision=hp) + params["fc1_b"])
    return jnp.dot(h, params["fc2_w"].T, precision=hp) + params["fc2_b"]


# ---------------------------------- main ------------------------------------ #

if __name__ == "__main__":
    input_shape = (1, 84, 84)     # matches the module's global `input_shape`
    num_actions = 2               # CartPole-v1 action space size
    batch = 2

    key = jax.random.PRNGKey(0)
    pkey, xkey = jax.random.split(key)
    params = init_params(pkey, input_shape, num_actions)
    x = jax.random.normal(xkey, (batch,) + input_shape, dtype=jnp.float32)

    prepared = prepare_params(params, input_shape)            # one-time prep
    fwd = jax.jit(functools.partial(convdqn_forward, num_actions=num_actions))

    q_values = fwd(prepared, x)
    jax.block_until_ready(q_values)

    assert q_values.shape == (batch, num_actions), q_values.shape
    assert q_values.dtype == jnp.float32

    q_ref = jax.jit(convdqn_reference)(params, x)
    max_err = float(jnp.max(jnp.abs(q_values - q_ref)))
    assert max_err < 2e-2, f"mismatch vs reference: max_err={max_err}"

    print("KERNEL_OK")
</pallas_src>

<mosaic_0001>
module attributes {stable_mosaic.version = 11 : i64} {
  func.func @_gemm_bias_relu_kernel(%arg0: i32, %arg1: i32, %arg2: i32, %arg3: memref<400x64xf32, #tpu.memory_space<vmem>>, %arg4: memref<64x128xf32, #tpu.memory_space<vmem>>, %arg5: memref<1x128xf32, #tpu.memory_space<vmem>>, %arg6: memref<400x128xf32, #tpu.memory_space<vmem>>, %arg7: memref<400x128xf32, #tpu.memory_space<vmem>>) attributes {dimension_semantics = [#tpu.dimension_semantics<parallel>, #tpu.dimension_semantics<parallel>, #tpu.dimension_semantics<arbitrary>], iteration_bounds = array<i64: 2, 1, 1>, scalar_prefetch = 0 : i64, scratch_operands = 1 : i64, tpu.core_type = #tpu.core_type<tc>, window_params = [{transform_indices = @transform_0, window_bounds = array<i64: 400, 64>}, {transform_indices = @transform_1, window_bounds = array<i64: 64, 128>}, {transform_indices = @transform_2, window_bounds = array<i64: 1, 128>}, {transform_indices = @transform_3, window_bounds = array<i64: 400, 128>}]} {
    %c0_i32 = arith.constant 0 : i32
    %0 = arith.cmpi eq, %arg2, %c0_i32 : i32
    %1 = arith.extui %0 : i1 to i32
    %c0_i32_0 = arith.constant 0 : i32
    %2 = arith.cmpi ne, %1, %c0_i32_0 : i32
    scf.if %2 {
      %cst_10 = arith.constant 0.000000e+00 : f32
      %12 = vector.broadcast %cst_10 : f32 to vector<400x128xf32>
      %c0_11 = arith.constant 0 : index
      %c0_12 = arith.constant 0 : index
      %13 = vector.load %arg7[%c0_11, %c0_12] : memref<400x128xf32, #tpu.memory_space<vmem>>, vector<400x128xf32>
      tpu.vector_store %arg7[%c0_11, %c0_12], %12 {strides = array<i32>} : memref<400x128xf32, #tpu.memory_space<vmem>>, vector<400x128xf32>,
    } else {
    }
    %c0 = arith.constant 0 : index
    %c0_1 = arith.constant 0 : index
    %3 = vector.load %arg7[%c0, %c0_1] : memref<400x128xf32, #tpu.memory_space<vmem>>, vector<400x128xf32>
    %c0_2 = arith.constant 0 : index
    %c0_3 = arith.constant 0 : index
    %4 = vector.load %arg3[%c0_2, %c0_3] : memref<400x64xf32, #tpu.memory_space<vmem>>, vector<400x64xf32>
    %c0_4 = arith.constant 0 : index
    %c0_5 = arith.constant 0 : index
    %5 = vector.load %arg4[%c0_4, %c0_5] : memref<64x128xf32, #tpu.memory_space<vmem>>, vector<64x128xf32>
    %cst = arith.constant dense<0.000000e+00> : vector<400x128xf32>
    %6 = tpu.matmul %4, %5, %cst {dimension_numbers = #tpu.dot_dimension_numbers<[1], [0], [0], [1], [0, 0, 1, 1], [], []>} : vector<400x64xf32>, vector<64x128xf32>, vector<400x128xf32> -> vector<400x128xf32>
    %7 = arith.addf %3, %6 : vector<400x128xf32>
    %c0_6 = arith.constant 0 : index
    %c0_7 = arith.constant 0 : index
    %8 = vector.load %arg7[%c0_6, %c0_7] : memref<400x128xf32, #tpu.memory_space<vmem>>, vector<400x128xf32>
    tpu.vector_store %arg7[%c0_6, %c0_7], %7 {strides = array<i32>} : memref<400x128xf32, #tpu.memory_space<vmem>>, vector<400x128xf32>,
    %c0_i32_8 = arith.constant 0 : i32
    %9 = arith.cmpi eq, %arg2, %c0_i32_8 : i32
    %10 = arith.extui %9 : i1 to i32
    %c0_i32_9 = arith.constant 0 : i32
    %11 = arith.cmpi ne, %10, %c0_i32_9 : i32
    scf.if %11 {
      %c0_10 = arith.constant 0 : index
      %c0_11 = arith.constant 0 : index
      %12 = vector.load %arg7[%c0_10, %c0_11] : memref<400x128xf32, #tpu.memory_space<vmem>>, vector<400x128xf32>
      %c0_12 = arith.constant 0 : index
      %c0_13 = arith.constant 0 : index
      %13 = vector.load %arg5[%c0_12, %c0_13] : memref<1x128xf32, #tpu.memory_space<vmem>>, vector<1x128xf32>
      %14 = vector.broadcast %13 : vector<1x128xf32> to vector<400x128xf32>
      %15 = arith.addf %12, %14 : vector<400x128xf32>
      %cst_14 = arith.constant 0.000000e+00 : f32
      %16 = vector.broadcast %cst_14 : f32 to vector<400x128xf32>
      %17 = arith.maximumf %15, %16 : vector<400x128xf32>
      %c0_15 = arith.constant 0 : index
      %c0_16 = arith.constant 0 : index
      %18 = vector.load %arg6[%c0_15, %c0_16] : memref<400x128xf32, #tpu.memory_space<vmem>>, vector<400x128xf32>
      tpu.vector_store %arg6[%c0_15, %c0_16], %17 {strides = array<i32>} : memref<400x128xf32, #tpu.memory_space<vmem>>, vector<400x128xf32>,
    } else {
    }
    return
  }
  func.func @transform_0(%arg0: i32, %arg1: i32, %arg2: i32) -> (i32, i32) {
    %c0_i32 = arith.constant 0 : i32
    return %arg0, %arg2 : i32, i32
  }
  func.func @transform_1(%arg0: i32, %arg1: i32, %arg2: i32) -> (i32, i32) {
    %c0_i32 = arith.constant 0 : i32
    return %arg2, %arg1 : i32, i32
  }
  func.func @transform_2(%arg0: i32, %arg1: i32, %arg2: i32) -> (i32, i32) {
    %c0_i32 = arith.constant 0 : i32
    %c0_i32_0 = arith.constant 0 : i32
    return %c0_i32, %arg1 : i32, i32
  }
  func.func @transform_3(%arg0: i32, %arg1: i32, %arg2: i32) -> (i32, i32) {
    %c0_i32 = arith.constant 0 : i32
    return %arg0, %arg1 : i32, i32
  }
}

module attributes {stable_mosaic.version = 11 : i64} {
  func.func @_gemm_bias_relu_kernel(%arg0: i32, %arg1: i32, %arg2: i32, %arg3: memref<162x1024xf32, #tpu.memory_space<vmem>>, %arg4: memref<1024x128xf32, #tpu.memory_space<vmem>>, %arg5: memref<1x128xf32, #tpu.memory_space<vmem>>, %arg6: memref<162x128xf32, #tpu.memory_space<vmem>>, %arg7: memref<162x128xf32, #tpu.memory_space<vmem>>) attributes {dimension_semantics = [#tpu.dimension_semantics<parallel>, #tpu.dimension_semantics<parallel>, #tpu.dimension_semantics<arbitrary>], iteration_bounds = array<i64: 1, 1, 2>, scalar_prefetch = 0 : i64, scratch_operands = 1 : i64, tpu.core_type = #tpu.core_type<tc>, window_params = [{transform_indices = @transform_0, window_bounds = array<i64: 162, 1024>}, {transform_indices = @transform_1, window_bounds = array<i64: 1024, 128>}, {transform_indices = @transform_2, window_bounds = array<i64: 1, 128>}, {transform_indices = @transform_3, window_bounds = array<i64: 162, 128>}]} {
    %c0_i32 = arith.constant 0 : i32
    %0 = arith.cmpi eq, %arg2, %c0_i32 : i32
    %1 = arith.extui %0 : i1 to i32
    %c0_i32_0 = arith.constant 0 : i32
    %2 = arith.cmpi ne, %1, %c0_i32_0 : i32
    scf.if %2 {
      %cst_9 = arith.constant 0.000000e+00 : f32
      %12 = vector.broadcast %cst_9 : f32 to vector<162x128xf32>
      %c0_10 = arith.constant 0 : index
      %c0_11 = arith.constant 0 : index
      %13 = vector.load %arg7[%c0_10, %c0_11] : memref<162x128xf32, #tpu.memory_space<vmem>>, vector<162x128xf32>
      tpu.vector_store %arg7[%c0_10, %c0_11], %12 {strides = array<i32>} : memref<162x128xf32, #tpu.memory_space<vmem>>, vector<162x128xf32>,
    } else {
    }
    %c0 = arith.constant 0 : index
    %c0_1 = arith.constant 0 : index
    %3 = vector.load %arg7[%c0, %c0_1] : memref<162x128xf32, #tpu.memory_space<vmem>>, vector<162x128xf32>
    %c0_2 = arith.constant 0 : index
    %c0_3 = arith.constant 0 : index
    %4 = vector.load %arg3[%c0_2, %c0_3] : memref<162x1024xf32, #tpu.memory_space<vmem>>, vector<162x1024xf32>
    %c0_4 = arith.constant 0 : index
    %c0_5 = arith.constant 0 : index
    %5 = vector.load %arg4[%c0_4, %c0_5] : memref<1024x128xf32, #tpu.memory_space<vmem>>, vector<1024x128xf32>
    %cst = arith.constant dense<0.000000e+00> : vector<162x128xf32>
    %6 = tpu.matmul %4, %5, %cst {dimension_numbers = #tpu.dot_dimension_numbers<[1], [0], [0], [1], [0, 0, 1, 1], [], []>} : vector<162x1024xf32>, vector<1024x128xf32>, vector<162x128xf32> -> vector<162x128xf32>
    %7 = arith.addf %3, %6 : vector<162x128xf32>
    %c0_6 = arith.constant 0 : index
    %c0_7 = arith.constant 0 : index
    %8 = vector.load %arg7[%c0_6, %c0_7] : memref<162x128xf32, #tpu.memory_space<vmem>>, vector<162x128xf32>
    tpu.vector_store %arg7[%c0_6, %c0_7], %7 {strides = array<i32>} : memref<162x128xf32, #tpu.memory_space<vmem>>, vector<162x128xf32>,
    %c1_i32 = arith.constant 1 : i32
    %9 = arith.cmpi eq, %arg2, %c1_i32 : i32
    %10 = arith.extui %9 : i1 to i32
    %c0_i32_8 = arith.constant 0 : i32
    %11 = arith.cmpi ne, %10, %c0_i32_8 : i32
    scf.if %11 {
      %c0_9 = arith.constant 0 : index
      %c0_10 = arith.constant 0 : index
      %12 = vector.load %arg7[%c0_9, %c0_10] : memref<162x128xf32, #tpu.memory_space<vmem>>, vector<162x128xf32>
      %c0_11 = arith.constant 0 : index
      %c0_12 = arith.constant 0 : index
      %13 = vector.load %arg5[%c0_11, %c0_12] : memref<1x128xf32, #tpu.memory_space<vmem>>, vector<1x128xf32>
      %14 = vector.broadcast %13 : vector<1x128xf32> to vector<162x128xf32>
      %15 = arith.addf %12, %14 : vector<162x128xf32>
      %cst_13 = arith.constant 0.000000e+00 : f32
      %16 = vector.broadcast %cst_13 : f32 to vector<162x128xf32>
      %17 = arith.maximumf %15, %16 : vector<162x128xf32>
      %c0_14 = arith.constant 0 : index
      %c0_15 = arith.constant 0 : index
      %18 = vector.load %arg6[%c0_14, %c0_15] : memref<162x128xf32, #tpu.memory_space<vmem>>, vector<162x128xf32>
      tpu.vector_store %arg6[%c0_14, %c0_15], %17 {strides = array<i32>} : memref<162x128xf32, #tpu.memory_space<vmem>>, vector<162x128xf32>,
    } else {
    }
    return
  }
  func.func @transform_0(%arg0: i32, %arg1: i32, %arg2: i32) -> (i32, i32) {
    %c0_i32 = arith.constant 0 : i32
    return %arg0, %arg2 : i32, i32
  }
  func.func @transform_1(%arg0: i32, %arg1: i32, %arg2: i32) -> (i32, i32) {
    %c0_i32 = arith.constant 0 : i32
    return %arg2, %arg1 : i32, i32
  }
  func.func @transform_2(%arg0: i32, %arg1: i32, %arg2: i32) -> (i32, i32) {
    %c0_i32 = arith.constant 0 : i32
    %c0_i32_0 = arith.constant 0 : i32
    return %c0_i32, %arg1 : i32, i32
  }
  func.func @transform_3(%arg0: i32, %arg1: i32, %arg2: i32) -> (i32, i32) {
    %c0_i32 = arith.constant 0 : i32
    return %arg0, %arg1 : i32, i32
  }
}

module attributes {stable_mosaic.version = 11 : i64} {
  func.func @_gemm_bias_relu_kernel(%arg0: i32, %arg1: i32, %arg2: i32, %arg3: memref<98x384xf32, #tpu.memory_space<vmem>>, %arg4: memref<384x128xf32, #tpu.memory_space<vmem>>, %arg5: memref<1x128xf32, #tpu.memory_space<vmem>>, %arg6: memref<98x128xf32, #tpu.memory_space<vmem>>, %arg7: memref<98x128xf32, #tpu.memory_space<vmem>>) attributes {dimension_semantics = [#tpu.dimension_semantics<parallel>, #tpu.dimension_semantics<parallel>, #tpu.dimension_semantics<arbitrary>], iteration_bounds = array<i64: 1, 1, 3>, scalar_prefetch = 0 : i64, scratch_operands = 1 : i64, tpu.core_type = #tpu.core_type<tc>, window_params = [{transform_indices = @transform_0, window_bounds = array<i64: 98, 384>}, {transform_indices = @transform_1, window_bounds = array<i64: 384, 128>}, {transform_indices = @transform_2, window_bounds = array<i64: 1, 128>}, {transform_indices = @transform_3, window_bounds = array<i64: 98, 128>}]} {
    %c0_i32 = arith.constant 0 : i32
    %0 = arith.cmpi eq, %arg2, %c0_i32 : i32
    %1 = arith.extui %0 : i1 to i32
    %c0_i32_0 = arith.constant 0 : i32
    %2 = arith.cmpi ne, %1, %c0_i32_0 : i32
    scf.if %2 {
      %cst_9 = arith.constant 0.000000e+00 : f32
      %12 = vector.broadcast %cst_9 : f32 to vector<98x128xf32>
      %c0_10 = arith.constant 0 : index
      %c0_11 = arith.constant 0 : index
      %13 = vector.load %arg7[%c0_10, %c0_11] : memref<98x128xf32, #tpu.memory_space<vmem>>, vector<98x128xf32>
      tpu.vector_store %arg7[%c0_10, %c0_11], %12 {strides = array<i32>} : memref<98x128xf32, #tpu.memory_space<vmem>>, vector<98x128xf32>,
    } else {
    }
    %c0 = arith.constant 0 : index
    %c0_1 = arith.constant 0 : index
    %3 = vector.load %arg7[%c0, %c0_1] : memref<98x128xf32, #tpu.memory_space<vmem>>, vector<98x128xf32>
    %c0_2 = arith.constant 0 : index
    %c0_3 = arith.constant 0 : index
    %4 = vector.load %arg3[%c0_2, %c0_3] : memref<98x384xf32, #tpu.memory_space<vmem>>, vector<98x384xf32>
    %c0_4 = arith.constant 0 : index
    %c0_5 = arith.constant 0 : index
    %5 = vector.load %arg4[%c0_4, %c0_5] : memref<384x128xf32, #tpu.memory_space<vmem>>, vector<384x128xf32>
    %cst = arith.constant dense<0.000000e+00> : vector<98x128xf32>
    %6 = tpu.matmul %4, %5, %cst {dimension_numbers = #tpu.dot_dimension_numbers<[1], [0], [0], [1], [0, 0, 1, 1], [], []>} : vector<98x384xf32>, vector<384x128xf32>, vector<98x128xf32> -> vector<98x128xf32>
    %7 = arith.addf %3, %6 : vector<98x128xf32>
    %c0_6 = arith.constant 0 : index
    %c0_7 = arith.constant 0 : index
    %8 = vector.load %arg7[%c0_6, %c0_7] : memref<98x128xf32, #tpu.memory_space<vmem>>, vector<98x128xf32>
    tpu.vector_store %arg7[%c0_6, %c0_7], %7 {strides = array<i32>} : memref<98x128xf32, #tpu.memory_space<vmem>>, vector<98x128xf32>,
    %c2_i32 = arith.constant 2 : i32
    %9 = arith.cmpi eq, %arg2, %c2_i32 : i32
    %10 = arith.extui %9 : i1 to i32
    %c0_i32_8 = arith.constant 0 : i32
    %11 = arith.cmpi ne, %10, %c0_i32_8 : i32
    scf.if %11 {
      %c0_9 = arith.constant 0 : index
      %c0_10 = arith.constant 0 : index
      %12 = vector.load %arg7[%c0_9, %c0_10] : memref<98x128xf32, #tpu.memory_space<vmem>>, vector<98x128xf32>
      %c0_11 = arith.constant 0 : index
      %c0_12 = arith.constant 0 : index
      %13 = vector.load %arg5[%c0_11, %c0_12] : memref<1x128xf32, #tpu.memory_space<vmem>>, vector<1x128xf32>
      %14 = vector.broadcast %13 : vector<1x128xf32> to vector<98x128xf32>
      %15 = arith.addf %12, %14 : vector<98x128xf32>
      %cst_13 = arith.constant 0.000000e+00 : f32
      %16 = vector.broadcast %cst_13 : f32 to vector<98x128xf32>
      %17 = arith.maximumf %15, %16 : vector<98x128xf32>
      %c0_14 = arith.constant 0 : index
      %c0_15 = arith.constant 0 : index
      %18 = vector.load %arg6[%c0_14, %c0_15] : memref<98x128xf32, #tpu.memory_space<vmem>>, vector<98x128xf32>
      tpu.vector_store %arg6[%c0_14, %c0_15], %17 {strides = array<i32>} : memref<98x128xf32, #tpu.memory_space<vmem>>, vector<98x128xf32>,
    } else {
    }
    return
  }
  func.func @transform_0(%arg0: i32, %arg1: i32, %arg2: i32) -> (i32, i32) {
    %c0_i32 = arith.constant 0 : i32
    return %arg0, %arg2 : i32, i32
  }
  func.func @transform_1(%arg0: i32, %arg1: i32, %arg2: i32) -> (i32, i32) {
    %c0_i32 = arith.constant 0 : i32
    return %arg2, %arg1 : i32, i32
  }
  func.func @transform_2(%arg0: i32, %arg1: i32, %arg2: i32) -> (i32, i32) {
    %c0_i32 = arith.constant 0 : i32
    %c0_i32_0 = arith.constant 0 : i32
    return %c0_i32, %arg1 : i32, i32
  }
  func.func @transform_3(%arg0: i32, %arg1: i32, %arg2: i32) -> (i32, i32) {
    %c0_i32 = arith.constant 0 : i32
    return %arg0, %arg1 : i32, i32
  }
}

module attributes {stable_mosaic.version = 11 : i64} {
  func.func @_fc_fused_kernel(%arg0: i32, %arg1: memref<2x3136xf32, #tpu.memory_space<vmem>>, %arg2: memref<3136x128xf32, #tpu.memory_space<vmem>>, %arg3: memref<1x128xf32, #tpu.memory_space<vmem>>, %arg4: memref<128x128xf32, #tpu.memory_space<vmem>>, %arg5: memref<1x128xf32, #tpu.memory_space<vmem>>, %arg6: memref<2x128xf32, #tpu.memory_space<vmem>>, %arg7: memref<2x128xf32, #tpu.memory_space<vmem>>) attributes {dimension_semantics = [#tpu.dimension_semantics<arbitrary>], iteration_bounds = array<i64: 4>, scalar_prefetch = 0 : i64, scratch_operands = 1 : i64, tpu.core_type = #tpu.core_type<tc>, window_params = [{pipeline_mode = #tpu.pipeline_mode<synchronous>, transform_indices = @transform_0, window_bounds = array<i64: 2, 3136>}, {transform_indices = @transform_1, window_bounds = array<i64: 3136, 128>}, {transform_indices = @transform_2, window_bounds = array<i64: 1, 128>}, {transform_indices = @transform_3, window_bounds = array<i64: 128, 128>}, {pipeline_mode = #tpu.pipeline_mode<synchronous>, transform_indices = @transform_4, window_bounds = array<i64: 1, 128>}, {pipeline_mode = #tpu.pipeline_mode<synchronous>, transform_indices = @transform_5, window_bounds = array<i64: 2, 128>}]} {
    %c0_i32 = arith.constant 0 : i32
    %0 = arith.cmpi eq, %arg0, %c0_i32 : i32
    %1 = arith.extui %0 : i1 to i32
    %c0_i32_0 = arith.constant 0 : i32
    %2 = arith.cmpi ne, %1, %c0_i32_0 : i32
    scf.if %2 {
      %cst_15 = arith.constant 0.000000e+00 : f32
      %19 = vector.broadcast %cst_15 : f32 to vector<2x128xf32>
      %c0_16 = arith.constant 0 : index
      %c0_17 = arith.constant 0 : index
      %20 = vector.load %arg7[%c0_16, %c0_17] : memref<2x128xf32, #tpu.memory_space<vmem>>, vector<2x128xf32>
      tpu.vector_store %arg7[%c0_16, %c0_17], %19 {strides = array<i32>} : memref<2x128xf32, #tpu.memory_space<vmem>>, vector<2x128xf32>,
    } else {
    }
    %c0 = arith.constant 0 : index
    %c0_1 = arith.constant 0 : index
    %3 = vector.load %arg1[%c0, %c0_1] : memref<2x3136xf32, #tpu.memory_space<vmem>>, vector<2x3136xf32>
    %c0_2 = arith.constant 0 : index
    %c0_3 = arith.constant 0 : index
    %4 = vector.load %arg2[%c0_2, %c0_3] : memref<3136x128xf32, #tpu.memory_space<vmem>>, vector<3136x128xf32>
    %cst = arith.constant dense<0.000000e+00> : vector<2x128xf32>
    %5 = tpu.matmul %3, %4, %cst {dimension_numbers = #tpu.dot_dimension_numbers<[1], [0], [0], [1], [0, 0, 1, 1], [], []>} : vector<2x3136xf32>, vector<3136x128xf32>, vector<2x128xf32> -> vector<2x128xf32>
    %c0_4 = arith.constant 0 : index
    %c0_5 = arith.constant 0 : index
    %6 = vector.load %arg3[%c0_4, %c0_5] : memref<1x128xf32, #tpu.memory_space<vmem>>, vector<1x128xf32>
    %7 = vector.broadcast %6 : vector<1x128xf32> to vector<2x128xf32>
    %8 = arith.addf %5, %7 : vector<2x128xf32>
    %cst_6 = arith.constant 0.000000e+00 : f32
    %9 = vector.broadcast %cst_6 : f32 to vector<2x128xf32>
    %10 = arith.maximumf %8, %9 : vector<2x128xf32>
    %c0_7 = arith.constant 0 : index
    %c0_8 = arith.constant 0 : index
    %11 = vector.load %arg7[%c0_7, %c0_8] : memref<2x128xf32, #tpu.memory_space<vmem>>, vector<2x128xf32>
    %c0_9 = arith.constant 0 : index
    %c0_10 = arith.constant 0 : index
    %12 = vector.load %arg4[%c0_9, %c0_10] : memref<128x128xf32, #tpu.memory_space<vmem>>, vector<128x128xf32>
    %cst_11 = arith.constant dense<0.000000e+00> : vector<2x128xf32>
    %13 = tpu.matmul %10, %12, %cst_11 {dimension_numbers = #tpu.dot_dimension_numbers<[1], [0], [0], [1], [0, 0, 1, 1], [], []>} : vector<2x128xf32>, vector<128x128xf32>, vector<2x128xf32> -> vector<2x128xf32>
    %14 = arith.addf %11, %13 : vector<2x128xf32>
    %c0_12 = arith.constant 0 : index
    %c0_13 = arith.constant 0 : index
    %15 = vector.load %arg7[%c0_12, %c0_13] : memref<2x128xf32, #tpu.memory_space<vmem>>, vector<2x128xf32>
    tpu.vector_store %arg7[%c0_12, %c0_13], %14 {strides = array<i32>} : memref<2x128xf32, #tpu.memory_space<vmem>>, vector<2x128xf32>,
    %c3_i32 = arith.constant 3 : i32
    %16 = arith.cmpi eq, %arg0, %c3_i32 : i32
    %17 = arith.extui %16 : i1 to i32
    %c0_i32_14 = arith.constant 0 : i32
    %18 = arith.cmpi ne, %17, %c0_i32_14 : i32
    scf.if %18 {
      %c0_15 = arith.constant 0 : index
      %c0_16 = arith.constant 0 : index
      %19 = vector.load %arg7[%c0_15, %c0_16] : memref<2x128xf32, #tpu.memory_space<vmem>>, vector<2x128xf32>
      %c0_17 = arith.constant 0 : index
      %c0_18 = arith.constant 0 : index
      %20 = vector.load %arg5[%c0_17, %c0_18] : memref<1x128xf32, #tpu.memory_space<vmem>>, vector<1x128xf32>
      %21 = vector.broadcast %20 : vector<1x128xf32> to vector<2x128xf32>
      %22 = arith.addf %19, %21 : vector<2x128xf32>
      %c0_19 = arith.constant 0 : index
      %c0_20 = arith.constant 0 : index
      %23 = vector.load %arg6[%c0_19, %c0_20] : memref<2x128xf32, #tpu.memory_space<vmem>>, vector<2x128xf32>
      tpu.vector_store %arg6[%c0_19, %c0_20], %22 {strides = array<i32>} : memref<2x128xf32, #tpu.memory_space<vmem>>, vector<2x128xf32>,
    } else {
    }
    return
  }
  func.func @transform_0(%arg0: i32) -> (i32, i32) {
    %c0_i32 = arith.constant 0 : i32
    %c0_i32_0 = arith.constant 0 : i32
    %c0_i32_1 = arith.constant 0 : i32
    return %c0_i32, %c0_i32_0 : i32, i32
  }
  func.func @transform_1(%arg0: i32) -> (i32, i32) {
    %c0_i32 = arith.constant 0 : i32
    %c0_i32_0 = arith.constant 0 : i32
    return %c0_i32, %arg0 : i32, i32
  }
  func.func @transform_2(%arg0: i32) -> (i32, i32) {
    %c0_i32 = arith.constant 0 : i32
    %c0_i32_0 = arith.constant 0 : i32
    return %c0_i32, %arg0 : i32, i32
  }
  func.func @transform_3(%arg0: i32) -> (i32, i32) {
    %c0_i32 = arith.constant 0 : i32
    %c0_i32_0 = arith.constant 0 : i32
    return %arg0, %c0_i32 : i32, i32
  }
  func.func @transform_4(%arg0: i32) -> (i32, i32) {
    %c0_i32 = arith.constant 0 : i32
    %c0_i32_0 = arith.constant 0 : i32
    %c0_i32_1 = arith.constant 0 : i32
    return %c0_i32, %c0_i32_0 : i32, i32
  }
  func.func @transform_5(%arg0: i32) -> (i32, i32) {
    %c0_i32 = arith.constant 0 : i32
    %c0_i32_0 = arith.constant 0 : i32
    %c0_i32_1 = arith.constant 0 : i32
    return %c0_i32, %c0_i32_0 : i32, i32
  }
}

</mosaic_0001>

<bundles_post_ra>
// kernel: convdqn_forward.4
= control target key start
LH: loop header
LB: loop body
LE: loop exit
PB: predicated region body
PF: predicated region fallthrough
CT: control target
= control target key end

     0   :  { %s1611_s12 = smov 0   ;;  %s1613_s13 = smov 0   ;;  %s1884_s0 = inlined_call_operand.vmem [shape: f32[800,64], index: 0, kind: input, shape index: {}]   ;;  %s1885_s1 = inlined_call_operand.vmem [shape: f32[64,128], index: 1, kind: input, shape index: {}]   ;;  %s1886_s2 = inlined_call_operand.vmem [shape: f32[1,128], index: 2, kind: input, shape index: {}]   ;;  %s1887_s3 = inlined_call_operand.vmem [shape: f32[800,128], index: 3, kind: output, shape index: {}]  }
   0x1   :  { %s1615_s14 = smov 0  }
   0x2 LB: > { %s32_s15 = sadd.s32 1, %s1585_s13  ;;  %p1314_p0 = scmp.ge.s32.totalorder %s1589_s14, 1  ;;  %s1589_s14 = sphi %s1615_s14, %s13_s14   ;;  %s1585_s13 = sphi %s1613_s13, %s1889_s13   ;;  %s1581_s12 = sphi %s1611_s12, %s1888_s12  }
   0x3   : > { %p34_p1 = scmp.ge.s32.totalorder %s32_s15, 2  ;;  %p188_p2 = scmp.lt.s32.totalorder %s1589_s14, 3 }
   0x5   : > { %s1891_s15 = smov (%p34_p1, %s32_s15), 0  ;;  %p189_p3 = pnand %p1314_p0, %p188_p2 }
   0x6   : > { %v413_v0 = vld [vmem:[%s1885_s1] sm:$0xff] (!%p189_p3)  ;;  %v414_v1 = vld [vmem:[%s1885_s1 + $0x8] sm:$0xff] (!%p189_p3)  ;;  %v415_v2 = vld [vmem:[%s1885_s1 + $0x10] sm:$0xff] (!%p189_p3)  ;;  %s229_s22 = smul.u32 (!%p189_p3), 50, %s1581_s12  ;;  %vm421_vm0 = vcmask (!%p189_p3), 523264  }
   0x7   : > { %192 = sbr.rel (%p189_p3) target bundleno = 292 (0x124), region = 32  ;;  %v1519_v3 = vpack.c.bf16 (!%p189_p3), %v414_v1, %v413_v0  ;;  %v416_v4 = vld [vmem:[%s1885_s1 + $0x18] sm:$0xff] (!%p189_p3)  ;;  %v417_v6 = vld [vmem:[%s1885_s1 + $0x20] sm:$0xff] (!%p189_p3)  ;;  %v418_v7 = vld [vmem:[%s1885_s1 + $0x28] sm:$0xff] (!%p189_p3) }
   0x8   : > { %v1523_v5 = vpack.c.bf16 (!%p189_p3), %v416_v4, %v415_v2  ;;  %p230_p4 = scmp.lt.s32.totalorder (!%p189_p3), %s229_s22, 99  ;;  %v1527_v8 = vpack.c.bf16 (!%p189_p3), %v418_v7, %v417_v6  ;;  %v419_v9 = vld [vmem:[%s1885_s1 + $0x30] sm:$0xff] (!%p189_p3)  ;;  %v420_v10 = vld [vmem:[%s1885_s1 + $0x38] sm:$0xff] (!%p189_p3)  ;;  %v1766_v62 = vld [vmem:[%s1886_s2] ss:$0 sm:$0xff] (!%p189_p3) }
   0x9   : > { %1520 = vmatprep.subr.bf16.mxu0 (!%p189_p3), %v1519_v3  ;;  %1535 = vmatprep.subr.bf16.mxu1 (!%p189_p3), %v1519_v3  ;;  %v1531_v13 = vpack.c.bf16 (!%p189_p3), %v420_v10, %v419_v9 }
   0xa   : > { %1522 = vmatpush3.bf16.msra.mxu0 (!%p189_p3), %v1519_v3  ;;  %1539 = vmatpush3.bf16.msra.mxu1 (!%p189_p3), %v1519_v3 }
   0xb   : > { %1524 = vmatprep.subr.bf16.mxu0 (!%p189_p3), %v1523_v5  ;;  %1536 = vmatprep.subr.bf16.mxu1 (!%p189_p3), %v1523_v5 }
   0xe   : > { %s1893_s22 = smov (!%p230_p4, %s229_s22), 99  ;;  %1526 = vmatpush3.bf16.msra.mxu0 %v1523_v5  ;;  %1540 = vmatpush3.bf16.msra.mxu1 %v1523_v5 }
   0xf   : > { %s1315_s6 = sshll.u32 %s1893_s22, 3  ;;  %1528 = vmatprep.subr.bf16.mxu0 %v1527_v8  ;;  %1537 = vmatprep.subr.bf16.mxu1 %v1527_v8 }
  0x10   : > { %s1661_s9 = scalar_lea.vmem %s1884_s0, %s1315_s6  ;;  %s1775_s17 = scalar_lea.vmem %s1887_s3, %s1315_s6 }
  0x11   : > { %v363_v11 = vld [vmem:[%s1661_s9] sm:$0xff]  ;;  %v389_v12 = vld [vmem:[%s1661_s9 + $0xd0] sm:$0xff]  ;;  %v364_v14 = vld [vmem:[%s1661_s9 + $0x8] sm:$0xff] }
  0x12   : > { %1444 = vmatprep.mubr.msk.f32.mxu0 %vm421_vm0, %v363_v11  ;;  %1483 = vmatprep.mubr.msk.f32.mxu1 %vm421_vm0, %v389_v12  ;;  %v390_v15 = vld [vmem:[%s1661_s9 + $0xd8] sm:$0xff]  ;;  %v365_v16 = vld [vmem:[%s1661_s9 + $0x10] sm:$0xff]  ;;  %v391_v17 = vld [vmem:[%s1661_s9 + $0xe0] sm:$0xff] }
  0x13   : > { %1530 = vmatpush3.bf16.msra.mxu0 %v1527_v8  ;;  %1541 = vmatpush3.bf16.msra.mxu1 %v1527_v8  ;;  %v366_v18 = vld [vmem:[%s1661_s9 + $0x18] sm:$0xff]  ;;  %v392_v19 = vld [vmem:[%s1661_s9 + $0xe8] sm:$0xff]  ;;  %v367_v20 = vld [vmem:[%s1661_s9 + $0x20] sm:$0xff] }
  0x14   : > { %1532 = vmatprep.subr.bf16.mxu0 %v1531_v13  ;;  %1538 = vmatprep.subr.bf16.mxu1 %v1531_v13  ;;  %v393_v21 = vld [vmem:[%s1661_s9 + $0xf0] sm:$0xff]  ;;  %v368_v22 = vld [vmem:[%s1661_s9 + $0x28] sm:$0xff]  ;;  %v394_v23 = vld [vmem:[%s1661_s9 + $0xf8] sm:$0xff] }
  0x15   : > { %v369_v24 = vld [vmem:[%s1661_s9 + $0x30] sm:$0xff]  ;;  %v395_v25 = vld [vmem:[%s1661_s9 + $0x100] sm:$0xff]  ;;  %v370_v26 = vld [vmem:[%s1661_s9 + $0x38] sm:$0xff] }
  0x16   : > { %v396_v27 = vld [vmem:[%s1661_s9 + $0x108] sm:$0xff]  ;;  %v371_v28 = vld [vmem:[%s1661_s9 + $0x40] sm:$0xff]  ;;  %v397_v29 = vld [vmem:[%s1661_s9 + $0x110] sm:$0xff] }
  0x17   : > { %1534 = vmatpush3.bf16.msra.mxu0 %v1531_v13  ;;  %1542 = vmatpush3.bf16.msra.mxu1 %v1531_v13  ;;  %v372_v30 = vld [vmem:[%s1661_s9 + $0x48] sm:$0xff]  ;;  %v398_v31 = vld [vmem:[%s1661_s9 + $0x118] sm:$0xff]  ;;  %v373_v32 = vld [vmem:[%s1661_s9 + $0x50] sm:$0xff] }
  0x18   : > { %v399_v33 = vld [vmem:[%s1661_s9 + $0x120] sm:$0xff]  ;;  %v374_v34 = vld [vmem:[%s1661_s9 + $0x58] sm:$0xff]  ;;  %v400_v35 = vld [vmem:[%s1661_s9 + $0x128] sm:$0xff] }
  0x19   : > { %v375_v36 = vld [vmem:[%s1661_s9 + $0x60] sm:$0xff]  ;;  %v401_v37 = vld [vmem:[%s1661_s9 + $0x130] sm:$0xff]  ;;  %v376_v38 = vld [vmem:[%s1661_s9 + $0x68] sm:$0xff] }
  0x1a   : > { %1445 = vmatmul.mubr.msk.f32.vlgmr.msra.gmra.mrb[0].mxu0 %vm421_vm0, %v364_v14  ;;  %1484 = vmatmul.mubr.msk.f32.vlgmr.msra.gmra.mrb[0].mxu1 %vm421_vm0, %v390_v15  ;;  %v402_v39 = vld [vmem:[%s1661_s9 + $0x138] sm:$0xff]  ;;  %v377_v40 = vld [vmem:[%s1661_s9 + $0x70] sm:$0xff]  ;;  %v403_v41 = vld [vmem:[%s1661_s9 + $0x140] sm:$0xff] }
  0x1b   : > { %1447 = vmatprep.mubr.msk.f32.mxu0 %vm421_vm0, %v365_v16  ;;  %1486 = vmatprep.mubr.msk.f32.mxu1 %vm421_vm0, %v391_v17  ;;  %v378_v42 = vld [vmem:[%s1661_s9 + $0x78] sm:$0xff]  ;;  %v404_v43 = vld [vmem:[%s1661_s9 + $0x148] sm:$0xff]  ;;  %v379_v44 = vld [vmem:[%s1661_s9 + $0x80] sm:$0xff] }
  0x1c   : > { %v405_v45 = vld [vmem:[%s1661_s9 + $0x150] sm:$0xff]  ;;  %v380_v46 = vld [vmem:[%s1661_s9 + $0x88] sm:$0xff]  ;;  %v406_v47 = vld [vmem:[%s1661_s9 + $0x158] sm:$0xff] }
  0x1d   : > { %v381_v48 = vld [vmem:[%s1661_s9 + $0x90] sm:$0xff]  ;;  %v407_v49 = vld [vmem:[%s1661_s9 + $0x160] sm:$0xff]  ;;  %v382_v50 = vld [vmem:[%s1661_s9 + $0x98] sm:$0xff] }
  0x1e   : > { %1448 = vmatmul.mubr.msk.f32.gmra.mrb[2].mxu0 %vm421_vm0, %v366_v18  ;;  %1487 = vmatmul.mubr.msk.f32.gmra.mrb[2].mxu1 %vm421_vm0, %v392_v19  ;;  %v408_v51 = vld [vmem:[%s1661_s9 + $0x168] sm:$0xff]  ;;  %v383_v52 = vld [vmem:[%s1661_s9 + $0xa0] sm:$0xff]  ;;  %v409_v53 = vld [vmem:[%s1661_s9 + $0x170] sm:$0xff] }
  0x1f   : > { %1450 = vmatprep.mubr.msk.f32.mxu0 %vm421_vm0, %v367_v20  ;;  %1489 = vmatprep.mubr.msk.f32.mxu1 %vm421_vm0, %v393_v21  ;;  %v384_v54 = vld [vmem:[%s1661_s9 + $0xa8] sm:$0xff]  ;;  %v410_v55 = vld [vmem:[%s1661_s9 + $0x178] sm:$0xff]  ;;  %v385_v56 = vld [vmem:[%s1661_s9 + $0xb0] sm:$0xff] }
  0x20   : > { %v411_v57 = vld [vmem:[%s1661_s9 + $0x180] sm:$0xff]  ;;  %v386_v58 = vld [vmem:[%s1661_s9 + $0xb8] sm:$0xff]  ;;  %v412_v59 = vld [vmem:[%s1661_s9 + $0x188] sm:$0xff] }
  0x21   : > { %v387_v60 = vld [vmem:[%s1661_s9 + $0xc0] sm:$0xff]  ;;  %v388_v61 = vld [vmem:[%s1661_s9 + $0xc8] sm:$0xff] }
  0x22   : > { %1451 = vmatmul.mubr.msk.f32.gmra.mrb[4].mxu0 %vm421_vm0, %v368_v22  ;;  %1490 = vmatmul.mubr.msk.f32.gmra.mrb[4].mxu1 %vm421_vm0, %v394_v23 }
  0x23   : > { %1453 = vmatprep.mubr.msk.f32.mxu0 %vm421_vm0, %v369_v24  ;;  %1492 = vmatprep.mubr.msk.f32.mxu1 %vm421_vm0, %v395_v25 }
  0x26   : > { %1454 = vmatmul.mubr.msk.f32.gmra.mrb[6].mxu0 %vm421_vm0, %v370_v26  ;;  %1493 = vmatmul.mubr.msk.f32.gmra.mrb[6].mxu1 %vm421_vm0, %v396_v27 }
  0x27   : > { %1456 = vmatprep.mubr.msk.f32.mxu0 %vm421_vm0, %v371_v28  ;;  %1495 = vmatprep.mubr.msk.f32.mxu1 %vm421_vm0, %v397_v29 }
  0x2a   : > { %1457 = vmatmul.mubr.msk.f32.gmra.mrb[8].mxu0 %vm421_vm0, %v372_v30  ;;  %1496 = vmatmul.mubr.msk.f32.gmra.mrb[8].mxu1 %vm421_vm0, %v398_v31 }
  0x2b   : > { %1459 = vmatprep.mubr.msk.f32.mxu0 %vm421_vm0, %v373_v32  ;;  %1498 = vmatprep.mubr.msk.f32.mxu1 %vm421_vm0, %v399_v33 }
  0x2e   : > { %1460 = vmatmul.mubr.msk.f32.gmra.mrb[10].mxu0 %vm421_vm0, %v374_v34  ;;  %1499 = vmatmul.mubr.msk.f32.gmra.mrb[10].mxu1 %vm421_vm0, %v400_v35 }
  0x2f   : > { %1462 = vmatprep.mubr.msk.f32.mxu0 %vm421_vm0, %v375_v36  ;;  %1501 = vmatprep.mubr.msk.f32.mxu1 %vm421_vm0, %v401_v37 }
  0x32   : > { %1463 = vmatmul.mubr.msk.f32.gmra.mrb[12].mxu0 %vm421_vm0, %v376_v38  ;;  %1502 = vmatmul.mubr.msk.f32.gmra.mrb[12].mxu1 %vm421_vm0, %v402_v39 }
  0x33   : > { %1465 = vmatprep.mubr.msk.f32.mxu0 %vm421_vm0, %v377_v40  ;;  %1504 = vmatprep.mubr.msk.f32.mxu1 %vm421_vm0, %v403_v41 }
  0x36   : > { %1466 = vmatmul.mubr.msk.f32.gmra.mrb[14].mxu0 %vm421_vm0, %v378_v42  ;;  %1505 = vmatmul.mubr.msk.f32.gmra.mrb[14].mxu1 %vm421_vm0, %v404_v43 }
  0x37   : > { %1468 = vmatprep.mubr.msk.f32.mxu0 %vm421_vm0, %v379_v44  ;;  %1507 = vmatprep.mubr.msk.f32.mxu1 %vm421_vm0, %v405_v45 }
  0x3a   : > { %1469 = vmatmul.mubr.msk.f32.gmra.mrb[16].mxu0 %vm421_vm0, %v380_v46  ;;  %1508 = vmatmul.mubr.msk.f32.gmra.mrb[16].mxu1 %vm421_vm0, %v406_v47 }
  0x3b   : > { %1471 = vmatprep.mubr.msk.f32.mxu0 %vm421_vm0, %v381_v48  ;;  %1510 = vmatprep.mubr.msk.f32.mxu1 %vm421_vm0, %v407_v49 }
  0x3e   : > { %1472 = vmatmul.mubr.msk.f32.gmra.mrb[18].mxu0 %vm421_vm0, %v382_v50  ;;  %1511 = vmatmul.mubr.msk.f32.gmra.mrb[18].mxu1 %vm421_vm0, %v408_v51 }
  0x3f   : > { %1474 = vmatprep.mubr.msk.f32.mxu0 %vm421_vm0, %v383_v52  ;;  %1513 = vmatprep.mubr.msk.f32.mxu1 %vm421_vm0, %v409_v53 }
  0x42   : > { %1475 = vmatmul.mubr.msk.f32.gmra.mrb[20].mxu0 %vm421_vm0, %v384_v54  ;;  %1514 = vmatmul.mubr.msk.f32.gmra.mrb[20].mxu1 %vm421_vm0, %v410_v55 }
  0x43   : > { %1477 = vmatprep.mubr.msk.f32.mxu0 %vm421_vm0, %v385_v56  ;;  %1516 = vmatprep.mubr.msk.f32.mxu1 %vm421_vm0, %v411_v57 }
  0x46   : > { %1478 = vmatmul.mubr.msk.f32.gmra.mrb[22].mxu0 %vm421_vm0, %v386_v58  ;;  %1517 = vmatmul.mubr.msk.f32.gmra.mrb[22].mxu1 %vm421_vm0, %v412_v59 }
  0x47   : > { %1480 = vmatprep.mubr.msk.f32.mxu0 %vm421_vm0, %v387_v60 }
  0x4a   : > { %1481 = vmatmul.mubr.msk.f32.gmra.mrb[24].mxu0 %vm421_vm0, %v388_v61 }
  0xed   : > { %v1446_v63 = vpop.f32.mrb[0].mxu0  ;;  %v1485_v0 = vpop.f32.mrb[0].mxu1 }
  0xee   : > { %v1048_v1 = vadd.f32 %v1446_v63, %v1766_v62  ;;  %v638_v2 = vpop.f32.mrb[1].mxu0  ;;  %v1074_v3 = vadd.f32 %v1485_v0, %v1766_v62  ;;  %v768_v4 = vpop.f32.mrb[1].mxu1 }
  0xef   : > { %v1047_v5 = vadd.f32 %v1766_v62, %v638_v2  ;;  %v1073_v6 = vadd.f32 %v1766_v62, %v768_v4 }
  0xf0   : > { %v1098_v7 = vmax.f32 %v1048_v1, 0.0  ;;  %v1124_v8 = vmax.f32 %v1074_v3, 0.0 }
  0xf1   : > { %v1097_v9 = vmax.f32 %v1047_v5, 0.0  ;;  %v1449_v10 = vpop.f32.mrb[2].mxu0  ;;  %v1123_v11 = vmax.f32 %v1073_v6, 0.0  ;;  %v1488_v12 = vpop.f32.mrb[2].mxu1 }
  0xf2   : > { %1148 = vst [vmem:[%s1775_s17 + $0x8] sm:$0xff] %v1098_v7  ;;  %1174 = vst [vmem:[%s1775_s17 + $0xd8] sm:$0xff] %v1124_v8  ;;  %v1050_v13 = vadd.f32 %v1449_v10, %v1766_v62  ;;  %v648_v14 = vpop.f32.mrb[3].mxu0  ;;  %v1076_v15 = vadd.f32 %v1488_v12, %v1766_v62  ;;  %v778_v16 = vpop.f32.mrb[3].mxu1 }
  0xf3   : > { %1147 = vst [vmem:[%s1775_s17] sm:$0xff] %v1097_v9  ;;  %1173 = vst [vmem:[%s1775_s17 + $0xd0] sm:$0xff] %v1123_v11  ;;  %v1049_v17 = vadd.f32 %v1766_v62, %v648_v14  ;;  %v1075_v18 = vadd.f32 %v1766_v62, %v778_v16 }
  0xf4   : > { %v1100_v19 = vmax.f32 %v1050_v13, 0.0  ;;  %v1126_v20 = vmax.f32 %v1076_v15, 0.0 }
  0xf5   : > { %v1099_v21 = vmax.f32 %v1049_v17, 0.0  ;;  %v1452_v22 = vpop.f32.mrb[4].mxu0  ;;  %v1125_v23 = vmax.f32 %v1075_v18, 0.0  ;;  %v1491_v24 = vpop.f32.mrb[4].mxu1 }
  0xf6   : > { %1150 = vst [vmem:[%s1775_s17 + $0x18] sm:$0xff] %v1100_v19  ;;  %1176 = vst [vmem:[%s1775_s17 + $0xe8] sm:$0xff] %v1126_v20  ;;  %v1052_v25 = vadd.f32 %v1452_v22, %v1766_v62  ;;  %v658_v26 = vpop.f32.mrb[5].mxu0  ;;  %v1078_v27 = vadd.f32 %v1491_v24, %v1766_v62  ;;  %v788_v28 = vpop.f32.mrb[5].mxu1 }
  0xf7   : > { %1149 = vst [vmem:[%s1775_s17 + $0x10] sm:$0xff] %v1099_v21  ;;  %1175 = vst [vmem:[%s1775_s17 + $0xe0] sm:$0xff] %v1125_v23  ;;  %v1051_v29 = vadd.f32 %v1766_v62, %v658_v26  ;;  %v1077_v30 = vadd.f32 %v1766_v62, %v788_v28 }
  0xf8   : > { %v1102_v31 = vmax.f32 %v1052_v25, 0.0  ;;  %v1128_v32 = vmax.f32 %v1078_v27, 0.0 }
  0xf9   : > { %v1101_v33 = vmax.f32 %v1051_v29, 0.0  ;;  %v1455_v34 = vpop.f32.mrb[6].mxu0  ;;  %v1127_v35 = vmax.f32 %v1077_v30, 0.0  ;;  %v1494_v36 = vpop.f32.mrb[6].mxu1 }
  0xfa   : > { %1152 = vst [vmem:[%s1775_s17 + $0x28] sm:$0xff] %v1102_v31  ;;  %1178 = vst [vmem:[%s1775_s17 + $0xf8] sm:$0xff] %v1128_v32  ;;  %v1054_v37 = vadd.f32 %v1455_v34, %v1766_v62  ;;  %v668_v38 = vpop.f32.mrb[7].mxu0  ;;  %v1080_v39 = vadd.f32 %v1494_v36, %v1766_v62  ;;  %v798_v40 = vpop.f32.mrb[7].mxu1 }
  0xfb   : > { %1151 = vst [vmem:[%s1775_s17 + $0x20] sm:$0xff] %v1101_v33  ;;  %1177 = vst [vmem:[%s1775_s17 + $0xf0] sm:$0xff] %v1127_v35  ;;  %v1053_v41 = vadd.f32 %v1766_v62, %v668_v38  ;;  %v1079_v42 = vadd.f32 %v1766_v62, %v798_v40 }
  0xfc   : > { %v1104_v43 = vmax.f32 %v1054_v37, 0.0  ;;  %v1130_v44 = vmax.f32 %v1080_v39, 0.0 }
  0xfd   : > { %v1103_v45 = vmax.f32 %v1053_v41, 0.0  ;;  %v1458_v46 = vpop.f32.mrb[8].mxu0  ;;  %v1129_v47 = vmax.f32 %v1079_v42, 0.0  ;;  %v1497_v48 = vpop.f32.mrb[8].mxu1 }
  0xfe   : > { %1154 = vst [vmem:[%s1775_s17 + $0x38] sm:$0xff] %v1104_v43  ;;  %1180 = vst [vmem:[%s1775_s17 + $0x108] sm:$0xff] %v1130_v44  ;;  %v1056_v49 = vadd.f32 %v1458_v46, %v1766_v62  ;;  %v678_v50 = vpop.f32.mrb[9].mxu0  ;;  %v1082_v51 = vadd.f32 %v1497_v48, %v1766_v62  ;;  %v808_v52 = vpop.f32.mrb[9].mxu1 }
  0xff   : > { %1153 = vst [vmem:[%s1775_s17 + $0x30] sm:$0xff] %v1103_v45  ;;  %1179 = vst [vmem:[%s1775_s17 + $0x100] sm:$0xff] %v1129_v47  ;;  %v1055_v53 = vadd.f32 %v1766_v62, %v678_v50  ;;  %v1081_v54 = vadd.f32 %v1766_v62, %v808_v52 }
 0x100   : > { %v1106_v55 = vmax.f32 %v1056_v49, 0.0  ;;  %v1132_v56 = vmax.f32 %v1082_v51, 0.0 }
 0x101   : > { %v1105_v57 = vmax.f32 %v1055_v53, 0.0  ;;  %v1461_v58 = vpop.f32.mrb[10].mxu0  ;;  %v1131_v59 = vmax.f32 %v1081_v54, 0.0  ;;  %v1500_v60 = vpop.f32.mrb[10].mxu1 }
 0x102   : > { %1156 = vst [vmem:[%s1775_s17 + $0x48] sm:$0xff] %v1106_v55  ;;  %1182 = vst [vmem:[%s1775_s17 + $0x118] sm:$0xff] %v1132_v56  ;;  %v1058_v61 = vadd.f32 %v1461_v58, %v1766_v62  ;;  %v688_v63 = vpop.f32.mrb[11].mxu0  ;;  %v1084_v0 = vadd.f32 %v1500_v60, %v1766_v62  ;;  %v818_v1 = vpop.f32.mrb[11].mxu1 }
 0x103   : > { %1155 = vst [vmem:[%s1775_s17 + $0x40] sm:$0xff] %v1105_v57  ;;  %1181 = vst [vmem:[%s1775_s17 + $0x110] sm:$0xff] %v1131_v59  ;;  %v1057_v2 = vadd.f32 %v1766_v62, %v688_v63  ;;  %v1083_v3 = vadd.f32 %v1766_v62, %v818_v1 }
 0x104   : > { %v1108_v4 = vmax.f32 %v1058_v61, 0.0  ;;  %v1134_v5 = vmax.f32 %v1084_v0, 0.0 }
 0x105   : > { %v1107_v6 = vmax.f32 %v1057_v2, 0.0  ;;  %v1464_v7 = vpop.f32.mrb[12].mxu0  ;;  %v1133_v8 = vmax.f32 %v1083_v3, 0.0  ;;  %v1503_v9 = vpop.f32.mrb[12].mxu1 }
 0x106   : > { %1158 = vst [vmem:[%s1775_s17 + $0x58] sm:$0xff] %v1108_v4  ;;  %1184 = vst [vmem:[%s1775_s17 + $0x128] sm:$0xff] %v1134_v5  ;;  %v1060_v10 = vadd.f32 %v1464_v7, %v1766_v62  ;;  %v698_v11 = vpop.f32.mrb[13].mxu0  ;;  %v1086_v12 = vadd.f32 %v1503_v9, %v1766_v62  ;;  %v828_v13 = vpop.f32.mrb[13].mxu1 }
 0x107   : > { %1157 = vst [vmem:[%s1775_s17 + $0x50] sm:$0xff] %v1107_v6  ;;  %1183 = vst [vmem:[%s1775_s17 + $0x120] sm:$0xff] %v1133_v8  ;;  %v1059_v14 = vadd.f32 %v1766_v62, %v698_v11  ;;  %v1085_v15 = vadd.f32 %v1766_v62, %v828_v13 }
 0x108   : > { %v1110_v16 = vmax.f32 %v1060_v10, 0.0  ;;  %v1136_v17 = vmax.f32 %v1086_v12, 0.0 }
 0x109   : > { %v1109_v18 = vmax.f32 %v1059_v14, 0.0  ;;  %v1467_v19 = vpop.f32.mrb[14].mxu0  ;;  %v1135_v20 = vmax.f32 %v1085_v15, 0.0  ;;  %v1506_v21 = vpop.f32.mrb[14].mxu1 }
 0x10a   : > { %1160 = vst [vmem:[%s1775_s17 + $0x68] sm:$0xff] %v1110_v16  ;;  %1186 = vst [vmem:[%s1775_s17 + $0x138] sm:$0xff] %v1136_v17  ;;  %v1062_v22 = vadd.f32 %v1467_v19, %v1766_v62  ;;  %v708_v23 = vpop.f32.mrb[15].mxu0  ;;  %v1088_v24 = vadd.f32 %v1506_v21, %v1766_v62  ;;  %v838_v25 = vpop.f32.mrb[15].mxu1 }
 0x10b   : > { %1159 = vst [vmem:[%s1775_s17 + $0x60] sm:$0xff] %v1109_v18  ;;  %1185 = vst [vmem:[%s1775_s17 + $0x130] sm:$0xff] %v1135_v20  ;;  %v1061_v26 = vadd.f32 %v1766_v62, %v708_v23  ;;  %v1087_v27 = vadd.f32 %v1766_v62, %v838_v25 }
 0x10c   : > { %v1112_v28 = vmax.f32 %v1062_v22, 0.0  ;;  %v1138_v29 = vmax.f32 %v1088_v24, 0.0 }
 0x10d   : > { %v1111_v30 = vmax.f32 %v1061_v26, 0.0  ;;  %v1470_v31 = vpop.f32.mrb[16].mxu0  ;;  %v1137_v32 = vmax.f32 %v1087_v27, 0.0  ;;  %v1509_v33 = vpop.f32.mrb[16].mxu1 }
 0x10e   : > { %1162 = vst [vmem:[%s1775_s17 + $0x78] sm:$0xff] %v1112_v28  ;;  %1188 = vst [vmem:[%s1775_s17 + $0x148] sm:$0xff] %v1138_v29  ;;  %v1064_v34 = vadd.f32 %v1470_v31, %v1766_v62  ;;  %v718_v35 = vpop.f32.mrb[17].mxu0  ;;  %v1090_v36 = vadd.f32 %v1509_v33, %v1766_v62  ;;  %v848_v37 = vpop.f32.mrb[17].mxu1 }
 0x10f   : > { %1161 = vst [vmem:[%s1775_s17 + $0x70] sm:$0xff] %v1111_v30  ;;  %1187 = vst [vmem:[%s1775_s17 + $0x140] sm:$0xff] %v1137_v32  ;;  %v1063_v38 = vadd.f32 %v1766_v62, %v718_v35  ;;  %v1089_v39 = vadd.f32 %v1766_v62, %v848_v37 }
 0x110   : > { %v1114_v40 = vmax.f32 %v1064_v34, 0.0  ;;  %v1140_v41 = vmax.f32 %v1090_v36, 0.0 }
 0x111   : > { %v1113_v42 = vmax.f32 %v1063_v38, 0.0  ;;  %v1473_v43 = vpop.f32.mrb[18].mxu0  ;;  %v1139_v44 = vmax.f32 %v1089_v39, 0.0  ;;  %v1512_v45 = vpop.f32.mrb[18].mxu1 }
 0x112   : > { %1164 = vst [vmem:[%s1775_s17 + $0x88] sm:$0xff] %v1114_v40  ;;  %1190 = vst [vmem:[%s1775_s17 + $0x158] sm:$0xff] %v1140_v41  ;;  %v1066_v46 = vadd.f32 %v1473_v43, %v1766_v62  ;;  %v728_v47 = vpop.f32.mrb[19].mxu0  ;;  %v1092_v48 = vadd.f32 %v1512_v45, %v1766_v62  ;;  %v858_v49 = vpop.f32.mrb[19].mxu1 }
 0x113   : > { %1163 = vst [vmem:[%s1775_s17 + $0x80] sm:$0xff] %v1113_v42  ;;  %1189 = vst [vmem:[%s1775_s17 + $0x150] sm:$0xff] %v1139_v44  ;;  %v1065_v50 = vadd.f32 %v1766_v62, %v728_v47  ;;  %v1091_v51 = vadd.f32 %v1766_v62, %v858_v49 }
 0x114   : > { %v1116_v52 = vmax.f32 %v1066_v46, 0.0  ;;  %v1142_v53 = vmax.f32 %v1092_v48, 0.0 }
 0x115   : > { %v1115_v54 = vmax.f32 %v1065_v50, 0.0  ;;  %v1476_v55 = vpop.f32.mrb[20].mxu0  ;;  %v1141_v56 = vmax.f32 %v1091_v51, 0.0  ;;  %v1515_v57 = vpop.f32.mrb[20].mxu1 }
 0x116   : > { %1166 = vst [vmem:[%s1775_s17 + $0x98] sm:$0xff] %v1116_v52  ;;  %1192 = vst [vmem:[%s1775_s17 + $0x168] sm:$0xff] %v1142_v53  ;;  %v1068_v58 = vadd.f32 %v1476_v55, %v1766_v62  ;;  %v738_v59 = vpop.f32.mrb[21].mxu0  ;;  %v1094_v60 = vadd.f32 %v1515_v57, %v1766_v62  ;;  %v868_v61 = vpop.f32.mrb[21].mxu1 }
 0x117   : > { %1165 = vst [vmem:[%s1775_s17 + $0x90] sm:$0xff] %v1115_v54  ;;  %1191 = vst [vmem:[%s1775_s17 + $0x160] sm:$0xff] %v1141_v56  ;;  %v1067_v63 = vadd.f32 %v1766_v62, %v738_v59  ;;  %v1093_v0 = vadd.f32 %v1766_v62, %v868_v61 }
 0x118   : > { %v1118_v1 = vmax.f32 %v1068_v58, 0.0  ;;  %v1144_v2 = vmax.f32 %v1094_v60, 0.0 }
 0x119   : > { %v1117_v3 = vmax.f32 %v1067_v63, 0.0  ;;  %v1479_v4 = vpop.f32.mrb[22].mxu0  ;;  %v1143_v5 = vmax.f32 %v1093_v0, 0.0  ;;  %v1518_v6 = vpop.f32.mrb[22].mxu1 }
 0x11a   : > { %1168 = vst [vmem:[%s1775_s17 + $0xa8] sm:$0xff] %v1118_v1  ;;  %1194 = vst [vmem:[%s1775_s17 + $0x178] sm:$0xff] %v1144_v2  ;;  %v1070_v7 = vadd.f32 %v1479_v4, %v1766_v62  ;;  %v748_v8 = vpop.f32.mrb[23].mxu0  ;;  %v1096_v9 = vadd.f32 %v1518_v6, %v1766_v62  ;;  %v878_v10 = vpop.f32.mrb[23].mxu1 }
 0x11b   : > { %1167 = vst [vmem:[%s1775_s17 + $0xa0] sm:$0xff] %v1117_v3  ;;  %1193 = vst [vmem:[%s1775_s17 + $0x170] sm:$0xff] %v1143_v5  ;;  %v1069_v11 = vadd.f32 %v1766_v62, %v748_v8  ;;  %v1095_v12 = vadd.f32 %v1766_v62, %v878_v10 }
 0x11c   : > { %v1120_v13 = vmax.f32 %v1070_v7, 0.0  ;;  %v1146_v14 = vmax.f32 %v1096_v9, 0.0 }
 0x11d   : > { %v1119_v15 = vmax.f32 %v1069_v11, 0.0  ;;  %v1482_v16 = vpop.f32.mrb[24].mxu0  ;;  %v1145_v17 = vmax.f32 %v1095_v12, 0.0 }
 0x11e   : > { %1170 = vst [vmem:[%s1775_s17 + $0xb8] sm:$0xff] %v1120_v13  ;;  %1196 = vst [vmem:[%s1775_s17 + $0x188] sm:$0xff] %v1146_v14  ;;  %v1072_v18 = vadd.f32 %v1482_v16, %v1766_v62  ;;  %v758_v19 = vpop.f32.mrb[25].mxu0 }
 0x11f   : > { %1169 = vst [vmem:[%s1775_s17 + $0xb0] sm:$0xff] %v1119_v15  ;;  %1195 = vst [vmem:[%s1775_s17 + $0x180] sm:$0xff] %v1145_v17  ;;  %v1071_v20 = vadd.f32 %v1766_v62, %v758_v19 }
 0x120   : > { %v1122_v21 = vmax.f32 %v1072_v18, 0.0 }
 0x121   : > { %v1121_v22 = vmax.f32 %v1071_v20, 0.0 }
 0x122   : > { %1172 = vst [vmem:[%s1775_s17 + $0xc8] sm:$0xff] %v1122_v21 }
 0x123   : > { %1171 = vst [vmem:[%s1775_s17 + $0xc0] sm:$0xff] %v1121_v22 }
 0x124 PF: > { %s13_s14 = sadd.s32 1, %s1589_s14   ;;  %s1888_s12 = smov %s1585_s13 }
 0x125   : > { %p10_p5 = scmp.ge.s32.totalorder %s13_s14, 4   ;;  %s1889_s13 = smov %s1891_s15 }
 0x127   :  { %12 = sbr.rel (!%p10_p5) target bundleno = 2 (0x2), region = 76 }

// kernel: convdqn_forward.5
= control target key start
LH: loop header
LB: loop body
LE: loop exit
PB: predicated region body
PF: predicated region fallthrough
CT: control target
= control target key end

     0   :  { %s2192_s12 = smov 0   ;;  %s2194_s13 = smov 0   ;;  %s3115_s0 = inlined_call_operand.vmem [shape: f32[162,2048], index: 0, kind: input, shape index: {}]   ;;  %s3116_s1 = inlined_call_operand.vmem [shape: f32[2048,128], index: 1, kind: input, shape index: {}]   ;;  %s3117_s2 = inlined_call_operand.vmem [shape: f32[1,128], index: 2, kind: input, shape index: {}]   ;;  %s3118_s3 = inlined_call_operand.vmem [shape: f32[162,128], index: 3, kind: output, shape index: {}]  }
   0x1   :  { %s2196_s14 = smov 0   ;;  %s2198_s15 = smov 0  }
   0x2   :  { %s2200_s16 = smov 0  }
   0x3 LB: > { %s25_s17 = sadd.s32 1, %s2164_s15  ;;  %p48_p1 = scmp.ne.s32.totalorder %s2156_s13, %s2152_s12  ;;  %s2168_s16 = sphi %s2200_s16, %s13_s16   ;;  %s2164_s15 = sphi %s2198_s15, %s3122_s15   ;;  %s2160_s14 = sphi %s2196_s14, %s3121_s14   ;;  %s2156_s13 = sphi %s2194_s13, %s3120_s13   ;;  %s2152_s12 = sphi %s2192_s12, %s3119_s12  }
   0x4   : > { %p26_p0 = scmp.ge.s32.totalorder %s25_s17, 2  ;;  %p49_p2 = scmp.eq.s32.totalorder %s2168_s16, 0 }
   0x5   : > { %s41_s19 = sadd.s32 1, %s2156_s13  ;;  %p1880_p5 = scmp.ge.s32.totalorder %s2168_s16, 2 }
   0x6   : > { %s3124_s17 = smov (%p26_p0, %s25_s17), 0  ;;  %p50_p3 = por %p49_p2, %p48_p1 }
   0x7   : > { %s37_s18 = ssub.s32 %s2164_s15, %s3124_s17  ;;  %162 = sbr.rel (%p1880_p5) target bundleno = 103 (0x67), region = 20 }
   0x8   : > { %p39_p4 = scmp.eq.s32.totalorder %s37_s18, 0 }
   0xa   : > { %s2227_s20 = scalar_select %p39_p4, %s2156_s13, %s41_s19  }
   0xe   : > { %165 = sbr.rel (!%p50_p3) target bundleno = 103 (0x67), region = 24  ;;  %s167_s21 = sand.u32 (%p50_p3), 1, %s2156_s13  }
   0xf   : > { %s1893_s22 = sshll.u32 (%p50_p3), %s2164_s15, 6  ;;  %s2086_s23 = smul.u32 (%p50_p3), 1344, %s167_s21 }
  0x10   : > { %s2235_s26 = scalar_lea.vmem (%p50_p3), %s3115_s0, %s1893_s22 }
  0x11   : > { %v188_v0 = vld [vmem:[%s2235_s26] sm:$0xff] (%p50_p3)  ;;  %v190_v1 = vld [vmem:[%s2235_s26 + $0x8] sm:$0xff] (%p50_p3)  ;;  %v192_v2 = vld [vmem:[%s2235_s26 + $0x10] sm:$0xff] (%p50_p3)  ;;  %s2243_s27 = scalar_lea.vmem (%p50_p3), [#allocation3], %s2086_s23 }
  0x12   : > { %v194_v3 = vld [vmem:[%s2235_s26 + $0x18] sm:$0xff] (%p50_p3)  ;;  %v196_v4 = vld [vmem:[%s2235_s26 + $0x20] sm:$0xff] (%p50_p3)  ;;  %v198_v5 = vld [vmem:[%s2235_s26 + $0x28] sm:$0xff] (%p50_p3)  ;;  %189 = vst [vmem:[%s2243_s27] sm:$0xff] (%p50_p3), %v188_v0 }
  0x13   : > { %191 = vst [vmem:[%s2243_s27 + $0x8] sm:$0xff] (%p50_p3), %v190_v1  ;;  %193 = vst [vmem:[%s2243_s27 + $0x10] sm:$0xff] (%p50_p3), %v192_v2  ;;  %v200_v6 = vld [vmem:[%s2235_s26 + $0x30] sm:$0xff] (%p50_p3)  ;;  %v202_v7 = vld [vmem:[%s2235_s26 + $0x38] sm:$0xff] (%p50_p3) }
  0x14   : > { %195 = vst [vmem:[%s2243_s27 + $0x18] sm:$0xff] (%p50_p3), %v194_v3  ;;  %197 = vst [vmem:[%s2243_s27 + $0x20] sm:$0xff] (%p50_p3), %v196_v4  ;;  %v204_v8 = vld [vmem:[%s2235_s26 + $0x80] sm:$0xff] (%p50_p3)  ;;  %v206_v9 = vld [vmem:[%s2235_s26 + $0x88] sm:$0xff] (%p50_p3) }
  0x15   : > { %199 = vst [vmem:[%s2243_s27 + $0x28] sm:$0xff] %v198_v5  ;;  %201 = vst [vmem:[%s2243_s27 + $0x30] sm:$0xff] %v200_v6  ;;  %v208_v10 = vld [vmem:[%s2235_s26 + $0x90] sm:$0xff]  ;;  %v210_v11 = vld [vmem:[%s2235_s26 + $0x98] sm:$0xff] }
  0x16   : > { %203 = vst [vmem:[%s2243_s27 + $0x38] sm:$0xff] %v202_v7  ;;  %205 = vst [vmem:[%s2243_s27 + $0x40] sm:$0xff] %v204_v8  ;;  %v212_v12 = vld [vmem:[%s2235_s26 + $0xa0] sm:$0xff]  ;;  %v214_v13 = vld [vmem:[%s2235_s26 + $0xa8] sm:$0xff] }
  0x17   : > { %207 = vst [vmem:[%s2243_s27 + $0x48] sm:$0xff] %v206_v9  ;;  %209 = vst [vmem:[%s2243_s27 + $0x50] sm:$0xff] %v208_v10  ;;  %v216_v14 = vld [vmem:[%s2235_s26 + $0xb0] sm:$0xff]  ;;  %v218_v15 = vld [vmem:[%s2235_s26 + $0xb8] sm:$0xff] }
  0x18   : > { %211 = vst [vmem:[%s2243_s27 + $0x58] sm:$0xff] %v210_v11  ;;  %213 = vst [vmem:[%s2243_s27 + $0x60] sm:$0xff] %v212_v12  ;;  %v220_v16 = vld [vmem:[%s2235_s26 + $0x100] sm:$0xff]  ;;  %v222_v17 = vld [vmem:[%s2235_s26 + $0x108] sm:$0xff] }
  0x19   : > { %215 = vst [vmem:[%s2243_s27 + $0x68] sm:$0xff] %v214_v13  ;;  %217 = vst [vmem:[%s2243_s27 + $0x70] sm:$0xff] %v216_v14  ;;  %v224_v18 = vld [vmem:[%s2235_s26 + $0x110] sm:$0xff]  ;;  %v226_v19 = vld [vmem:[%s2235_s26 + $0x118] sm:$0xff] }
  0x1a   : > { %219 = vst [vmem:[%s2243_s27 + $0x78] sm:$0xff] %v218_v15  ;;  %221 = vst [vmem:[%s2243_s27 + $0x80] sm:$0xff] %v220_v16  ;;  %v228_v20 = vld [vmem:[%s2235_s26 + $0x120] sm:$0xff]  ;;  %v230_v21 = vld [vmem:[%s2235_s26 + $0x128] sm:$0xff] }
  0x1b   : > { %223 = vst [vmem:[%s2243_s27 + $0x88] sm:$0xff] %v222_v17  ;;  %225 = vst [vmem:[%s2243_s27 + $0x90] sm:$0xff] %v224_v18  ;;  %v232_v22 = vld [vmem:[%s2235_s26 + $0x130] sm:$0xff]  ;;  %v234_v23 = vld [vmem:[%s2235_s26 + $0x138] sm:$0xff] }
  0x1c   : > { %227 = vst [vmem:[%s2243_s27 + $0x98] sm:$0xff] %v226_v19  ;;  %229 = vst [vmem:[%s2243_s27 + $0xa0] sm:$0xff] %v228_v20  ;;  %v236_v24 = vld [vmem:[%s2235_s26 + $0x180] sm:$0xff]  ;;  %v238_v25 = vld [vmem:[%s2235_s26 + $0x188] sm:$0xff] }
  0x1d   : > { %231 = vst [vmem:[%s2243_s27 + $0xa8] sm:$0xff] %v230_v21  ;;  %233 = vst [vmem:[%s2243_s27 + $0xb0] sm:$0xff] %v232_v22  ;;  %v240_v26 = vld [vmem:[%s2235_s26 + $0x190] sm:$0xff]  ;;  %v242_v27 = vld [vmem:[%s2235_s26 + $0x198] sm:$0xff] }
  0x1e   : > { %235 = vst [vmem:[%s2243_s27 + $0xb8] sm:$0xff] %v234_v23  ;;  %237 = vst [vmem:[%s2243_s27 + $0xc0] sm:$0xff] %v236_v24  ;;  %v244_v28 = vld [vmem:[%s2235_s26 + $0x1a0] sm:$0xff]  ;;  %v246_v29 = vld [vmem:[%s2235_s26 + $0x1a8] sm:$0xff] }
  0x1f   : > { %239 = vst [vmem:[%s2243_s27 + $0xc8] sm:$0xff] %v238_v25  ;;  %241 = vst [vmem:[%s2243_s27 + $0xd0] sm:$0xff] %v240_v26  ;;  %v248_v30 = vld [vmem:[%s2235_s26 + $0x1b0] sm:$0xff]  ;;  %v250_v31 = vld [vmem:[%s2235_s26 + $0x1b8] sm:$0xff] }
  0x20   : > { %243 = vst [vmem:[%s2243_s27 + $0xd8] sm:$0xff] %v242_v27  ;;  %245 = vst [vmem:[%s2243_s27 + $0xe0] sm:$0xff] %v244_v28  ;;  %v252_v32 = vld [vmem:[%s2235_s26 + $0x200] sm:$0xff]  ;;  %v254_v33 = vld [vmem:[%s2235_s26 + $0x208] sm:$0xff] }
  0x21   : > { %247 = vst [vmem:[%s2243_s27 + $0xe8] sm:$0xff] %v246_v29  ;;  %249 = vst [vmem:[%s2243_s27 + $0xf0] sm:$0xff] %v248_v30  ;;  %v256_v34 = vld [vmem:[%s2235_s26 + $0x210] sm:$0xff]  ;;  %v258_v35 = vld [vmem:[%s2235_s26 + $0x218] sm:$0xff] }
  0x22   : > { %251 = vst [vmem:[%s2243_s27 + $0xf8] sm:$0xff] %v250_v31  ;;  %253 = vst [vmem:[%s2243_s27 + $0x100] sm:$0xff] %v252_v32  ;;  %v260_v36 = vld [vmem:[%s2235_s26 + $0x220] sm:$0xff]  ;;  %v262_v37 = vld [vmem:[%s2235_s26 + $0x228] sm:$0xff] }
  0x23   : > { %255 = vst [vmem:[%s2243_s27 + $0x108] sm:$0xff] %v254_v33  ;;  %257 = vst [vmem:[%s2243_s27 + $0x110] sm:$0xff] %v256_v34  ;;  %v264_v38 = vld [vmem:[%s2235_s26 + $0x230] sm:$0xff]  ;;  %v266_v39 = vld [vmem:[%s2235_s26 + $0x238] sm:$0xff] }
  0x24   : > { %259 = vst [vmem:[%s2243_s27 + $0x118] sm:$0xff] %v258_v35  ;;  %261 = vst [vmem:[%s2243_s27 + $0x120] sm:$0xff] %v260_v36  ;;  %v268_v40 = vld [vmem:[%s2235_s26 + $0x280] sm:$0xff]  ;;  %v270_v41 = vld [vmem:[%s2235_s26 + $0x288] sm:$0xff] }
  0x25   : > { %263 = vst [vmem:[%s2243_s27 + $0x128] sm:$0xff] %v262_v37  ;;  %265 = vst [vmem:[%s2243_s27 + $0x130] sm:$0xff] %v264_v38  ;;  %v272_v42 = vld [vmem:[%s2235_s26 + $0x290] sm:$0xff]  ;;  %v274_v43 = vld [vmem:[%s2235_s26 + $0x298] sm:$0xff] }
  0x26   : > { %267 = vst [vmem:[%s2243_s27 + $0x138] sm:$0xff] %v266_v39  ;;  %269 = vst [vmem:[%s2243_s27 + $0x140] sm:$0xff] %v268_v40  ;;  %v276_v44 = vld [vmem:[%s2235_s26 + $0x2a0] sm:$0xff]  ;;  %v278_v45 = vld [vmem:[%s2235_s26 + $0x2a8] sm:$0xff] }
  0x27   : > { %271 = vst [vmem:[%s2243_s27 + $0x148] sm:$0xff] %v270_v41  ;;  %273 = vst [vmem:[%s2243_s27 + $0x150] sm:$0xff] %v272_v42  ;;  %v280_v46 = vld [vmem:[%s2235_s26 + $0x2b0] sm:$0xff]  ;;  %v282_v47 = vld [vmem:[%s2235_s26 + $0x2b8] sm:$0xff] }
  0x28   : > { %275 = vst [vmem:[%s2243_s27 + $0x158] sm:$0xff] %v274_v43  ;;  %277 = vst [vmem:[%s2243_s27 + $0x160] sm:$0xff] %v276_v44  ;;  %v284_v48 = vld [vmem:[%s2235_s26 + $0x300] sm:$0xff]  ;;  %v286_v49 = vld [vmem:[%s2235_s26 + $0x308] sm:$0xff] }
  0x29   : > { %279 = vst [vmem:[%s2243_s27 + $0x168] sm:$0xff] %v278_v45  ;;  %281 = vst [vmem:[%s2243_s27 + $0x170] sm:$0xff] %v280_v46  ;;  %v288_v50 = vld [vmem:[%s2235_s26 + $0x310] sm:$0xff]  ;;  %v290_v51 = vld [vmem:[%s2235_s26 + $0x318] sm:$0xff] }
  0x2a   : > { %283 = vst [vmem:[%s2243_s27 + $0x178] sm:$0xff] %v282_v47  ;;  %285 = vst [vmem:[%s2243_s27 + $0x180] sm:$0xff] %v284_v48  ;;  %v292_v52 = vld [vmem:[%s2235_s26 + $0x320] sm:$0xff]  ;;  %v294_v53 = vld [vmem:[%s2235_s26 + $0x328] sm:$0xff] }
  0x2b   : > { %287 = vst [vmem:[%s2243_s27 + $0x188] sm:$0xff] %v286_v49  ;;  %289 = vst [vmem:[%s2243_s27 + $0x190] sm:$0xff] %v288_v50  ;;  %v296_v54 = vld [vmem:[%s2235_s26 + $0x330] sm:$0xff]  ;;  %v298_v55 = vld [vmem:[%s2235_s26 + $0x338] sm:$0xff] }
  0x2c   : > { %291 = vst [vmem:[%s2243_s27 + $0x198] sm:$0xff] %v290_v51  ;;  %293 = vst [vmem:[%s2243_s27 + $0x1a0] sm:$0xff] %v292_v52  ;;  %v300_v56 = vld [vmem:[%s2235_s26 + $0x380] sm:$0xff]  ;;  %v302_v57 = vld [vmem:[%s2235_s26 + $0x388] sm:$0xff] }
  0x2d   : > { %295 = vst [vmem:[%s2243_s27 + $0x1a8] sm:$0xff] %v294_v53  ;;  %297 = vst [vmem:[%s2243_s27 + $0x1b0] sm:$0xff] %v296_v54  ;;  %v304_v58 = vld [vmem:[%s2235_s26 + $0x390] sm:$0xff]  ;;  %v306_v59 = vld [vmem:[%s2235_s26 + $0x398] sm:$0xff] }
  0x2e   : > { %299 = vst [vmem:[%s2243_s27 + $0x1b8] sm:$0xff] %v298_v55  ;;  %301 = vst [vmem:[%s2243_s27 + $0x1c0] sm:$0xff] %v300_v56  ;;  %v308_v60 = vld [vmem:[%s2235_s26 + $0x3a0] sm:$0xff]  ;;  %v310_v61 = vld [vmem:[%s2235_s26 + $0x3a8] sm:$0xff] }
  0x2f   : > { %303 = vst [vmem:[%s2243_s27 + $0x1c8] sm:$0xff] %v302_v57  ;;  %305 = vst [vmem:[%s2243_s27 + $0x1d0] sm:$0xff] %v304_v58  ;;  %v312_v62 = vld [vmem:[%s2235_s26 + $0x3b0] sm:$0xff]  ;;  %v314_v63 = vld [vmem:[%s2235_s26 + $0x3b8] sm:$0xff] }
  0x30   : > { %307 = vst [vmem:[%s2243_s27 + $0x1d8] sm:$0xff] %v306_v59  ;;  %309 = vst [vmem:[%s2243_s27 + $0x1e0] sm:$0xff] %v308_v60  ;;  %v316_v0 = vld [vmem:[%s2235_s26 + $0x400] sm:$0xff]  ;;  %v318_v1 = vld [vmem:[%s2235_s26 + $0x408] sm:$0xff] }
  0x31   : > { %311 = vst [vmem:[%s2243_s27 + $0x1e8] sm:$0xff] %v310_v61  ;;  %313 = vst [vmem:[%s2243_s27 + $0x1f0] sm:$0xff] %v312_v62  ;;  %v320_v2 = vld [vmem:[%s2235_s26 + $0x410] sm:$0xff]  ;;  %v322_v3 = vld [vmem:[%s2235_s26 + $0x418] sm:$0xff] }
  0x32   : > { %315 = vst [vmem:[%s2243_s27 + $0x1f8] sm:$0xff] %v314_v63  ;;  %317 = vst [vmem:[%s2243_s27 + $0x200] sm:$0xff] %v316_v0  ;;  %v324_v4 = vld [vmem:[%s2235_s26 + $0x420] sm:$0xff]  ;;  %v326_v5 = vld [vmem:[%s2235_s26 + $0x428] sm:$0xff] }
  0x33   : > { %319 = vst [vmem:[%s2243_s27 + $0x208] sm:$0xff] %v318_v1  ;;  %321 = vst [vmem:[%s2243_s27 + $0x210] sm:$0xff] %v320_v2  ;;  %v328_v6 = vld [vmem:[%s2235_s26 + $0x430] sm:$0xff]  ;;  %v330_v7 = vld [vmem:[%s2235_s26 + $0x438] sm:$0xff] }
  0x34   : > { %323 = vst [vmem:[%s2243_s27 + $0x218] sm:$0xff] %v322_v3  ;;  %325 = vst [vmem:[%s2243_s27 + $0x220] sm:$0xff] %v324_v4  ;;  %v332_v8 = vld [vmem:[%s2235_s26 + $0x480] sm:$0xff]  ;;  %v334_v9 = vld [vmem:[%s2235_s26 + $0x488] sm:$0xff] }
  0x35   : > { %327 = vst [vmem:[%s2243_s27 + $0x228] sm:$0xff] %v326_v5  ;;  %329 = vst [vmem:[%s2243_s27 + $0x230] sm:$0xff] %v328_v6  ;;  %v336_v10 = vld [vmem:[%s2235_s26 + $0x490] sm:$0xff]  ;;  %v338_v11 = vld [vmem:[%s2235_s26 + $0x498] sm:$0xff] }
  0x36   : > { %331 = vst [vmem:[%s2243_s27 + $0x238] sm:$0xff] %v330_v7  ;;  %333 = vst [vmem:[%s2243_s27 + $0x240] sm:$0xff] %v332_v8  ;;  %v340_v12 = vld [vmem:[%s2235_s26 + $0x4a0] sm:$0xff]  ;;  %v342_v13 = vld [vmem:[%s2235_s26 + $0x4a8] sm:$0xff] }
  0x37   : > { %335 = vst [vmem:[%s2243_s27 + $0x248] sm:$0xff] %v334_v9  ;;  %337 = vst [vmem:[%s2243_s27 + $0x250] sm:$0xff] %v336_v10  ;;  %v344_v14 = vld [vmem:[%s2235_s26 + $0x4b0] sm:$0xff]  ;;  %v346_v15 = vld [vmem:[%s2235_s26 + $0x4b8] sm:$0xff] }
  0x38   : > { %339 = vst [vmem:[%s2243_s27 + $0x258] sm:$0xff] %v338_v11  ;;  %341 = vst [vmem:[%s2243_s27 + $0x260] sm:$0xff] %v340_v12  ;;  %v348_v16 = vld [vmem:[%s2235_s26 + $0x500] sm:$0xff]  ;;  %v350_v17 = vld [vmem:[%s2235_s26 + $0x508] sm:$0xff] }
  0x39   : > { %343 = vst [vmem:[%s2243_s27 + $0x268] sm:$0xff] %v342_v13  ;;  %345 = vst [vmem:[%s2243_s27 + $0x270] sm:$0xff] %v344_v14  ;;  %v352_v18 = vld [vmem:[%s2235_s26 + $0x510] sm:$0xff]  ;;  %v354_v19 = vld [vmem:[%s2235_s26 + $0x518] sm:$0xff] }
  0x3a   : > { %347 = vst [vmem:[%s2243_s27 + $0x278] sm:$0xff] %v346_v15  ;;  %349 = vst [vmem:[%s2243_s27 + $0x280] sm:$0xff] %v348_v16  ;;  %v356_v20 = vld [vmem:[%s2235_s26 + $0x520] sm:$0xff]  ;;  %v358_v21 = vld [vmem:[%s2235_s26 + $0x528] sm:$0xff] }
  0x3b   : > { %351 = vst [vmem:[%s2243_s27 + $0x288] sm:$0xff] %v350_v17  ;;  %353 = vst [vmem:[%s2243_s27 + $0x290] sm:$0xff] %v352_v18  ;;  %v360_v22 = vld [vmem:[%s2235_s26 + $0x530] sm:$0xff]  ;;  %v362_v23 = vld [vmem:[%s2235_s26 + $0x538] sm:$0xff] }
  0x3c   : > { %355 = vst [vmem:[%s2243_s27 + $0x298] sm:$0xff] %v354_v19  ;;  %357 = vst [vmem:[%s2243_s27 + $0x2a0] sm:$0xff] %v356_v20  ;;  %v364_v24 = vld [vmem:[%s2235_s26 + $0x580] sm:$0xff]  ;;  %v366_v25 = vld [vmem:[%s2235_s26 + $0x588] sm:$0xff] }
  0x3d   : > { %359 = vst [vmem:[%s2243_s27 + $0x2a8] sm:$0xff] %v358_v21  ;;  %361 = vst [vmem:[%s2243_s27 + $0x2b0] sm:$0xff] %v360_v22  ;;  %v368_v26 = vld [vmem:[%s2235_s26 + $0x590] sm:$0xff]  ;;  %v370_v27 = vld [vmem:[%s2235_s26 + $0x598] sm:$0xff] }
  0x3e   : > { %363 = vst [vmem:[%s2243_s27 + $0x2b8] sm:$0xff] %v362_v23  ;;  %365 = vst [vmem:[%s2243_s27 + $0x2c0] sm:$0xff] %v364_v24  ;;  %v372_v28 = vld [vmem:[%s2235_s26 + $0x5a0] sm:$0xff]  ;;  %v374_v29 = vld [vmem:[%s2235_s26 + $0x5a8] sm:$0xff] }
  0x3f   : > { %367 = vst [vmem:[%s2243_s27 + $0x2c8] sm:$0xff] %v366_v25  ;;  %369 = vst [vmem:[%s2243_s27 + $0x2d0] sm:$0xff] %v368_v26  ;;  %v376_v30 = vld [vmem:[%s2235_s26 + $0x5b0] sm:$0xff]  ;;  %v378_v31 = vld [vmem:[%s2235_s26 + $0x5b8] sm:$0xff] }
  0x40   : > { %371 = vst [vmem:[%s2243_s27 + $0x2d8] sm:$0xff] %v370_v27  ;;  %373 = vst [vmem:[%s2243_s27 + $0x2e0] sm:$0xff] %v372_v28  ;;  %v380_v32 = vld [vmem:[%s2235_s26 + $0x600] sm:$0xff]  ;;  %v382_v33 = vld [vmem:[%s2235_s26 + $0x608] sm:$0xff] }
  0x41   : > { %375 = vst [vmem:[%s2243_s27 + $0x2e8] sm:$0xff] %v374_v29  ;;  %377 = vst [vmem:[%s2243_s27 + $0x2f0] sm:$0xff] %v376_v30  ;;  %v384_v34 = vld [vmem:[%s2235_s26 + $0x610] sm:$0xff]  ;;  %v386_v35 = vld [vmem:[%s2235_s26 + $0x618] sm:$0xff] }
  0x42   : > { %379 = vst [vmem:[%s2243_s27 + $0x2f8] sm:$0xff] %v378_v31  ;;  %381 = vst [vmem:[%s2243_s27 + $0x300] sm:$0xff] %v380_v32  ;;  %v388_v36 = vld [vmem:[%s2235_s26 + $0x620] sm:$0xff]  ;;  %v390_v37 = vld [vmem:[%s2235_s26 + $0x628] sm:$0xff] }
  0x43   : > { %383 = vst [vmem:[%s2243_s27 + $0x308] sm:$0xff] %v382_v33  ;;  %385 = vst [vmem:[%s2243_s27 + $0x310] sm:$0xff] %v384_v34  ;;  %v392_v38 = vld [vmem:[%s2235_s26 + $0x630] sm:$0xff]  ;;  %v394_v39 = vld [vmem:[%s2235_s26 + $0x638] sm:$0xff] }
  0x44   : > { %387 = vst [vmem:[%s2243_s27 + $0x318] sm:$0xff] %v386_v35  ;;  %389 = vst [vmem:[%s2243_s27 + $0x320] sm:$0xff] %v388_v36  ;;  %v396_v40 = vld [vmem:[%s2235_s26 + $0x680] sm:$0xff]  ;;  %v398_v41 = vld [vmem:[%s2235_s26 + $0x688] sm:$0xff] }
  0x45   : > { %391 = vst [vmem:[%s2243_s27 + $0x328] sm:$0xff] %v390_v37  ;;  %393 = vst [vmem:[%s2243_s27 + $0x330] sm:$0xff] %v392_v38  ;;  %v400_v42 = vld [vmem:[%s2235_s26 + $0x690] sm:$0xff]  ;;  %v402_v43 = vld [vmem:[%s2235_s26 + $0x698] sm:$0xff] }
  0x46   : > { %395 = vst [vmem:[%s2243_s27 + $0x338] sm:$0xff] %v394_v39  ;;  %397 = vst [vmem:[%s2243_s27 + $0x340] sm:$0xff] %v396_v40  ;;  %v404_v44 = vld [vmem:[%s2235_s26 + $0x6a0] sm:$0xff]  ;;  %v406_v45 = vld [vmem:[%s2235_s26 + $0x6a8] sm:$0xff] }
  0x47   : > { %399 = vst [vmem:[%s2243_s27 + $0x348] sm:$0xff] %v398_v41  ;;  %401 = vst [vmem:[%s2243_s27 + $0x350] sm:$0xff] %v400_v42  ;;  %v408_v46 = vld [vmem:[%s2235_s26 + $0x6b0] sm:$0xff]  ;;  %v410_v47 = vld [vmem:[%s2235_s26 + $0x6b8] sm:$0xff] }
  0x48   : > { %403 = vst [vmem:[%s2243_s27 + $0x358] sm:$0xff] %v402_v43  ;;  %405 = vst [vmem:[%s2243_s27 + $0x360] sm:$0xff] %v404_v44  ;;  %v412_v48 = vld [vmem:[%s2235_s26 + $0x700] sm:$0xff]  ;;  %v414_v49 = vld [vmem:[%s2235_s26 + $0x708] sm:$0xff] }
  0x49   : > { %407 = vst [vmem:[%s2243_s27 + $0x368] sm:$0xff] %v406_v45  ;;  %409 = vst [vmem:[%s2243_s27 + $0x370] sm:$0xff] %v408_v46  ;;  %v416_v50 = vld [vmem:[%s2235_s26 + $0x710] sm:$0xff]  ;;  %v418_v51 = vld [vmem:[%s2235_s26 + $0x718] sm:$0xff] }
  0x4a   : > { %411 = vst [vmem:[%s2243_s27 + $0x378] sm:$0xff] %v410_v47  ;;  %413 = vst [vmem:[%s2243_s27 + $0x380] sm:$0xff] %v412_v48  ;;  %v420_v52 = vld [vmem:[%s2235_s26 + $0x720] sm:$0xff]  ;;  %v422_v53 = vld [vmem:[%s2235_s26 + $0x728] sm:$0xff] }
  0x4b   : > { %415 = vst [vmem:[%s2243_s27 + $0x388] sm:$0xff] %v414_v49  ;;  %417 = vst [vmem:[%s2243_s27 + $0x390] sm:$0xff] %v416_v50  ;;  %v424_v54 = vld [vmem:[%s2235_s26 + $0x730] sm:$0xff]  ;;  %v426_v55 = vld [vmem:[%s2235_s26 + $0x738] sm:$0xff] }
  0x4c   : > { %419 = vst [vmem:[%s2243_s27 + $0x398] sm:$0xff] %v418_v51  ;;  %421 = vst [vmem:[%s2243_s27 + $0x3a0] sm:$0xff] %v420_v52  ;;  %v428_v56 = vld [vmem:[%s2235_s26 + $0x780] sm:$0xff]  ;;  %v430_v57 = vld [vmem:[%s2235_s26 + $0x788] sm:$0xff] }
  0x4d   : > { %423 = vst [vmem:[%s2243_s27 + $0x3a8] sm:$0xff] %v422_v53  ;;  %425 = vst [vmem:[%s2243_s27 + $0x3b0] sm:$0xff] %v424_v54  ;;  %v432_v58 = vld [vmem:[%s2235_s26 + $0x790] sm:$0xff]  ;;  %v434_v59 = vld [vmem:[%s2235_s26 + $0x798] sm:$0xff] }
  0x4e   : > { %427 = vst [vmem:[%s2243_s27 + $0x3b8] sm:$0xff] %v426_v55  ;;  %429 = vst [vmem:[%s2243_s27 + $0x3c0] sm:$0xff] %v428_v56  ;;  %v436_v60 = vld [vmem:[%s2235_s26 + $0x7a0] sm:$0xff]  ;;  %v438_v61 = vld [vmem:[%s2235_s26 + $0x7a8] sm:$0xff] }
  0x4f   : > { %431 = vst [vmem:[%s2243_s27 + $0x3c8] sm:$0xff] %v430_v57  ;;  %433 = vst [vmem:[%s2243_s27 + $0x3d0] sm:$0xff] %v432_v58  ;;  %v440_v62 = vld [vmem:[%s2235_s26 + $0x7b0] sm:$0xff]  ;;  %v442_v63 = vld [vmem:[%s2235_s26 + $0x7b8] sm:$0xff] }
  0x50   : > { %435 = vst [vmem:[%s2243_s27 + $0x3d8] sm:$0xff] %v434_v59  ;;  %437 = vst [vmem:[%s2243_s27 + $0x3e0] sm:$0xff] %v436_v60  ;;  %v444_v0 = vld [vmem:[%s2235_s26 + $0x800] sm:$0xff]  ;;  %v446_v1 = vld [vmem:[%s2235_s26 + $0x808] sm:$0xff] }
  0x51   : > { %439 = vst [vmem:[%s2243_s27 + $0x3e8] sm:$0xff] %v438_v61  ;;  %441 = vst [vmem:[%s2243_s27 + $0x3f0] sm:$0xff] %v440_v62  ;;  %v448_v2 = vld [vmem:[%s2235_s26 + $0x810] sm:$0xff]  ;;  %v450_v3 = vld [vmem:[%s2235_s26 + $0x818] sm:$0xff] }
  0x52   : > { %443 = vst [vmem:[%s2243_s27 + $0x3f8] sm:$0xff] %v442_v63  ;;  %445 = vst [vmem:[%s2243_s27 + $0x400] sm:$0xff] %v444_v0  ;;  %v452_v4 = vld [vmem:[%s2235_s26 + $0x820] sm:$0xff]  ;;  %v454_v5 = vld [vmem:[%s2235_s26 + $0x828] sm:$0xff] }
  0x53   : > { %447 = vst [vmem:[%s2243_s27 + $0x408] sm:$0xff] %v446_v1  ;;  %449 = vst [vmem:[%s2243_s27 + $0x410] sm:$0xff] %v448_v2  ;;  %v456_v6 = vld [vmem:[%s2235_s26 + $0x830] sm:$0xff]  ;;  %v458_v7 = vld [vmem:[%s2235_s26 + $0x838] sm:$0xff] }
  0x54   : > { %451 = vst [vmem:[%s2243_s27 + $0x418] sm:$0xff] %v450_v3  ;;  %453 = vst [vmem:[%s2243_s27 + $0x420] sm:$0xff] %v452_v4  ;;  %v460_v8 = vld [vmem:[%s2235_s26 + $0x880] sm:$0xff]  ;;  %v462_v9 = vld [vmem:[%s2235_s26 + $0x888] sm:$0xff] }
  0x55   : > { %455 = vst [vmem:[%s2243_s27 + $0x428] sm:$0xff] %v454_v5  ;;  %457 = vst [vmem:[%s2243_s27 + $0x430] sm:$0xff] %v456_v6  ;;  %v464_v10 = vld [vmem:[%s2235_s26 + $0x890] sm:$0xff]  ;;  %v466_v11 = vld [vmem:[%s2235_s26 + $0x898] sm:$0xff] }
  0x56   : > { %459 = vst [vmem:[%s2243_s27 + $0x438] sm:$0xff] %v458_v7  ;;  %461 = vst [vmem:[%s2243_s27 + $0x440] sm:$0xff] %v460_v8  ;;  %v468_v12 = vld [vmem:[%s2235_s26 + $0x8a0] sm:$0xff]  ;;  %v470_v13 = vld [vmem:[%s2235_s26 + $0x8a8] sm:$0xff] }
  0x57   : > { %463 = vst [vmem:[%s2243_s27 + $0x448] sm:$0xff] %v462_v9  ;;  %465 = vst [vmem:[%s2243_s27 + $0x450] sm:$0xff] %v464_v10  ;;  %v472_v14 = vld [vmem:[%s2235_s26 + $0x8b0] sm:$0xff]  ;;  %v474_v15 = vld [vmem:[%s2235_s26 + $0x8b8] sm:$0xff] }
  0x58   : > { %467 = vst [vmem:[%s2243_s27 + $0x458] sm:$0xff] %v466_v11  ;;  %469 = vst [vmem:[%s2243_s27 + $0x460] sm:$0xff] %v468_v12  ;;  %v476_v16 = vld [vmem:[%s2235_s26 + $0x900] sm:$0xff]  ;;  %v478_v17 = vld [vmem:[%s2235_s26 + $0x908] sm:$0xff] }
  0x59   : > { %471 = vst [vmem:[%s2243_s27 + $0x468] sm:$0xff] %v470_v13  ;;  %473 = vst [vmem:[%s2243_s27 + $0x470] sm:$0xff] %v472_v14  ;;  %v480_v18 = vld [vmem:[%s2235_s26 + $0x910] sm:$0xff]  ;;  %v482_v19 = vld [vmem:[%s2235_s26 + $0x918] sm:$0xff] }
  0x5a   : > { %475 = vst [vmem:[%s2243_s27 + $0x478] sm:$0xff] %v474_v15  ;;  %477 = vst [vmem:[%s2243_s27 + $0x480] sm:$0xff] %v476_v16  ;;  %v484_v20 = vld [vmem:[%s2235_s26 + $0x920] sm:$0xff]  ;;  %v486_v21 = vld [vmem:[%s2235_s26 + $0x928] sm:$0xff] }
  0x5b   : > { %479 = vst [vmem:[%s2243_s27 + $0x488] sm:$0xff] %v478_v17  ;;  %481 = vst [vmem:[%s2243_s27 + $0x490] sm:$0xff] %v480_v18  ;;  %v488_v22 = vld [vmem:[%s2235_s26 + $0x930] sm:$0xff]  ;;  %v490_v23 = vld [vmem:[%s2235_s26 + $0x938] sm:$0xff] }
  0x5c   : > { %483 = vst [vmem:[%s2243_s27 + $0x498] sm:$0xff] %v482_v19  ;;  %485 = vst [vmem:[%s2243_s27 + $0x4a0] sm:$0xff] %v484_v20  ;;  %v492_v24 = vld [vmem:[%s2235_s26 + $0x980] sm:$0xff]  ;;  %v494_v25 = vld [vmem:[%s2235_s26 + $0x988] sm:$0xff] }
  0x5d   : > { %487 = vst [vmem:[%s2243_s27 + $0x4a8] sm:$0xff] %v486_v21  ;;  %489 = vst [vmem:[%s2243_s27 + $0x4b0] sm:$0xff] %v488_v22  ;;  %v496_v26 = vld [vmem:[%s2235_s26 + $0x990] sm:$0xff]  ;;  %v498_v27 = vld [vmem:[%s2235_s26 + $0x998] sm:$0xff] }
  0x5e   : > { %491 = vst [vmem:[%s2243_s27 + $0x4b8] sm:$0xff] %v490_v23  ;;  %493 = vst [vmem:[%s2243_s27 + $0x4c0] sm:$0xff] %v492_v24  ;;  %v500_v28 = vld [vmem:[%s2235_s26 + $0x9a0] sm:$0xff]  ;;  %v502_v29 = vld [vmem:[%s2235_s26 + $0x9a8] sm:$0xff] }
  0x5f   : > { %495 = vst [vmem:[%s2243_s27 + $0x4c8] sm:$0xff] %v494_v25  ;;  %497 = vst [vmem:[%s2243_s27 + $0x4d0] sm:$0xff] %v496_v26  ;;  %v504_v30 = vld [vmem:[%s2235_s26 + $0x9b0] sm:$0xff]  ;;  %v506_v31 = vld [vmem:[%s2235_s26 + $0x9b8] sm:$0xff] }
  0x60   : > { %499 = vst [vmem:[%s2243_s27 + $0x4d8] sm:$0xff] %v498_v27  ;;  %501 = vst [vmem:[%s2243_s27 + $0x4e0] sm:$0xff] %v500_v28  ;;  %v508_v32 = vld [vmem:[%s2235_s26 + $0xa00] sm:$0xff]  ;;  %v510_v33 = vld [vmem:[%s2235_s26 + $0xa08] sm:$0xff] }
  0x61   : > { %503 = vst [vmem:[%s2243_s27 + $0x4e8] sm:$0xff] %v502_v29  ;;  %505 = vst [vmem:[%s2243_s27 + $0x4f0] sm:$0xff] %v504_v30  ;;  %v512_v34 = vld [vmem:[%s2235_s26 + $0xa10] sm:$0xff]  ;;  %v514_v35 = vld [vmem:[%s2235_s26 + $0xa18] sm:$0xff] }
  0x62   : > { %507 = vst [vmem:[%s2243_s27 + $0x4f8] sm:$0xff] %v506_v31  ;;  %509 = vst [vmem:[%s2243_s27 + $0x500] sm:$0xff] %v508_v32  ;;  %v516_v36 = vld [vmem:[%s2235_s26 + $0xa20] sm:$0xff]  ;;  %v518_v37 = vld [vmem:[%s2235_s26 + $0xa28] sm:$0xff] }
  0x63   : > { %511 = vst [vmem:[%s2243_s27 + $0x508] sm:$0xff] %v510_v33  ;;  %513 = vst [vmem:[%s2243_s27 + $0x510] sm:$0xff] %v512_v34  ;;  %v520_v38 = vld [vmem:[%s2235_s26 + $0xa30] sm:$0xff]  ;;  %v522_v39 = vld [vmem:[%s2235_s26 + $0xa38] sm:$0xff] }
  0x64   : > { %515 = vst [vmem:[%s2243_s27 + $0x518] sm:$0xff] %v514_v35  ;;  %517 = vst [vmem:[%s2243_s27 + $0x520] sm:$0xff] %v516_v36 }
  0x65   : > { %519 = vst [vmem:[%s2243_s27 + $0x528] sm:$0xff] %v518_v37  ;;  %521 = vst [vmem:[%s2243_s27 + $0x530] sm:$0xff] %v520_v38 }
  0x66   : > { %523 = vst [vmem:[%s2243_s27 + $0x538] sm:$0xff] %v522_v39 }
  0x67 PF: > { %p1883_p6 = scmp.ge.s32.totalorder %s2168_s16, 1  ;;  %p540_p7 = scmp.lt.s32.totalorder %s2168_s16, 3 }
  0x69   : > { %p541_p8 = pnand %p1883_p6, %p540_p7 }
  0x6a   : > { %s547_s28 = sand.u32 (!%p541_p8), 1, %s2152_s12   ;;  %s1884_s29 = sshll.u32 (!%p541_p8), %s2160_s14, 7 }
  0x6b   : > { %544 = sbr.rel (%p541_p8) target bundleno = 588 (0x24c), region = 51  ;;  %p587_p9 = scmp.lt.s32.totalorder (!%p541_p8), %s1884_s29, 255 }
  0x6c   : > { %s2087_s30 = smul.u32 (!%p541_p8), 1344, %s547_s28  ;;  %p1886_p10 = scmp.ne.s32.totalorder (!%p541_p8), %s2160_s14, 0 }
  0x6e   : > { %s2584_s8 = scalar_lea.vmem (!%p541_p8), [#allocation3], %s2087_s30 }
  0x72   : > { %s3126_s29 = smov (!%p587_p9, %s1884_s29), 255  ;;  %610 = sbr.rel (%p1886_p10) target bundleno = 127 (0x7f), region = 59 }
  0x73   : > { %s1885_s4 = sshll.u32 %s3126_s29, 3  ;;  %v2170_v40 = vmov (!%p1886_p10), 0.0  }
  0x74   : > { %s2582_s7 = scalar_lea.vmem %s3116_s1, %s1885_s4  ;;  %611 = vst [vmem:[#allocation2] sm:$0xff] (!%p1886_p10), %v2170_v40  ;;  %612 = vst [vmem:[#allocation2 + $0x8] sm:$0xff] (!%p1886_p10), %v2170_v40 }
  0x75   : > { %613 = vst [vmem:[#allocation2 + $0x10] sm:$0xff] (!%p1886_p10), %v2170_v40  ;;  %614 = vst [vmem:[#allocation2 + $0x18] sm:$0xff] (!%p1886_p10), %v2170_v40 }
  0x76   : > { %615 = vst [vmem:[#allocation2 + $0x20] sm:$0xff] (!%p1886_p10), %v2170_v40  ;;  %616 = vst [vmem:[#allocation2 + $0x28] sm:$0xff] (!%p1886_p10), %v2170_v40 }
  0x77   : > { %617 = vst [vmem:[#allocation2 + $0x30] sm:$0xff] (!%p1886_p10), %v2170_v40  ;;  %618 = vst [vmem:[#allocation2 + $0x38] sm:$0xff] (!%p1886_p10), %v2170_v40 }
  0x78   : > { %619 = vst [vmem:[#allocation2 + $0x40] sm:$0xff] (!%p1886_p10), %v2170_v40  ;;  %620 = vst [vmem:[#allocation2 + $0x48] sm:$0xff] (!%p1886_p10), %v2170_v40 }
  0x79   : > { %621 = vst [vmem:[#allocation2 + $0x50] sm:$0xff] %v2170_v40  ;;  %622 = vst [vmem:[#allocation2 + $0x58] sm:$0xff] %v2170_v40 }
  0x7a   : > { %623 = vst [vmem:[#allocation2 + $0x60] sm:$0xff] %v2170_v40  ;;  %624 = vst [vmem:[#allocation2 + $0x68] sm:$0xff] %v2170_v40 }
  0x7b   : > { %625 = vst [vmem:[#allocation2 + $0x70] sm:$0xff] %v2170_v40  ;;  %626 = vst [vmem:[#allocation2 + $0x78] sm:$0xff] %v2170_v40 }
  0x7c   : > { %627 = vst [vmem:[#allocation2 + $0x80] sm:$0xff] %v2170_v40  ;;  %628 = vst [vmem:[#allocation2 + $0x88] sm:$0xff] %v2170_v40 }
  0x7d   : > { %629 = vst [vmem:[#allocation2 + $0x90] sm:$0xff] %v2170_v40  ;;  %630 = vst [vmem:[#allocation2 + $0x98] sm:$0xff] %v2170_v40 }
  0x7e   : > { %631 = vst [vmem:[#allocation2 + $0xa0] sm:$0x3] %v2170_v40 }
  0x7f PF: > { %v821_v41 = vld [vmem:[%s2582_s7] sm:$0xff]  ;;  %v822_v42 = vld [vmem:[%s2582_s7 + $0x8] sm:$0xff]  ;;  %v2171_v44 = vmov 0.0|0.0   ;;  %v823_v47 = vld [vmem:[%s2582_s7 + $0x10] sm:$0xff]  ;;  %p1887_p11 = scmp.ne.s32.totalorder %s2160_s14, 1 }
  0x80   : > { %v853_v43 = vld [vmem:[%s2582_s7 + $0x100] sm:$0xff]  ;;  %1894 = vmatprep.subr.bf16.mxu0 %v2171_v44  ;;  %v1895_v45 = vpack.c.bf16 %v822_v42, %v821_v41  ;;  %1942 = vmatprep.subr.bf16.mxu1 %v2171_v44  ;;  %v854_v46 = vld [vmem:[%s2582_s7 + $0x108] sm:$0xff]  ;;  %v824_v48 = vld [vmem:[%s2582_s7 + $0x18] sm:$0xff] }
  0x81   : > { %v1943_v49 = vpack.c.bf16 %v854_v46, %v853_v43  ;;  %v855_v50 = vld [vmem:[%s2582_s7 + $0x110] sm:$0xff]  ;;  %v856_v51 = vld [vmem:[%s2582_s7 + $0x118] sm:$0xff]  ;;  %v1898_v52 = vpack.c.bf16 %v824_v48, %v823_v47  ;;  %v825_v54 = vld [vmem:[%s2582_s7 + $0x20] sm:$0xff] }
  0x82   : > { %1896 = vmatpush1.bf16.msra.mxu0 %v1895_v45  ;;  %v1946_v53 = vpack.c.bf16 %v856_v51, %v855_v50  ;;  %v826_v55 = vld [vmem:[%s2582_s7 + $0x28] sm:$0xff]  ;;  %v857_v56 = vld [vmem:[%s2582_s7 + $0x120] sm:$0xff]  ;;  %v827_v60 = vld [vmem:[%s2582_s7 + $0x30] sm:$0xff] }
  0x83   : > { %1944 = vmatpush1.bf16.msra.mxu1 %v1943_v49  ;;  %1897 = vmatprep.subr.bf16.mxu0 %v2171_v44  ;;  %v858_v57 = vld [vmem:[%s2582_s7 + $0x128] sm:$0xff]  ;;  %v1901_v58 = vpack.c.bf16 %v826_v55, %v825_v54  ;;  %v828_v61 = vld [vmem:[%s2582_s7 + $0x38] sm:$0xff]  ;;  %v859_v62 = vld [vmem:[%s2582_s7 + $0x130] sm:$0xff] }
  0x84   : > { %1945 = vmatprep.subr.bf16.mxu1 %v2171_v44  ;;  %v1949_v59 = vpack.c.bf16 %v858_v57, %v857_v56  ;;  %v860_v63 = vld [vmem:[%s2582_s7 + $0x138] sm:$0xff]  ;;  %v1904_v0 = vpack.c.bf16 %v828_v61, %v827_v60  ;;  %v829_v2 = vld [vmem:[%s2582_s7 + $0x40] sm:$0xff]  ;;  %v830_v3 = vld [vmem:[%s2582_s7 + $0x48] sm:$0xff] }
  0x85   : > { %v1952_v1 = vpack.c.bf16 %v860_v63, %v859_v62  ;;  %v861_v4 = vld [vmem:[%s2582_s7 + $0x140] sm:$0xff]  ;;  %v862_v5 = vld [vmem:[%s2582_s7 + $0x148] sm:$0xff]  ;;  %v1907_v6 = vpack.c.bf16 %v830_v3, %v829_v2  ;;  %v831_v8 = vld [vmem:[%s2582_s7 + $0x50] sm:$0xff] }
  0x86   : > { %1899 = vmatpush1.bf16.msra.mxu0 %v1898_v52  ;;  %v1955_v7 = vpack.c.bf16 %v862_v5, %v861_v4  ;;  %v832_v9 = vld [vmem:[%s2582_s7 + $0x58] sm:$0xff]  ;;  %v863_v10 = vld [vmem:[%s2582_s7 + $0x150] sm:$0xff]  ;;  %v833_v14 = vld [vmem:[%s2582_s7 + $0x60] sm:$0xff] }
  0x87   : > { %1947 = vmatpush1.bf16.msra.mxu1 %v1946_v53  ;;  %1900 = vmatprep.subr.bf16.mxu0 %v2171_v44  ;;  %v864_v11 = vld [vmem:[%s2582_s7 + $0x158] sm:$0xff]  ;;  %v1910_v12 = vpack.c.bf16 %v832_v9, %v831_v8  ;;  %v834_v15 = vld [vmem:[%s2582_s7 + $0x68] sm:$0xff]  ;;  %v865_v16 = vld [vmem:[%s2582_s7 + $0x160] sm:$0xff] }
  0x88   : > { %1948 = vmatprep.subr.bf16.mxu1 %v2171_v44  ;;  %v1958_v13 = vpack.c.bf16 %v864_v11, %v863_v10  ;;  %v866_v17 = vld [vmem:[%s2582_s7 + $0x168] sm:$0xff]  ;;  %v654_v18 = vld [vmem:[%s2584_s8 + $0x8] sm:$0xff]  ;;  %v656_v19 = vld [vmem:[%s2584_s8 + $0x18] sm:$0xff]  ;;  %v1913_v20 = vpack.c.bf16 %v834_v15, %v833_v14 }
  0x89   : > { %1013 = vmatprep.mubr.f32.mxu0 %v654_v18  ;;  %1183 = vmatprep.mubr.f32.mxu1 %v656_v19  ;;  %v1961_v21 = vpack.c.bf16 %v866_v17, %v865_v16  ;;  %v835_v22 = vld [vmem:[%s2582_s7 + $0x70] sm:$0xff]  ;;  %v836_v23 = vld [vmem:[%s2582_s7 + $0x78] sm:$0xff]  ;;  %v837_v28 = vld [vmem:[%s2582_s7 + $0x80] sm:$0xff] }
  0x8a   : > { %1902 = vmatpush1.bf16.msra.mxu0 %v1901_v58  ;;  %v867_v24 = vld [vmem:[%s2582_s7 + $0x170] sm:$0xff]  ;;  %v868_v25 = vld [vmem:[%s2582_s7 + $0x178] sm:$0xff]  ;;  %v1916_v26 = vpack.c.bf16 %v836_v23, %v835_v22  ;;  %v838_v29 = vld [vmem:[%s2582_s7 + $0x88] sm:$0xff] }
  0x8b   : > { %1950 = vmatpush1.bf16.msra.mxu1 %v1949_v59  ;;  %1903 = vmatprep.subr.bf16.mxu0 %v2171_v44  ;;  %v1964_v27 = vpack.c.bf16 %v868_v25, %v867_v24  ;;  %v869_v30 = vld [vmem:[%s2582_s7 + $0x180] sm:$0xff]  ;;  %v870_v31 = vld [vmem:[%s2582_s7 + $0x188] sm:$0xff]  ;;  %v1919_v32 = vpack.c.bf16 %v838_v29, %v837_v28  ;;  %v839_v34 = vld [vmem:[%s2582_s7 + $0x90] sm:$0xff] }
  0x8c   : > { %1951 = vmatprep.subr.bf16.mxu1 %v2171_v44  ;;  %v1967_v33 = vpack.c.bf16 %v870_v31, %v869_v30  ;;  %v840_v35 = vld [vmem:[%s2582_s7 + $0x98] sm:$0xff]  ;;  %v871_v36 = vld [vmem:[%s2582_s7 + $0x190] sm:$0xff]  ;;  %v841_v40 = vld [vmem:[%s2582_s7 + $0xa0] sm:$0xff] }
  0x8d   : > { %v872_v37 = vld [vmem:[%s2582_s7 + $0x198] sm:$0xff]  ;;  %v1922_v38 = vpack.c.bf16 %v840_v35, %v839_v34  ;;  %v842_v41 = vld [vmem:[%s2582_s7 + $0xa8] sm:$0xff]  ;;  %v873_v42 = vld [vmem:[%s2582_s7 + $0x1a0] sm:$0xff] }
  0x8e   : > { %1905 = vmatpush1.bf16.msra.mxu0 %v1904_v0  ;;  %v1970_v39 = vpack.c.bf16 %v872_v37, %v871_v36  ;;  %v874_v43 = vld [vmem:[%s2582_s7 + $0x1a8] sm:$0xff]  ;;  %v1925_v45 = vpack.c.bf16 %v842_v41, %v841_v40  ;;  %v843_v47 = vld [vmem:[%s2582_s7 + $0xb0] sm:$0xff]  ;;  %v844_v48 = vld [vmem:[%s2582_s7 + $0xb8] sm:$0xff] }
  0x8f   : > { %1953 = vmatpush1.bf16.msra.mxu1 %v1952_v1  ;;  %1906 = vmatprep.subr.bf16.mxu0 %v2171_v44  ;;  %v1973_v46 = vpack.c.bf16 %v874_v43, %v873_v42  ;;  %v875_v49 = vld [vmem:[%s2582_s7 + $0x1b0] sm:$0xff]  ;;  %v876_v50 = vld [vmem:[%s2582_s7 + $0x1b8] sm:$0xff]  ;;  %v1928_v51 = vpack.c.bf16 %v844_v48, %v843_v47  ;;  %v845_v53 = vld [vmem:[%s2582_s7 + $0xc0] sm:$0xff] }
  0x90   : > { %1954 = vmatprep.subr.bf16.mxu1 %v2171_v44  ;;  %v1976_v52 = vpack.c.bf16 %v876_v50, %v875_v49  ;;  %v846_v54 = vld [vmem:[%s2582_s7 + $0xc8] sm:$0xff]  ;;  %v877_v55 = vld [vmem:[%s2582_s7 + $0x1c0] sm:$0xff]  ;;  %v847_v59 = vld [vmem:[%s2582_s7 + $0xd0] sm:$0xff] }
  0x91   : > { %v878_v56 = vld [vmem:[%s2582_s7 + $0x1c8] sm:$0xff]  ;;  %v1931_v57 = vpack.c.bf16 %v846_v54, %v845_v53  ;;  %v848_v60 = vld [vmem:[%s2582_s7 + $0xd8] sm:$0xff]  ;;  %v879_v61 = vld [vmem:[%s2582_s7 + $0x1d0] sm:$0xff] }
  0x92   : > { %1908 = vmatpush1.bf16.msra.mxu0 %v1907_v6  ;;  %v1979_v58 = vpack.c.bf16 %v878_v56, %v877_v55  ;;  %v880_v62 = vld [vmem:[%s2582_s7 + $0x1d8] sm:$0xff]  ;;  %v1934_v63 = vpack.c.bf16 %v848_v60, %v847_v59  ;;  %v849_v1 = vld [vmem:[%s2582_s7 + $0xe0] sm:$0xff]  ;;  %v850_v2 = vld [vmem:[%s2582_s7 + $0xe8] sm:$0xff] }
  0x93   : > { %1956 = vmatpush1.bf16.msra.mxu1 %v1955_v7  ;;  %1909 = vmatprep.subr.bf16.mxu0 %v2171_v44  ;;  %v1982_v0 = vpack.c.bf16 %v880_v62, %v879_v61  ;;  %v881_v3 = vld [vmem:[%s2582_s7 + $0x1e0] sm:$0xff]  ;;  %v882_v4 = vld [vmem:[%s2582_s7 + $0x1e8] sm:$0xff]  ;;  %v1937_v5 = vpack.c.bf16 %v850_v2, %v849_v1  ;;  %v851_v7 = vld [vmem:[%s2582_s7 + $0xf0] sm:$0xff] }
  0x94   : > { %1957 = vmatprep.subr.bf16.mxu1 %v2171_v44  ;;  %v1985_v6 = vpack.c.bf16 %v882_v4, %v881_v3  ;;  %v852_v8 = vld [vmem:[%s2582_s7 + $0xf8] sm:$0xff]  ;;  %v883_v9 = vld [vmem:[%s2582_s7 + $0x1f0] sm:$0xff]  ;;  %v886_v14 = vld [vmem:[%s2582_s7 + $0x208] sm:$0xff] }
  0x95   : > { %v884_v10 = vld [vmem:[%s2582_s7 + $0x1f8] sm:$0xff]  ;;  %v1940_v11 = vpack.c.bf16 %v852_v8, %v851_v7  ;;  %v917_v15 = vld [vmem:[%s2582_s7 + $0x300] sm:$0xff]  ;;  %v918_v16 = vld [vmem:[%s2582_s7 + $0x308] sm:$0xff] }
  0x96   : > { %1911 = vmatpush1.bf16.msra.mxu0 %v1910_v12  ;;  %v1988_v12 = vpack.c.bf16 %v884_v10, %v883_v9  ;;  %v653_v17 = vld [vmem:[%s2584_s8] sm:$0xff]  ;;  %v655_v19 = vld [vmem:[%s2584_s8 + $0x10] sm:$0xff]  ;;  %v887_v22 = vld [vmem:[%s2582_s7 + $0x210] sm:$0xff] }
  0x97   : > { %1959 = vmatpush1.bf16.msra.mxu1 %v1958_v13  ;;  %1912 = vmatprep.subr.bf16.mxu0 %v2171_v44  ;;  %v885_v13 = vld [vmem:[%s2582_s7 + $0x200] sm:$0xff]  ;;  %v888_v23 = vld [vmem:[%s2582_s7 + $0x218] sm:$0xff]  ;;  %v919_v25 = vld [vmem:[%s2582_s7 + $0x310] sm:$0xff] }
  0x98   : > { %1960 = vmatprep.subr.bf16.mxu1 %v2171_v44  ;;  %v1991_v18 = vpack.c.bf16 %v886_v14, %v885_v13  ;;  %v664_v24 = vld [vmem:[%s2584_s8 + $0x58] sm:$0xff]  ;;  %v663_v28 = vld [vmem:[%s2584_s8 + $0x50] sm:$0xff]  ;;  %v670_v29 = vld [vmem:[%s2584_s8 + $0x88] sm:$0xff]  ;;  %v1994_v30 = vpack.c.bf16 %v888_v23, %v887_v22 }
  0x99   : > { %v672_v31 = vld [vmem:[%s2584_s8 + $0x98] sm:$0xff]  ;;  %v890_v34 = vld [vmem:[%s2582_s7 + $0x228] sm:$0xff]  ;;  %v891_v43 = vld [vmem:[%s2582_s7 + $0x230] sm:$0xff] }
  0x9a   : > { %1914 = vmatpush1.bf16.msra.mxu0 %v1913_v20  ;;  %v2039_v20 = vpack.c.bf16 %v918_v16, %v917_v15  ;;  %v921_v35 = vld [vmem:[%s2582_s7 + $0x320] sm:$0xff]  ;;  %v922_v36 = vld [vmem:[%s2582_s7 + $0x328] sm:$0xff]  ;;  %v924_v47 = vld [vmem:[%s2582_s7 + $0x338] sm:$0xff] }
  0x9b   : > { %1962 = vmatpush1.bf16.msra.mxu1 %v1961_v21  ;;  %1915 = vmatprep.subr.bf16.mxu0 %v2171_v44  ;;  %v662_v21 = vld [vmem:[%s2584_s8 + $0x48] sm:$0xff]  ;;  %v669_v37 = vld [vmem:[%s2584_s8 + $0x80] sm:$0xff]  ;;  %v680_v41 = vld [vmem:[%s2584_s8 + $0xd8] sm:$0xff]  ;;  %v2045_v42 = vpack.c.bf16 %v922_v36, %v921_v35 }
  0x9c   : > { %1963 = vmatprep.subr.bf16.mxu1 %v2171_v44  ;;  %v677_v48 = vld [vmem:[%s2584_s8 + $0xc0] sm:$0xff]  ;;  %v679_v49 = vld [vmem:[%s2584_s8 + $0xd0] sm:$0xff]  ;;  %v686_v50 = vld [vmem:[%s2584_s8 + $0x108] sm:$0xff] }
  0x9d   : > { %v893_v54 = vld [vmem:[%s2582_s7 + $0x240] sm:$0xff]  ;;  %v894_v55 = vld [vmem:[%s2582_s7 + $0x248] sm:$0xff]  ;;  %v687_v59 = vld [vmem:[%s2584_s8 + $0x110] sm:$0xff] }
  0x9e   : > { %1917 = vmatpush1.bf16.msra.mxu0 %v1916_v26  ;;  %v920_v26 = vld [vmem:[%s2582_s7 + $0x318] sm:$0xff]  ;;  %v925_v56 = vld [vmem:[%s2582_s7 + $0x340] sm:$0xff]  ;;  %v694_v60 = vld [vmem:[%s2584_s8 + $0x148] sm:$0xff]  ;;  %v2003_v61 = vpack.c.bf16 %v894_v55, %v893_v54 }
  0x9f   : > { %1965 = vmatpush1.bf16.msra.mxu1 %v1964_v27  ;;  %1918 = vmatprep.subr.bf16.mxu0 %v2171_v44  ;;  %v661_v27 = vld [vmem:[%s2584_s8 + $0x40] sm:$0xff]  ;;  %v696_v62 = vld [vmem:[%s2584_s8 + $0x158] sm:$0xff]  ;;  %v896_v1 = vld [vmem:[%s2582_s7 + $0x258] sm:$0xff] }
  0xa0   : > { %1966 = vmatprep.subr.bf16.mxu1 %v2171_v44  ;;  %v927_v2 = vld [vmem:[%s2582_s7 + $0x350] sm:$0xff]  ;;  %v928_v3 = vld [vmem:[%s2582_s7 + $0x358] sm:$0xff]  ;;  %v693_v4 = vld [vmem:[%s2584_s8 + $0x140] sm:$0xff] }
  0xa1   : > { %v704_v8 = vld [vmem:[%s2584_s8 + $0x198] sm:$0xff]  ;;  %v2054_v9 = vpack.c.bf16 %v928_v3, %v927_v2  ;;  %v930_v13 = vld [vmem:[%s2582_s7 + $0x368] sm:$0xff]  ;;  %v703_v15 = vld [vmem:[%s2584_s8 + $0x190] sm:$0xff] }
  0xa2   : > { %1920 = vmatpush1.bf16.msra.mxu0 %v1919_v32  ;;  %v2042_v32 = vpack.c.bf16 %v920_v26, %v919_v25  ;;  %v897_v10 = vld [vmem:[%s2582_s7 + $0x260] sm:$0xff]  ;;  %v701_v14 = vld [vmem:[%s2584_s8 + $0x180] sm:$0xff]  ;;  %v710_v16 = vld [vmem:[%s2584_s8 + $0x1c8] sm:$0xff] }
  0xa3   : > { %1968 = vmatpush1.bf16.msra.mxu1 %v1967_v33  ;;  %1921 = vmatprep.subr.bf16.mxu0 %v2171_v44  ;;  %v889_v33 = vld [vmem:[%s2582_s7 + $0x220] sm:$0xff]  ;;  %v931_v22 = vld [vmem:[%s2582_s7 + $0x370] sm:$0xff]  ;;  %v932_v23 = vld [vmem:[%s2582_s7 + $0x378] sm:$0xff] }
  0xa4   : > { %1969 = vmatprep.subr.bf16.mxu1 %v2171_v44  ;;  %v1997_v40 = vpack.c.bf16 %v890_v34, %v889_v33  ;;  %v711_v25 = vld [vmem:[%s2584_s8 + $0x1d0] sm:$0xff]  ;;  %v718_v26 = vld [vmem:[%s2584_s8 + $0x208] sm:$0xff]  ;;  %v934_v33 = vld [vmem:[%s2582_s7 + $0x388] sm:$0xff] }
  0xa5   : > { %v717_v34 = vld [vmem:[%s2584_s8 + $0x200] sm:$0xff]  ;;  %v719_v35 = vld [vmem:[%s2584_s8 + $0x210] sm:$0xff]  ;;  %v726_v36 = vld [vmem:[%s2584_s8 + $0x248] sm:$0xff] }
  0xa6   : > { %1923 = vmatpush1.bf16.msra.mxu0 %v1922_v38  ;;  %v671_v38 = vld [vmem:[%s2584_s8 + $0x90] sm:$0xff]  ;;  %v938_v54 = vld [vmem:[%s2582_s7 + $0x3a8] sm:$0xff]  ;;  %v750_v3 = vld [vmem:[%s2584_s8 + $0x308] sm:$0xff] }
  0xa7   : > { %1971 = vmatpush1.bf16.msra.mxu1 %v1970_v39  ;;  %1924 = vmatprep.subr.bf16.mxu0 %v2171_v44  ;;  %v678_v39 = vld [vmem:[%s2584_s8 + $0xc8] sm:$0xff]  ;;  %v733_v55 = vld [vmem:[%s2584_s8 + $0x280] sm:$0xff]  ;;  %v743_v2 = vld [vmem:[%s2584_s8 + $0x2d0] sm:$0xff] }
  0xa8   : > { %1972 = vmatprep.subr.bf16.mxu1 %v2171_v44 }
  0xaa   : > { %1926 = vmatpush1.bf16.msra.mxu0 %v1925_v45  ;;  %v892_v45 = vld [vmem:[%s2582_s7 + $0x238] sm:$0xff] }
  0xab   : > { %1974 = vmatpush1.bf16.msra.mxu1 %v1973_v46  ;;  %1927 = vmatprep.subr.bf16.mxu0 %v2171_v44  ;;  %v923_v46 = vld [vmem:[%s2582_s7 + $0x330] sm:$0xff] }
  0xac   : > { %1975 = vmatprep.subr.bf16.mxu1 %v2171_v44  ;;  %v2048_v53 = vpack.c.bf16 %v924_v47, %v923_v46  ;;  %v727_v46 = vld [vmem:[%s2584_s8 + $0x250] sm:$0xff]  ;;  %v734_v47 = vld [vmem:[%s2584_s8 + $0x288] sm:$0xff] }
  0xae   : > { %1929 = vmatpush1.bf16.msra.mxu0 %v1928_v51  ;;  %v2000_v51 = vpack.c.bf16 %v892_v45, %v891_v43  ;;  %v936_v43 = vld [vmem:[%s2582_s7 + $0x398] sm:$0xff]  ;;  %v725_v45 = vld [vmem:[%s2584_s8 + $0x240] sm:$0xff] }
  0xaf   : > { %1977 = vmatpush1.bf16.msra.mxu1 %v1976_v52  ;;  %1930 = vmatprep.subr.bf16.mxu0 %v2171_v44  ;;  %v688_v52 = vld [vmem:[%s2584_s8 + $0x118] sm:$0xff] }
  0xb0   : > { %1978 = vmatprep.subr.bf16.mxu1 %v2171_v44 }
  0xb2   : > { %1932 = vmatpush1.bf16.msra.mxu0 %v1931_v57  ;;  %v926_v57 = vld [vmem:[%s2582_s7 + $0x348] sm:$0xff] }
  0xb3   : > { %1980 = vmatpush1.bf16.msra.mxu1 %v1979_v58  ;;  %1933 = vmatprep.subr.bf16.mxu0 %v2171_v44  ;;  %v685_v58 = vld [vmem:[%s2584_s8 + $0x100] sm:$0xff] }
  0xb4   : > { %1981 = vmatprep.subr.bf16.mxu1 %v2171_v44 }
  0xb6   : > { %1935 = vmatpush1.bf16.msra.mxu0 %v1934_v63  ;;  %v2051_v63 = vpack.c.bf16 %v926_v57, %v925_v56  ;;  %v735_v56 = vld [vmem:[%s2584_s8 + $0x290] sm:$0xff]  ;;  %v742_v57 = vld [vmem:[%s2584_s8 + $0x2c8] sm:$0xff] }
  0xb7   : > { %1983 = vmatpush1.bf16.msra.mxu1 %v1982_v0  ;;  %1936 = vmatprep.subr.bf16.mxu0 %v2171_v44  ;;  %v895_v0 = vld [vmem:[%s2582_s7 + $0x250] sm:$0xff] }
  0xb8   : > { %1984 = vmatprep.subr.bf16.mxu1 %v2171_v44  ;;  %v2006_v7 = vpack.c.bf16 %v896_v1, %v895_v0  ;;  %v940_v0 = vld [vmem:[%s2582_s7 + $0x3b8] sm:$0xff]  ;;  %v741_v1 = vld [vmem:[%s2584_s8 + $0x2c0] sm:$0xff] }
  0xba   : > { %1938 = vmatpush1.bf16.msra.mxu0 %v1937_v5  ;;  %v695_v5 = vld [vmem:[%s2584_s8 + $0x150] sm:$0xff] }
  0xbb   : > { %1986 = vmatpush1.bf16.msra.mxu1 %v1985_v6  ;;  %1939 = vmatprep.subr.bf16.mxu0 %v2171_v44  ;;  %v702_v6 = vld [vmem:[%s2584_s8 + $0x188] sm:$0xff] }
  0xbc   : > { %1987 = vmatprep.subr.bf16.mxu1 %v2171_v44 }
  0xbe   : > { %1941 = vmatpush1.bf16.msra.mxu0 %v1940_v11  ;;  %v898_v11 = vld [vmem:[%s2582_s7 + $0x268] sm:$0xff] }
  0xbf   : > { %1989 = vmatpush1.bf16.msra.mxu1 %v1988_v12  ;;  %1990 = vmatprep.subr.bf16.mxu0 %v2171_v44  ;;  %v929_v12 = vld [vmem:[%s2582_s7 + $0x360] sm:$0xff] }
  0xc0   : > { %2038 = vmatprep.subr.bf16.mxu1 %v2171_v44 }
  0xc1   : > { %1014 = vmatmul.mubr.f32.vlgmr.msra.gmra.mrb[0].mxu0 %v653_v17  ;;  %v2009_v17 = vpack.c.bf16 %v898_v11, %v897_v10  ;;  %v942_v10 = vld [vmem:[%s2582_s7 + $0x3c8] sm:$0xff] }
  0xc2   : > { %1184 = vmatmul.mubr.f32.vlgmr.msra.gmra.mrb[0].mxu1 %v655_v19  ;;  %1992 = vmatpush1.bf16.msra.mxu0 %v1991_v18  ;;  %v712_v18 = vld [vmem:[%s2584_s8 + $0x1d8] sm:$0xff]  ;;  %v2057_v19 = vpack.c.bf16 %v930_v13, %v929_v12  ;;  %v749_v11 = vld [vmem:[%s2584_s8 + $0x300] sm:$0xff]  ;;  %v751_v12 = vld [vmem:[%s2584_s8 + $0x310] sm:$0xff] }
  0xc3   : > { %1018 = vmatprep.mubr.f32.mxu0 %v662_v21  ;;  %2040 = vmatpush1.bf16.msra.mxu1 %v2039_v20  ;;  %v899_v20 = vld [vmem:[%s2582_s7 + $0x270] sm:$0xff]  ;;  %v900_v21 = vld [vmem:[%s2582_s7 + $0x278] sm:$0xff] }
  0xc4   : > { %1188 = vmatprep.mubr.f32.mxu1 %v664_v24  ;;  %1993 = vmatprep.subr.bf16.mxu0 %v2171_v44  ;;  %v709_v24 = vld [vmem:[%s2584_s8 + $0x1c0] sm:$0xff]  ;;  %v758_v13 = vld [vmem:[%s2584_s8 + $0x348] sm:$0xff] }
  0xc5   : > { %1019 = vmatmul.mubr.f32.gmra.mrb[2].mxu0 %v661_v27  ;;  %2041 = vmatprep.subr.bf16.mxu1 %v2171_v44  ;;  %v2012_v27 = vpack.c.bf16 %v900_v21, %v899_v20  ;;  %v944_v20 = vld [vmem:[%s2582_s7 + $0x3d8] sm:$0xff]  ;;  %v757_v21 = vld [vmem:[%s2584_s8 + $0x340] sm:$0xff] }
  0xc6   : > { %1189 = vmatmul.mubr.f32.gmra.mrb[2].mxu1 %v663_v28  ;;  %1023 = vmatprep.mubr.f32.mxu0 %v670_v29  ;;  %v720_v28 = vld [vmem:[%s2584_s8 + $0x218] sm:$0xff]  ;;  %v2060_v29 = vpack.c.bf16 %v932_v23, %v931_v22  ;;  %v759_v22 = vld [vmem:[%s2584_s8 + $0x350] sm:$0xff]  ;;  %v766_v23 = vld [vmem:[%s2584_s8 + $0x388] sm:$0xff] }
  0xc7   : > { %1995 = vmatpush1.bf16.msra.mxu0 %v1994_v30  ;;  %1193 = vmatprep.mubr.f32.mxu1 %v672_v31  ;;  %v901_v30 = vld [vmem:[%s2582_s7 + $0x280] sm:$0xff]  ;;  %v902_v31 = vld [vmem:[%s2582_s7 + $0x288] sm:$0xff] }
  0xc8   : > { %2043 = vmatpush1.bf16.msra.mxu1 %v2042_v32  ;;  %1996 = vmatprep.subr.bf16.mxu0 %v2171_v44  ;;  %v933_v32 = vld [vmem:[%s2582_s7 + $0x380] sm:$0xff] }
  0xc9   : > { %1024 = vmatmul.mubr.f32.gmra.mrb[4].mxu0 %v669_v37  ;;  %2044 = vmatprep.subr.bf16.mxu1 %v2171_v44  ;;  %v2015_v37 = vpack.c.bf16 %v902_v31, %v901_v30  ;;  %v946_v30 = vld [vmem:[%s2582_s7 + $0x3e8] sm:$0xff] }
  0xca   : > { %1194 = vmatmul.mubr.f32.gmra.mrb[4].mxu1 %v671_v38  ;;  %1028 = vmatprep.mubr.f32.mxu0 %v678_v39  ;;  %v728_v38 = vld [vmem:[%s2584_s8 + $0x258] sm:$0xff]  ;;  %v2063_v39 = vpack.c.bf16 %v934_v33, %v933_v32  ;;  %v765_v31 = vld [vmem:[%s2584_s8 + $0x380] sm:$0xff]  ;;  %v767_v32 = vld [vmem:[%s2584_s8 + $0x390] sm:$0xff] }
  0xcb   : > { %1198 = vmatprep.mubr.f32.mxu1 %v680_v41  ;;  %1998 = vmatpush1.bf16.msra.mxu0 %v1997_v40  ;;  %v903_v40 = vld [vmem:[%s2582_s7 + $0x290] sm:$0xff]  ;;  %v904_v41 = vld [vmem:[%s2582_s7 + $0x298] sm:$0xff] }
  0xcc   : > { %2046 = vmatpush1.bf16.msra.mxu1 %v2045_v42  ;;  %1999 = vmatprep.subr.bf16.mxu0 %v2171_v44  ;;  %v935_v42 = vld [vmem:[%s2582_s7 + $0x390] sm:$0xff] }
  0xcd   : > { %1029 = vmatmul.mubr.f32.gmra.mrb[6].mxu0 %v677_v48  ;;  %2047 = vmatprep.subr.bf16.mxu1 %v2171_v44  ;;  %v2018_v48 = vpack.c.bf16 %v904_v41, %v903_v40  ;;  %v774_v33 = vld [vmem:[%s2584_s8 + $0x3c8] sm:$0xff]  ;;  %v948_v40 = vld [vmem:[%s2582_s7 + $0x3f8] sm:$0xff]  ;;  %v773_v41 = vld [vmem:[%s2584_s8 + $0x3c0] sm:$0xff] }
  0xce   : > { %1199 = vmatmul.mubr.f32.gmra.mrb[6].mxu1 %v679_v49  ;;  %1033 = vmatprep.mubr.f32.mxu0 %v686_v50  ;;  %v736_v49 = vld [vmem:[%s2584_s8 + $0x298] sm:$0xff]  ;;  %v2066_v50 = vpack.c.bf16 %v936_v43, %v935_v42  ;;  %v775_v42 = vld [vmem:[%s2584_s8 + $0x3d0] sm:$0xff]  ;;  %v782_v43 = vld [vmem:[%s2584_s8 + $0x408] sm:$0xff] }
  0xcf   : > { %1203 = vmatprep.mubr.f32.mxu1 %v688_v52  ;;  %2001 = vmatpush1.bf16.msra.mxu0 %v2000_v51  ;;  %v905_v51 = vld [vmem:[%s2582_s7 + $0x2a0] sm:$0xff]  ;;  %v906_v52 = vld [vmem:[%s2582_s7 + $0x2a8] sm:$0xff] }
  0xd0   : > { %2049 = vmatpush1.bf16.msra.mxu1 %v2048_v53  ;;  %2002 = vmatprep.subr.bf16.mxu0 %v2171_v44  ;;  %v937_v53 = vld [vmem:[%s2582_s7 + $0x3a0] sm:$0xff] }
  0xd1   : > { %1034 = vmatmul.mubr.f32.gmra.mrb[8].mxu0 %v685_v58  ;;  %2050 = vmatprep.subr.bf16.mxu1 %v2171_v44  ;;  %v2021_v58 = vpack.c.bf16 %v906_v52, %v905_v51  ;;  %v792_v51 = vld [vmem:[%s2584_s8 + $0x458] sm:$0xff]  ;;  %v789_v52 = vld [vmem:[%s2584_s8 + $0x440] sm:$0xff] }
  0xd2   : > { %1204 = vmatmul.mubr.f32.gmra.mrb[8].mxu1 %v687_v59  ;;  %1038 = vmatprep.mubr.f32.mxu0 %v694_v60  ;;  %v744_v59 = vld [vmem:[%s2584_s8 + $0x2d8] sm:$0xff]  ;;  %v2069_v60 = vpack.c.bf16 %v938_v54, %v937_v53  ;;  %v798_v53 = vld [vmem:[%s2584_s8 + $0x488] sm:$0xff] }
  0xd3   : > { %1208 = vmatprep.mubr.f32.mxu1 %v696_v62  ;;  %2004 = vmatpush1.bf16.msra.mxu0 %v2003_v61  ;;  %v907_v61 = vld [vmem:[%s2582_s7 + $0x2b0] sm:$0xff]  ;;  %v908_v62 = vld [vmem:[%s2582_s7 + $0x2b8] sm:$0xff]  ;;  %v800_v54 = vld [vmem:[%s2584_s8 + $0x498] sm:$0xff] }
  0xd4   : > { %2052 = vmatpush1.bf16.msra.mxu1 %v2051_v63  ;;  %2005 = vmatprep.subr.bf16.mxu0 %v2171_v44  ;;  %v939_v63 = vld [vmem:[%s2582_s7 + $0x3b0] sm:$0xff] }
  0xd5   : > { %1039 = vmatmul.mubr.f32.gmra.mrb[10].mxu0 %v693_v4  ;;  %2053 = vmatprep.subr.bf16.mxu1 %v2171_v44  ;;  %v2024_v4 = vpack.c.bf16 %v908_v62, %v907_v61  ;;  %v814_v61 = vld [vmem:[%s2584_s8 + $0x508] sm:$0x3]  ;;  %v816_v62 = vld [vmem:[%s2584_s8 + $0x518] sm:$0x3] }
  0xd6   : > { %1209 = vmatmul.mubr.f32.gmra.mrb[10].mxu1 %v695_v5  ;;  %1043 = vmatprep.mubr.f32.mxu0 %v702_v6  ;;  %v752_v5 = vld [vmem:[%s2584_s8 + $0x318] sm:$0xff]  ;;  %v2072_v6 = vpack.c.bf16 %v940_v0, %v939_v63  ;;  %v813_v63 = vld [vmem:[%s2584_s8 + $0x500] sm:$0x3]  ;;  %v815_v0 = vld [vmem:[%s2584_s8 + $0x510] sm:$0x3] }
  0xd7   : > { %1213 = vmatprep.mubr.f32.mxu1 %v704_v8  ;;  %2007 = vmatpush1.bf16.msra.mxu0 %v2006_v7  ;;  %v909_v7 = vld [vmem:[%s2582_s7 + $0x2c0] sm:$0xff]  ;;  %v910_v8 = vld [vmem:[%s2582_s7 + $0x2c8] sm:$0xff] }
  0xd8   : > { %2055 = vmatpush1.bf16.msra.mxu1 %v2054_v9  ;;  %2008 = vmatprep.subr.bf16.mxu0 %v2171_v44  ;;  %v941_v9 = vld [vmem:[%s2582_s7 + $0x3c0] sm:$0xff] }
  0xd9   : > { %1044 = vmatmul.mubr.f32.gmra.mrb[12].mxu0 %v701_v14  ;;  %2056 = vmatprep.subr.bf16.mxu1 %v2171_v44  ;;  %v2027_v14 = vpack.c.bf16 %v910_v8, %v909_v7  ;;  %v665_v7 = vld [vmem:[%s2584_s8 + $0x60] sm:$0xff]  ;;  %v667_v8 = vld [vmem:[%s2584_s8 + $0x70] sm:$0xff] }
  0xda   : > { %1214 = vmatmul.mubr.f32.gmra.mrb[12].mxu1 %v703_v15  ;;  %1048 = vmatprep.mubr.f32.mxu0 %v710_v16  ;;  %v760_v15 = vld [vmem:[%s2584_s8 + $0x358] sm:$0xff]  ;;  %v2075_v16 = vpack.c.bf16 %v942_v10, %v941_v9  ;;  %v674_v9 = vld [vmem:[%s2584_s8 + $0xa8] sm:$0xff] }
  0xdb   : > { %1218 = vmatprep.mubr.f32.mxu1 %v712_v18  ;;  %2010 = vmatpush1.bf16.msra.mxu0 %v2009_v17  ;;  %v911_v17 = vld [vmem:[%s2582_s7 + $0x2d0] sm:$0xff]  ;;  %v912_v18 = vld [vmem:[%s2582_s7 + $0x2d8] sm:$0xff]  ;;  %v676_v10 = vld [vmem:[%s2584_s8 + $0xb8] sm:$0xff] }
  0xdc   : > { %2058 = vmatpush1.bf16.msra.mxu1 %v2057_v19  ;;  %2011 = vmatprep.subr.bf16.mxu0 %v2171_v44  ;;  %v943_v19 = vld [vmem:[%s2582_s7 + $0x3d0] sm:$0xff] }
  0xdd   : > { %1049 = vmatmul.mubr.f32.gmra.mrb[14].mxu0 %v709_v24  ;;  %2059 = vmatprep.subr.bf16.mxu1 %v2171_v44  ;;  %v2030_v24 = vpack.c.bf16 %v912_v18, %v911_v17  ;;  %v690_v17 = vld [vmem:[%s2584_s8 + $0x128] sm:$0xff]  ;;  %v692_v18 = vld [vmem:[%s2584_s8 + $0x138] sm:$0xff] }
  0xde   : > { %1219 = vmatmul.mubr.f32.gmra.mrb[14].mxu1 %v711_v25  ;;  %1053 = vmatprep.mubr.f32.mxu0 %v718_v26  ;;  %v768_v25 = vld [vmem:[%s2584_s8 + $0x398] sm:$0xff]  ;;  %v2078_v26 = vpack.c.bf16 %v944_v20, %v943_v19  ;;  %v689_v19 = vld [vmem:[%s2584_s8 + $0x120] sm:$0xff]  ;;  %v691_v20 = vld [vmem:[%s2584_s8 + $0x130] sm:$0xff] }
  0xdf   : > { %1223 = vmatprep.mubr.f32.mxu1 %v720_v28  ;;  %2013 = vmatpush1.bf16.msra.mxu0 %v2012_v27  ;;  %v913_v27 = vld [vmem:[%s2582_s7 + $0x2e0] sm:$0xff]  ;;  %v914_v28 = vld [vmem:[%s2582_s7 + $0x2e8] sm:$0xff] }
  0xe0   : > { %2061 = vmatpush1.bf16.msra.mxu1 %v2060_v29  ;;  %2014 = vmatprep.subr.bf16.mxu0 %v2171_v44  ;;  %v945_v29 = vld [vmem:[%s2582_s7 + $0x3e0] sm:$0xff] }
  0xe1   : > { %1054 = vmatmul.mubr.f32.gmra.mrb[16].mxu0 %v717_v34  ;;  %2062 = vmatprep.subr.bf16.mxu1 %v2171_v44  ;;  %v2033_v34 = vpack.c.bf16 %v914_v28, %v913_v27  ;;  %v705_v27 = vld [vmem:[%s2584_s8 + $0x1a0] sm:$0xff]  ;;  %v707_v28 = vld [vmem:[%s2584_s8 + $0x1b0] sm:$0xff] }
  0xe2   : > { %1224 = vmatmul.mubr.f32.gmra.mrb[16].mxu1 %v719_v35  ;;  %1058 = vmatprep.mubr.f32.mxu0 %v726_v36  ;;  %v776_v35 = vld [vmem:[%s2584_s8 + $0x3d8] sm:$0xff]  ;;  %v2081_v36 = vpack.c.bf16 %v946_v30, %v945_v29  ;;  %v714_v29 = vld [vmem:[%s2584_s8 + $0x1e8] sm:$0xff] }
  0xe3   : > { %1228 = vmatprep.mubr.f32.mxu1 %v728_v38  ;;  %2016 = vmatpush1.bf16.msra.mxu0 %v2015_v37  ;;  %v915_v37 = vld [vmem:[%s2582_s7 + $0x2f0] sm:$0xff]  ;;  %v916_v38 = vld [vmem:[%s2582_s7 + $0x2f8] sm:$0xff]  ;;  %v716_v30 = vld [vmem:[%s2584_s8 + $0x1f8] sm:$0xff] }
  0xe4   : > { %2064 = vmatpush1.bf16.msra.mxu1 %v2063_v39  ;;  %2017 = vmatprep.subr.bf16.mxu0 %v2171_v44  ;;  %v947_v39 = vld [vmem:[%s2582_s7 + $0x3f0] sm:$0xff] }
  0xe5   : > { %1059 = vmatmul.mubr.f32.gmra.mrb[18].mxu0 %v725_v45  ;;  %2065 = vmatprep.subr.bf16.mxu1 %v2171_v44  ;;  %v2036_v45 = vpack.c.bf16 %v916_v38, %v915_v37  ;;  %v730_v37 = vld [vmem:[%s2584_s8 + $0x268] sm:$0xff]  ;;  %v732_v38 = vld [vmem:[%s2584_s8 + $0x278] sm:$0xff] }
  0xe6   : > { %1229 = vmatmul.mubr.f32.gmra.mrb[18].mxu1 %v727_v46  ;;  %1063 = vmatprep.mubr.f32.mxu0 %v734_v47  ;;  %v784_v46 = vld [vmem:[%s2584_s8 + $0x418] sm:$0xff]  ;;  %v2084_v47 = vpack.c.bf16 %v948_v40, %v947_v39  ;;  %v729_v39 = vld [vmem:[%s2584_s8 + $0x260] sm:$0xff]  ;;  %v731_v40 = vld [vmem:[%s2584_s8 + $0x270] sm:$0xff] }
  0xe7   : > { %1233 = vmatprep.mubr.f32.mxu1 %v736_v49  ;;  %2019 = vmatpush1.bf16.msra.mxu0 %v2018_v48  ;;  %v781_v48 = vld [vmem:[%s2584_s8 + $0x400] sm:$0xff]  ;;  %v783_v49 = vld [vmem:[%s2584_s8 + $0x410] sm:$0xff] }
  0xe8   : > { %2067 = vmatpush1.bf16.msra.mxu1 %v2066_v50  ;;  %2020 = vmatprep.subr.bf16.mxu0 %v2171_v44  ;;  %v790_v50 = vld [vmem:[%s2584_s8 + $0x448] sm:$0xff] }
  0xe9   : > { %1064 = vmatmul.mubr.f32.gmra.mrb[20].mxu0 %v733_v55  ;;  %2068 = vmatprep.subr.bf16.mxu1 %v2171_v44  ;;  %v797_v55 = vld [vmem:[%s2584_s8 + $0x480] sm:$0xff] }
  0xea   : > { %1234 = vmatmul.mubr.f32.gmra.mrb[20].mxu1 %v735_v56  ;;  %1068 = vmatprep.mubr.f32.mxu0 %v742_v57  ;;  %v799_v56 = vld [vmem:[%s2584_s8 + $0x490] sm:$0xff]  ;;  %v806_v57 = vld [vmem:[%s2584_s8 + $0x4c8] sm:$0xff] }
  0xeb   : > { %1238 = vmatprep.mubr.f32.mxu1 %v744_v59  ;;  %2022 = vmatpush1.bf16.msra.mxu0 %v2021_v58  ;;  %v808_v58 = vld [vmem:[%s2584_s8 + $0x4d8] sm:$0xff]  ;;  %v805_v59 = vld [vmem:[%s2584_s8 + $0x4c0] sm:$0xff] }
  0xec   : > { %2070 = vmatpush1.bf16.msra.mxu1 %v2069_v60  ;;  %2023 = vmatprep.subr.bf16.mxu0 %v2171_v44  ;;  %v807_v60 = vld [vmem:[%s2584_s8 + $0x4d0] sm:$0xff] }
  0xed   : > { %1069 = vmatmul.mubr.f32.gmra.mrb[22].mxu0 %v741_v1  ;;  %2071 = vmatprep.subr.bf16.mxu1 %v2171_v44  ;;  %v658_v1 = vld [vmem:[%s2584_s8 + $0x28] sm:$0xff] }
  0xee   : > { %1239 = vmatmul.mubr.f32.gmra.mrb[22].mxu1 %v743_v2  ;;  %1073 = vmatprep.mubr.f32.mxu0 %v750_v3  ;;  %v660_v2 = vld [vmem:[%s2584_s8 + $0x38] sm:$0xff]  ;;  %v657_v3 = vld [vmem:[%s2584_s8 + $0x20] sm:$0xff] }
  0xef   : > { %1243 = vmatprep.mubr.f32.mxu1 %v752_v5  ;;  %2025 = vmatpush1.bf16.msra.mxu0 %v2024_v4  ;;  %v659_v4 = vld [vmem:[%s2584_s8 + $0x30] sm:$0xff]  ;;  %v666_v5 = vld [vmem:[%s2584_s8 + $0x68] sm:$0xff] }
  0xf0   : > { %2073 = vmatpush1.bf16.msra.mxu1 %v2072_v6  ;;  %2026 = vmatprep.subr.bf16.mxu0 %v2171_v44  ;;  %v668_v6 = vld [vmem:[%s2584_s8 + $0x78] sm:$0xff] }
  0xf1   : > { %1074 = vmatmul.mubr.f32.gmra.mrb[24].mxu0 %v749_v11  ;;  %2074 = vmatprep.subr.bf16.mxu1 %v2171_v44  ;;  %v673_v11 = vld [vmem:[%s2584_s8 + $0xa0] sm:$0xff] }
  0xf2   : > { %1244 = vmatmul.mubr.f32.gmra.mrb[24].mxu1 %v751_v12  ;;  %1078 = vmatprep.mubr.f32.mxu0 %v758_v13  ;;  %v675_v12 = vld [vmem:[%s2584_s8 + $0xb0] sm:$0xff]  ;;  %v682_v13 = vld [vmem:[%s2584_s8 + $0xe8] sm:$0xff] }
  0xf3   : > { %1248 = vmatprep.mubr.f32.mxu1 %v760_v15  ;;  %2028 = vmatpush1.bf16.msra.mxu0 %v2027_v14  ;;  %v684_v14 = vld [vmem:[%s2584_s8 + $0xf8] sm:$0xff]  ;;  %v681_v15 = vld [vmem:[%s2584_s8 + $0xe0] sm:$0xff] }
  0xf4   : > { %2076 = vmatpush1.bf16.msra.mxu1 %v2075_v16  ;;  %2029 = vmatprep.subr.bf16.mxu0 %v2171_v44  ;;  %v683_v16 = vld [vmem:[%s2584_s8 + $0xf0] sm:$0xff] }
  0xf5   : > { %1079 = vmatmul.mubr.f32.gmra.mrb[26].mxu0 %v757_v21  ;;  %2077 = vmatprep.subr.bf16.mxu1 %v2171_v44  ;;  %v698_v21 = vld [vmem:[%s2584_s8 + $0x168] sm:$0xff] }
  0xf6   : > { %1249 = vmatmul.mubr.f32.gmra.mrb[26].mxu1 %v759_v22  ;;  %1083 = vmatprep.mubr.f32.mxu0 %v766_v23  ;;  %v700_v22 = vld [vmem:[%s2584_s8 + $0x178] sm:$0xff]  ;;  %v697_v23 = vld [vmem:[%s2584_s8 + $0x160] sm:$0xff] }
  0xf7   : > { %1253 = vmatprep.mubr.f32.mxu1 %v768_v25  ;;  %2031 = vmatpush1.bf16.msra.mxu0 %v2030_v24  ;;  %v699_v24 = vld [vmem:[%s2584_s8 + $0x170] sm:$0xff]  ;;  %v706_v25 = vld [vmem:[%s2584_s8 + $0x1a8] sm:$0xff] }
  0xf8   : > { %2079 = vmatpush1.bf16.msra.mxu1 %v2078_v26  ;;  %2032 = vmatprep.subr.bf16.mxu0 %v2171_v44  ;;  %v708_v26 = vld [vmem:[%s2584_s8 + $0x1b8] sm:$0xff] }
  0xf9   : > { %1084 = vmatmul.mubr.f32.gmra.mrb[28].mxu0 %v765_v31  ;;  %2080 = vmatprep.subr.bf16.mxu1 %v2171_v44  ;;  %v713_v31 = vld [vmem:[%s2584_s8 + $0x1e0] sm:$0xff] }
  0xfa   : > { %1254 = vmatmul.mubr.f32.gmra.mrb[28].mxu1 %v767_v32  ;;  %1088 = vmatprep.mubr.f32.mxu0 %v774_v33  ;;  %v715_v32 = vld [vmem:[%s2584_s8 + $0x1f0] sm:$0xff]  ;;  %v722_v33 = vld [vmem:[%s2584_s8 + $0x228] sm:$0xff] }
  0xfb   : > { %1258 = vmatprep.mubr.f32.mxu1 %v776_v35  ;;  %2034 = vmatpush1.bf16.msra.mxu0 %v2033_v34  ;;  %v724_v34 = vld [vmem:[%s2584_s8 + $0x238] sm:$0xff]  ;;  %v721_v35 = vld [vmem:[%s2584_s8 + $0x220] sm:$0xff] }
  0xfc   : > { %2082 = vmatpush1.bf16.msra.mxu1 %v2081_v36  ;;  %2035 = vmatprep.subr.bf16.mxu0 %v2171_v44  ;;  %v723_v36 = vld [vmem:[%s2584_s8 + $0x230] sm:$0xff] }
  0xfd   : > { %1089 = vmatmul.mubr.f32.gmra.mrb[30].mxu0 %v773_v41  ;;  %2083 = vmatprep.subr.bf16.mxu1 %v2171_v44  ;;  %v791_v44 = vld [vmem:[%s2584_s8 + $0x450] sm:$0xff]  ;;  %v738_v41 = vld [vmem:[%s2584_s8 + $0x2a8] sm:$0xff] }
  0xfe   : > { %1259 = vmatmul.mubr.f32.gmra.mrb[30].mxu1 %v775_v42  ;;  %1093 = vmatprep.mubr.f32.mxu0 %v782_v43  ;;  %v740_v42 = vld [vmem:[%s2584_s8 + $0x2b8] sm:$0xff]  ;;  %v737_v43 = vld [vmem:[%s2584_s8 + $0x2a0] sm:$0xff] }
  0xff   : > { %1263 = vmatprep.mubr.f32.mxu1 %v784_v46  ;;  %2037 = vmatpush1.bf16.msra.mxu0 %v2036_v45  ;;  %v739_v45 = vld [vmem:[%s2584_s8 + $0x2b0] sm:$0xff]  ;;  %v746_v46 = vld [vmem:[%s2584_s8 + $0x2e8] sm:$0xff] }
 0x100   : > { %2085 = vmatpush1.bf16.msra.mxu1 %v2084_v47  ;;  %v748_v47 = vld [vmem:[%s2584_s8 + $0x2f8] sm:$0xff] }
 0x101   : > { %1094 = vmatmul.mubr.f32.gmra.mrb[32].mxu0 %v781_v48  ;;  %v745_v48 = vld [vmem:[%s2584_s8 + $0x2e0] sm:$0xff] }
 0x102   : > { %1264 = vmatmul.mubr.f32.gmra.mrb[32].mxu1 %v783_v49  ;;  %1098 = vmatprep.mubr.f32.mxu0 %v790_v50  ;;  %v747_v49 = vld [vmem:[%s2584_s8 + $0x2f0] sm:$0xff]  ;;  %v754_v50 = vld [vmem:[%s2584_s8 + $0x328] sm:$0xff] }
 0x103   : > { %1268 = vmatprep.mubr.f32.mxu1 %v792_v51  ;;  %v756_v51 = vld [vmem:[%s2584_s8 + $0x338] sm:$0xff] }
 0x105   : > { %1099 = vmatmul.mubr.f32.gmra.mrb[34].mxu0 %v789_v52  ;;  %v753_v52 = vld [vmem:[%s2584_s8 + $0x320] sm:$0xff] }
 0x106   : > { %1269 = vmatmul.mubr.f32.gmra.mrb[34].mxu1 %v791_v44  ;;  %1103 = vmatprep.mubr.f32.mxu0 %v798_v53  ;;  %v755_v44 = vld [vmem:[%s2584_s8 + $0x330] sm:$0xff]  ;;  %v762_v53 = vld [vmem:[%s2584_s8 + $0x368] sm:$0xff] }
 0x107   : > { %1273 = vmatprep.mubr.f32.mxu1 %v800_v54  ;;  %v764_v54 = vld [vmem:[%s2584_s8 + $0x378] sm:$0xff] }
 0x109   : > { %1104 = vmatmul.mubr.f32.gmra.mrb[36].mxu0 %v797_v55  ;;  %v761_v55 = vld [vmem:[%s2584_s8 + $0x360] sm:$0xff] }
 0x10a   : > { %1274 = vmatmul.mubr.f32.gmra.mrb[36].mxu1 %v799_v56  ;;  %1108 = vmatprep.mubr.f32.mxu0 %v806_v57  ;;  %v763_v56 = vld [vmem:[%s2584_s8 + $0x370] sm:$0xff]  ;;  %v770_v57 = vld [vmem:[%s2584_s8 + $0x3a8] sm:$0xff] }
 0x10b   : > { %1278 = vmatprep.mubr.f32.mxu1 %v808_v58  ;;  %v772_v58 = vld [vmem:[%s2584_s8 + $0x3b8] sm:$0xff] }
 0x10d   : > { %1109 = vmatmul.mubr.f32.gmra.mrb[38].mxu0 %v805_v59  ;;  %v769_v59 = vld [vmem:[%s2584_s8 + $0x3a0] sm:$0xff] }
 0x10e   : > { %1279 = vmatmul.mubr.f32.gmra.mrb[38].mxu1 %v807_v60  ;;  %1113 = vmatprep.mubr.f32.mxu0 %v814_v61  ;;  %v771_v60 = vld [vmem:[%s2584_s8 + $0x3b0] sm:$0xff]  ;;  %v778_v61 = vld [vmem:[%s2584_s8 + $0x3e8] sm:$0xff] }
 0x10f   : > { %1283 = vmatprep.mubr.f32.mxu1 %v816_v62  ;;  %v780_v62 = vld [vmem:[%s2584_s8 + $0x3f8] sm:$0xff] }
 0x111   : > { %1114 = vmatmul.mubr.f32.gmra.mrb[40].mxu0 %v813_v63  ;;  %v777_v63 = vld [vmem:[%s2584_s8 + $0x3e0] sm:$0xff] }
 0x112   : > { %1284 = vmatmul.mubr.f32.gmra.mrb[40].mxu1 %v815_v0  ;;  %1353 = vmatprep.mubr.f32.mxu0 %v658_v1  ;;  %v779_v0 = vld [vmem:[%s2584_s8 + $0x3f0] sm:$0xff]  ;;  %v786_v1 = vld [vmem:[%s2584_s8 + $0x428] sm:$0xff] }
 0x113   : > { %1523 = vmatprep.mubr.f32.mxu1 %v660_v2  ;;  %v788_v2 = vld [vmem:[%s2584_s8 + $0x438] sm:$0xff] }
 0x115   : > { %1354 = vmatmul.mubr.f32.vlgmr.msra.gmra.mrb[42].mxu0 %v657_v3  ;;  %v785_v3 = vld [vmem:[%s2584_s8 + $0x420] sm:$0xff] }
 0x116   : > { %1524 = vmatmul.mubr.f32.vlgmr.msra.gmra.mrb[42].mxu1 %v659_v4  ;;  %1358 = vmatprep.mubr.f32.mxu0 %v666_v5  ;;  %v787_v4 = vld [vmem:[%s2584_s8 + $0x430] sm:$0xff]  ;;  %v794_v5 = vld [vmem:[%s2584_s8 + $0x468] sm:$0xff] }
 0x117   : > { %1528 = vmatprep.mubr.f32.mxu1 %v668_v6  ;;  %v796_v6 = vld [vmem:[%s2584_s8 + $0x478] sm:$0xff] }
 0x119   : > { %1359 = vmatmul.mubr.f32.gmra.mrb[44].mxu0 %v665_v7  ;;  %v793_v7 = vld [vmem:[%s2584_s8 + $0x460] sm:$0xff] }
 0x11a   : > { %1529 = vmatmul.mubr.f32.gmra.mrb[44].mxu1 %v667_v8  ;;  %1363 = vmatprep.mubr.f32.mxu0 %v674_v9  ;;  %v795_v8 = vld [vmem:[%s2584_s8 + $0x470] sm:$0xff]  ;;  %v802_v9 = vld [vmem:[%s2584_s8 + $0x4a8] sm:$0xff] }
 0x11b   : > { %1533 = vmatprep.mubr.f32.mxu1 %v676_v10  ;;  %v804_v10 = vld [vmem:[%s2584_s8 + $0x4b8] sm:$0xff] }
 0x11d   : > { %1364 = vmatmul.mubr.f32.gmra.mrb[46].mxu0 %v673_v11  ;;  %v801_v11 = vld [vmem:[%s2584_s8 + $0x4a0] sm:$0xff] }
 0x11e   : > { %1534 = vmatmul.mubr.f32.gmra.mrb[46].mxu1 %v675_v12  ;;  %1368 = vmatprep.mubr.f32.mxu0 %v682_v13  ;;  %v803_v12 = vld [vmem:[%s2584_s8 + $0x4b0] sm:$0xff]  ;;  %v810_v13 = vld [vmem:[%s2584_s8 + $0x4e8] sm:$0xff] }
 0x11f   : > { %1538 = vmatprep.mubr.f32.mxu1 %v684_v14  ;;  %v812_v14 = vld [vmem:[%s2584_s8 + $0x4f8] sm:$0xff] }
 0x121   : > { %1369 = vmatmul.mubr.f32.gmra.mrb[48].mxu0 %v681_v15  ;;  %v809_v15 = vld [vmem:[%s2584_s8 + $0x4e0] sm:$0xff] }
 0x122   : > { %1539 = vmatmul.mubr.f32.gmra.mrb[48].mxu1 %v683_v16  ;;  %1373 = vmatprep.mubr.f32.mxu0 %v690_v17  ;;  %v811_v16 = vld [vmem:[%s2584_s8 + $0x4f0] sm:$0xff]  ;;  %v818_v17 = vld [vmem:[%s2584_s8 + $0x528] sm:$0x3] }
 0x123   : > { %1543 = vmatprep.mubr.f32.mxu1 %v692_v18  ;;  %v820_v18 = vld [vmem:[%s2584_s8 + $0x538] sm:$0x3] }
 0x125   : > { %1374 = vmatmul.mubr.f32.gmra.mrb[50].mxu0 %v689_v19  ;;  %v817_v19 = vld [vmem:[%s2584_s8 + $0x520] sm:$0x3] }
 0x126   : > { %1544 = vmatmul.mubr.f32.gmra.mrb[50].mxu1 %v691_v20  ;;  %1378 = vmatprep.mubr.f32.mxu0 %v698_v21  ;;  %v819_v20 = vld [vmem:[%s2584_s8 + $0x530] sm:$0x3] }
 0x127   : > { %1548 = vmatprep.mubr.f32.mxu1 %v700_v22 }
 0x129   : > { %1379 = vmatmul.mubr.f32.gmra.mrb[52].mxu0 %v697_v23 }
 0x12a   : > { %1549 = vmatmul.mubr.f32.gmra.mrb[52].mxu1 %v699_v24  ;;  %1383 = vmatprep.mubr.f32.mxu0 %v706_v25 }
 0x12b   : > { %1553 = vmatprep.mubr.f32.mxu1 %v708_v26 }
 0x12d   : > { %1384 = vmatmul.mubr.f32.gmra.mrb[54].mxu0 %v705_v27 }
 0x12e   : > { %1554 = vmatmul.mubr.f32.gmra.mrb[54].mxu1 %v707_v28  ;;  %1388 = vmatprep.mubr.f32.mxu0 %v714_v29 }
 0x12f   : > { %1558 = vmatprep.mubr.f32.mxu1 %v716_v30 }
 0x131   : > { %1389 = vmatmul.mubr.f32.gmra.mrb[56].mxu0 %v713_v31 }
 0x132   : > { %1559 = vmatmul.mubr.f32.gmra.mrb[56].mxu1 %v715_v32  ;;  %1393 = vmatprep.mubr.f32.mxu0 %v722_v33 }
 0x133   : > { %1563 = vmatprep.mubr.f32.mxu1 %v724_v34 }
 0x135   : > { %1394 = vmatmul.mubr.f32.gmra.mrb[58].mxu0 %v721_v35 }
 0x136   : > { %1564 = vmatmul.mubr.f32.gmra.mrb[58].mxu1 %v723_v36  ;;  %1398 = vmatprep.mubr.f32.mxu0 %v730_v37 }
 0x137   : > { %1568 = vmatprep.mubr.f32.mxu1 %v732_v38 }
 0x139   : > { %1399 = vmatmul.mubr.f32.gmra.mrb[60].mxu0 %v729_v39 }
 0x13a   : > { %1569 = vmatmul.mubr.f32.gmra.mrb[60].mxu1 %v731_v40  ;;  %1403 = vmatprep.mubr.f32.mxu0 %v738_v41 }
 0x13b   : > { %1573 = vmatprep.mubr.f32.mxu1 %v740_v42 }
 0x13d   : > { %1404 = vmatmul.mubr.f32.gmra.mrb[62].mxu0 %v737_v43 }
 0x13e   : > { %1574 = vmatmul.mubr.f32.gmra.mrb[62].mxu1 %v739_v45  ;;  %1408 = vmatprep.mubr.f32.mxu0 %v746_v46 }
 0x13f   : > { %1578 = vmatprep.mubr.f32.mxu1 %v748_v47 }
 0x141   : > { %1409 = vmatmul.mubr.f32.gmra.mrb[64].mxu0 %v745_v48 }
 0x142   : > { %1579 = vmatmul.mubr.f32.gmra.mrb[64].mxu1 %v747_v49  ;;  %1413 = vmatprep.mubr.f32.mxu0 %v754_v50 }
 0x143   : > { %1583 = vmatprep.mubr.f32.mxu1 %v756_v51 }
 0x145   : > { %1414 = vmatmul.mubr.f32.gmra.mrb[66].mxu0 %v753_v52 }
 0x146   : > { %1584 = vmatmul.mubr.f32.gmra.mrb[66].mxu1 %v755_v44  ;;  %1418 = vmatprep.mubr.f32.mxu0 %v762_v53 }
 0x147   : > { %1588 = vmatprep.mubr.f32.mxu1 %v764_v54 }
 0x149   : > { %1419 = vmatmul.mubr.f32.gmra.mrb[68].mxu0 %v761_v55 }
 0x14a   : > { %1589 = vmatmul.mubr.f32.gmra.mrb[68].mxu1 %v763_v56  ;;  %1423 = vmatprep.mubr.f32.mxu0 %v770_v57 }
 0x14b   : > { %1593 = vmatprep.mubr.f32.mxu1 %v772_v58 }
 0x14d   : > { %1424 = vmatmul.mubr.f32.gmra.mrb[70].mxu0 %v769_v59 }
 0x14e   : > { %1594 = vmatmul.mubr.f32.gmra.mrb[70].mxu1 %v771_v60  ;;  %1428 = vmatprep.mubr.f32.mxu0 %v778_v61 }
 0x14f   : > { %1598 = vmatprep.mubr.f32.mxu1 %v780_v62 }
 0x151   : > { %1429 = vmatmul.mubr.f32.gmra.mrb[72].mxu0 %v777_v63 }
 0x152   : > { %1599 = vmatmul.mubr.f32.gmra.mrb[72].mxu1 %v779_v0  ;;  %1433 = vmatprep.mubr.f32.mxu0 %v786_v1 }
 0x153   : > { %1603 = vmatprep.mubr.f32.mxu1 %v788_v2 }
 0x155   : > { %1434 = vmatmul.mubr.f32.gmra.mrb[74].mxu0 %v785_v3 }
 0x156   : > { %1604 = vmatmul.mubr.f32.gmra.mrb[74].mxu1 %v787_v4  ;;  %1438 = vmatprep.mubr.f32.mxu0 %v794_v5 }
 0x157   : > { %1608 = vmatprep.mubr.f32.mxu1 %v796_v6 }
 0x159   : > { %1439 = vmatmul.mubr.f32.gmra.mrb[76].mxu0 %v793_v7 }
 0x15a   : > { %1609 = vmatmul.mubr.f32.gmra.mrb[76].mxu1 %v795_v8  ;;  %1443 = vmatprep.mubr.f32.mxu0 %v802_v9 }
 0x15b   : > { %1613 = vmatprep.mubr.f32.mxu1 %v804_v10 }
 0x15d   : > { %1444 = vmatmul.mubr.f32.gmra.mrb[78].mxu0 %v801_v11 }
 0x15e   : > { %1614 = vmatmul.mubr.f32.gmra.mrb[78].mxu1 %v803_v12  ;;  %1448 = vmatprep.mubr.f32.mxu0 %v810_v13 }
 0x15f   : > { %1618 = vmatprep.mubr.f32.mxu1 %v812_v14 }
 0x161   : > { %1449 = vmatmul.mubr.f32.gmra.mrb[80].mxu0 %v809_v15 }
 0x162   : > { %1619 = vmatmul.mubr.f32.gmra.mrb[80].mxu1 %v811_v16  ;;  %1453 = vmatprep.mubr.f32.mxu0 %v818_v17 }
 0x163   : > { %1623 = vmatprep.mubr.f32.mxu1 %v820_v18 }
 0x165   : > { %1454 = vmatmul.mubr.f32.gmra.mrb[82].mxu0 %v817_v19 }
 0x166   : > { %1624 = vmatmul.mubr.f32.gmra.mrb[82].mxu1 %v819_v20 }
 0x194   : > { %v1015_v21 = vpop.f32.mrb[0].mxu0 }
 0x195   : > { %v1017_v22 = vpop.f32.mrb[1].mxu0  ;;  %v1185_v23 = vpop.f32.mrb[0].mxu1 }
 0x196   : > { %v2947_v24 = vadd.f32 %v1185_v23, %v1015_v21  ;;  %v1187_v25 = vpop.f32.mrb[1].mxu1 }
 0x198   : > { %v1020_v26 = vpop.f32.mrb[2].mxu0 }
 0x199   : > { %v1022_v27 = vpop.f32.mrb[3].mxu0  ;;  %v1190_v28 = vpop.f32.mrb[2].mxu1 }
 0x19a   : > { %v2949_v29 = vadd.f32 %v1190_v28, %v1020_v26  ;;  %v1192_v30 = vpop.f32.mrb[3].mxu1 }
 0x19c   : > { %v1025_v31 = vpop.f32.mrb[4].mxu0 }
 0x19d   : > { %v1027_v32 = vpop.f32.mrb[5].mxu0  ;;  %v1195_v33 = vpop.f32.mrb[4].mxu1 }
 0x19e   : > { %v2951_v34 = vadd.f32 %v1195_v33, %v1025_v31  ;;  %v1197_v35 = vpop.f32.mrb[5].mxu1 }
 0x1a0   : > { %v1030_v36 = vpop.f32.mrb[6].mxu0 }
 0x1a1   : > { %v1032_v37 = vpop.f32.mrb[7].mxu0  ;;  %v1200_v38 = vpop.f32.mrb[6].mxu1 }
 0x1a2   : > { %v2953_v39 = vadd.f32 %v1200_v38, %v1030_v36  ;;  %v1202_v40 = vpop.f32.mrb[7].mxu1 }
 0x1a4   : > { %v1035_v41 = vpop.f32.mrb[8].mxu0 }
 0x1a5   : > { %v1037_v42 = vpop.f32.mrb[9].mxu0  ;;  %v1205_v43 = vpop.f32.mrb[8].mxu1 }
 0x1a6   : > { %v2955_v45 = vadd.f32 %v1205_v43, %v1035_v41  ;;  %v1207_v46 = vpop.f32.mrb[9].mxu1 }
 0x1a8   : > { %v1040_v47 = vpop.f32.mrb[10].mxu0 }
 0x1a9   : > { %v1042_v48 = vpop.f32.mrb[11].mxu0  ;;  %v1210_v49 = vpop.f32.mrb[10].mxu1 }
 0x1aa   : > { %v2957_v50 = vadd.f32 %v1210_v49, %v1040_v47  ;;  %v1212_v51 = vpop.f32.mrb[11].mxu1 }
 0x1ac   : > { %v1045_v52 = vpop.f32.mrb[12].mxu0 }
 0x1ad   : > { %v1047_v44 = vpop.f32.mrb[13].mxu0  ;;  %v1215_v53 = vpop.f32.mrb[12].mxu1 }
 0x1ae   : > { %v2959_v54 = vadd.f32 %v1215_v53, %v1045_v52  ;;  %v1217_v55 = vpop.f32.mrb[13].mxu1 }
 0x1b0   : > { %v1050_v56 = vpop.f32.mrb[14].mxu0 }
 0x1b1   : > { %v1052_v57 = vpop.f32.mrb[15].mxu0  ;;  %v1220_v58 = vpop.f32.mrb[14].mxu1 }
 0x1b2   : > { %v2961_v59 = vadd.f32 %v1220_v58, %v1050_v56  ;;  %v1222_v60 = vpop.f32.mrb[15].mxu1 }
 0x1b4   : > { %v1055_v61 = vpop.f32.mrb[16].mxu0 }
 0x1b5   : > { %v1057_v62 = vpop.f32.mrb[17].mxu0  ;;  %v1225_v63 = vpop.f32.mrb[16].mxu1 }
 0x1b6   : > { %v2963_v0 = vadd.f32 %v1225_v63, %v1055_v61  ;;  %v1227_v1 = vpop.f32.mrb[17].mxu1 }
 0x1b8   : > { %v1060_v2 = vpop.f32.mrb[18].mxu0 }
 0x1b9   : > { %v1062_v3 = vpop.f32.mrb[19].mxu0  ;;  %v1230_v4 = vpop.f32.mrb[18].mxu1 }
 0x1ba   : > { %v2965_v5 = vadd.f32 %v1230_v4, %v1060_v2  ;;  %v1232_v6 = vpop.f32.mrb[19].mxu1 }
 0x1bc   : > { %v1065_v7 = vpop.f32.mrb[20].mxu0 }
 0x1bd   : > { %v1067_v8 = vpop.f32.mrb[21].mxu0  ;;  %v1235_v9 = vpop.f32.mrb[20].mxu1 }
 0x1be   : > { %v2967_v10 = vadd.f32 %v1235_v9, %v1065_v7  ;;  %v1237_v11 = vpop.f32.mrb[21].mxu1 }
 0x1c0   : > { %v1070_v12 = vpop.f32.mrb[22].mxu0 }
 0x1c1   : > { %v1072_v13 = vpop.f32.mrb[23].mxu0  ;;  %v1240_v14 = vpop.f32.mrb[22].mxu1 }
 0x1c2   : > { %v2969_v15 = vadd.f32 %v1240_v14, %v1070_v12  ;;  %v1242_v16 = vpop.f32.mrb[23].mxu1  ;;  %v632_v13 = vld [vmem:[#allocation2] sm:$0xff] }
 0x1c4   : > { %v1075_v17 = vpop.f32.mrb[24].mxu0 }
 0x1c5   : > { %v1077_v18 = vpop.f32.mrb[25].mxu0  ;;  %v1245_v19 = vpop.f32.mrb[24].mxu1 }
 0x1c6   : > { %v2971_v20 = vadd.f32 %v1245_v19, %v1075_v17  ;;  %v1247_v21 = vpop.f32.mrb[25].mxu1 }
 0x1c8   : > { %v1080_v22 = vpop.f32.mrb[26].mxu0 }
 0x1c9   : > { %v1082_v23 = vpop.f32.mrb[27].mxu0  ;;  %v1250_v25 = vpop.f32.mrb[26].mxu1 }
 0x1ca   : > { %v2973_v26 = vadd.f32 %v1250_v25, %v1080_v22  ;;  %v1252_v27 = vpop.f32.mrb[27].mxu1  ;;  %v633_v23 = vld [vmem:[#allocation2 + $0x8] sm:$0xff] }
 0x1cc   : > { %v1085_v28 = vpop.f32.mrb[28].mxu0 }
 0x1cd   : > { %v1087_v30 = vpop.f32.mrb[29].mxu0  ;;  %v1255_v31 = vpop.f32.mrb[28].mxu1 }
 0x1ce   : > { %v2975_v32 = vadd.f32 %v1255_v31, %v1085_v28  ;;  %v1257_v33 = vpop.f32.mrb[29].mxu1 }
 0x1d0   : > { %v1090_v35 = vpop.f32.mrb[30].mxu0 }
 0x1d1   : > { %v1092_v36 = vpop.f32.mrb[31].mxu0  ;;  %v1260_v37 = vpop.f32.mrb[30].mxu1 }
 0x1d2   : > { %v2977_v38 = vadd.f32 %v1260_v37, %v1090_v35  ;;  %v1262_v40 = vpop.f32.mrb[31].mxu1  ;;  %v634_v35 = vld [vmem:[#allocation2 + $0x10] sm:$0xff] }
 0x1d4   : > { %v1095_v41 = vpop.f32.mrb[32].mxu0 }
 0x1d5   : > { %v1097_v42 = vpop.f32.mrb[33].mxu0  ;;  %v1265_v43 = vpop.f32.mrb[32].mxu1 }
 0x1d6   : > { %v2979_v46 = vadd.f32 %v1265_v43, %v1095_v41  ;;  %v1267_v47 = vpop.f32.mrb[33].mxu1 }
 0x1d7   : > { %v635_v47 = vld [vmem:[#allocation2 + $0x18] sm:$0xff] }
 0x1d8   : > { %v1100_v48 = vpop.f32.mrb[34].mxu0 }
 0x1d9   : > { %v1102_v49 = vpop.f32.mrb[35].mxu0  ;;  %v1270_v51 = vpop.f32.mrb[34].mxu1 }
 0x1da   : > { %v2981_v52 = vadd.f32 %v1270_v51, %v1100_v48  ;;  %v1272_v44 = vpop.f32.mrb[35].mxu1 }
 0x1dc   : > { %v1105_v53 = vpop.f32.mrb[36].mxu0 }
 0x1dd   : > { %v1107_v55 = vpop.f32.mrb[37].mxu0  ;;  %v1275_v56 = vpop.f32.mrb[36].mxu1 }
 0x1de   : > { %v2983_v57 = vadd.f32 %v1275_v56, %v1105_v53  ;;  %v1277_v58 = vpop.f32.mrb[37].mxu1  ;;  %v636_v56 = vld [vmem:[#allocation2 + $0x20] sm:$0xff] }
 0x1e0   : > { %v1110_v60 = vpop.f32.mrb[38].mxu0 }
 0x1e1   : > { %v1112_v61 = vpop.f32.mrb[39].mxu0  ;;  %v1280_v62 = vpop.f32.mrb[38].mxu1 }
 0x1e2   : > { %v2985_v63 = vadd.f32 %v1280_v62, %v1110_v60  ;;  %v1282_v1 = vpop.f32.mrb[39].mxu1 }
 0x1e4   : > { %v1115_v2 = vpop.f32.mrb[40].mxu0 }
 0x1e5   : > { %v1117_v3 = vpop.f32.mrb[41].mxu0  ;;  %v1285_v4 = vpop.f32.mrb[40].mxu1 }
 0x1e6   : > { %v2987_v6 = vadd.f32 %v1285_v4, %v1115_v2  ;;  %v1287_v7 = vpop.f32.mrb[41].mxu1  ;;  %v637_v3 = vld [vmem:[#allocation2 + $0x28] sm:$0xff] }
 0x1e8   : > { %v1355_v8 = vpop.f32.mrb[42].mxu0 }
 0x1e9   : > { %v1356_v9 = vadd.f32 %v1355_v8, %v2947_v24  ;;  %v1357_v11 = vpop.f32.mrb[43].mxu0  ;;  %v1525_v12 = vpop.f32.mrb[42].mxu1 }
 0x1ea   : > { %v1527_v14 = vpop.f32.mrb[43].mxu1 }
 0x1eb   : > { %v1526_v16 = vadd.f32 %v1525_v12, %v1356_v9 }
 0x1ec   : > { %v1360_v17 = vpop.f32.mrb[44].mxu0 }
 0x1ed   : > { %v1629_v18 = vadd.f32 %v1526_v16, %v632_v13  ;;  %v1361_v19 = vadd.f32 %v1360_v17, %v2949_v29  ;;  %v1362_v21 = vpop.f32.mrb[45].mxu0  ;;  %v1530_v22 = vpop.f32.mrb[44].mxu1  ;;  %v638_v13 = vld [vmem:[#allocation2 + $0x30] sm:$0xff] }
 0x1ee   : > { %v1532_v25 = vpop.f32.mrb[45].mxu1 }
 0x1ef   : > { %1650 = vst [vmem:[#allocation2] sm:$0xff] %v1629_v18  ;;  %v1531_v27 = vadd.f32 %v1530_v22, %v1361_v19  ;;  %v639_v22 = vld [vmem:[#allocation2 + $0x38] sm:$0xff] }
 0x1f0   : > { %v1365_v28 = vpop.f32.mrb[46].mxu0 }
 0x1f1   : > { %v1630_v30 = vadd.f32 %v1531_v27, %v633_v23  ;;  %v1366_v31 = vadd.f32 %v1365_v28, %v2951_v34  ;;  %v1367_v24 = vpop.f32.mrb[47].mxu0  ;;  %v1535_v33 = vpop.f32.mrb[46].mxu1 }
 0x1f2   : > { %v1537_v36 = vpop.f32.mrb[47].mxu1  ;;  %v640_v24 = vld [vmem:[#allocation2 + $0x40] sm:$0xff] }
 0x1f3   : > { %1651 = vst [vmem:[#allocation2 + $0x8] sm:$0xff] %v1630_v30  ;;  %v1536_v37 = vadd.f32 %v1535_v33, %v1366_v31 }
 0x1f4   : > { %v1370_v40 = vpop.f32.mrb[48].mxu0 }
 0x1f5   : > { %v1631_v41 = vadd.f32 %v1536_v37, %v634_v35  ;;  %v1371_v29 = vadd.f32 %v1370_v40, %v2953_v39  ;;  %v1372_v42 = vpop.f32.mrb[49].mxu0  ;;  %v1540_v43 = vpop.f32.mrb[48].mxu1 }
 0x1f6   : > { %v1542_v48 = vpop.f32.mrb[49].mxu1 }
 0x1f7   : > { %1652 = vst [vmem:[#allocation2 + $0x10] sm:$0xff] %v1631_v41  ;;  %v1541_v49 = vadd.f32 %v1540_v43, %v1371_v29  ;;  %v641_v29 = vld [vmem:[#allocation2 + $0x48] sm:$0xff] }
 0x1f8   : > { %v1375_v51 = vpop.f32.mrb[50].mxu0 }
 0x1f9   : > { %v1632_v44 = vadd.f32 %v1541_v49, %v635_v47  ;;  %v1376_v34 = vadd.f32 %v1375_v51, %v2955_v45  ;;  %v1377_v53 = vpop.f32.mrb[51].mxu0  ;;  %v1545_v55 = vpop.f32.mrb[50].mxu1 }
 0x1fa   : > { %v1547_v58 = vpop.f32.mrb[51].mxu1 }
 0x1fb   : > { %1653 = vst [vmem:[#allocation2 + $0x18] sm:$0xff] %v1632_v44  ;;  %v1546_v60 = vadd.f32 %v1545_v55, %v1376_v34  ;;  %v642_v44 = vld [vmem:[#allocation2 + $0x50] sm:$0xff] }
 0x1fc   : > { %v1380_v61 = vpop.f32.mrb[52].mxu0 }
 0x1fd   : > { %v1633_v62 = vadd.f32 %v1546_v60, %v636_v56  ;;  %v1381_v39 = vadd.f32 %v1380_v61, %v2957_v50  ;;  %v1382_v1 = vpop.f32.mrb[53].mxu0  ;;  %v1550_v2 = vpop.f32.mrb[52].mxu1  ;;  %v643_v61 = vld [vmem:[#allocation2 + $0x58] sm:$0xff] }
 0x1fe   : > { %v1552_v4 = vpop.f32.mrb[53].mxu1 }
 0x1ff   : > { %1654 = vst [vmem:[#allocation2 + $0x20] sm:$0xff] %v1633_v62  ;;  %v1551_v7 = vadd.f32 %v1550_v2, %v1381_v39 }
 0x200   : > { %v1385_v8 = vpop.f32.mrb[54].mxu0 }
 0x201   : > { %v1634_v9 = vadd.f32 %v1551_v7, %v637_v3  ;;  %v1386_v45 = vadd.f32 %v1385_v8, %v2959_v54  ;;  %v1387_v11 = vpop.f32.mrb[55].mxu0  ;;  %v1555_v12 = vpop.f32.mrb[54].mxu1  ;;  %v644_v7 = vld [vmem:[#allocation2 + $0x60] sm:$0xff] }
 0x202   : > { %v1557_v14 = vpop.f32.mrb[55].mxu1 }
 0x203   : > { %1655 = vst [vmem:[#allocation2 + $0x28] sm:$0xff] %v1634_v9  ;;  %v1556_v16 = vadd.f32 %v1555_v12, %v1386_v45  ;;  %v645_v14 = vld [vmem:[#allocation2 + $0x68] sm:$0xff] }
 0x204   : > { %v1390_v17 = vpop.f32.mrb[56].mxu0 }
 0x205   : > { %v1635_v18 = vadd.f32 %v1556_v16, %v638_v13  ;;  %v1391_v50 = vadd.f32 %v1390_v17, %v2961_v59  ;;  %v1392_v19 = vpop.f32.mrb[57].mxu0  ;;  %v1560_v21 = vpop.f32.mrb[56].mxu1 }
 0x206   : > { %v1562_v23 = vpop.f32.mrb[57].mxu1 }
 0x207   : > { %1656 = vst [vmem:[#allocation2 + $0x30] sm:$0xff] %v1635_v18  ;;  %v1561_v25 = vadd.f32 %v1560_v21, %v1391_v50 }
 0x208   : > { %v1395_v27 = vpop.f32.mrb[58].mxu0 }
 0x209   : > { %v1636_v28 = vadd.f32 %v1561_v25, %v639_v22  ;;  %v1396_v54 = vadd.f32 %v1395_v27, %v2963_v0  ;;  %v1397_v30 = vpop.f32.mrb[59].mxu0  ;;  %v1565_v31 = vpop.f32.mrb[58].mxu1  ;;  %v646_v22 = vld [vmem:[#allocation2 + $0x70] sm:$0xff] }
 0x20a   : > { %v1567_v33 = vpop.f32.mrb[59].mxu1 }
 0x20b   : > { %1657 = vst [vmem:[#allocation2 + $0x38] sm:$0xff] %v1636_v28  ;;  %v1566_v35 = vadd.f32 %v1565_v31, %v1396_v54  ;;  %v647_v31 = vld [vmem:[#allocation2 + $0x78] sm:$0xff] }
 0x20c   : > { %v1400_v36 = vpop.f32.mrb[60].mxu0 }
 0x20d   : > { %v1637_v37 = vadd.f32 %v1566_v35, %v640_v24  ;;  %v1401_v59 = vadd.f32 %v1400_v36, %v2965_v5  ;;  %v1402_v40 = vpop.f32.mrb[61].mxu0  ;;  %v1570_v41 = vpop.f32.mrb[60].mxu1 }
 0x20e   : > { %v1572_v42 = vpop.f32.mrb[61].mxu1  ;;  %v648_v40 = vld [vmem:[#allocation2 + $0x80] sm:$0xff] }
 0x20f   : > { %1658 = vst [vmem:[#allocation2 + $0x40] sm:$0xff] %v1637_v37  ;;  %v1571_v43 = vadd.f32 %v1570_v41, %v1401_v59 }
 0x210   : > { %v1405_v47 = vpop.f32.mrb[62].mxu0 }
 0x211   : > { %v1638_v48 = vadd.f32 %v1571_v43, %v641_v29  ;;  %v1406_v0 = vadd.f32 %v1405_v47, %v2967_v10  ;;  %v1407_v49 = vpop.f32.mrb[63].mxu0  ;;  %v1575_v51 = vpop.f32.mrb[62].mxu1 }
 0x212   : > { %v1577_v34 = vpop.f32.mrb[63].mxu1 }
 0x213   : > { %1659 = vst [vmem:[#allocation2 + $0x48] sm:$0xff] %v1638_v48  ;;  %v1576_v53 = vadd.f32 %v1575_v51, %v1406_v0  ;;  %v649_v0 = vld [vmem:[#allocation2 + $0x88] sm:$0xff] }
 0x214   : > { %v1410_v55 = vpop.f32.mrb[64].mxu0 }
 0x215   : > { %v1639_v56 = vadd.f32 %v1576_v53, %v642_v44  ;;  %v1411_v5 = vadd.f32 %v1410_v55, %v2969_v15  ;;  %v1412_v58 = vpop.f32.mrb[65].mxu0  ;;  %v1580_v60 = vpop.f32.mrb[64].mxu1 }
 0x216   : > { %v1582_v62 = vpop.f32.mrb[65].mxu1 }
 0x217   : > { %1660 = vst [vmem:[#allocation2 + $0x50] sm:$0xff] %v1639_v56  ;;  %v1581_v39 = vadd.f32 %v1580_v60, %v1411_v5  ;;  %v650_v56 = vld [vmem:[#allocation2 + $0x90] sm:$0xff] }
 0x218   : > { %v1415_v1 = vpop.f32.mrb[66].mxu0 }
 0x219   : > { %v1640_v2 = vadd.f32 %v1581_v39, %v643_v61  ;;  %v1416_v10 = vadd.f32 %v1415_v1, %v2971_v20  ;;  %v1417_v3 = vpop.f32.mrb[67].mxu0  ;;  %v1585_v4 = vpop.f32.mrb[66].mxu1  ;;  %v651_v1 = vld [vmem:[#allocation2 + $0x98] sm:$0xff] }
 0x21a   : > { %v1587_v8 = vpop.f32.mrb[67].mxu1 }
 0x21b   : > { %1661 = vst [vmem:[#allocation2 + $0x58] sm:$0xff] %v1640_v2  ;;  %v1586_v9 = vadd.f32 %v1585_v4, %v1416_v10 }
 0x21c   : > { %v1420_v45 = vpop.f32.mrb[68].mxu0 }
 0x21d   : > { %v1641_v11 = vadd.f32 %v1586_v9, %v644_v7  ;;  %v1421_v15 = vadd.f32 %v1420_v45, %v2973_v26  ;;  %v1422_v12 = vpop.f32.mrb[69].mxu0  ;;  %v1590_v13 = vpop.f32.mrb[68].mxu1  ;;  %v652_v9 = vld [vmem:[#allocation2 + $0xa0] sm:$0x3] }
 0x21e   : > { %v1592_v16 = vpop.f32.mrb[69].mxu1  ;;  %v3014_v12 = vld [vmem:[%s3117_s2] ss:$0 sm:$0xff] (!%p1887_p11) }
 0x21f   : > { %1662 = vst [vmem:[#allocation2 + $0x60] sm:$0xff] %v1641_v11  ;;  %v1591_v17 = vadd.f32 %v1590_v13, %v1421_v15  ;;  %v1676_v13 = vld [vmem:[#allocation2 + $0x8] sm:$0xff] (!%p1887_p11)  ;;  %v1677_v16 = vld [vmem:[#allocation2 + $0x10] sm:$0xff] (!%p1887_p11) }
 0x220   : > { %v1425_v18 = vpop.f32.mrb[70].mxu0 }
 0x221   : > { %v1642_v50 = vadd.f32 %v1591_v17, %v645_v14  ;;  %v1426_v20 = vadd.f32 %v1425_v18, %v2975_v32  ;;  %v1427_v19 = vpop.f32.mrb[71].mxu0  ;;  %v1595_v21 = vpop.f32.mrb[70].mxu1  ;;  %v1704_v14 = vadd.f32 (!%p1887_p11), %v3014_v12, %v1676_v13  ;;  %v1678_v17 = vld [vmem:[#allocation2 + $0x18] sm:$0xff] (!%p1887_p11)  ;;  %v1679_v18 = vld [vmem:[#allocation2 + $0x20] sm:$0xff] (!%p1887_p11) }
 0x222   : > { %v1597_v23 = vpop.f32.mrb[71].mxu1  ;;  %v1707_v19 = vadd.f32 (!%p1887_p11), %v3014_v12, %v1679_v18 }
 0x223   : > { %1663 = vst [vmem:[#allocation2 + $0x68] sm:$0xff] %v1642_v50  ;;  %v1596_v25 = vadd.f32 %v1595_v21, %v1426_v20  ;;  %v1705_v50 = vadd.f32 (!%p1887_p11), %v3014_v12, %v1677_v16  ;;  %v1706_v20 = vadd.f32 (!%p1887_p11), %v3014_v12, %v1678_v17  ;;  %v1680_v21 = vld [vmem:[#allocation2 + $0x28] sm:$0xff] (!%p1887_p11)  ;;  %v1682_v23 = vld [vmem:[#allocation2 + $0x38] sm:$0xff] (!%p1887_p11) }
 0x224   : > { %v1430_v27 = vpop.f32.mrb[72].mxu0 }
 0x225   : > { %v1643_v28 = vadd.f32 %v1596_v25, %v646_v22  ;;  %v1431_v26 = vadd.f32 %v1430_v27, %v2977_v38  ;;  %v1432_v54 = vpop.f32.mrb[73].mxu0  ;;  %v1600_v30 = vpop.f32.mrb[72].mxu1  ;;  %v1681_v22 = vld [vmem:[#allocation2 + $0x30] sm:$0xff] (!%p1887_p11)  ;;  %v1725_v27 = vmax.f32 (!%p1887_p11), %v1704_v14, 0.0 }
 0x226   : > { %v1602_v24 = vpop.f32.mrb[73].mxu1  ;;  %v1683_v54 = vld [vmem:[#allocation2 + $0x40] sm:$0xff] (!%p1887_p11) }
 0x227   : > { %1664 = vst [vmem:[#allocation2 + $0x70] sm:$0xff] %v1643_v28  ;;  %v1601_v33 = vadd.f32 %v1600_v30, %v1431_v26  ;;  %v1708_v28 = vadd.f32 (!%p1887_p11), %v3014_v12, %v1680_v21  ;;  %v1709_v26 = vadd.f32 (!%p1887_p11), %v3014_v12, %v1681_v22  ;;  %v1684_v30 = vld [vmem:[#allocation2 + $0x48] sm:$0xff] (!%p1887_p11)  ;;  %v1726_v24 = vmax.f32 (!%p1887_p11), %v1705_v50, 0.0  ;;  %1746 = vst [vmem:[%s3118_s3 + $0x8] sm:$0xff] (!%p1887_p11), %v1725_v27 }
 0x228   : > { %v1435_v35 = vpop.f32.mrb[74].mxu0 }
 0x229   : > { %v1644_v36 = vadd.f32 %v1601_v33, %v647_v31  ;;  %v1436_v32 = vadd.f32 %v1435_v35, %v2979_v46  ;;  %v1437_v37 = vpop.f32.mrb[75].mxu0  ;;  %v1605_v59 = vpop.f32.mrb[74].mxu1  ;;  %v1685_v31 = vld [vmem:[#allocation2 + $0x50] sm:$0xff] (!%p1887_p11)  ;;  %v1727_v33 = vmax.f32 (!%p1887_p11), %v1706_v20, 0.0  ;;  %v1728_v35 = vmax.f32 (!%p1887_p11), %v1707_v19, 0.0  ;;  %1747 = vst [vmem:[%s3118_s3 + $0x10] sm:$0xff] (!%p1887_p11), %v1726_v24 }
 0x22a   : > { %v1607_v41 = vpop.f32.mrb[75].mxu1  ;;  %v1687_v37 = vld [vmem:[#allocation2 + $0x60] sm:$0xff] (!%p1887_p11) }
 0x22b   : > { %1665 = vst [vmem:[#allocation2 + $0x78] sm:$0xff] %v1644_v36  ;;  %v1606_v29 = vadd.f32 %v1605_v59, %v1436_v32  ;;  %v1710_v36 = vadd.f32 (!%p1887_p11), %v3014_v12, %v1682_v23  ;;  %v1686_v32 = vld [vmem:[#allocation2 + $0x58] sm:$0xff] (!%p1887_p11)  ;;  %v1688_v59 = vld [vmem:[#allocation2 + $0x68] sm:$0xff] (!%p1887_p11)  ;;  %v1730_v41 = vmax.f32 (!%p1887_p11), %v1709_v26, 0.0  ;;  %1748 = vst [vmem:[%s3118_s3 + $0x18] sm:$0xff] (!%p1887_p11), %v1727_v33 }
 0x22c   : > { %v1440_v42 = vpop.f32.mrb[76].mxu0  ;;  %1749 = vst [vmem:[%s3118_s3 + $0x20] sm:$0xff] (!%p1887_p11), %v1728_v35 }
 0x22d   : > { %v1645_v43 = vadd.f32 %v1606_v29, %v648_v40  ;;  %v1441_v38 = vadd.f32 %v1440_v42, %v2981_v52  ;;  %v1442_v47 = vpop.f32.mrb[77].mxu0  ;;  %v1610_v48 = vpop.f32.mrb[76].mxu1  ;;  %v1729_v40 = vmax.f32 (!%p1887_p11), %v1708_v28, 0.0  ;;  %v1711_v29 = vadd.f32 (!%p1887_p11), %v3014_v12, %v1683_v54  ;;  %1751 = vst [vmem:[%s3118_s3 + $0x30] sm:$0xff] (!%p1887_p11), %v1730_v41 }
 0x22e   : > { %v1612_v49 = vpop.f32.mrb[77].mxu1  ;;  %v1712_v42 = vadd.f32 (!%p1887_p11), %v3014_v12, %v1684_v30  ;;  %v1731_v47 = vmax.f32 (!%p1887_p11), %v1710_v36, 0.0 }
 0x22f   : > { %1666 = vst [vmem:[#allocation2 + $0x80] sm:$0xff] %v1645_v43  ;;  %v1611_v51 = vadd.f32 %v1610_v48, %v1441_v38  ;;  %v1689_v43 = vld [vmem:[#allocation2 + $0x70] sm:$0xff] (!%p1887_p11)  ;;  %v1713_v48 = vadd.f32 (!%p1887_p11), %v3014_v12, %v1685_v31  ;;  %v1715_v49 = vadd.f32 (!%p1887_p11), %v3014_v12, %v1687_v37  ;;  %1750 = vst [vmem:[%s3118_s3 + $0x28] sm:$0xff] (!%p1887_p11), %v1729_v40 }
 0x230   : > { %v1445_v44 = vpop.f32.mrb[78].mxu0  ;;  %1752 = vst [vmem:[%s3118_s3 + $0x38] sm:$0xff] (!%p1887_p11), %v1731_v47 }
 0x231   : > { %v1646_v34 = vadd.f32 %v1611_v51, %v649_v0  ;;  %v1446_v46 = vadd.f32 %v1445_v44, %v2983_v57  ;;  %v1447_v53 = vpop.f32.mrb[79].mxu0  ;;  %v1615_v55 = vpop.f32.mrb[78].mxu1  ;;  %v1714_v0 = vadd.f32 (!%p1887_p11), %v3014_v12, %v1686_v32 }
 0x232   : > { %v1617_v5 = vpop.f32.mrb[79].mxu1  ;;  %v1690_v38 = vld [vmem:[#allocation2 + $0x78] sm:$0xff] (!%p1887_p11)  ;;  %v1716_v53 = vadd.f32 (!%p1887_p11), %v3014_v12, %v1688_v59 }
 0x233   : > { %1667 = vst [vmem:[#allocation2 + $0x88] sm:$0xff] %v1646_v34  ;;  %v1616_v58 = vadd.f32 %v1615_v55, %v1446_v46  ;;  %v1732_v34 = vmax.f32 (!%p1887_p11), %v1711_v29, 0.0  ;;  %v1733_v46 = vmax.f32 (!%p1887_p11), %v1712_v42, 0.0  ;;  %v1717_v55 = vadd.f32 (!%p1887_p11), %v3014_v12, %v1689_v43 }
 0x234   : > { %v1450_v60 = vpop.f32.mrb[80].mxu0 }
 0x235   : > { %v1647_v61 = vadd.f32 %v1616_v58, %v650_v56  ;;  %v1451_v52 = vadd.f32 %v1450_v60, %v2985_v63  ;;  %v1452_v62 = vpop.f32.mrb[81].mxu0  ;;  %v1620_v39 = vpop.f32.mrb[80].mxu1  ;;  %v1675_v63 = vld [vmem:[#allocation2] sm:$0xff] (!%p1887_p11)  ;;  %v1734_v60 = vmax.f32 (!%p1887_p11), %v1713_v48, 0.0  ;;  %1753 = vst [vmem:[%s3118_s3 + $0x40] sm:$0xff] (!%p1887_p11), %v1732_v34  ;;  %1754 = vst [vmem:[%s3118_s3 + $0x48] sm:$0xff] (!%p1887_p11), %v1733_v46 }
 0x236   : > { %v1622_v2 = vpop.f32.mrb[81].mxu1  ;;  %v1691_v51 = vld [vmem:[#allocation2 + $0x80] sm:$0xff] (!%p1887_p11)  ;;  %v1718_v62 = vadd.f32 (!%p1887_p11), %v3014_v12, %v1690_v38 }
 0x237   : > { %1668 = vst [vmem:[#allocation2 + $0x90] sm:$0xff] %v1647_v61  ;;  %v1621_v10 = vadd.f32 %v1620_v39, %v1451_v52  ;;  %v1735_v61 = vmax.f32 (!%p1887_p11), %v1714_v0, 0.0  ;;  %v1736_v52 = vmax.f32 (!%p1887_p11), %v1715_v49, 0.0  ;;  %v1737_v39 = vmax.f32 (!%p1887_p11), %v1716_v53, 0.0  ;;  %1755 = vst [vmem:[%s3118_s3 + $0x50] sm:$0xff] (!%p1887_p11), %v1734_v60 }
 0x238   : > { %v1455_v3 = vpop.f32.mrb[82].mxu0  ;;  %v1719_v2 = vadd.f32 (!%p1887_p11), %v3014_v12, %v1691_v51 }
 0x239   : > { %v1648_v4 = vadd.f32 %v1621_v10, %v651_v1  ;;  %v1456_v57 = vadd.f32 %v1455_v3, %v2987_v6  ;;  %v1457_v7 = vpop.f32.mrb[83].mxu0  ;;  %v1625_v8 = vpop.f32.mrb[82].mxu1  ;;  %1674 = sbr.rel (%p1887_p11) target bundleno = 588 (0x24c), region = 63  ;;  %v1703_v6 = vadd.f32 (!%p1887_p11), %v3014_v12, %v1675_v63  ;;  %v1738_v1 = vmax.f32 (!%p1887_p11), %v1717_v55, 0.0  ;;  %1756 = vst [vmem:[%s3118_s3 + $0x58] sm:$0xff] (!%p1887_p11), %v1735_v61  ;;  %1757 = vst [vmem:[%s3118_s3 + $0x60] sm:$0xff] (!%p1887_p11), %v1736_v52 }
 0x23a   : > { %v1627_v45 = vpop.f32.mrb[83].mxu1  ;;  %v1692_v44 = vld [vmem:[#allocation2 + $0x88] sm:$0xff] (!%p1887_p11)  ;;  %v1739_v3 = vmax.f32 (!%p1887_p11), %v1718_v62, 0.0  ;;  %1758 = vst [vmem:[%s3118_s3 + $0x68] sm:$0xff] (!%p1887_p11), %v1737_v39 }
 0x23b   : > { %1669 = vst [vmem:[#allocation2 + $0x98] sm:$0xff] %v1648_v4  ;;  %v1626_v11 = vadd.f32 %v1625_v8, %v1456_v57  ;;  %v1724_v25 = vmax.f32 (!%p1887_p11), %v1703_v6, 0.0  ;;  %v1720_v10 = vadd.f32 (!%p1887_p11), %v3014_v12, %v1692_v44  ;;  %1759 = vst [vmem:[%s3118_s3 + $0x70] sm:$0xff] (!%p1887_p11), %v1738_v1  ;;  %v1740_v8 = vmax.f32 (!%p1887_p11), %v1719_v2, 0.0 }
 0x23c   : > { %1760 = vst [vmem:[%s3118_s3 + $0x78] sm:$0xff] (!%p1887_p11), %v1739_v3 }
 0x23d   : > { %v1649_v15 = vadd.f32 %v1626_v11, %v652_v9  ;;  %1745 = vst [vmem:[%s3118_s3] sm:$0xff] (!%p1887_p11), %v1724_v25  ;;  %v1741_v9 = vmax.f32 (!%p1887_p11), %v1720_v10, 0.0  ;;  %1761 = vst [vmem:[%s3118_s3 + $0x80] sm:$0xff] (!%p1887_p11), %v1740_v8 }
 0x23e   : > { %v1693_v56 = vld [vmem:[#allocation2 + $0x90] sm:$0xff] (!%p1887_p11) }
 0x23f   : > { %1670 = vst [vmem:[#allocation2 + $0xa0] sm:$0x3] %v1649_v15  ;;  %v1721_v4 = vadd.f32 (!%p1887_p11), %v3014_v12, %v1693_v56  ;;  %1762 = vst [vmem:[%s3118_s3 + $0x88] sm:$0xff] (!%p1887_p11), %v1741_v9 }
 0x241   : > { %v1742_v45 = vmax.f32 %v1721_v4, 0.0 }
 0x242   : > { %v1694_v5 = vld [vmem:[#allocation2 + $0x98] sm:$0xff] }
 0x243   : > { %v1722_v57 = vadd.f32 %v3014_v12, %v1694_v5  ;;  %1763 = vst [vmem:[%s3118_s3 + $0x90] sm:$0xff] %v1742_v45 }
 0x245   : > { %v1743_v11 = vmax.f32 %v1722_v57, 0.0 }
 0x246   : > { %v1695_v58 = vld [vmem:[#allocation2 + $0xa0] sm:$0x3] }
 0x247   : > { %v1723_v7 = vadd.f32 %v3014_v12, %v1695_v58  ;;  %1764 = vst [vmem:[%s3118_s3 + $0x98] sm:$0xff] %v1743_v11 }
 0x249   : > { %v1744_v15 = vmax.f32 %v1723_v7, 0.0 }
 0x24b   : > { %1765 = vst [vmem:[%s3118_s3 + $0xa0] sm:$0x3] %v1744_v15 }
 0x24c PF: > { %s13_s16 = sadd.s32 1, %s2168_s16   ;;  %s3119_s12 = smov %s2156_s13 }
 0x24d   : > { %p10_p12 = scmp.ge.s32.totalorder %s13_s16, 4   ;;  %s3120_s13 = smov %s2227_s20 }
 0x24e   : > { %s3121_s14 = smov %s2164_s15  ;;  %s3122_s15 = smov %s3124_s17 }
 0x24f   :  { %12 = sbr.rel (!%p10_p12) target bundleno = 3 (0x3), region = 104 }

// kernel: convdqn_forward.6
= control target key start
LH: loop header
LB: loop body
LE: loop exit
PB: predicated region body
PF: predicated region fallthrough
CT: control target
= control target key end

     0   :  { %s1278_s12 = smov 0   ;;  %s1280_s13 = smov 0   ;;  %s1594_s0 = inlined_call_operand.vmem [shape: f32[98,1152], index: 0, kind: input, shape index: {}]   ;;  %s1595_s1 = inlined_call_operand.vmem [shape: f32[1152,128], index: 1, kind: input, shape index: {}]   ;;  %s1596_s2 = inlined_call_operand.vmem [shape: f32[1,128], index: 2, kind: input, shape index: {}]   ;;  %s1597_s3 = inlined_call_operand.vmem [shape: f32[98,128], index: 3, kind: output, shape index: {}]  }
   0x1   :  { %s1282_s14 = smov 0   ;;  %s1284_s15 = smov 0  }
   0x2   :  { %s1286_s16 = smov 0  }
   0x3 LB: > { %s25_s17 = sadd.s32 1, %s1248_s15  ;;  %p48_p1 = scmp.ne.s32.totalorder %s1240_s13, %s1236_s12  ;;  %s1252_s16 = sphi %s1286_s16, %s13_s16   ;;  %s1248_s15 = sphi %s1284_s15, %s1601_s15   ;;  %s1244_s14 = sphi %s1282_s14, %s1600_s14   ;;  %s1240_s13 = sphi %s1280_s13, %s1599_s13   ;;  %s1236_s12 = sphi %s1278_s12, %s1598_s12  }
   0x4   : > { %p26_p0 = scmp.ge.s32.totalorder %s25_s17, 3  ;;  %p49_p2 = scmp.eq.s32.totalorder %s1252_s16, 0 }
   0x5   : > { %s41_s19 = sadd.s32 1, %s1240_s13  ;;  %p929_p5 = scmp.ge.s32.totalorder %s1252_s16, 3 }
   0x6   : > { %s1603_s17 = smov (%p26_p0, %s25_s17), 0  ;;  %p50_p3 = por %p49_p2, %p48_p1 }
   0x7   : > { %s37_s18 = ssub.s32 %s1248_s15, %s1603_s17  ;;  %162 = sbr.rel (%p929_p5) target bundleno = 39 (0x27), region = 20 }
   0x8   : > { %p39_p4 = scmp.eq.s32.totalorder %s37_s18, 0 }
   0xa   : > { %s1313_s20 = scalar_select %p39_p4, %s1240_s13, %s41_s19  }
   0xe   : > { %165 = sbr.rel (!%p50_p3) target bundleno = 39 (0x27), region = 24  ;;  %s167_s21 = sand.u32 (%p50_p3), 1, %s1240_s13  }
   0xf   : > { %s940_s22 = smul.u32 (%p50_p3), 24, %s1248_s15 }
  0x10   : > { %s1168_s23 = smul.u32 (%p50_p3), 312, %s167_s21 }
  0x11   : > { %s1321_s26 = scalar_lea.vmem (%p50_p3), %s1594_s0, %s940_s22 }
  0x12   : > { %v188_v0 = vld [vmem:[%s1321_s26] sm:$0xff] (%p50_p3)  ;;  %v190_v1 = vld [vmem:[%s1321_s26 + $0x8] sm:$0xff] (%p50_p3)  ;;  %v192_v2 = vld [vmem:[%s1321_s26 + $0x10] sm:$0xff] (%p50_p3)  ;;  %s1326_s27 = scalar_lea.vmem (%p50_p3), [#allocation3], %s1168_s23 }
  0x13   : > { %189 = vst [vmem:[%s1326_s27] sm:$0xff] (%p50_p3), %v188_v0  ;;  %191 = vst [vmem:[%s1326_s27 + $0x8] sm:$0xff] (%p50_p3), %v190_v1  ;;  %v194_v3 = vld [vmem:[%s1321_s26 + $0x48] sm:$0xff] (%p50_p3)  ;;  %v196_v4 = vld [vmem:[%s1321_s26 + $0x50] sm:$0xff] (%p50_p3) }
  0x14   : > { %193 = vst [vmem:[%s1326_s27 + $0x10] sm:$0xff] (%p50_p3), %v192_v2  ;;  %v198_v5 = vld [vmem:[%s1321_s26 + $0x58] sm:$0xff] (%p50_p3)  ;;  %195 = vst [vmem:[%s1326_s27 + $0x18] sm:$0xff] (%p50_p3), %v194_v3  ;;  %v200_v6 = vld [vmem:[%s1321_s26 + $0x90] sm:$0xff] (%p50_p3) }
  0x15   : > { %197 = vst [vmem:[%s1326_s27 + $0x20] sm:$0xff] %v196_v4  ;;  %199 = vst [vmem:[%s1326_s27 + $0x28] sm:$0xff] %v198_v5  ;;  %v202_v7 = vld [vmem:[%s1321_s26 + $0x98] sm:$0xff]  ;;  %v204_v8 = vld [vmem:[%s1321_s26 + $0xa0] sm:$0xff] }
  0x16   : > { %201 = vst [vmem:[%s1326_s27 + $0x30] sm:$0xff] %v200_v6  ;;  %203 = vst [vmem:[%s1326_s27 + $0x38] sm:$0xff] %v202_v7  ;;  %v206_v9 = vld [vmem:[%s1321_s26 + $0xd8] sm:$0xff]  ;;  %v208_v10 = vld [vmem:[%s1321_s26 + $0xe0] sm:$0xff] }
  0x17   : > { %205 = vst [vmem:[%s1326_s27 + $0x40] sm:$0xff] %v204_v8  ;;  %v210_v11 = vld [vmem:[%s1321_s26 + $0xe8] sm:$0xff]  ;;  %207 = vst [vmem:[%s1326_s27 + $0x48] sm:$0xff] %v206_v9  ;;  %v212_v12 = vld [vmem:[%s1321_s26 + $0x120] sm:$0xff] }
  0x18   : > { %209 = vst [vmem:[%s1326_s27 + $0x50] sm:$0xff] %v208_v10  ;;  %211 = vst [vmem:[%s1326_s27 + $0x58] sm:$0xff] %v210_v11  ;;  %v214_v13 = vld [vmem:[%s1321_s26 + $0x128] sm:$0xff]  ;;  %v216_v14 = vld [vmem:[%s1321_s26 + $0x130] sm:$0xff] }
  0x19   : > { %213 = vst [vmem:[%s1326_s27 + $0x60] sm:$0xff] %v212_v12  ;;  %215 = vst [vmem:[%s1326_s27 + $0x68] sm:$0xff] %v214_v13  ;;  %v218_v15 = vld [vmem:[%s1321_s26 + $0x168] sm:$0xff]  ;;  %v220_v16 = vld [vmem:[%s1321_s26 + $0x170] sm:$0xff] }
  0x1a   : > { %217 = vst [vmem:[%s1326_s27 + $0x70] sm:$0xff] %v216_v14  ;;  %v222_v17 = vld [vmem:[%s1321_s26 + $0x178] sm:$0xff]  ;;  %219 = vst [vmem:[%s1326_s27 + $0x78] sm:$0xff] %v218_v15  ;;  %v224_v18 = vld [vmem:[%s1321_s26 + $0x1b0] sm:$0xff] }
  0x1b   : > { %221 = vst [vmem:[%s1326_s27 + $0x80] sm:$0xff] %v220_v16  ;;  %223 = vst [vmem:[%s1326_s27 + $0x88] sm:$0xff] %v222_v17  ;;  %v226_v19 = vld [vmem:[%s1321_s26 + $0x1b8] sm:$0xff]  ;;  %v228_v20 = vld [vmem:[%s1321_s26 + $0x1c0] sm:$0xff] }
  0x1c   : > { %225 = vst [vmem:[%s1326_s27 + $0x90] sm:$0xff] %v224_v18  ;;  %227 = vst [vmem:[%s1326_s27 + $0x98] sm:$0xff] %v226_v19  ;;  %v230_v21 = vld [vmem:[%s1321_s26 + $0x1f8] sm:$0xff]  ;;  %v232_v22 = vld [vmem:[%s1321_s26 + $0x200] sm:$0xff] }
  0x1d   : > { %229 = vst [vmem:[%s1326_s27 + $0xa0] sm:$0xff] %v228_v20  ;;  %v234_v23 = vld [vmem:[%s1321_s26 + $0x208] sm:$0xff]  ;;  %231 = vst [vmem:[%s1326_s27 + $0xa8] sm:$0xff] %v230_v21  ;;  %v236_v24 = vld [vmem:[%s1321_s26 + $0x240] sm:$0xff] }
  0x1e   : > { %233 = vst [vmem:[%s1326_s27 + $0xb0] sm:$0xff] %v232_v22  ;;  %235 = vst [vmem:[%s1326_s27 + $0xb8] sm:$0xff] %v234_v23  ;;  %v238_v25 = vld [vmem:[%s1321_s26 + $0x248] sm:$0xff]  ;;  %v240_v26 = vld [vmem:[%s1321_s26 + $0x250] sm:$0xff] }
  0x1f   : > { %237 = vst [vmem:[%s1326_s27 + $0xc0] sm:$0xff] %v236_v24  ;;  %239 = vst [vmem:[%s1326_s27 + $0xc8] sm:$0xff] %v238_v25  ;;  %v242_v27 = vld [vmem:[%s1321_s26 + $0x288] sm:$0xff]  ;;  %v244_v28 = vld [vmem:[%s1321_s26 + $0x290] sm:$0xff] }
  0x20   : > { %241 = vst [vmem:[%s1326_s27 + $0xd0] sm:$0xff] %v240_v26  ;;  %v246_v29 = vld [vmem:[%s1321_s26 + $0x298] sm:$0xff]  ;;  %243 = vst [vmem:[%s1326_s27 + $0xd8] sm:$0xff] %v242_v27  ;;  %v248_v30 = vld [vmem:[%s1321_s26 + $0x2d0] sm:$0xff] }
  0x21   : > { %245 = vst [vmem:[%s1326_s27 + $0xe0] sm:$0xff] %v244_v28  ;;  %247 = vst [vmem:[%s1326_s27 + $0xe8] sm:$0xff] %v246_v29  ;;  %v250_v31 = vld [vmem:[%s1321_s26 + $0x2d8] sm:$0xff]  ;;  %v252_v32 = vld [vmem:[%s1321_s26 + $0x2e0] sm:$0xff] }
  0x22   : > { %249 = vst [vmem:[%s1326_s27 + $0xf0] sm:$0xff] %v248_v30  ;;  %251 = vst [vmem:[%s1326_s27 + $0xf8] sm:$0xff] %v250_v31  ;;  %v254_v33 = vld [vmem:[%s1321_s26 + $0x318] sm:$0xff]  ;;  %v256_v34 = vld [vmem:[%s1321_s26 + $0x320] sm:$0xff] }
  0x23   : > { %253 = vst [vmem:[%s1326_s27 + $0x100] sm:$0xff] %v252_v32  ;;  %v258_v35 = vld [vmem:[%s1321_s26 + $0x328] sm:$0xff]  ;;  %255 = vst [vmem:[%s1326_s27 + $0x108] sm:$0xff] %v254_v33  ;;  %v260_v36 = vld [vmem:[%s1321_s26 + $0x360] sm:$0xff] }
  0x24   : > { %257 = vst [vmem:[%s1326_s27 + $0x110] sm:$0xff] %v256_v34  ;;  %259 = vst [vmem:[%s1326_s27 + $0x118] sm:$0xff] %v258_v35  ;;  %v262_v37 = vld [vmem:[%s1321_s26 + $0x368] sm:$0xff]  ;;  %v264_v38 = vld [vmem:[%s1321_s26 + $0x370] sm:$0xff] }
  0x25   : > { %261 = vst [vmem:[%s1326_s27 + $0x120] sm:$0xff] %v260_v36  ;;  %263 = vst [vmem:[%s1326_s27 + $0x128] sm:$0xff] %v262_v37 }
  0x26   : > { %265 = vst [vmem:[%s1326_s27 + $0x130] sm:$0xff] %v264_v38 }
  0x27 PF: > { %p931_p6 = scmp.ge.s32.totalorder %s1252_s16, 1  ;;  %p282_p7 = scmp.lt.s32.totalorder %s1252_s16, 4 }
  0x29   : > { %p283_p8 = pnand %p931_p6, %p282_p7 }
  0x2a   : > { %s289_s28 = sand.u32 (!%p283_p8), 1, %s1236_s12   ;;  %s328_s29 = smul.u32 (!%p283_p8), 48, %s1244_s14 }
  0x2b   : > { %286 = sbr.rel (%p283_p8) target bundleno = 374 (0x176), region = 51  ;;  %p933_p10 = scmp.ne.s32.totalorder (!%p283_p8), %s1244_s14, 0 }
  0x2c   : > { %s1169_s30 = smul.u32 (!%p283_p8), 312, %s289_s28  ;;  %p329_p9 = scmp.lt.s32.totalorder (!%p283_p8), %s328_s29, 143 }
  0x2e   : > { %s1412_s8 = scalar_lea.vmem (!%p283_p8), [#allocation3], %s1169_s30 }
  0x32   : > { %s1605_s29 = smov (!%p329_p9, %s328_s29), 143  ;;  %352 = sbr.rel (%p933_p10) target bundleno = 59 (0x3b), region = 59 }
  0x33   : > { %s932_s4 = sshll.u32 %s1605_s29, 3  ;;  %v1254_v39 = vmov (!%p933_p10), 0.0  }
  0x34   : > { %s1410_s7 = scalar_lea.vmem %s1595_s1, %s932_s4  ;;  %353 = vst [vmem:[#allocation2] sm:$0xff] (!%p933_p10), %v1254_v39  ;;  %354 = vst [vmem:[#allocation2 + $0x8] sm:$0xff] (!%p933_p10), %v1254_v39 }
  0x35   : > { %355 = vst [vmem:[#allocation2 + $0x10] sm:$0xff] (!%p933_p10), %v1254_v39  ;;  %356 = vst [vmem:[#allocation2 + $0x18] sm:$0xff] (!%p933_p10), %v1254_v39 }
  0x36   : > { %357 = vst [vmem:[#allocation2 + $0x20] sm:$0xff] (!%p933_p10), %v1254_v39  ;;  %358 = vst [vmem:[#allocation2 + $0x28] sm:$0xff] (!%p933_p10), %v1254_v39 }
  0x37   : > { %359 = vst [vmem:[#allocation2 + $0x30] sm:$0xff] (!%p933_p10), %v1254_v39  ;;  %360 = vst [vmem:[#allocation2 + $0x38] sm:$0xff] (!%p933_p10), %v1254_v39 }
  0x38   : > { %361 = vst [vmem:[#allocation2 + $0x40] sm:$0xff] (!%p933_p10), %v1254_v39  ;;  %362 = vst [vmem:[#allocation2 + $0x48] sm:$0xff] (!%p933_p10), %v1254_v39 }
  0x39   : > { %363 = vst [vmem:[#allocation2 + $0x50] sm:$0xff] %v1254_v39  ;;  %364 = vst [vmem:[#allocation2 + $0x58] sm:$0xff] %v1254_v39 }
  0x3a   : > { %365 = vst [vmem:[#allocation2 + $0x60] sm:$0x3] %v1254_v39 }
  0x3b PF: > { %v434_v40 = vld [vmem:[%s1410_s7 + $0x80] sm:$0xff]  ;;  %v435_v41 = vld [vmem:[%s1410_s7 + $0x88] sm:$0xff]  ;;  %v1255_v45 = vmov 0.0|0.0   ;;  %vm1256_vm0 = vmmov 0   ;;  %v1257_v48 = vmov 0.0   ;;  %v436_v51 = vld [vmem:[%s1410_s7 + $0x90] sm:$0xff] }
  0x3c   : > { %v418_v42 = vld [vmem:[%s1410_s7] sm:$0xff]  ;;  %v1112_v43 = vpack.c.bf16 %v435_v41, %v434_v40  ;;  %v419_v44 = vld [vmem:[%s1410_s7 + $0x8] sm:$0xff]  ;;  %1144 = vmatprep.subr.bf16.mxu1 %v1255_v45  ;;  %1073 = vmatprep.mubr.msk.f32.mxu1 %vm1256_vm0, %v1257_v48  ;;  %v437_v52 = vld [vmem:[%s1410_s7 + $0x98] sm:$0xff]  ;;  %p934_p11 = scmp.ne.s32.totalorder %s1244_s14, 2 }
  0x3d   : > { %v450_v46 = vld [vmem:[%s1410_s7 + $0x100] sm:$0xff]  ;;  %v451_v47 = vld [vmem:[%s1410_s7 + $0x108] sm:$0xff]  ;;  %v1114_v49 = vpack.c.bf16 %v419_v44, %v418_v42  ;;  %v420_v53 = vld [vmem:[%s1410_s7 + $0x10] sm:$0xff]  ;;  %v1116_v54 = vpack.c.bf16 %v437_v52, %v436_v51 }
  0x3e   : > { %v1145_v50 = vpack.c.bf16 %v451_v47, %v450_v46  ;;  %1113 = vmatprep.subr.bf16.mxu0 %v1112_v43  ;;  %v421_v55 = vld [vmem:[%s1410_s7 + $0x18] sm:$0xff]  ;;  %v452_v56 = vld [vmem:[%s1410_s7 + $0x110] sm:$0xff]  ;;  %v438_v60 = vld [vmem:[%s1410_s7 + $0xa0] sm:$0xff] }
  0x3f   : > { %v453_v57 = vld [vmem:[%s1410_s7 + $0x118] sm:$0xff]  ;;  %1115 = vmatpush3.bf16.msra.mxu0 %v1114_v49  ;;  %v1118_v58 = vpack.c.bf16 %v421_v55, %v420_v53  ;;  %v439_v61 = vld [vmem:[%s1410_s7 + $0xa8] sm:$0xff]  ;;  %v422_v62 = vld [vmem:[%s1410_s7 + $0x20] sm:$0xff] }
  0x40   : > { %1146 = vmatpush3.bf16.msra.mxu1 %v1145_v50  ;;  %v1148_v59 = vpack.c.bf16 %v453_v57, %v452_v56  ;;  %1117 = vmatprep.subr.bf16.mxu0 %v1116_v54  ;;  %v1120_v63 = vpack.c.bf16 %v439_v61, %v438_v60  ;;  %v423_v0 = vld [vmem:[%s1410_s7 + $0x28] sm:$0xff]  ;;  %v454_v1 = vld [vmem:[%s1410_s7 + $0x120] sm:$0xff]  ;;  %v440_v3 = vld [vmem:[%s1410_s7 + $0xb0] sm:$0xff] }
  0x41   : > { %1147 = vmatprep.subr.bf16.mxu1 %v1255_v45  ;;  %v455_v2 = vld [vmem:[%s1410_s7 + $0x128] sm:$0xff]  ;;  %v441_v4 = vld [vmem:[%s1410_s7 + $0xb8] sm:$0xff]  ;;  %v1122_v5 = vpack.c.bf16 %v423_v0, %v422_v62  ;;  %v424_v7 = vld [vmem:[%s1410_s7 + $0x30] sm:$0xff] }
  0x42   : > { %v1151_v6 = vpack.c.bf16 %v455_v2, %v454_v1  ;;  %v1124_v8 = vpack.c.bf16 %v441_v4, %v440_v3  ;;  %v425_v9 = vld [vmem:[%s1410_s7 + $0x38] sm:$0xff]  ;;  %v456_v10 = vld [vmem:[%s1410_s7 + $0x130] sm:$0xff]  ;;  %v442_v12 = vld [vmem:[%s1410_s7 + $0xc0] sm:$0xff] }
  0x43   : > { %1119 = vmatpush3.bf16.msra.mxu0 %v1118_v58  ;;  %v457_v11 = vld [vmem:[%s1410_s7 + $0x138] sm:$0xff]  ;;  %v443_v13 = vld [vmem:[%s1410_s7 + $0xc8] sm:$0xff]  ;;  %v1126_v14 = vpack.c.bf16 %v425_v9, %v424_v7  ;;  %v426_v16 = vld [vmem:[%s1410_s7 + $0x40] sm:$0xff] }
  0x44   : > { %1149 = vmatpush3.bf16.msra.mxu1 %v1148_v59  ;;  %1121 = vmatprep.subr.bf16.mxu0 %v1120_v63  ;;  %v1154_v15 = vpack.c.bf16 %v457_v11, %v456_v10  ;;  %v1128_v17 = vpack.c.bf16 %v443_v13, %v442_v12  ;;  %v427_v18 = vld [vmem:[%s1410_s7 + $0x48] sm:$0xff]  ;;  %v458_v19 = vld [vmem:[%s1410_s7 + $0x140] sm:$0xff]  ;;  %v444_v21 = vld [vmem:[%s1410_s7 + $0xd0] sm:$0xff] }
  0x45   : > { %1150 = vmatprep.subr.bf16.mxu1 %v1255_v45  ;;  %v459_v20 = vld [vmem:[%s1410_s7 + $0x148] sm:$0xff]  ;;  %v445_v22 = vld [vmem:[%s1410_s7 + $0xd8] sm:$0xff]  ;;  %v1130_v24 = vpack.c.bf16 %v427_v18, %v426_v16  ;;  %v428_v26 = vld [vmem:[%s1410_s7 + $0x50] sm:$0xff] }
  0x46   : > { %v380_v23 = vld [vmem:[%s1412_s8 + $0x8] sm:$0xff]  ;;  %v1157_v25 = vpack.c.bf16 %v459_v20, %v458_v19  ;;  %v1132_v27 = vpack.c.bf16 %v445_v22, %v444_v21  ;;  %v429_v28 = vld [vmem:[%s1410_s7 + $0x58] sm:$0xff]  ;;  %v446_v31 = vld [vmem:[%s1410_s7 + $0xe0] sm:$0xff] }
  0x47   : > { %1123 = vmatpush3.bf16.msra.mxu0 %v1122_v5  ;;  %v460_v29 = vld [vmem:[%s1410_s7 + $0x150] sm:$0xff]  ;;  %v461_v30 = vld [vmem:[%s1410_s7 + $0x158] sm:$0xff]  ;;  %v447_v32 = vld [vmem:[%s1410_s7 + $0xe8] sm:$0xff]  ;;  %530 = vmatprep.mubr.f32.mxu0 %v380_v23  ;;  %v1134_v33 = vpack.c.bf16 %v429_v28, %v428_v26 }
  0x48   : > { %1152 = vmatpush3.bf16.msra.mxu1 %v1151_v6  ;;  %1125 = vmatprep.subr.bf16.mxu0 %v1124_v8  ;;  %v1160_v34 = vpack.c.bf16 %v461_v30, %v460_v29  ;;  %v430_v35 = vld [vmem:[%s1410_s7 + $0x60] sm:$0xff]  ;;  %v1136_v36 = vpack.c.bf16 %v447_v32, %v446_v31  ;;  %v431_v37 = vld [vmem:[%s1410_s7 + $0x68] sm:$0xff]  ;;  %v448_v40 = vld [vmem:[%s1410_s7 + $0xf0] sm:$0xff] }
  0x49   : > { %1153 = vmatprep.subr.bf16.mxu1 %v1255_v45  ;;  %v462_v38 = vld [vmem:[%s1410_s7 + $0x160] sm:$0xff]  ;;  %v463_v39 = vld [vmem:[%s1410_s7 + $0x168] sm:$0xff]  ;;  %v449_v41 = vld [vmem:[%s1410_s7 + $0xf8] sm:$0xff]  ;;  %v1138_v42 = vpack.c.bf16 %v431_v37, %v430_v35 }
  0x4a   : > { %v1163_v43 = vpack.c.bf16 %v463_v39, %v462_v38  ;;  %v432_v44 = vld [vmem:[%s1410_s7 + $0x70] sm:$0xff]  ;;  %v1140_v46 = vpack.c.bf16 %v449_v41, %v448_v40  ;;  %v433_v47 = vld [vmem:[%s1410_s7 + $0x78] sm:$0xff]  ;;  %v379_v53 = vld [vmem:[%s1412_s8] sm:$0xff] }
  0x4b   : > { %1127 = vmatpush3.bf16.msra.mxu0 %v1126_v14  ;;  %v464_v49 = vld [vmem:[%s1410_s7 + $0x170] sm:$0xff]  ;;  %v465_v50 = vld [vmem:[%s1410_s7 + $0x178] sm:$0xff]  ;;  %v1142_v51 = vpack.c.bf16 %v433_v47, %v432_v44  ;;  %v383_v55 = vld [vmem:[%s1412_s8 + $0x20] sm:$0xff] }
  0x4c   : > { %1155 = vmatpush3.bf16.msra.mxu1 %v1154_v15  ;;  %1129 = vmatprep.subr.bf16.mxu0 %v1128_v17  ;;  %v1166_v52 = vpack.c.bf16 %v465_v50, %v464_v49  ;;  %v381_v54 = vld [vmem:[%s1412_s8 + $0x10] sm:$0xff]  ;;  %v382_v56 = vld [vmem:[%s1412_s8 + $0x18] sm:$0xff]  ;;  %v384_v57 = vld [vmem:[%s1412_s8 + $0x28] sm:$0xff] }
  0x4d   : > { %1156 = vmatprep.subr.bf16.mxu1 %v1255_v45  ;;  %v385_v58 = vld [vmem:[%s1412_s8 + $0x30] sm:$0xff]  ;;  %v387_v59 = vld [vmem:[%s1412_s8 + $0x40] sm:$0xff]  ;;  %v388_v61 = vld [vmem:[%s1412_s8 + $0x48] sm:$0xff] }
  0x4e   : > { %v389_v60 = vld [vmem:[%s1412_s8 + $0x50] sm:$0xff]  ;;  %v390_v62 = vld [vmem:[%s1412_s8 + $0x58] sm:$0xff]  ;;  %v392_v63 = vld [vmem:[%s1412_s8 + $0x68] sm:$0xff] }
  0x4f   : > { %1131 = vmatpush3.bf16.msra.mxu0 %v1130_v24  ;;  %v391_v0 = vld [vmem:[%s1412_s8 + $0x60] sm:$0xff]  ;;  %v393_v1 = vld [vmem:[%s1412_s8 + $0x70] sm:$0xff]  ;;  %v394_v3 = vld [vmem:[%s1412_s8 + $0x78] sm:$0xff] }
  0x50   : > { %1158 = vmatpush3.bf16.msra.mxu1 %v1157_v25  ;;  %1133 = vmatprep.subr.bf16.mxu0 %v1132_v27  ;;  %v395_v2 = vld [vmem:[%s1412_s8 + $0x80] sm:$0xff]  ;;  %v396_v4 = vld [vmem:[%s1412_s8 + $0x88] sm:$0xff]  ;;  %v398_v5 = vld [vmem:[%s1412_s8 + $0x98] sm:$0xff] }
  0x51   : > { %1159 = vmatprep.subr.bf16.mxu1 %v1255_v45  ;;  %v397_v6 = vld [vmem:[%s1412_s8 + $0x90] sm:$0xff]  ;;  %v399_v7 = vld [vmem:[%s1412_s8 + $0xa0] sm:$0xff]  ;;  %v400_v9 = vld [vmem:[%s1412_s8 + $0xa8] sm:$0xff] }
  0x52   : > { %v401_v8 = vld [vmem:[%s1412_s8 + $0xb0] sm:$0xff]  ;;  %v402_v10 = vld [vmem:[%s1412_s8 + $0xb8] sm:$0xff]  ;;  %v404_v11 = vld [vmem:[%s1412_s8 + $0xc8] sm:$0xff] }
  0x53   : > { %1135 = vmatpush3.bf16.msra.mxu0 %v1134_v33  ;;  %v403_v12 = vld [vmem:[%s1412_s8 + $0xc0] sm:$0xff]  ;;  %v405_v13 = vld [vmem:[%s1412_s8 + $0xd0] sm:$0xff]  ;;  %v406_v15 = vld [vmem:[%s1412_s8 + $0xd8] sm:$0xff] }
  0x54   : > { %1161 = vmatpush3.bf16.msra.mxu1 %v1160_v34  ;;  %1137 = vmatprep.subr.bf16.mxu0 %v1136_v36  ;;  %v407_v14 = vld [vmem:[%s1412_s8 + $0xe0] sm:$0xff]  ;;  %v408_v16 = vld [vmem:[%s1412_s8 + $0xe8] sm:$0xff]  ;;  %v410_v17 = vld [vmem:[%s1412_s8 + $0xf8] sm:$0xff] }
  0x55   : > { %1162 = vmatprep.subr.bf16.mxu1 %v1255_v45  ;;  %v409_v18 = vld [vmem:[%s1412_s8 + $0xf0] sm:$0xff]  ;;  %v411_v19 = vld [vmem:[%s1412_s8 + $0x100] sm:$0xff]  ;;  %v412_v21 = vld [vmem:[%s1412_s8 + $0x108] sm:$0xff] }
  0x56   : > { %v413_v20 = vld [vmem:[%s1412_s8 + $0x110] sm:$0xff]  ;;  %v414_v22 = vld [vmem:[%s1412_s8 + $0x118] sm:$0xff]  ;;  %v416_v23 = vld [vmem:[%s1412_s8 + $0x128] sm:$0x3] }
  0x57   : > { %1139 = vmatpush3.bf16.msra.mxu0 %v1138_v42  ;;  %v415_v24 = vld [vmem:[%s1412_s8 + $0x120] sm:$0x3]  ;;  %v417_v25 = vld [vmem:[%s1412_s8 + $0x130] sm:$0x3] }
  0x58   : > { %1164 = vmatpush3.bf16.msra.mxu1 %v1163_v43  ;;  %1141 = vmatprep.subr.bf16.mxu0 %v1140_v46  ;;  %v366_v31 = vld [vmem:[#allocation2] sm:$0xff]  ;;  %v367_v39 = vld [vmem:[#allocation2 + $0x8] sm:$0xff]  ;;  %v368_v47 = vld [vmem:[#allocation2 + $0x10] sm:$0xff] }
  0x59   : > { %1165 = vmatprep.subr.bf16.mxu1 %v1255_v45  ;;  %v386_v45 = vld [vmem:[%s1412_s8 + $0x38] sm:$0xff] }
  0x5b   : > { %1143 = vmatpush3.bf16.msra.mxu0 %v1142_v51 }
  0x5c   : > { %1167 = vmatpush3.bf16.msra.mxu1 %v1166_v52 }
  0x5e   : > { %531 = vmatmul.mubr.f32.vlgmr.msra.gmra.mrb[0].mxu0 %v379_v53 }
  0x5f   : > { %1074 = vmatmul.mubr.f32.vlgmr.msra.gmra.mrb[0].mxu1 %v381_v54  ;;  %535 = vmatprep.mubr.f32.mxu0 %v383_v55 }
  0x60   : > { %1076 = vmatprep.mubr.msk.f32.mxu1 %vm1256_vm0, %v1257_v48 }
  0x62   : > { %536 = vmatmul.mubr.f32.gmra.mrb[2].mxu0 %v382_v56  ;;  %v369_v56 = vld [vmem:[#allocation2 + $0x18] sm:$0xff] }
  0x63   : > { %1077 = vmatmul.mubr.f32.gmra.mrb[2].mxu1 %v384_v57  ;;  %540 = vmatprep.mubr.f32.mxu0 %v386_v45 }
  0x64   : > { %1079 = vmatprep.mubr.msk.f32.mxu1 %vm1256_vm0, %v1257_v48 }
  0x66   : > { %541 = vmatmul.mubr.f32.gmra.mrb[4].mxu0 %v385_v58 }
  0x67   : > { %1080 = vmatmul.mubr.f32.gmra.mrb[4].mxu1 %v387_v59  ;;  %545 = vmatprep.mubr.f32.mxu0 %v389_v60 }
  0x68   : > { %1082 = vmatprep.mubr.msk.f32.mxu1 %vm1256_vm0, %v1257_v48 }
  0x6a   : > { %546 = vmatmul.mubr.f32.gmra.mrb[6].mxu0 %v388_v61 }
  0x6b   : > { %1083 = vmatmul.mubr.f32.gmra.mrb[6].mxu1 %v390_v62  ;;  %550 = vmatprep.mubr.f32.mxu0 %v392_v63  ;;  %v370_v63 = vld [vmem:[#allocation2 + $0x20] sm:$0xff] }
  0x6c   : > { %1085 = vmatprep.mubr.msk.f32.mxu1 %vm1256_vm0, %v1257_v48 }
  0x6e   : > { %551 = vmatmul.mubr.f32.gmra.mrb[8].mxu0 %v391_v0 }
  0x6f   : > { %1086 = vmatmul.mubr.f32.gmra.mrb[8].mxu1 %v393_v1  ;;  %555 = vmatprep.mubr.f32.mxu0 %v395_v2 }
  0x70   : > { %1088 = vmatprep.mubr.msk.f32.mxu1 %vm1256_vm0, %v1257_v48 }
  0x72   : > { %556 = vmatmul.mubr.f32.gmra.mrb[10].mxu0 %v394_v3 }
  0x73   : > { %1089 = vmatmul.mubr.f32.gmra.mrb[10].mxu1 %v396_v4  ;;  %560 = vmatprep.mubr.f32.mxu0 %v398_v5 }
  0x74   : > { %1091 = vmatprep.mubr.msk.f32.mxu1 %vm1256_vm0, %v1257_v48 }
  0x76   : > { %561 = vmatmul.mubr.f32.gmra.mrb[12].mxu0 %v397_v6 }
  0x77   : > { %1092 = vmatmul.mubr.f32.gmra.mrb[12].mxu1 %v399_v7  ;;  %565 = vmatprep.mubr.f32.mxu0 %v401_v8  ;;  %v371_v7 = vld [vmem:[#allocation2 + $0x28] sm:$0xff] }
  0x78   : > { %1094 = vmatprep.mubr.msk.f32.mxu1 %vm1256_vm0, %v1257_v48 }
  0x7a   : > { %566 = vmatmul.mubr.f32.gmra.mrb[14].mxu0 %v400_v9 }
  0x7b   : > { %1095 = vmatmul.mubr.f32.gmra.mrb[14].mxu1 %v402_v10  ;;  %570 = vmatprep.mubr.f32.mxu0 %v404_v11 }
  0x7c   : > { %1097 = vmatprep.mubr.msk.f32.mxu1 %vm1256_vm0, %v1257_v48 }
  0x7e   : > { %571 = vmatmul.mubr.f32.gmra.mrb[16].mxu0 %v403_v12 }
  0x7f   : > { %1098 = vmatmul.mubr.f32.gmra.mrb[16].mxu1 %v405_v13  ;;  %575 = vmatprep.mubr.f32.mxu0 %v407_v14 }
  0x80   : > { %1100 = vmatprep.mubr.msk.f32.mxu1 %vm1256_vm0, %v1257_v48 }
  0x82   : > { %576 = vmatmul.mubr.f32.gmra.mrb[18].mxu0 %v406_v15  ;;  %v372_v15 = vld [vmem:[#allocation2 + $0x30] sm:$0xff] }
  0x83   : > { %1101 = vmatmul.mubr.f32.gmra.mrb[18].mxu1 %v408_v16  ;;  %580 = vmatprep.mubr.f32.mxu0 %v410_v17 }
  0x84   : > { %1103 = vmatprep.mubr.msk.f32.mxu1 %vm1256_vm0, %v1257_v48 }
  0x86   : > { %581 = vmatmul.mubr.f32.gmra.mrb[20].mxu0 %v409_v18 }
  0x87   : > { %1104 = vmatmul.mubr.f32.gmra.mrb[20].mxu1 %v411_v19  ;;  %585 = vmatprep.mubr.f32.mxu0 %v413_v20 }
  0x88   : > { %1106 = vmatprep.mubr.msk.f32.mxu1 %vm1256_vm0, %v1257_v48 }
  0x8a   : > { %586 = vmatmul.mubr.f32.gmra.mrb[22].mxu0 %v412_v21 }
  0x8b   : > { %1107 = vmatmul.mubr.f32.gmra.mrb[22].mxu1 %v414_v22  ;;  %590 = vmatprep.mubr.f32.mxu0 %v416_v23  ;;  %v373_v23 = vld [vmem:[#allocation2 + $0x38] sm:$0xff] }
  0x8c   : > { %1109 = vmatprep.mubr.msk.f32.mxu1 %vm1256_vm0, %v1257_v48 }
  0x8e   : > { %591 = vmatmul.mubr.f32.gmra.mrb[24].mxu0 %v415_v24 }
  0x8f   : > { %1110 = vmatmul.mubr.f32.gmra.mrb[24].mxu1 %v417_v25 }
 0x131   : > { %v973_v26 = vpop.f32.mrb[0].mxu0 }
 0x132   : > { %v662_v27 = vpop.f32.mrb[0].mxu1  ;;  %v974_v28 = vpop.f32.mrb[1].mxu0 }
 0x133   : > { %v1075_v29 = vpop.f32.mrb[1].mxu1  ;;  %v975_v30 = vadd.f32 %v974_v28, %v973_v26 }
 0x135   : > { %v663_v32 = vadd.f32 %v975_v30, %v662_v27  ;;  %v976_v33 = vpop.f32.mrb[2].mxu0 }
 0x136   : > { %v667_v34 = vpop.f32.mrb[2].mxu1  ;;  %v977_v35 = vpop.f32.mrb[3].mxu0 }
 0x137   : > { %v1078_v36 = vpop.f32.mrb[3].mxu1  ;;  %v726_v37 = vadd.f32 %v663_v32, %v366_v31  ;;  %v978_v38 = vadd.f32 %v977_v35, %v976_v33  ;;  %v374_v31 = vld [vmem:[#allocation2 + $0x40] sm:$0xff] }
 0x139   : > { %739 = vst [vmem:[#allocation2] sm:$0xff] %v726_v37  ;;  %v668_v40 = vadd.f32 %v978_v38, %v667_v34  ;;  %v979_v48 = vpop.f32.mrb[4].mxu0 }
 0x13a   : > { %v672_v41 = vpop.f32.mrb[4].mxu1  ;;  %v980_v42 = vpop.f32.mrb[5].mxu0 }
 0x13b   : > { %v1081_v43 = vpop.f32.mrb[5].mxu1  ;;  %v727_v44 = vadd.f32 %v668_v40, %v367_v39  ;;  %v981_v46 = vadd.f32 %v980_v42, %v979_v48  ;;  %v375_v39 = vld [vmem:[#allocation2 + $0x48] sm:$0xff] }
 0x13d   : > { %740 = vst [vmem:[#allocation2 + $0x8] sm:$0xff] %v727_v44  ;;  %v673_v49 = vadd.f32 %v981_v46, %v672_v41  ;;  %v982_v50 = vpop.f32.mrb[6].mxu0 }
 0x13e   : > { %v677_v51 = vpop.f32.mrb[6].mxu1  ;;  %v983_v52 = vpop.f32.mrb[7].mxu0 }
 0x13f   : > { %v1084_v53 = vpop.f32.mrb[7].mxu1  ;;  %v728_v54 = vadd.f32 %v673_v49, %v368_v47  ;;  %v984_v55 = vadd.f32 %v983_v52, %v982_v50  ;;  %v376_v47 = vld [vmem:[#allocation2 + $0x50] sm:$0xff] }
 0x141   : > { %741 = vst [vmem:[#allocation2 + $0x10] sm:$0xff] %v728_v54  ;;  %v678_v57 = vadd.f32 %v984_v55, %v677_v51  ;;  %v985_v45 = vpop.f32.mrb[8].mxu0 }
 0x142   : > { %v682_v58 = vpop.f32.mrb[8].mxu1  ;;  %v986_v59 = vpop.f32.mrb[9].mxu0 }
 0x143   : > { %v1087_v60 = vpop.f32.mrb[9].mxu1  ;;  %v729_v61 = vadd.f32 %v678_v57, %v369_v56  ;;  %v987_v62 = vadd.f32 %v986_v59, %v985_v45  ;;  %v377_v56 = vld [vmem:[#allocation2 + $0x58] sm:$0xff] }
 0x145   : > { %742 = vst [vmem:[#allocation2 + $0x18] sm:$0xff] %v729_v61  ;;  %v683_v0 = vadd.f32 %v987_v62, %v682_v58  ;;  %v988_v1 = vpop.f32.mrb[10].mxu0 }
 0x146   : > { %v687_v2 = vpop.f32.mrb[10].mxu1  ;;  %v989_v3 = vpop.f32.mrb[11].mxu0 }
 0x147   : > { %v1090_v4 = vpop.f32.mrb[11].mxu1  ;;  %v730_v5 = vadd.f32 %v683_v0, %v370_v63  ;;  %v990_v6 = vadd.f32 %v989_v3, %v988_v1  ;;  %v378_v63 = vld [vmem:[#allocation2 + $0x60] sm:$0x3] }
 0x148   : > { %v935_v3 = vld [vmem:[%s1596_s2] ss:$0 sm:$0xff] (!%p934_p11)  ;;  %v757_v4 = vld [vmem:[#allocation2 + $0x8] sm:$0xff] (!%p934_p11) }
 0x149   : > { %743 = vst [vmem:[#allocation2 + $0x20] sm:$0xff] %v730_v5  ;;  %v688_v8 = vadd.f32 %v990_v6, %v687_v2  ;;  %v991_v9 = vpop.f32.mrb[12].mxu0  ;;  %v756_v2 = vld [vmem:[#allocation2] sm:$0xff] (!%p934_p11)  ;;  %v777_v6 = vadd.f32 (!%p934_p11), %v935_v3, %v757_v4 }
 0x14a   : > { %v692_v10 = vpop.f32.mrb[12].mxu1  ;;  %v992_v11 = vpop.f32.mrb[13].mxu0  ;;  %v776_v5 = vadd.f32 (!%p934_p11), %v935_v3, %v756_v2 }
 0x14b   : > { %v1093_v12 = vpop.f32.mrb[13].mxu1  ;;  %v731_v13 = vadd.f32 %v688_v8, %v371_v7  ;;  %v993_v14 = vadd.f32 %v992_v11, %v991_v9  ;;  %v758_v7 = vld [vmem:[#allocation2 + $0x10] sm:$0xff] (!%p934_p11) }
 0x14c   : > { %v759_v8 = vld [vmem:[#allocation2 + $0x18] sm:$0xff] (!%p934_p11) }
 0x14d   : > { %744 = vst [vmem:[#allocation2 + $0x28] sm:$0xff] %v731_v13  ;;  %v693_v16 = vadd.f32 %v993_v14, %v692_v10  ;;  %v994_v17 = vpop.f32.mrb[14].mxu0  ;;  %v778_v10 = vadd.f32 (!%p934_p11), %v935_v3, %v758_v7  ;;  %v779_v11 = vadd.f32 (!%p934_p11), %v935_v3, %v759_v8 }
 0x14e   : > { %v697_v18 = vpop.f32.mrb[14].mxu1  ;;  %v995_v19 = vpop.f32.mrb[15].mxu0 }
 0x14f   : > { %v1096_v20 = vpop.f32.mrb[15].mxu1  ;;  %v732_v21 = vadd.f32 %v693_v16, %v372_v15  ;;  %v996_v22 = vadd.f32 %v995_v19, %v994_v17  ;;  %v789_v16 = vmax.f32 (!%p934_p11), %v776_v5, 0.0  ;;  %v790_v17 = vmax.f32 (!%p934_p11), %v777_v6, 0.0 }
 0x150   : > { %v760_v9 = vld [vmem:[#allocation2 + $0x20] sm:$0xff] (!%p934_p11) }
 0x151   : > { %745 = vst [vmem:[#allocation2 + $0x30] sm:$0xff] %v732_v21  ;;  %v698_v24 = vadd.f32 %v996_v22, %v697_v18  ;;  %v997_v25 = vpop.f32.mrb[16].mxu0  ;;  %v780_v12 = vadd.f32 (!%p934_p11), %v935_v3, %v760_v9  ;;  %802 = vst [vmem:[%s1597_s3] sm:$0xff] (!%p934_p11), %v789_v16 }
 0x152   : > { %v702_v26 = vpop.f32.mrb[16].mxu1  ;;  %v998_v27 = vpop.f32.mrb[17].mxu0  ;;  %803 = vst [vmem:[%s1597_s3 + $0x8] sm:$0xff] (!%p934_p11), %v790_v17 }
 0x153   : > { %v1099_v28 = vpop.f32.mrb[17].mxu1  ;;  %v733_v29 = vadd.f32 %v698_v24, %v373_v23  ;;  %v999_v30 = vadd.f32 %v998_v27, %v997_v25  ;;  %v791_v23 = vmax.f32 (!%p934_p11), %v778_v10, 0.0  ;;  %v792_v24 = vmax.f32 (!%p934_p11), %v779_v11, 0.0 }
 0x154   : > { %v761_v13 = vld [vmem:[#allocation2 + $0x28] sm:$0xff] (!%p934_p11)  ;;  %v793_v25 = vmax.f32 (!%p934_p11), %v780_v12, 0.0 }
 0x155   : > { %746 = vst [vmem:[#allocation2 + $0x38] sm:$0xff] %v733_v29  ;;  %v703_v32 = vadd.f32 %v999_v30, %v702_v26  ;;  %v1000_v33 = vpop.f32.mrb[18].mxu0  ;;  %v781_v18 = vadd.f32 (!%p934_p11), %v935_v3, %v761_v13  ;;  %804 = vst [vmem:[%s1597_s3 + $0x10] sm:$0xff] (!%p934_p11), %v791_v23 }
 0x156   : > { %v707_v34 = vpop.f32.mrb[18].mxu1  ;;  %v1001_v35 = vpop.f32.mrb[19].mxu0  ;;  %805 = vst [vmem:[%s1597_s3 + $0x18] sm:$0xff] (!%p934_p11), %v792_v24  ;;  %806 = vst [vmem:[%s1597_s3 + $0x20] sm:$0xff] (!%p934_p11), %v793_v25 }
 0x157   : > { %v1102_v36 = vpop.f32.mrb[19].mxu1  ;;  %v734_v37 = vadd.f32 %v703_v32, %v374_v31  ;;  %v1002_v38 = vadd.f32 %v1001_v35, %v1000_v33  ;;  %v794_v29 = vmax.f32 (!%p934_p11), %v781_v18, 0.0 }
 0x158   : > { %v762_v14 = vld [vmem:[#allocation2 + $0x30] sm:$0xff] (!%p934_p11) }
 0x159   : > { %747 = vst [vmem:[#allocation2 + $0x40] sm:$0xff] %v734_v37  ;;  %v708_v40 = vadd.f32 %v1002_v38, %v707_v34  ;;  %v1003_v48 = vpop.f32.mrb[20].mxu0  ;;  %v782_v19 = vadd.f32 (!%p934_p11), %v935_v3, %v762_v14  ;;  %807 = vst [vmem:[%s1597_s3 + $0x28] sm:$0xff] (!%p934_p11), %v794_v29 }
 0x15a   : > { %v712_v41 = vpop.f32.mrb[20].mxu1  ;;  %v1004_v42 = vpop.f32.mrb[21].mxu0 }
 0x15b   : > { %v1105_v43 = vpop.f32.mrb[21].mxu1  ;;  %v735_v44 = vadd.f32 %v708_v40, %v375_v39  ;;  %v1005_v46 = vadd.f32 %v1004_v42, %v1003_v48  ;;  %v795_v30 = vmax.f32 (!%p934_p11), %v782_v19, 0.0 }
 0x15c   : > { %v763_v15 = vld [vmem:[#allocation2 + $0x38] sm:$0xff] (!%p934_p11) }
 0x15d   : > { %748 = vst [vmem:[#allocation2 + $0x48] sm:$0xff] %v735_v44  ;;  %v713_v49 = vadd.f32 %v1005_v46, %v712_v41  ;;  %v1006_v50 = vpop.f32.mrb[22].mxu0  ;;  %v783_v26 = vadd.f32 (!%p934_p11), %v935_v3, %v763_v15  ;;  %808 = vst [vmem:[%s1597_s3 + $0x30] sm:$0xff] (!%p934_p11), %v795_v30 }
 0x15e   : > { %v717_v51 = vpop.f32.mrb[22].mxu1  ;;  %v1007_v52 = vpop.f32.mrb[23].mxu0 }
 0x15f   : > { %v1108_v53 = vpop.f32.mrb[23].mxu1  ;;  %v736_v54 = vadd.f32 %v713_v49, %v376_v47  ;;  %v1008_v55 = vadd.f32 %v1007_v52, %v1006_v50  ;;  %v796_v33 = vmax.f32 (!%p934_p11), %v783_v26, 0.0 }
 0x160   : > { %v764_v20 = vld [vmem:[#allocation2 + $0x40] sm:$0xff] (!%p934_p11) }
 0x161   : > { %749 = vst [vmem:[#allocation2 + $0x50] sm:$0xff] %v736_v54  ;;  %v718_v57 = vadd.f32 %v1008_v55, %v717_v51  ;;  %v1009_v45 = vpop.f32.mrb[24].mxu0  ;;  %v784_v31 = vadd.f32 (!%p934_p11), %v935_v3, %v764_v20  ;;  %809 = vst [vmem:[%s1597_s3 + $0x38] sm:$0xff] (!%p934_p11), %v796_v33 }
 0x162   : > { %v722_v58 = vpop.f32.mrb[24].mxu1  ;;  %v1010_v59 = vpop.f32.mrb[25].mxu0 }
 0x163   : > { %v1111_v60 = vpop.f32.mrb[25].mxu1  ;;  %v737_v61 = vadd.f32 %v718_v57, %v377_v56  ;;  %v1011_v62 = vadd.f32 %v1010_v59, %v1009_v45  ;;  %755 = sbr.rel (%p934_p11) target bundleno = 374 (0x176), region = 63  ;;  %v797_v37 = vmax.f32 (!%p934_p11), %v784_v31, 0.0 }
 0x164   : > { %v765_v21 = vld [vmem:[#allocation2 + $0x48] sm:$0xff] (!%p934_p11) }
 0x165   : > { %750 = vst [vmem:[#allocation2 + $0x58] sm:$0xff] %v737_v61  ;;  %v723_v0 = vadd.f32 %v1011_v62, %v722_v58  ;;  %v785_v32 = vadd.f32 (!%p934_p11), %v935_v3, %v765_v21  ;;  %810 = vst [vmem:[%s1597_s3 + $0x40] sm:$0xff] (!%p934_p11), %v797_v37 }
 0x167   : > { %v738_v1 = vadd.f32 %v723_v0, %v378_v63  ;;  %v798_v38 = vmax.f32 (!%p934_p11), %v785_v32, 0.0 }
 0x168   : > { %v766_v22 = vld [vmem:[#allocation2 + $0x50] sm:$0xff] (!%p934_p11) }
 0x169   : > { %751 = vst [vmem:[#allocation2 + $0x60] sm:$0x3] %v738_v1  ;;  %v786_v34 = vadd.f32 (!%p934_p11), %v935_v3, %v766_v22  ;;  %811 = vst [vmem:[%s1597_s3 + $0x48] sm:$0xff] (!%p934_p11), %v798_v38 }
 0x16b   : > { %v799_v39 = vmax.f32 %v786_v34, 0.0 }
 0x16c   : > { %v767_v27 = vld [vmem:[#allocation2 + $0x58] sm:$0xff] }
 0x16d   : > { %v787_v35 = vadd.f32 %v935_v3, %v767_v27  ;;  %812 = vst [vmem:[%s1597_s3 + $0x50] sm:$0xff] %v799_v39 }
 0x16f   : > { %v800_v40 = vmax.f32 %v787_v35, 0.0 }
 0x170   : > { %v768_v28 = vld [vmem:[#allocation2 + $0x60] sm:$0x3] }
 0x171   : > { %v788_v36 = vadd.f32 %v935_v3, %v768_v28  ;;  %813 = vst [vmem:[%s1597_s3 + $0x58] sm:$0xff] %v800_v40 }
 0x173   : > { %v801_v48 = vmax.f32 %v788_v36, 0.0 }
 0x175   : > { %814 = vst [vmem:[%s1597_s3 + $0x60] sm:$0x3] %v801_v48 }
 0x176 PF: > { %s13_s16 = sadd.s32 1, %s1252_s16   ;;  %s1598_s12 = smov %s1240_s13 }
 0x177   : > { %p10_p12 = scmp.ge.s32.totalorder %s13_s16, 5   ;;  %s1599_s13 = smov %s1313_s20 }
 0x178   : > { %s1600_s14 = smov %s1248_s15  ;;  %s1601_s15 = smov %s1603_s17 }
 0x179   :  { %12 = sbr.rel (!%p10_p12) target bundleno = 3 (0x3), region = 104 }

// kernel: convdqn_forward.7
= control target key start
LH: loop header
LB: loop body
LE: loop exit
PB: predicated region body
PF: predicated region fallthrough
CT: control target
= control target key end

     0   :  { %10 = vsyncpa [#allocation5], 0  ;;  %s4557_s18 = smov 0   ;;  %s4559_s19 = smov 0   ;;  %s5948_s0 = inlined_call_operand.vmem [shape: f32[2,3136], index: 0, kind: input, shape index: {}]   ;;  %s5949_s1 = inlined_call_operand.vmem [shape: f32[3136,512], index: 1, kind: input, shape index: {}]   ;;  %s5950_s2 = inlined_call_operand.vmem [shape: f32[1,512], index: 2, kind: input, shape index: {}]   ;;  %s5951_s3 = inlined_call_operand.vmem [shape: f32[512,128], index: 3, kind: input, shape index: {}]   ;;  %s5952_s4 = inlined_call_operand.vmem [shape: f32[1,128], index: 4, kind: input, shape index: {}]   ;;  %s5953_s5 = inlined_call_operand.hbm [shape: f32[2,128], index: 5, kind: output, shape index: {}]  }
   0x1   :  { %s4561_s20 = smov 0  }
   0x2 LB: > { %s4573_s21 = sadd.s32 4294967295, %s4519_s20   ;;  %s4576_s22 = sadd.s32 1, %s4519_s20   ;;  %s4519_s20 = sphi %s4561_s20, %s5956_s20   ;;  %s4515_s19 = sphi %s4559_s19, %s5955_s19   ;;  %s4511_s18 = sphi %s4557_s18, %s5954_s18  }
   0x3   : > { %s41_s23 = ssub.s32 %s4519_s20, %s4576_s22  ;;  %s44_s24 = sadd.s32 1, %s4515_s19 }
   0x4   : > { %p42_p0 = scmp.eq.s32.totalorder %s41_s23, 0  ;;  %p51_p1 = scmp.ne.s32.totalorder %s4515_s19, %s4511_s18 }
   0x5   : > { %p52_p2 = scmp.eq.s32.totalorder %s4519_s20, 0  ;;  %p3488_p4 = scmp.ge.s32.totalorder %s4519_s20, 4 }
   0x6   : > { %s4585_s25 = scalar_select %p42_p0, %s4515_s19, %s44_s24  }
   0x7   : > { %p53_p3 = por %p52_p2, %p51_p1  ;;  %177 = sbr.rel (%p3488_p4) target bundleno = 410 (0x19a), region = 24 }
   0xe   : > { %180 = sbr.rel (!%p53_p3) target bundleno = 410 (0x19a), region = 28  ;;  %s182_s26 = sand.u32 (%p53_p3), 1, %s4515_s19  }
   0xf   : > { %s3489_s27 = sshll.u32 (%p53_p3), %s4519_s20, 3  ;;  %s4423_s28 = smul.u32 (%p53_p3), 3136, %s182_s26 }
  0x10   : > { %s4593_s6 = scalar_lea.vmem (%p53_p3), %s5949_s1, %s3489_s27 }
  0x11   : > { %v996_v0 = vld [vmem:[%s4593_s6] sm:$0xff] (%p53_p3)  ;;  %s4601_s7 = scalar_lea.vmem (%p53_p3), [#allocation3], %s4423_s28 }
  0x12   : > { %v998_v1 = vld [vmem:[%s4593_s6 + $0x20] sm:$0xff] (%p53_p3)  ;;  %997 = vst [vmem:[%s4601_s7] sm:$0xff] (%p53_p3), %v996_v0 }
  0x13   : > { %v1000_v2 = vld [vmem:[%s4593_s6 + $0x40] sm:$0xff] (%p53_p3)  ;;  %999 = vst [vmem:[%s4601_s7 + $0x8] sm:$0xff] (%p53_p3), %v998_v1 }
  0x14   : > { %v1002_v3 = vld [vmem:[%s4593_s6 + $0x60] sm:$0xff] (%p53_p3)  ;;  %1001 = vst [vmem:[%s4601_s7 + $0x10] sm:$0xff] (%p53_p3), %v1000_v2 }
  0x15   : > { %v1004_v4 = vld [vmem:[%s4593_s6 + $0x80] sm:$0xff]  ;;  %1003 = vst [vmem:[%s4601_s7 + $0x18] sm:$0xff] %v1002_v3 }
  0x16   : > { %v1006_v5 = vld [vmem:[%s4593_s6 + $0xa0] sm:$0xff]  ;;  %1005 = vst [vmem:[%s4601_s7 + $0x20] sm:$0xff] %v1004_v4 }
  0x17   : > { %1007 = vst [vmem:[%s4601_s7 + $0x28] sm:$0xff] %v1006_v5  ;;  %v1008_v6 = vld [vmem:[%s4593_s6 + $0xc0] sm:$0xff] }
  0x18   : > { %v1010_v7 = vld [vmem:[%s4593_s6 + $0xe0] sm:$0xff]  ;;  %1009 = vst [vmem:[%s4601_s7 + $0x30] sm:$0xff] %v1008_v6 }
  0x19   : > { %v1012_v8 = vld [vmem:[%s4593_s6 + $0x100] sm:$0xff]  ;;  %1011 = vst [vmem:[%s4601_s7 + $0x38] sm:$0xff] %v1010_v7 }
  0x1a   : > { %1013 = vst [vmem:[%s4601_s7 + $0x40] sm:$0xff] %v1012_v8  ;;  %v1014_v9 = vld [vmem:[%s4593_s6 + $0x120] sm:$0xff] }
  0x1b   : > { %v1016_v10 = vld [vmem:[%s4593_s6 + $0x140] sm:$0xff]  ;;  %1015 = vst [vmem:[%s4601_s7 + $0x48] sm:$0xff] %v1014_v9 }
  0x1c   : > { %v1018_v11 = vld [vmem:[%s4593_s6 + $0x160] sm:$0xff]  ;;  %1017 = vst [vmem:[%s4601_s7 + $0x50] sm:$0xff] %v1016_v10 }
  0x1d   : > { %1019 = vst [vmem:[%s4601_s7 + $0x58] sm:$0xff] %v1018_v11  ;;  %v1020_v12 = vld [vmem:[%s4593_s6 + $0x180] sm:$0xff] }
  0x1e   : > { %v1022_v13 = vld [vmem:[%s4593_s6 + $0x1a0] sm:$0xff]  ;;  %1021 = vst [vmem:[%s4601_s7 + $0x60] sm:$0xff] %v1020_v12 }
  0x1f   : > { %v1024_v14 = vld [vmem:[%s4593_s6 + $0x1c0] sm:$0xff]  ;;  %1023 = vst [vmem:[%s4601_s7 + $0x68] sm:$0xff] %v1022_v13 }
  0x20   : > { %1025 = vst [vmem:[%s4601_s7 + $0x70] sm:$0xff] %v1024_v14  ;;  %v1026_v15 = vld [vmem:[%s4593_s6 + $0x1e0] sm:$0xff] }
  0x21   : > { %v1028_v16 = vld [vmem:[%s4593_s6 + $0x200] sm:$0xff]  ;;  %1027 = vst [vmem:[%s4601_s7 + $0x78] sm:$0xff] %v1026_v15 }
  0x22   : > { %v1030_v17 = vld [vmem:[%s4593_s6 + $0x220] sm:$0xff]  ;;  %1029 = vst [vmem:[%s4601_s7 + $0x80] sm:$0xff] %v1028_v16 }
  0x23   : > { %1031 = vst [vmem:[%s4601_s7 + $0x88] sm:$0xff] %v1030_v17  ;;  %v1032_v18 = vld [vmem:[%s4593_s6 + $0x240] sm:$0xff] }
  0x24   : > { %v1034_v19 = vld [vmem:[%s4593_s6 + $0x260] sm:$0xff]  ;;  %1033 = vst [vmem:[%s4601_s7 + $0x90] sm:$0xff] %v1032_v18 }
  0x25   : > { %v1036_v20 = vld [vmem:[%s4593_s6 + $0x280] sm:$0xff]  ;;  %1035 = vst [vmem:[%s4601_s7 + $0x98] sm:$0xff] %v1034_v19 }
  0x26   : > { %1037 = vst [vmem:[%s4601_s7 + $0xa0] sm:$0xff] %v1036_v20  ;;  %v1038_v21 = vld [vmem:[%s4593_s6 + $0x2a0] sm:$0xff] }
  0x27   : > { %v1040_v22 = vld [vmem:[%s4593_s6 + $0x2c0] sm:$0xff]  ;;  %1039 = vst [vmem:[%s4601_s7 + $0xa8] sm:$0xff] %v1038_v21 }
  0x28   : > { %v1042_v23 = vld [vmem:[%s4593_s6 + $0x2e0] sm:$0xff]  ;;  %1041 = vst [vmem:[%s4601_s7 + $0xb0] sm:$0xff] %v1040_v22 }
  0x29   : > { %1043 = vst [vmem:[%s4601_s7 + $0xb8] sm:$0xff] %v1042_v23  ;;  %v1044_v24 = vld [vmem:[%s4593_s6 + $0x300] sm:$0xff] }
  0x2a   : > { %v1046_v25 = vld [vmem:[%s4593_s6 + $0x320] sm:$0xff]  ;;  %1045 = vst [vmem:[%s4601_s7 + $0xc0] sm:$0xff] %v1044_v24 }
  0x2b   : > { %v1048_v26 = vld [vmem:[%s4593_s6 + $0x340] sm:$0xff]  ;;  %1047 = vst [vmem:[%s4601_s7 + $0xc8] sm:$0xff] %v1046_v25 }
  0x2c   : > { %1049 = vst [vmem:[%s4601_s7 + $0xd0] sm:$0xff] %v1048_v26  ;;  %v1050_v27 = vld [vmem:[%s4593_s6 + $0x360] sm:$0xff] }
  0x2d   : > { %v1052_v28 = vld [vmem:[%s4593_s6 + $0x380] sm:$0xff]  ;;  %1051 = vst [vmem:[%s4601_s7 + $0xd8] sm:$0xff] %v1050_v27 }
  0x2e   : > { %v1054_v29 = vld [vmem:[%s4593_s6 + $0x3a0] sm:$0xff]  ;;  %1053 = vst [vmem:[%s4601_s7 + $0xe0] sm:$0xff] %v1052_v28 }
  0x2f   : > { %1055 = vst [vmem:[%s4601_s7 + $0xe8] sm:$0xff] %v1054_v29  ;;  %v1056_v30 = vld [vmem:[%s4593_s6 + $0x3c0] sm:$0xff] }
  0x30   : > { %v1058_v31 = vld [vmem:[%s4593_s6 + $0x3e0] sm:$0xff]  ;;  %1057 = vst [vmem:[%s4601_s7 + $0xf0] sm:$0xff] %v1056_v30 }
  0x31   : > { %v1060_v32 = vld [vmem:[%s4593_s6 + $0x400] sm:$0xff]  ;;  %1059 = vst [vmem:[%s4601_s7 + $0xf8] sm:$0xff] %v1058_v31 }
  0x32   : > { %1061 = vst [vmem:[%s4601_s7 + $0x100] sm:$0xff] %v1060_v32  ;;  %v1062_v33 = vld [vmem:[%s4593_s6 + $0x420] sm:$0xff] }
  0x33   : > { %v1064_v34 = vld [vmem:[%s4593_s6 + $0x440] sm:$0xff]  ;;  %1063 = vst [vmem:[%s4601_s7 + $0x108] sm:$0xff] %v1062_v33 }
  0x34   : > { %v1066_v35 = vld [vmem:[%s4593_s6 + $0x460] sm:$0xff]  ;;  %1065 = vst [vmem:[%s4601_s7 + $0x110] sm:$0xff] %v1064_v34 }
  0x35   : > { %1067 = vst [vmem:[%s4601_s7 + $0x118] sm:$0xff] %v1066_v35  ;;  %v1068_v36 = vld [vmem:[%s4593_s6 + $0x480] sm:$0xff] }
  0x36   : > { %v1070_v37 = vld [vmem:[%s4593_s6 + $0x4a0] sm:$0xff]  ;;  %1069 = vst [vmem:[%s4601_s7 + $0x120] sm:$0xff] %v1068_v36 }
  0x37   : > { %v1072_v38 = vld [vmem:[%s4593_s6 + $0x4c0] sm:$0xff]  ;;  %1071 = vst [vmem:[%s4601_s7 + $0x128] sm:$0xff] %v1070_v37 }
  0x38   : > { %1073 = vst [vmem:[%s4601_s7 + $0x130] sm:$0xff] %v1072_v38  ;;  %v1074_v39 = vld [vmem:[%s4593_s6 + $0x4e0] sm:$0xff] }
  0x39   : > { %v1076_v40 = vld [vmem:[%s4593_s6 + $0x500] sm:$0xff]  ;;  %1075 = vst [vmem:[%s4601_s7 + $0x138] sm:$0xff] %v1074_v39 }
  0x3a   : > { %v1078_v41 = vld [vmem:[%s4593_s6 + $0x520] sm:$0xff]  ;;  %1077 = vst [vmem:[%s4601_s7 + $0x140] sm:$0xff] %v1076_v40 }
  0x3b   : > { %1079 = vst [vmem:[%s4601_s7 + $0x148] sm:$0xff] %v1078_v41  ;;  %v1080_v42 = vld [vmem:[%s4593_s6 + $0x540] sm:$0xff] }
  0x3c   : > { %v1082_v43 = vld [vmem:[%s4593_s6 + $0x560] sm:$0xff]  ;;  %1081 = vst [vmem:[%s4601_s7 + $0x150] sm:$0xff] %v1080_v42 }
  0x3d   : > { %v1084_v44 = vld [vmem:[%s4593_s6 + $0x580] sm:$0xff]  ;;  %1083 = vst [vmem:[%s4601_s7 + $0x158] sm:$0xff] %v1082_v43 }
  0x3e   : > { %1085 = vst [vmem:[%s4601_s7 + $0x160] sm:$0xff] %v1084_v44  ;;  %v1086_v45 = vld [vmem:[%s4593_s6 + $0x5a0] sm:$0xff] }
  0x3f   : > { %v1088_v46 = vld [vmem:[%s4593_s6 + $0x5c0] sm:$0xff]  ;;  %1087 = vst [vmem:[%s4601_s7 + $0x168] sm:$0xff] %v1086_v45 }
  0x40   : > { %v1090_v47 = vld [vmem:[%s4593_s6 + $0x5e0] sm:$0xff]  ;;  %1089 = vst [vmem:[%s4601_s7 + $0x170] sm:$0xff] %v1088_v46 }
  0x41   : > { %1091 = vst [vmem:[%s4601_s7 + $0x178] sm:$0xff] %v1090_v47  ;;  %v1092_v48 = vld [vmem:[%s4593_s6 + $0x600] sm:$0xff] }
  0x42   : > { %v1094_v49 = vld [vmem:[%s4593_s6 + $0x620] sm:$0xff]  ;;  %1093 = vst [vmem:[%s4601_s7 + $0x180] sm:$0xff] %v1092_v48 }
  0x43   : > { %v1096_v50 = vld [vmem:[%s4593_s6 + $0x640] sm:$0xff]  ;;  %1095 = vst [vmem:[%s4601_s7 + $0x188] sm:$0xff] %v1094_v49 }
  0x44   : > { %1097 = vst [vmem:[%s4601_s7 + $0x190] sm:$0xff] %v1096_v50  ;;  %v1098_v51 = vld [vmem:[%s4593_s6 + $0x660] sm:$0xff] }
  0x45   : > { %v1100_v52 = vld [vmem:[%s4593_s6 + $0x680] sm:$0xff]  ;;  %1099 = vst [vmem:[%s4601_s7 + $0x198] sm:$0xff] %v1098_v51 }
  0x46   : > { %v1102_v53 = vld [vmem:[%s4593_s6 + $0x6a0] sm:$0xff]  ;;  %1101 = vst [vmem:[%s4601_s7 + $0x1a0] sm:$0xff] %v1100_v52 }
  0x47   : > { %1103 = vst [vmem:[%s4601_s7 + $0x1a8] sm:$0xff] %v1102_v53  ;;  %v1104_v54 = vld [vmem:[%s4593_s6 + $0x6c0] sm:$0xff] }
  0x48   : > { %v1106_v55 = vld [vmem:[%s4593_s6 + $0x6e0] sm:$0xff]  ;;  %1105 = vst [vmem:[%s4601_s7 + $0x1b0] sm:$0xff] %v1104_v54 }
  0x49   : > { %v1108_v56 = vld [vmem:[%s4593_s6 + $0x700] sm:$0xff]  ;;  %1107 = vst [vmem:[%s4601_s7 + $0x1b8] sm:$0xff] %v1106_v55 }
  0x4a   : > { %1109 = vst [vmem:[%s4601_s7 + $0x1c0] sm:$0xff] %v1108_v56  ;;  %v1110_v57 = vld [vmem:[%s4593_s6 + $0x720] sm:$0xff] }
  0x4b   : > { %v1112_v58 = vld [vmem:[%s4593_s6 + $0x740] sm:$0xff]  ;;  %1111 = vst [vmem:[%s4601_s7 + $0x1c8] sm:$0xff] %v1110_v57 }
  0x4c   : > { %v1114_v59 = vld [vmem:[%s4593_s6 + $0x760] sm:$0xff]  ;;  %1113 = vst [vmem:[%s4601_s7 + $0x1d0] sm:$0xff] %v1112_v58 }
  0x4d   : > { %1115 = vst [vmem:[%s4601_s7 + $0x1d8] sm:$0xff] %v1114_v59  ;;  %v1116_v60 = vld [vmem:[%s4593_s6 + $0x780] sm:$0xff] }
  0x4e   : > { %v1118_v61 = vld [vmem:[%s4593_s6 + $0x7a0] sm:$0xff]  ;;  %1117 = vst [vmem:[%s4601_s7 + $0x1e0] sm:$0xff] %v1116_v60 }
  0x4f   : > { %v1120_v62 = vld [vmem:[%s4593_s6 + $0x7c0] sm:$0xff]  ;;  %1119 = vst [vmem:[%s4601_s7 + $0x1e8] sm:$0xff] %v1118_v61 }
  0x50   : > { %1121 = vst [vmem:[%s4601_s7 + $0x1f0] sm:$0xff] %v1120_v62  ;;  %v1122_v63 = vld [vmem:[%s4593_s6 + $0x7e0] sm:$0xff] }
  0x51   : > { %v1124_v0 = vld [vmem:[%s4593_s6 + $0x800] sm:$0xff]  ;;  %1123 = vst [vmem:[%s4601_s7 + $0x1f8] sm:$0xff] %v1122_v63 }
  0x52   : > { %v1126_v1 = vld [vmem:[%s4593_s6 + $0x820] sm:$0xff]  ;;  %1125 = vst [vmem:[%s4601_s7 + $0x200] sm:$0xff] %v1124_v0 }
  0x53   : > { %1127 = vst [vmem:[%s4601_s7 + $0x208] sm:$0xff] %v1126_v1  ;;  %v1128_v2 = vld [vmem:[%s4593_s6 + $0x840] sm:$0xff] }
  0x54   : > { %v1130_v3 = vld [vmem:[%s4593_s6 + $0x860] sm:$0xff]  ;;  %1129 = vst [vmem:[%s4601_s7 + $0x210] sm:$0xff] %v1128_v2 }
  0x55   : > { %v1132_v4 = vld [vmem:[%s4593_s6 + $0x880] sm:$0xff]  ;;  %1131 = vst [vmem:[%s4601_s7 + $0x218] sm:$0xff] %v1130_v3 }
  0x56   : > { %1133 = vst [vmem:[%s4601_s7 + $0x220] sm:$0xff] %v1132_v4  ;;  %v1134_v5 = vld [vmem:[%s4593_s6 + $0x8a0] sm:$0xff] }
  0x57   : > { %v1136_v6 = vld [vmem:[%s4593_s6 + $0x8c0] sm:$0xff]  ;;  %1135 = vst [vmem:[%s4601_s7 + $0x228] sm:$0xff] %v1134_v5 }
  0x58   : > { %v1138_v7 = vld [vmem:[%s4593_s6 + $0x8e0] sm:$0xff]  ;;  %1137 = vst [vmem:[%s4601_s7 + $0x230] sm:$0xff] %v1136_v6 }
  0x59   : > { %1139 = vst [vmem:[%s4601_s7 + $0x238] sm:$0xff] %v1138_v7  ;;  %v1140_v8 = vld [vmem:[%s4593_s6 + $0x900] sm:$0xff] }
  0x5a   : > { %v1142_v9 = vld [vmem:[%s4593_s6 + $0x920] sm:$0xff]  ;;  %1141 = vst [vmem:[%s4601_s7 + $0x240] sm:$0xff] %v1140_v8 }
  0x5b   : > { %v1144_v10 = vld [vmem:[%s4593_s6 + $0x940] sm:$0xff]  ;;  %1143 = vst [vmem:[%s4601_s7 + $0x248] sm:$0xff] %v1142_v9 }
  0x5c   : > { %1145 = vst [vmem:[%s4601_s7 + $0x250] sm:$0xff] %v1144_v10  ;;  %v1146_v11 = vld [vmem:[%s4593_s6 + $0x960] sm:$0xff] }
  0x5d   : > { %v1148_v12 = vld [vmem:[%s4593_s6 + $0x980] sm:$0xff]  ;;  %1147 = vst [vmem:[%s4601_s7 + $0x258] sm:$0xff] %v1146_v11 }
  0x5e   : > { %v1150_v13 = vld [vmem:[%s4593_s6 + $0x9a0] sm:$0xff]  ;;  %1149 = vst [vmem:[%s4601_s7 + $0x260] sm:$0xff] %v1148_v12 }
  0x5f   : > { %1151 = vst [vmem:[%s4601_s7 + $0x268] sm:$0xff] %v1150_v13  ;;  %v1152_v14 = vld [vmem:[%s4593_s6 + $0x9c0] sm:$0xff] }
  0x60   : > { %v1154_v15 = vld [vmem:[%s4593_s6 + $0x9e0] sm:$0xff]  ;;  %1153 = vst [vmem:[%s4601_s7 + $0x270] sm:$0xff] %v1152_v14 }
  0x61   : > { %v1156_v16 = vld [vmem:[%s4593_s6 + $0xa00] sm:$0xff]  ;;  %1155 = vst [vmem:[%s4601_s7 + $0x278] sm:$0xff] %v1154_v15 }
  0x62   : > { %1157 = vst [vmem:[%s4601_s7 + $0x280] sm:$0xff] %v1156_v16  ;;  %v1158_v17 = vld [vmem:[%s4593_s6 + $0xa20] sm:$0xff] }
  0x63   : > { %v1160_v18 = vld [vmem:[%s4593_s6 + $0xa40] sm:$0xff]  ;;  %1159 = vst [vmem:[%s4601_s7 + $0x288] sm:$0xff] %v1158_v17 }
  0x64   : > { %v1162_v19 = vld [vmem:[%s4593_s6 + $0xa60] sm:$0xff]  ;;  %1161 = vst [vmem:[%s4601_s7 + $0x290] sm:$0xff] %v1160_v18 }
  0x65   : > { %1163 = vst [vmem:[%s4601_s7 + $0x298] sm:$0xff] %v1162_v19  ;;  %v1164_v20 = vld [vmem:[%s4593_s6 + $0xa80] sm:$0xff] }
  0x66   : > { %v1166_v21 = vld [vmem:[%s4593_s6 + $0xaa0] sm:$0xff]  ;;  %1165 = vst [vmem:[%s4601_s7 + $0x2a0] sm:$0xff] %v1164_v20 }
  0x67   : > { %v1168_v22 = vld [vmem:[%s4593_s6 + $0xac0] sm:$0xff]  ;;  %1167 = vst [vmem:[%s4601_s7 + $0x2a8] sm:$0xff] %v1166_v21 }
  0x68   : > { %1169 = vst [vmem:[%s4601_s7 + $0x2b0] sm:$0xff] %v1168_v22  ;;  %v1170_v23 = vld [vmem:[%s4593_s6 + $0xae0] sm:$0xff] }
  0x69   : > { %v1172_v24 = vld [vmem:[%s4593_s6 + $0xb00] sm:$0xff]  ;;  %1171 = vst [vmem:[%s4601_s7 + $0x2b8] sm:$0xff] %v1170_v23 }
  0x6a   : > { %v1174_v25 = vld [vmem:[%s4593_s6 + $0xb20] sm:$0xff]  ;;  %1173 = vst [vmem:[%s4601_s7 + $0x2c0] sm:$0xff] %v1172_v24 }
  0x6b   : > { %1175 = vst [vmem:[%s4601_s7 + $0x2c8] sm:$0xff] %v1174_v25  ;;  %v1176_v26 = vld [vmem:[%s4593_s6 + $0xb40] sm:$0xff] }
  0x6c   : > { %v1178_v27 = vld [vmem:[%s4593_s6 + $0xb60] sm:$0xff]  ;;  %1177 = vst [vmem:[%s4601_s7 + $0x2d0] sm:$0xff] %v1176_v26 }
  0x6d   : > { %v1180_v28 = vld [vmem:[%s4593_s6 + $0xb80] sm:$0xff]  ;;  %1179 = vst [vmem:[%s4601_s7 + $0x2d8] sm:$0xff] %v1178_v27 }
  0x6e   : > { %1181 = vst [vmem:[%s4601_s7 + $0x2e0] sm:$0xff] %v1180_v28  ;;  %v1182_v29 = vld [vmem:[%s4593_s6 + $0xba0] sm:$0xff] }
  0x6f   : > { %v1184_v30 = vld [vmem:[%s4593_s6 + $0xbc0] sm:$0xff]  ;;  %1183 = vst [vmem:[%s4601_s7 + $0x2e8] sm:$0xff] %v1182_v29 }
  0x70   : > { %v1186_v31 = vld [vmem:[%s4593_s6 + $0xbe0] sm:$0xff]  ;;  %1185 = vst [vmem:[%s4601_s7 + $0x2f0] sm:$0xff] %v1184_v30 }
  0x71   : > { %1187 = vst [vmem:[%s4601_s7 + $0x2f8] sm:$0xff] %v1186_v31  ;;  %v1188_v32 = vld [vmem:[%s4593_s6 + $0xc00] sm:$0xff] }
  0x72   : > { %v1190_v33 = vld [vmem:[%s4593_s6 + $0xc20] sm:$0xff]  ;;  %1189 = vst [vmem:[%s4601_s7 + $0x300] sm:$0xff] %v1188_v32 }
  0x73   : > { %v1192_v34 = vld [vmem:[%s4593_s6 + $0xc40] sm:$0xff]  ;;  %1191 = vst [vmem:[%s4601_s7 + $0x308] sm:$0xff] %v1190_v33 }
  0x74   : > { %1193 = vst [vmem:[%s4601_s7 + $0x310] sm:$0xff] %v1192_v34  ;;  %v1194_v35 = vld [vmem:[%s4593_s6 + $0xc60] sm:$0xff] }
  0x75   : > { %v1196_v36 = vld [vmem:[%s4593_s6 + $0xc80] sm:$0xff]  ;;  %1195 = vst [vmem:[%s4601_s7 + $0x318] sm:$0xff] %v1194_v35 }
  0x76   : > { %v1198_v37 = vld [vmem:[%s4593_s6 + $0xca0] sm:$0xff]  ;;  %1197 = vst [vmem:[%s4601_s7 + $0x320] sm:$0xff] %v1196_v36 }
  0x77   : > { %1199 = vst [vmem:[%s4601_s7 + $0x328] sm:$0xff] %v1198_v37  ;;  %v1200_v38 = vld [vmem:[%s4593_s6 + $0xcc0] sm:$0xff] }
  0x78   : > { %v1202_v39 = vld [vmem:[%s4593_s6 + $0xce0] sm:$0xff]  ;;  %1201 = vst [vmem:[%s4601_s7 + $0x330] sm:$0xff] %v1200_v38 }
  0x79   : > { %v1204_v40 = vld [vmem:[%s4593_s6 + $0xd00] sm:$0xff]  ;;  %1203 = vst [vmem:[%s4601_s7 + $0x338] sm:$0xff] %v1202_v39 }
  0x7a   : > { %1205 = vst [vmem:[%s4601_s7 + $0x340] sm:$0xff] %v1204_v40  ;;  %v1206_v41 = vld [vmem:[%s4593_s6 + $0xd20] sm:$0xff] }
  0x7b   : > { %v1208_v42 = vld [vmem:[%s4593_s6 + $0xd40] sm:$0xff]  ;;  %1207 = vst [vmem:[%s4601_s7 + $0x348] sm:$0xff] %v1206_v41 }
  0x7c   : > { %v1210_v43 = vld [vmem:[%s4593_s6 + $0xd60] sm:$0xff]  ;;  %1209 = vst [vmem:[%s4601_s7 + $0x350] sm:$0xff] %v1208_v42 }
  0x7d   : > { %1211 = vst [vmem:[%s4601_s7 + $0x358] sm:$0xff] %v1210_v43  ;;  %v1212_v44 = vld [vmem:[%s4593_s6 + $0xd80] sm:$0xff] }
  0x7e   : > { %v1214_v45 = vld [vmem:[%s4593_s6 + $0xda0] sm:$0xff]  ;;  %1213 = vst [vmem:[%s4601_s7 + $0x360] sm:$0xff] %v1212_v44 }
  0x7f   : > { %v1216_v46 = vld [vmem:[%s4593_s6 + $0xdc0] sm:$0xff]  ;;  %1215 = vst [vmem:[%s4601_s7 + $0x368] sm:$0xff] %v1214_v45 }
  0x80   : > { %1217 = vst [vmem:[%s4601_s7 + $0x370] sm:$0xff] %v1216_v46  ;;  %v1218_v47 = vld [vmem:[%s4593_s6 + $0xde0] sm:$0xff] }
  0x81   : > { %v1220_v48 = vld [vmem:[%s4593_s6 + $0xe00] sm:$0xff]  ;;  %1219 = vst [vmem:[%s4601_s7 + $0x378] sm:$0xff] %v1218_v47 }
  0x82   : > { %v1222_v49 = vld [vmem:[%s4593_s6 + $0xe20] sm:$0xff]  ;;  %1221 = vst [vmem:[%s4601_s7 + $0x380] sm:$0xff] %v1220_v48 }
  0x83   : > { %1223 = vst [vmem:[%s4601_s7 + $0x388] sm:$0xff] %v1222_v49  ;;  %v1224_v50 = vld [vmem:[%s4593_s6 + $0xe40] sm:$0xff] }
  0x84   : > { %v1226_v51 = vld [vmem:[%s4593_s6 + $0xe60] sm:$0xff]  ;;  %1225 = vst [vmem:[%s4601_s7 + $0x390] sm:$0xff] %v1224_v50 }
  0x85   : > { %v1228_v52 = vld [vmem:[%s4593_s6 + $0xe80] sm:$0xff]  ;;  %1227 = vst [vmem:[%s4601_s7 + $0x398] sm:$0xff] %v1226_v51 }
  0x86   : > { %1229 = vst [vmem:[%s4601_s7 + $0x3a0] sm:$0xff] %v1228_v52  ;;  %v1230_v53 = vld [vmem:[%s4593_s6 + $0xea0] sm:$0xff] }
  0x87   : > { %v1232_v54 = vld [vmem:[%s4593_s6 + $0xec0] sm:$0xff]  ;;  %1231 = vst [vmem:[%s4601_s7 + $0x3a8] sm:$0xff] %v1230_v53 }
  0x88   : > { %v1234_v55 = vld [vmem:[%s4593_s6 + $0xee0] sm:$0xff]  ;;  %1233 = vst [vmem:[%s4601_s7 + $0x3b0] sm:$0xff] %v1232_v54 }
  0x89   : > { %1235 = vst [vmem:[%s4601_s7 + $0x3b8] sm:$0xff] %v1234_v55  ;;  %v1236_v56 = vld [vmem:[%s4593_s6 + $0xf00] sm:$0xff] }
  0x8a   : > { %v1238_v57 = vld [vmem:[%s4593_s6 + $0xf20] sm:$0xff]  ;;  %1237 = vst [vmem:[%s4601_s7 + $0x3c0] sm:$0xff] %v1236_v56 }
  0x8b   : > { %v1240_v58 = vld [vmem:[%s4593_s6 + $0xf40] sm:$0xff]  ;;  %1239 = vst [vmem:[%s4601_s7 + $0x3c8] sm:$0xff] %v1238_v57 }
  0x8c   : > { %1241 = vst [vmem:[%s4601_s7 + $0x3d0] sm:$0xff] %v1240_v58  ;;  %v1242_v59 = vld [vmem:[%s4593_s6 + $0xf60] sm:$0xff] }
  0x8d   : > { %v1244_v60 = vld [vmem:[%s4593_s6 + $0xf80] sm:$0xff]  ;;  %1243 = vst [vmem:[%s4601_s7 + $0x3d8] sm:$0xff] %v1242_v59 }
  0x8e   : > { %v1246_v61 = vld [vmem:[%s4593_s6 + $0xfa0] sm:$0xff]  ;;  %1245 = vst [vmem:[%s4601_s7 + $0x3e0] sm:$0xff] %v1244_v60 }
  0x8f   : > { %1247 = vst [vmem:[%s4601_s7 + $0x3e8] sm:$0xff] %v1246_v61  ;;  %v1248_v62 = vld [vmem:[%s4593_s6 + $0xfc0] sm:$0xff] }
  0x90   : > { %v1250_v63 = vld [vmem:[%s4593_s6 + $0xfe0] sm:$0xff]  ;;  %1249 = vst [vmem:[%s4601_s7 + $0x3f0] sm:$0xff] %v1248_v62 }
  0x91   : > { %v1252_v0 = vld [vmem:[%s4593_s6 + $0x1000] sm:$0xff]  ;;  %1251 = vst [vmem:[%s4601_s7 + $0x3f8] sm:$0xff] %v1250_v63 }
  0x92   : > { %1253 = vst [vmem:[%s4601_s7 + $0x400] sm:$0xff] %v1252_v0  ;;  %v1254_v1 = vld [vmem:[%s4593_s6 + $0x1020] sm:$0xff] }
  0x93   : > { %v1256_v2 = vld [vmem:[%s4593_s6 + $0x1040] sm:$0xff]  ;;  %1255 = vst [vmem:[%s4601_s7 + $0x408] sm:$0xff] %v1254_v1 }
  0x94   : > { %v1258_v3 = vld [vmem:[%s4593_s6 + $0x1060] sm:$0xff]  ;;  %1257 = vst [vmem:[%s4601_s7 + $0x410] sm:$0xff] %v1256_v2 }
  0x95   : > { %1259 = vst [vmem:[%s4601_s7 + $0x418] sm:$0xff] %v1258_v3  ;;  %v1260_v4 = vld [vmem:[%s4593_s6 + $0x1080] sm:$0xff] }
  0x96   : > { %v1262_v5 = vld [vmem:[%s4593_s6 + $0x10a0] sm:$0xff]  ;;  %1261 = vst [vmem:[%s4601_s7 + $0x420] sm:$0xff] %v1260_v4 }
  0x97   : > { %v1264_v6 = vld [vmem:[%s4593_s6 + $0x10c0] sm:$0xff]  ;;  %1263 = vst [vmem:[%s4601_s7 + $0x428] sm:$0xff] %v1262_v5 }
  0x98   : > { %1265 = vst [vmem:[%s4601_s7 + $0x430] sm:$0xff] %v1264_v6  ;;  %v1266_v7 = vld [vmem:[%s4593_s6 + $0x10e0] sm:$0xff] }
  0x99   : > { %v1268_v8 = vld [vmem:[%s4593_s6 + $0x1100] sm:$0xff]  ;;  %1267 = vst [vmem:[%s4601_s7 + $0x438] sm:$0xff] %v1266_v7 }
  0x9a   : > { %v1270_v9 = vld [vmem:[%s4593_s6 + $0x1120] sm:$0xff]  ;;  %1269 = vst [vmem:[%s4601_s7 + $0x440] sm:$0xff] %v1268_v8 }
  0x9b   : > { %1271 = vst [vmem:[%s4601_s7 + $0x448] sm:$0xff] %v1270_v9  ;;  %v1272_v10 = vld [vmem:[%s4593_s6 + $0x1140] sm:$0xff] }
  0x9c   : > { %v1274_v11 = vld [vmem:[%s4593_s6 + $0x1160] sm:$0xff]  ;;  %1273 = vst [vmem:[%s4601_s7 + $0x450] sm:$0xff] %v1272_v10 }
  0x9d   : > { %v1276_v12 = vld [vmem:[%s4593_s6 + $0x1180] sm:$0xff]  ;;  %1275 = vst [vmem:[%s4601_s7 + $0x458] sm:$0xff] %v1274_v11 }
  0x9e   : > { %1277 = vst [vmem:[%s4601_s7 + $0x460] sm:$0xff] %v1276_v12  ;;  %v1278_v13 = vld [vmem:[%s4593_s6 + $0x11a0] sm:$0xff] }
  0x9f   : > { %v1280_v14 = vld [vmem:[%s4593_s6 + $0x11c0] sm:$0xff]  ;;  %1279 = vst [vmem:[%s4601_s7 + $0x468] sm:$0xff] %v1278_v13 }
  0xa0   : > { %v1282_v15 = vld [vmem:[%s4593_s6 + $0x11e0] sm:$0xff]  ;;  %1281 = vst [vmem:[%s4601_s7 + $0x470] sm:$0xff] %v1280_v14 }
  0xa1   : > { %1283 = vst [vmem:[%s4601_s7 + $0x478] sm:$0xff] %v1282_v15  ;;  %v1284_v16 = vld [vmem:[%s4593_s6 + $0x1200] sm:$0xff] }
  0xa2   : > { %v1286_v17 = vld [vmem:[%s4593_s6 + $0x1220] sm:$0xff]  ;;  %1285 = vst [vmem:[%s4601_s7 + $0x480] sm:$0xff] %v1284_v16 }
  0xa3   : > { %v1288_v18 = vld [vmem:[%s4593_s6 + $0x1240] sm:$0xff]  ;;  %1287 = vst [vmem:[%s4601_s7 + $0x488] sm:$0xff] %v1286_v17 }
  0xa4   : > { %1289 = vst [vmem:[%s4601_s7 + $0x490] sm:$0xff] %v1288_v18  ;;  %v1290_v19 = vld [vmem:[%s4593_s6 + $0x1260] sm:$0xff] }
  0xa5   : > { %v1292_v20 = vld [vmem:[%s4593_s6 + $0x1280] sm:$0xff]  ;;  %1291 = vst [vmem:[%s4601_s7 + $0x498] sm:$0xff] %v1290_v19 }
  0xa6   : > { %v1294_v21 = vld [vmem:[%s4593_s6 + $0x12a0] sm:$0xff]  ;;  %1293 = vst [vmem:[%s4601_s7 + $0x4a0] sm:$0xff] %v1292_v20 }
  0xa7   : > { %1295 = vst [vmem:[%s4601_s7 + $0x4a8] sm:$0xff] %v1294_v21  ;;  %v1296_v22 = vld [vmem:[%s4593_s6 + $0x12c0] sm:$0xff] }
  0xa8   : > { %v1298_v23 = vld [vmem:[%s4593_s6 + $0x12e0] sm:$0xff]  ;;  %1297 = vst [vmem:[%s4601_s7 + $0x4b0] sm:$0xff] %v1296_v22 }
  0xa9   : > { %v1300_v24 = vld [vmem:[%s4593_s6 + $0x1300] sm:$0xff]  ;;  %1299 = vst [vmem:[%s4601_s7 + $0x4b8] sm:$0xff] %v1298_v23 }
  0xaa   : > { %1301 = vst [vmem:[%s4601_s7 + $0x4c0] sm:$0xff] %v1300_v24  ;;  %v1302_v25 = vld [vmem:[%s4593_s6 + $0x1320] sm:$0xff] }
  0xab   : > { %v1304_v26 = vld [vmem:[%s4593_s6 + $0x1340] sm:$0xff]  ;;  %1303 = vst [vmem:[%s4601_s7 + $0x4c8] sm:$0xff] %v1302_v25 }
  0xac   : > { %v1306_v27 = vld [vmem:[%s4593_s6 + $0x1360] sm:$0xff]  ;;  %1305 = vst [vmem:[%s4601_s7 + $0x4d0] sm:$0xff] %v1304_v26 }
  0xad   : > { %1307 = vst [vmem:[%s4601_s7 + $0x4d8] sm:$0xff] %v1306_v27  ;;  %v1308_v28 = vld [vmem:[%s4593_s6 + $0x1380] sm:$0xff] }
  0xae   : > { %v1310_v29 = vld [vmem:[%s4593_s6 + $0x13a0] sm:$0xff]  ;;  %1309 = vst [vmem:[%s4601_s7 + $0x4e0] sm:$0xff] %v1308_v28 }
  0xaf   : > { %v1312_v30 = vld [vmem:[%s4593_s6 + $0x13c0] sm:$0xff]  ;;  %1311 = vst [vmem:[%s4601_s7 + $0x4e8] sm:$0xff] %v1310_v29 }
  0xb0   : > { %1313 = vst [vmem:[%s4601_s7 + $0x4f0] sm:$0xff] %v1312_v30  ;;  %v1314_v31 = vld [vmem:[%s4593_s6 + $0x13e0] sm:$0xff] }
  0xb1   : > { %v1316_v32 = vld [vmem:[%s4593_s6 + $0x1400] sm:$0xff]  ;;  %1315 = vst [vmem:[%s4601_s7 + $0x4f8] sm:$0xff] %v1314_v31 }
  0xb2   : > { %v1318_v33 = vld [vmem:[%s4593_s6 + $0x1420] sm:$0xff]  ;;  %1317 = vst [vmem:[%s4601_s7 + $0x500] sm:$0xff] %v1316_v32 }
  0xb3   : > { %1319 = vst [vmem:[%s4601_s7 + $0x508] sm:$0xff] %v1318_v33  ;;  %v1320_v34 = vld [vmem:[%s4593_s6 + $0x1440] sm:$0xff] }
  0xb4   : > { %v1322_v35 = vld [vmem:[%s4593_s6 + $0x1460] sm:$0xff]  ;;  %1321 = vst [vmem:[%s4601_s7 + $0x510] sm:$0xff] %v1320_v34 }
  0xb5   : > { %v1324_v36 = vld [vmem:[%s4593_s6 + $0x1480] sm:$0xff]  ;;  %1323 = vst [vmem:[%s4601_s7 + $0x518] sm:$0xff] %v1322_v35 }
  0xb6   : > { %1325 = vst [vmem:[%s4601_s7 + $0x520] sm:$0xff] %v1324_v36  ;;  %v1326_v37 = vld [vmem:[%s4593_s6 + $0x14a0] sm:$0xff] }
  0xb7   : > { %v1328_v38 = vld [vmem:[%s4593_s6 + $0x14c0] sm:$0xff]  ;;  %1327 = vst [vmem:[%s4601_s7 + $0x528] sm:$0xff] %v1326_v37 }
  0xb8   : > { %v1330_v39 = vld [vmem:[%s4593_s6 + $0x14e0] sm:$0xff]  ;;  %1329 = vst [vmem:[%s4601_s7 + $0x530] sm:$0xff] %v1328_v38 }
  0xb9   : > { %1331 = vst [vmem:[%s4601_s7 + $0x538] sm:$0xff] %v1330_v39  ;;  %v1332_v40 = vld [vmem:[%s4593_s6 + $0x1500] sm:$0xff] }
  0xba   : > { %v1334_v41 = vld [vmem:[%s4593_s6 + $0x1520] sm:$0xff]  ;;  %1333 = vst [vmem:[%s4601_s7 + $0x540] sm:$0xff] %v1332_v40 }
  0xbb   : > { %v1336_v42 = vld [vmem:[%s4593_s6 + $0x1540] sm:$0xff]  ;;  %1335 = vst [vmem:[%s4601_s7 + $0x548] sm:$0xff] %v1334_v41 }
  0xbc   : > { %1337 = vst [vmem:[%s4601_s7 + $0x550] sm:$0xff] %v1336_v42  ;;  %v1338_v43 = vld [vmem:[%s4593_s6 + $0x1560] sm:$0xff] }
  0xbd   : > { %v1340_v44 = vld [vmem:[%s4593_s6 + $0x1580] sm:$0xff]  ;;  %1339 = vst [vmem:[%s4601_s7 + $0x558] sm:$0xff] %v1338_v43 }
  0xbe   : > { %v1342_v45 = vld [vmem:[%s4593_s6 + $0x15a0] sm:$0xff]  ;;  %1341 = vst [vmem:[%s4601_s7 + $0x560] sm:$0xff] %v1340_v44 }
  0xbf   : > { %1343 = vst [vmem:[%s4601_s7 + $0x568] sm:$0xff] %v1342_v45  ;;  %v1344_v46 = vld [vmem:[%s4593_s6 + $0x15c0] sm:$0xff] }
  0xc0   : > { %v1346_v47 = vld [vmem:[%s4593_s6 + $0x15e0] sm:$0xff]  ;;  %1345 = vst [vmem:[%s4601_s7 + $0x570] sm:$0xff] %v1344_v46 }
  0xc1   : > { %v1348_v48 = vld [vmem:[%s4593_s6 + $0x1600] sm:$0xff]  ;;  %1347 = vst [vmem:[%s4601_s7 + $0x578] sm:$0xff] %v1346_v47 }
  0xc2   : > { %1349 = vst [vmem:[%s4601_s7 + $0x580] sm:$0xff] %v1348_v48  ;;  %v1350_v49 = vld [vmem:[%s4593_s6 + $0x1620] sm:$0xff] }
  0xc3   : > { %v1352_v50 = vld [vmem:[%s4593_s6 + $0x1640] sm:$0xff]  ;;  %1351 = vst [vmem:[%s4601_s7 + $0x588] sm:$0xff] %v1350_v49 }
  0xc4   : > { %v1354_v51 = vld [vmem:[%s4593_s6 + $0x1660] sm:$0xff]  ;;  %1353 = vst [vmem:[%s4601_s7 + $0x590] sm:$0xff] %v1352_v50 }
  0xc5   : > { %1355 = vst [vmem:[%s4601_s7 + $0x598] sm:$0xff] %v1354_v51  ;;  %v1356_v52 = vld [vmem:[%s4593_s6 + $0x1680] sm:$0xff] }
  0xc6   : > { %v1358_v53 = vld [vmem:[%s4593_s6 + $0x16a0] sm:$0xff]  ;;  %1357 = vst [vmem:[%s4601_s7 + $0x5a0] sm:$0xff] %v1356_v52 }
  0xc7   : > { %v1360_v54 = vld [vmem:[%s4593_s6 + $0x16c0] sm:$0xff]  ;;  %1359 = vst [vmem:[%s4601_s7 + $0x5a8] sm:$0xff] %v1358_v53 }
  0xc8   : > { %1361 = vst [vmem:[%s4601_s7 + $0x5b0] sm:$0xff] %v1360_v54  ;;  %v1362_v55 = vld [vmem:[%s4593_s6 + $0x16e0] sm:$0xff] }
  0xc9   : > { %v1364_v56 = vld [vmem:[%s4593_s6 + $0x1700] sm:$0xff]  ;;  %1363 = vst [vmem:[%s4601_s7 + $0x5b8] sm:$0xff] %v1362_v55 }
  0xca   : > { %v1366_v57 = vld [vmem:[%s4593_s6 + $0x1720] sm:$0xff]  ;;  %1365 = vst [vmem:[%s4601_s7 + $0x5c0] sm:$0xff] %v1364_v56 }
  0xcb   : > { %1367 = vst [vmem:[%s4601_s7 + $0x5c8] sm:$0xff] %v1366_v57  ;;  %v1368_v58 = vld [vmem:[%s4593_s6 + $0x1740] sm:$0xff] }
  0xcc   : > { %v1370_v59 = vld [vmem:[%s4593_s6 + $0x1760] sm:$0xff]  ;;  %1369 = vst [vmem:[%s4601_s7 + $0x5d0] sm:$0xff] %v1368_v58 }
  0xcd   : > { %v1372_v60 = vld [vmem:[%s4593_s6 + $0x1780] sm:$0xff]  ;;  %1371 = vst [vmem:[%s4601_s7 + $0x5d8] sm:$0xff] %v1370_v59 }
  0xce   : > { %1373 = vst [vmem:[%s4601_s7 + $0x5e0] sm:$0xff] %v1372_v60  ;;  %v1374_v61 = vld [vmem:[%s4593_s6 + $0x17a0] sm:$0xff] }
  0xcf   : > { %v1376_v62 = vld [vmem:[%s4593_s6 + $0x17c0] sm:$0xff]  ;;  %1375 = vst [vmem:[%s4601_s7 + $0x5e8] sm:$0xff] %v1374_v61 }
  0xd0   : > { %v1378_v63 = vld [vmem:[%s4593_s6 + $0x17e0] sm:$0xff]  ;;  %1377 = vst [vmem:[%s4601_s7 + $0x5f0] sm:$0xff] %v1376_v62 }
  0xd1   : > { %1379 = vst [vmem:[%s4601_s7 + $0x5f8] sm:$0xff] %v1378_v63  ;;  %v1380_v0 = vld [vmem:[%s4593_s6 + $0x1800] sm:$0xff] }
  0xd2   : > { %v1382_v1 = vld [vmem:[%s4593_s6 + $0x1820] sm:$0xff]  ;;  %1381 = vst [vmem:[%s4601_s7 + $0x600] sm:$0xff] %v1380_v0 }
  0xd3   : > { %v1384_v2 = vld [vmem:[%s4593_s6 + $0x1840] sm:$0xff]  ;;  %1383 = vst [vmem:[%s4601_s7 + $0x608] sm:$0xff] %v1382_v1 }
  0xd4   : > { %1385 = vst [vmem:[%s4601_s7 + $0x610] sm:$0xff] %v1384_v2  ;;  %v1386_v3 = vld [vmem:[%s4593_s6 + $0x1860] sm:$0xff] }
  0xd5   : > { %v1388_v4 = vld [vmem:[%s4593_s6 + $0x1880] sm:$0xff]  ;;  %1387 = vst [vmem:[%s4601_s7 + $0x618] sm:$0xff] %v1386_v3 }
  0xd6   : > { %v1390_v5 = vld [vmem:[%s4593_s6 + $0x18a0] sm:$0xff]  ;;  %1389 = vst [vmem:[%s4601_s7 + $0x620] sm:$0xff] %v1388_v4 }
  0xd7   : > { %1391 = vst [vmem:[%s4601_s7 + $0x628] sm:$0xff] %v1390_v5  ;;  %v1392_v6 = vld [vmem:[%s4593_s6 + $0x18c0] sm:$0xff] }
  0xd8   : > { %v1394_v7 = vld [vmem:[%s4593_s6 + $0x18e0] sm:$0xff]  ;;  %1393 = vst [vmem:[%s4601_s7 + $0x630] sm:$0xff] %v1392_v6 }
  0xd9   : > { %v1396_v8 = vld [vmem:[%s4593_s6 + $0x1900] sm:$0xff]  ;;  %1395 = vst [vmem:[%s4601_s7 + $0x638] sm:$0xff] %v1394_v7 }
  0xda   : > { %1397 = vst [vmem:[%s4601_s7 + $0x640] sm:$0xff] %v1396_v8  ;;  %v1398_v9 = vld [vmem:[%s4593_s6 + $0x1920] sm:$0xff] }
  0xdb   : > { %v1400_v10 = vld [vmem:[%s4593_s6 + $0x1940] sm:$0xff]  ;;  %1399 = vst [vmem:[%s4601_s7 + $0x648] sm:$0xff] %v1398_v9 }
  0xdc   : > { %v1402_v11 = vld [vmem:[%s4593_s6 + $0x1960] sm:$0xff]  ;;  %1401 = vst [vmem:[%s4601_s7 + $0x650] sm:$0xff] %v1400_v10 }
  0xdd   : > { %1403 = vst [vmem:[%s4601_s7 + $0x658] sm:$0xff] %v1402_v11  ;;  %v1404_v12 = vld [vmem:[%s4593_s6 + $0x1980] sm:$0xff] }
  0xde   : > { %v1406_v13 = vld [vmem:[%s4593_s6 + $0x19a0] sm:$0xff]  ;;  %1405 = vst [vmem:[%s4601_s7 + $0x660] sm:$0xff] %v1404_v12 }
  0xdf   : > { %v1408_v14 = vld [vmem:[%s4593_s6 + $0x19c0] sm:$0xff]  ;;  %1407 = vst [vmem:[%s4601_s7 + $0x668] sm:$0xff] %v1406_v13 }
  0xe0   : > { %1409 = vst [vmem:[%s4601_s7 + $0x670] sm:$0xff] %v1408_v14  ;;  %v1410_v15 = vld [vmem:[%s4593_s6 + $0x19e0] sm:$0xff] }
  0xe1   : > { %v1412_v16 = vld [vmem:[%s4593_s6 + $0x1a00] sm:$0xff]  ;;  %1411 = vst [vmem:[%s4601_s7 + $0x678] sm:$0xff] %v1410_v15 }
  0xe2   : > { %v1414_v17 = vld [vmem:[%s4593_s6 + $0x1a20] sm:$0xff]  ;;  %1413 = vst [vmem:[%s4601_s7 + $0x680] sm:$0xff] %v1412_v16 }
  0xe3   : > { %1415 = vst [vmem:[%s4601_s7 + $0x688] sm:$0xff] %v1414_v17  ;;  %v1416_v18 = vld [vmem:[%s4593_s6 + $0x1a40] sm:$0xff] }
  0xe4   : > { %v1418_v19 = vld [vmem:[%s4593_s6 + $0x1a60] sm:$0xff]  ;;  %1417 = vst [vmem:[%s4601_s7 + $0x690] sm:$0xff] %v1416_v18 }
  0xe5   : > { %v1420_v20 = vld [vmem:[%s4593_s6 + $0x1a80] sm:$0xff]  ;;  %1419 = vst [vmem:[%s4601_s7 + $0x698] sm:$0xff] %v1418_v19 }
  0xe6   : > { %1421 = vst [vmem:[%s4601_s7 + $0x6a0] sm:$0xff] %v1420_v20  ;;  %v1422_v21 = vld [vmem:[%s4593_s6 + $0x1aa0] sm:$0xff] }
  0xe7   : > { %v1424_v22 = vld [vmem:[%s4593_s6 + $0x1ac0] sm:$0xff]  ;;  %1423 = vst [vmem:[%s4601_s7 + $0x6a8] sm:$0xff] %v1422_v21 }
  0xe8   : > { %v1426_v23 = vld [vmem:[%s4593_s6 + $0x1ae0] sm:$0xff]  ;;  %1425 = vst [vmem:[%s4601_s7 + $0x6b0] sm:$0xff] %v1424_v22 }
  0xe9   : > { %1427 = vst [vmem:[%s4601_s7 + $0x6b8] sm:$0xff] %v1426_v23  ;;  %v1428_v24 = vld [vmem:[%s4593_s6 + $0x1b00] sm:$0xff] }
  0xea   : > { %v1430_v25 = vld [vmem:[%s4593_s6 + $0x1b20] sm:$0xff]  ;;  %1429 = vst [vmem:[%s4601_s7 + $0x6c0] sm:$0xff] %v1428_v24 }
  0xeb   : > { %v1432_v26 = vld [vmem:[%s4593_s6 + $0x1b40] sm:$0xff]  ;;  %1431 = vst [vmem:[%s4601_s7 + $0x6c8] sm:$0xff] %v1430_v25 }
  0xec   : > { %1433 = vst [vmem:[%s4601_s7 + $0x6d0] sm:$0xff] %v1432_v26  ;;  %v1434_v27 = vld [vmem:[%s4593_s6 + $0x1b60] sm:$0xff] }
  0xed   : > { %v1436_v28 = vld [vmem:[%s4593_s6 + $0x1b80] sm:$0xff]  ;;  %1435 = vst [vmem:[%s4601_s7 + $0x6d8] sm:$0xff] %v1434_v27 }
  0xee   : > { %v1438_v29 = vld [vmem:[%s4593_s6 + $0x1ba0] sm:$0xff]  ;;  %1437 = vst [vmem:[%s4601_s7 + $0x6e0] sm:$0xff] %v1436_v28 }
  0xef   : > { %1439 = vst [vmem:[%s4601_s7 + $0x6e8] sm:$0xff] %v1438_v29  ;;  %v1440_v30 = vld [vmem:[%s4593_s6 + $0x1bc0] sm:$0xff] }
  0xf0   : > { %v1442_v31 = vld [vmem:[%s4593_s6 + $0x1be0] sm:$0xff]  ;;  %1441 = vst [vmem:[%s4601_s7 + $0x6f0] sm:$0xff] %v1440_v30 }
  0xf1   : > { %v1444_v32 = vld [vmem:[%s4593_s6 + $0x1c00] sm:$0xff]  ;;  %1443 = vst [vmem:[%s4601_s7 + $0x6f8] sm:$0xff] %v1442_v31 }
  0xf2   : > { %1445 = vst [vmem:[%s4601_s7 + $0x700] sm:$0xff] %v1444_v32  ;;  %v1446_v33 = vld [vmem:[%s4593_s6 + $0x1c20] sm:$0xff] }
  0xf3   : > { %v1448_v34 = vld [vmem:[%s4593_s6 + $0x1c40] sm:$0xff]  ;;  %1447 = vst [vmem:[%s4601_s7 + $0x708] sm:$0xff] %v1446_v33 }
  0xf4   : > { %v1450_v35 = vld [vmem:[%s4593_s6 + $0x1c60] sm:$0xff]  ;;  %1449 = vst [vmem:[%s4601_s7 + $0x710] sm:$0xff] %v1448_v34 }
  0xf5   : > { %1451 = vst [vmem:[%s4601_s7 + $0x718] sm:$0xff] %v1450_v35  ;;  %v1452_v36 = vld [vmem:[%s4593_s6 + $0x1c80] sm:$0xff] }
  0xf6   : > { %v1454_v37 = vld [vmem:[%s4593_s6 + $0x1ca0] sm:$0xff]  ;;  %1453 = vst [vmem:[%s4601_s7 + $0x720] sm:$0xff] %v1452_v36 }
  0xf7   : > { %v1456_v38 = vld [vmem:[%s4593_s6 + $0x1cc0] sm:$0xff]  ;;  %1455 = vst [vmem:[%s4601_s7 + $0x728] sm:$0xff] %v1454_v37 }
  0xf8   : > { %1457 = vst [vmem:[%s4601_s7 + $0x730] sm:$0xff] %v1456_v38  ;;  %v1458_v39 = vld [vmem:[%s4593_s6 + $0x1ce0] sm:$0xff] }
  0xf9   : > { %v1460_v40 = vld [vmem:[%s4593_s6 + $0x1d00] sm:$0xff]  ;;  %1459 = vst [vmem:[%s4601_s7 + $0x738] sm:$0xff] %v1458_v39 }
  0xfa   : > { %v1462_v41 = vld [vmem:[%s4593_s6 + $0x1d20] sm:$0xff]  ;;  %1461 = vst [vmem:[%s4601_s7 + $0x740] sm:$0xff] %v1460_v40 }
  0xfb   : > { %1463 = vst [vmem:[%s4601_s7 + $0x748] sm:$0xff] %v1462_v41  ;;  %v1464_v42 = vld [vmem:[%s4593_s6 + $0x1d40] sm:$0xff] }
  0xfc   : > { %v1466_v43 = vld [vmem:[%s4593_s6 + $0x1d60] sm:$0xff]  ;;  %1465 = vst [vmem:[%s4601_s7 + $0x750] sm:$0xff] %v1464_v42 }
  0xfd   : > { %v1468_v44 = vld [vmem:[%s4593_s6 + $0x1d80] sm:$0xff]  ;;  %1467 = vst [vmem:[%s4601_s7 + $0x758] sm:$0xff] %v1466_v43 }
  0xfe   : > { %1469 = vst [vmem:[%s4601_s7 + $0x760] sm:$0xff] %v1468_v44  ;;  %v1470_v45 = vld [vmem:[%s4593_s6 + $0x1da0] sm:$0xff] }
  0xff   : > { %v1472_v46 = vld [vmem:[%s4593_s6 + $0x1dc0] sm:$0xff]  ;;  %1471 = vst [vmem:[%s4601_s7 + $0x768] sm:$0xff] %v1470_v45 }
 0x100   : > { %v1474_v47 = vld [vmem:[%s4593_s6 + $0x1de0] sm:$0xff]  ;;  %1473 = vst [vmem:[%s4601_s7 + $0x770] sm:$0xff] %v1472_v46 }
 0x101   : > { %1475 = vst [vmem:[%s4601_s7 + $0x778] sm:$0xff] %v1474_v47  ;;  %v1476_v48 = vld [vmem:[%s4593_s6 + $0x1e00] sm:$0xff] }
 0x102   : > { %v1478_v49 = vld [vmem:[%s4593_s6 + $0x1e20] sm:$0xff]  ;;  %1477 = vst [vmem:[%s4601_s7 + $0x780] sm:$0xff] %v1476_v48 }
 0x103   : > { %v1480_v50 = vld [vmem:[%s4593_s6 + $0x1e40] sm:$0xff]  ;;  %1479 = vst [vmem:[%s4601_s7 + $0x788] sm:$0xff] %v1478_v49 }
 0x104   : > { %1481 = vst [vmem:[%s4601_s7 + $0x790] sm:$0xff] %v1480_v50  ;;  %v1482_v51 = vld [vmem:[%s4593_s6 + $0x1e60] sm:$0xff] }
 0x105   : > { %v1484_v52 = vld [vmem:[%s4593_s6 + $0x1e80] sm:$0xff]  ;;  %1483 = vst [vmem:[%s4601_s7 + $0x798] sm:$0xff] %v1482_v51 }
 0x106   : > { %v1486_v53 = vld [vmem:[%s4593_s6 + $0x1ea0] sm:$0xff]  ;;  %1485 = vst [vmem:[%s4601_s7 + $0x7a0] sm:$0xff] %v1484_v52 }
 0x107   : > { %1487 = vst [vmem:[%s4601_s7 + $0x7a8] sm:$0xff] %v1486_v53  ;;  %v1488_v54 = vld [vmem:[%s4593_s6 + $0x1ec0] sm:$0xff] }
 0x108   : > { %v1490_v55 = vld [vmem:[%s4593_s6 + $0x1ee0] sm:$0xff]  ;;  %1489 = vst [vmem:[%s4601_s7 + $0x7b0] sm:$0xff] %v1488_v54 }
 0x109   : > { %v1492_v56 = vld [vmem:[%s4593_s6 + $0x1f00] sm:$0xff]  ;;  %1491 = vst [vmem:[%s4601_s7 + $0x7b8] sm:$0xff] %v1490_v55 }
 0x10a   : > { %1493 = vst [vmem:[%s4601_s7 + $0x7c0] sm:$0xff] %v1492_v56  ;;  %v1494_v57 = vld [vmem:[%s4593_s6 + $0x1f20] sm:$0xff] }
 0x10b   : > { %v1496_v58 = vld [vmem:[%s4593_s6 + $0x1f40] sm:$0xff]  ;;  %1495 = vst [vmem:[%s4601_s7 + $0x7c8] sm:$0xff] %v1494_v57 }
 0x10c   : > { %v1498_v59 = vld [vmem:[%s4593_s6 + $0x1f60] sm:$0xff]  ;;  %1497 = vst [vmem:[%s4601_s7 + $0x7d0] sm:$0xff] %v1496_v58 }
 0x10d   : > { %1499 = vst [vmem:[%s4601_s7 + $0x7d8] sm:$0xff] %v1498_v59  ;;  %v1500_v60 = vld [vmem:[%s4593_s6 + $0x1f80] sm:$0xff] }
 0x10e   : > { %v1502_v61 = vld [vmem:[%s4593_s6 + $0x1fa0] sm:$0xff]  ;;  %1501 = vst [vmem:[%s4601_s7 + $0x7e0] sm:$0xff] %v1500_v60 }
 0x10f   : > { %v1504_v62 = vld [vmem:[%s4593_s6 + $0x1fc0] sm:$0xff]  ;;  %1503 = vst [vmem:[%s4601_s7 + $0x7e8] sm:$0xff] %v1502_v61 }
 0x110   : > { %1505 = vst [vmem:[%s4601_s7 + $0x7f0] sm:$0xff] %v1504_v62  ;;  %v1506_v63 = vld [vmem:[%s4593_s6 + $0x1fe0] sm:$0xff] }
 0x111   : > { %v1508_v0 = vld [vmem:[%s4593_s6 + $0x2000] sm:$0xff]  ;;  %1507 = vst [vmem:[%s4601_s7 + $0x7f8] sm:$0xff] %v1506_v63 }
 0x112   : > { %v1510_v1 = vld [vmem:[%s4593_s6 + $0x2020] sm:$0xff]  ;;  %1509 = vst [vmem:[%s4601_s7 + $0x800] sm:$0xff] %v1508_v0 }
 0x113   : > { %1511 = vst [vmem:[%s4601_s7 + $0x808] sm:$0xff] %v1510_v1  ;;  %v1512_v2 = vld [vmem:[%s4593_s6 + $0x2040] sm:$0xff] }
 0x114   : > { %v1514_v3 = vld [vmem:[%s4593_s6 + $0x2060] sm:$0xff]  ;;  %1513 = vst [vmem:[%s4601_s7 + $0x810] sm:$0xff] %v1512_v2 }
 0x115   : > { %v1516_v4 = vld [vmem:[%s4593_s6 + $0x2080] sm:$0xff]  ;;  %1515 = vst [vmem:[%s4601_s7 + $0x818] sm:$0xff] %v1514_v3 }
 0x116   : > { %1517 = vst [vmem:[%s4601_s7 + $0x820] sm:$0xff] %v1516_v4  ;;  %v1518_v5 = vld [vmem:[%s4593_s6 + $0x20a0] sm:$0xff] }
 0x117   : > { %v1520_v6 = vld [vmem:[%s4593_s6 + $0x20c0] sm:$0xff]  ;;  %1519 = vst [vmem:[%s4601_s7 + $0x828] sm:$0xff] %v1518_v5 }
 0x118   : > { %v1522_v7 = vld [vmem:[%s4593_s6 + $0x20e0] sm:$0xff]  ;;  %1521 = vst [vmem:[%s4601_s7 + $0x830] sm:$0xff] %v1520_v6 }
 0x119   : > { %1523 = vst [vmem:[%s4601_s7 + $0x838] sm:$0xff] %v1522_v7  ;;  %v1524_v8 = vld [vmem:[%s4593_s6 + $0x2100] sm:$0xff] }
 0x11a   : > { %v1526_v9 = vld [vmem:[%s4593_s6 + $0x2120] sm:$0xff]  ;;  %1525 = vst [vmem:[%s4601_s7 + $0x840] sm:$0xff] %v1524_v8 }
 0x11b   : > { %v1528_v10 = vld [vmem:[%s4593_s6 + $0x2140] sm:$0xff]  ;;  %1527 = vst [vmem:[%s4601_s7 + $0x848] sm:$0xff] %v1526_v9 }
 0x11c   : > { %1529 = vst [vmem:[%s4601_s7 + $0x850] sm:$0xff] %v1528_v10  ;;  %v1530_v11 = vld [vmem:[%s4593_s6 + $0x2160] sm:$0xff] }
 0x11d   : > { %v1532_v12 = vld [vmem:[%s4593_s6 + $0x2180] sm:$0xff]  ;;  %1531 = vst [vmem:[%s4601_s7 + $0x858] sm:$0xff] %v1530_v11 }
 0x11e   : > { %v1534_v13 = vld [vmem:[%s4593_s6 + $0x21a0] sm:$0xff]  ;;  %1533 = vst [vmem:[%s4601_s7 + $0x860] sm:$0xff] %v1532_v12 }
 0x11f   : > { %1535 = vst [vmem:[%s4601_s7 + $0x868] sm:$0xff] %v1534_v13  ;;  %v1536_v14 = vld [vmem:[%s4593_s6 + $0x21c0] sm:$0xff] }
 0x120   : > { %v1538_v15 = vld [vmem:[%s4593_s6 + $0x21e0] sm:$0xff]  ;;  %1537 = vst [vmem:[%s4601_s7 + $0x870] sm:$0xff] %v1536_v14 }
 0x121   : > { %v1540_v16 = vld [vmem:[%s4593_s6 + $0x2200] sm:$0xff]  ;;  %1539 = vst [vmem:[%s4601_s7 + $0x878] sm:$0xff] %v1538_v15 }
 0x122   : > { %1541 = vst [vmem:[%s4601_s7 + $0x880] sm:$0xff] %v1540_v16  ;;  %v1542_v17 = vld [vmem:[%s4593_s6 + $0x2220] sm:$0xff] }
 0x123   : > { %v1544_v18 = vld [vmem:[%s4593_s6 + $0x2240] sm:$0xff]  ;;  %1543 = vst [vmem:[%s4601_s7 + $0x888] sm:$0xff] %v1542_v17 }
 0x124   : > { %v1546_v19 = vld [vmem:[%s4593_s6 + $0x2260] sm:$0xff]  ;;  %1545 = vst [vmem:[%s4601_s7 + $0x890] sm:$0xff] %v1544_v18 }
 0x125   : > { %1547 = vst [vmem:[%s4601_s7 + $0x898] sm:$0xff] %v1546_v19  ;;  %v1548_v20 = vld [vmem:[%s4593_s6 + $0x2280] sm:$0xff] }
 0x126   : > { %v1550_v21 = vld [vmem:[%s4593_s6 + $0x22a0] sm:$0xff]  ;;  %1549 = vst [vmem:[%s4601_s7 + $0x8a0] sm:$0xff] %v1548_v20 }
 0x127   : > { %v1552_v22 = vld [vmem:[%s4593_s6 + $0x22c0] sm:$0xff]  ;;  %1551 = vst [vmem:[%s4601_s7 + $0x8a8] sm:$0xff] %v1550_v21 }
 0x128   : > { %1553 = vst [vmem:[%s4601_s7 + $0x8b0] sm:$0xff] %v1552_v22  ;;  %v1554_v23 = vld [vmem:[%s4593_s6 + $0x22e0] sm:$0xff] }
 0x129   : > { %v1556_v24 = vld [vmem:[%s4593_s6 + $0x2300] sm:$0xff]  ;;  %1555 = vst [vmem:[%s4601_s7 + $0x8b8] sm:$0xff] %v1554_v23 }
 0x12a   : > { %v1558_v25 = vld [vmem:[%s4593_s6 + $0x2320] sm:$0xff]  ;;  %1557 = vst [vmem:[%s4601_s7 + $0x8c0] sm:$0xff] %v1556_v24 }
 0x12b   : > { %1559 = vst [vmem:[%s4601_s7 + $0x8c8] sm:$0xff] %v1558_v25  ;;  %v1560_v26 = vld [vmem:[%s4593_s6 + $0x2340] sm:$0xff] }
 0x12c   : > { %v1562_v27 = vld [vmem:[%s4593_s6 + $0x2360] sm:$0xff]  ;;  %1561 = vst [vmem:[%s4601_s7 + $0x8d0] sm:$0xff] %v1560_v26 }
 0x12d   : > { %v1564_v28 = vld [vmem:[%s4593_s6 + $0x2380] sm:$0xff]  ;;  %1563 = vst [vmem:[%s4601_s7 + $0x8d8] sm:$0xff] %v1562_v27 }
 0x12e   : > { %1565 = vst [vmem:[%s4601_s7 + $0x8e0] sm:$0xff] %v1564_v28  ;;  %v1566_v29 = vld [vmem:[%s4593_s6 + $0x23a0] sm:$0xff] }
 0x12f   : > { %v1568_v30 = vld [vmem:[%s4593_s6 + $0x23c0] sm:$0xff]  ;;  %1567 = vst [vmem:[%s4601_s7 + $0x8e8] sm:$0xff] %v1566_v29 }
 0x130   : > { %v1570_v31 = vld [vmem:[%s4593_s6 + $0x23e0] sm:$0xff]  ;;  %1569 = vst [vmem:[%s4601_s7 + $0x8f0] sm:$0xff] %v1568_v30 }
 0x131   : > { %1571 = vst [vmem:[%s4601_s7 + $0x8f8] sm:$0xff] %v1570_v31  ;;  %v1572_v32 = vld [vmem:[%s4593_s6 + $0x2400] sm:$0xff] }
 0x132   : > { %v1574_v33 = vld [vmem:[%s4593_s6 + $0x2420] sm:$0xff]  ;;  %1573 = vst [vmem:[%s4601_s7 + $0x900] sm:$0xff] %v1572_v32 }
 0x133   : > { %v1576_v34 = vld [vmem:[%s4593_s6 + $0x2440] sm:$0xff]  ;;  %1575 = vst [vmem:[%s4601_s7 + $0x908] sm:$0xff] %v1574_v33 }
 0x134   : > { %1577 = vst [vmem:[%s4601_s7 + $0x910] sm:$0xff] %v1576_v34  ;;  %v1578_v35 = vld [vmem:[%s4593_s6 + $0x2460] sm:$0xff] }
 0x135   : > { %v1580_v36 = vld [vmem:[%s4593_s6 + $0x2480] sm:$0xff]  ;;  %1579 = vst [vmem:[%s4601_s7 + $0x918] sm:$0xff] %v1578_v35 }
 0x136   : > { %v1582_v37 = vld [vmem:[%s4593_s6 + $0x24a0] sm:$0xff]  ;;  %1581 = vst [vmem:[%s4601_s7 + $0x920] sm:$0xff] %v1580_v36 }
 0x137   : > { %1583 = vst [vmem:[%s4601_s7 + $0x928] sm:$0xff] %v1582_v37  ;;  %v1584_v38 = vld [vmem:[%s4593_s6 + $0x24c0] sm:$0xff] }
 0x138   : > { %v1586_v39 = vld [vmem:[%s4593_s6 + $0x24e0] sm:$0xff]  ;;  %1585 = vst [vmem:[%s4601_s7 + $0x930] sm:$0xff] %v1584_v38 }
 0x139   : > { %v1588_v40 = vld [vmem:[%s4593_s6 + $0x2500] sm:$0xff]  ;;  %1587 = vst [vmem:[%s4601_s7 + $0x938] sm:$0xff] %v1586_v39 }
 0x13a   : > { %1589 = vst [vmem:[%s4601_s7 + $0x940] sm:$0xff] %v1588_v40  ;;  %v1590_v41 = vld [vmem:[%s4593_s6 + $0x2520] sm:$0xff] }
 0x13b   : > { %v1592_v42 = vld [vmem:[%s4593_s6 + $0x2540] sm:$0xff]  ;;  %1591 = vst [vmem:[%s4601_s7 + $0x948] sm:$0xff] %v1590_v41 }
 0x13c   : > { %v1594_v43 = vld [vmem:[%s4593_s6 + $0x2560] sm:$0xff]  ;;  %1593 = vst [vmem:[%s4601_s7 + $0x950] sm:$0xff] %v1592_v42 }
 0x13d   : > { %1595 = vst [vmem:[%s4601_s7 + $0x958] sm:$0xff] %v1594_v43  ;;  %v1596_v44 = vld [vmem:[%s4593_s6 + $0x2580] sm:$0xff] }
 0x13e   : > { %v1598_v45 = vld [vmem:[%s4593_s6 + $0x25a0] sm:$0xff]  ;;  %1597 = vst [vmem:[%s4601_s7 + $0x960] sm:$0xff] %v1596_v44 }
 0x13f   : > { %v1600_v46 = vld [vmem:[%s4593_s6 + $0x25c0] sm:$0xff]  ;;  %1599 = vst [vmem:[%s4601_s7 + $0x968] sm:$0xff] %v1598_v45 }
 0x140   : > { %1601 = vst [vmem:[%s4601_s7 + $0x970] sm:$0xff] %v1600_v46  ;;  %v1602_v47 = vld [vmem:[%s4593_s6 + $0x25e0] sm:$0xff] }
 0x141   : > { %v1604_v48 = vld [vmem:[%s4593_s6 + $0x2600] sm:$0xff]  ;;  %1603 = vst [vmem:[%s4601_s7 + $0x978] sm:$0xff] %v1602_v47 }
 0x142   : > { %v1606_v49 = vld [vmem:[%s4593_s6 + $0x2620] sm:$0xff]  ;;  %1605 = vst [vmem:[%s4601_s7 + $0x980] sm:$0xff] %v1604_v48 }
 0x143   : > { %1607 = vst [vmem:[%s4601_s7 + $0x988] sm:$0xff] %v1606_v49  ;;  %v1608_v50 = vld [vmem:[%s4593_s6 + $0x2640] sm:$0xff] }
 0x144   : > { %v1610_v51 = vld [vmem:[%s4593_s6 + $0x2660] sm:$0xff]  ;;  %1609 = vst [vmem:[%s4601_s7 + $0x990] sm:$0xff] %v1608_v50 }
 0x145   : > { %v1612_v52 = vld [vmem:[%s4593_s6 + $0x2680] sm:$0xff]  ;;  %1611 = vst [vmem:[%s4601_s7 + $0x998] sm:$0xff] %v1610_v51 }
 0x146   : > { %1613 = vst [vmem:[%s4601_s7 + $0x9a0] sm:$0xff] %v1612_v52  ;;  %v1614_v53 = vld [vmem:[%s4593_s6 + $0x26a0] sm:$0xff] }
 0x147   : > { %v1616_v54 = vld [vmem:[%s4593_s6 + $0x26c0] sm:$0xff]  ;;  %1615 = vst [vmem:[%s4601_s7 + $0x9a8] sm:$0xff] %v1614_v53 }
 0x148   : > { %v1618_v55 = vld [vmem:[%s4593_s6 + $0x26e0] sm:$0xff]  ;;  %1617 = vst [vmem:[%s4601_s7 + $0x9b0] sm:$0xff] %v1616_v54 }
 0x149   : > { %1619 = vst [vmem:[%s4601_s7 + $0x9b8] sm:$0xff] %v1618_v55  ;;  %v1620_v56 = vld [vmem:[%s4593_s6 + $0x2700] sm:$0xff] }
 0x14a   : > { %v1622_v57 = vld [vmem:[%s4593_s6 + $0x2720] sm:$0xff]  ;;  %1621 = vst [vmem:[%s4601_s7 + $0x9c0] sm:$0xff] %v1620_v56 }
 0x14b   : > { %v1624_v58 = vld [vmem:[%s4593_s6 + $0x2740] sm:$0xff]  ;;  %1623 = vst [vmem:[%s4601_s7 + $0x9c8] sm:$0xff] %v1622_v57 }
 0x14c   : > { %1625 = vst [vmem:[%s4601_s7 + $0x9d0] sm:$0xff] %v1624_v58  ;;  %v1626_v59 = vld [vmem:[%s4593_s6 + $0x2760] sm:$0xff] }
 0x14d   : > { %v1628_v60 = vld [vmem:[%s4593_s6 + $0x2780] sm:$0xff]  ;;  %1627 = vst [vmem:[%s4601_s7 + $0x9d8] sm:$0xff] %v1626_v59 }
 0x14e   : > { %v1630_v61 = vld [vmem:[%s4593_s6 + $0x27a0] sm:$0xff]  ;;  %1629 = vst [vmem:[%s4601_s7 + $0x9e0] sm:$0xff] %v1628_v60 }
 0x14f   : > { %1631 = vst [vmem:[%s4601_s7 + $0x9e8] sm:$0xff] %v1630_v61  ;;  %v1632_v62 = vld [vmem:[%s4593_s6 + $0x27c0] sm:$0xff] }
 0x150   : > { %v1634_v63 = vld [vmem:[%s4593_s6 + $0x27e0] sm:$0xff]  ;;  %1633 = vst [vmem:[%s4601_s7 + $0x9f0] sm:$0xff] %v1632_v62 }
 0x151   : > { %v1636_v0 = vld [vmem:[%s4593_s6 + $0x2800] sm:$0xff]  ;;  %1635 = vst [vmem:[%s4601_s7 + $0x9f8] sm:$0xff] %v1634_v63 }
 0x152   : > { %1637 = vst [vmem:[%s4601_s7 + $0xa00] sm:$0xff] %v1636_v0  ;;  %v1638_v1 = vld [vmem:[%s4593_s6 + $0x2820] sm:$0xff] }
 0x153   : > { %v1640_v2 = vld [vmem:[%s4593_s6 + $0x2840] sm:$0xff]  ;;  %1639 = vst [vmem:[%s4601_s7 + $0xa08] sm:$0xff] %v1638_v1 }
 0x154   : > { %v1642_v3 = vld [vmem:[%s4593_s6 + $0x2860] sm:$0xff]  ;;  %1641 = vst [vmem:[%s4601_s7 + $0xa10] sm:$0xff] %v1640_v2 }
 0x155   : > { %1643 = vst [vmem:[%s4601_s7 + $0xa18] sm:$0xff] %v1642_v3  ;;  %v1644_v4 = vld [vmem:[%s4593_s6 + $0x2880] sm:$0xff] }
 0x156   : > { %v1646_v5 = vld [vmem:[%s4593_s6 + $0x28a0] sm:$0xff]  ;;  %1645 = vst [vmem:[%s4601_s7 + $0xa20] sm:$0xff] %v1644_v4 }
 0x157   : > { %v1648_v6 = vld [vmem:[%s4593_s6 + $0x28c0] sm:$0xff]  ;;  %1647 = vst [vmem:[%s4601_s7 + $0xa28] sm:$0xff] %v1646_v5 }
 0x158   : > { %1649 = vst [vmem:[%s4601_s7 + $0xa30] sm:$0xff] %v1648_v6  ;;  %v1650_v7 = vld [vmem:[%s4593_s6 + $0x28e0] sm:$0xff] }
 0x159   : > { %v1652_v8 = vld [vmem:[%s4593_s6 + $0x2900] sm:$0xff]  ;;  %1651 = vst [vmem:[%s4601_s7 + $0xa38] sm:$0xff] %v1650_v7 }
 0x15a   : > { %v1654_v9 = vld [vmem:[%s4593_s6 + $0x2920] sm:$0xff]  ;;  %1653 = vst [vmem:[%s4601_s7 + $0xa40] sm:$0xff] %v1652_v8 }
 0x15b   : > { %1655 = vst [vmem:[%s4601_s7 + $0xa48] sm:$0xff] %v1654_v9  ;;  %v1656_v10 = vld [vmem:[%s4593_s6 + $0x2940] sm:$0xff] }
 0x15c   : > { %v1658_v11 = vld [vmem:[%s4593_s6 + $0x2960] sm:$0xff]  ;;  %1657 = vst [vmem:[%s4601_s7 + $0xa50] sm:$0xff] %v1656_v10 }
 0x15d   : > { %v1660_v12 = vld [vmem:[%s4593_s6 + $0x2980] sm:$0xff]  ;;  %1659 = vst [vmem:[%s4601_s7 + $0xa58] sm:$0xff] %v1658_v11 }
 0x15e   : > { %1661 = vst [vmem:[%s4601_s7 + $0xa60] sm:$0xff] %v1660_v12  ;;  %v1662_v13 = vld [vmem:[%s4593_s6 + $0x29a0] sm:$0xff] }
 0x15f   : > { %v1664_v14 = vld [vmem:[%s4593_s6 + $0x29c0] sm:$0xff]  ;;  %1663 = vst [vmem:[%s4601_s7 + $0xa68] sm:$0xff] %v1662_v13 }
 0x160   : > { %v1666_v15 = vld [vmem:[%s4593_s6 + $0x29e0] sm:$0xff]  ;;  %1665 = vst [vmem:[%s4601_s7 + $0xa70] sm:$0xff] %v1664_v14 }
 0x161   : > { %1667 = vst [vmem:[%s4601_s7 + $0xa78] sm:$0xff] %v1666_v15  ;;  %v1668_v16 = vld [vmem:[%s4593_s6 + $0x2a00] sm:$0xff] }
 0x162   : > { %v1670_v17 = vld [vmem:[%s4593_s6 + $0x2a20] sm:$0xff]  ;;  %1669 = vst [vmem:[%s4601_s7 + $0xa80] sm:$0xff] %v1668_v16 }
 0x163   : > { %v1672_v18 = vld [vmem:[%s4593_s6 + $0x2a40] sm:$0xff]  ;;  %1671 = vst [vmem:[%s4601_s7 + $0xa88] sm:$0xff] %v1670_v17 }
 0x164   : > { %1673 = vst [vmem:[%s4601_s7 + $0xa90] sm:$0xff] %v1672_v18  ;;  %v1674_v19 = vld [vmem:[%s4593_s6 + $0x2a60] sm:$0xff] }
 0x165   : > { %v1676_v20 = vld [vmem:[%s4593_s6 + $0x2a80] sm:$0xff]  ;;  %1675 = vst [vmem:[%s4601_s7 + $0xa98] sm:$0xff] %v1674_v19 }
 0x166   : > { %v1678_v21 = vld [vmem:[%s4593_s6 + $0x2aa0] sm:$0xff]  ;;  %1677 = vst [vmem:[%s4601_s7 + $0xaa0] sm:$0xff] %v1676_v20 }
 0x167   : > { %1679 = vst [vmem:[%s4601_s7 + $0xaa8] sm:$0xff] %v1678_v21  ;;  %v1680_v22 = vld [vmem:[%s4593_s6 + $0x2ac0] sm:$0xff] }
 0x168   : > { %v1682_v23 = vld [vmem:[%s4593_s6 + $0x2ae0] sm:$0xff]  ;;  %1681 = vst [vmem:[%s4601_s7 + $0xab0] sm:$0xff] %v1680_v22 }
 0x169   : > { %v1684_v24 = vld [vmem:[%s4593_s6 + $0x2b00] sm:$0xff]  ;;  %1683 = vst [vmem:[%s4601_s7 + $0xab8] sm:$0xff] %v1682_v23 }
 0x16a   : > { %1685 = vst [vmem:[%s4601_s7 + $0xac0] sm:$0xff] %v1684_v24  ;;  %v1686_v25 = vld [vmem:[%s4593_s6 + $0x2b20] sm:$0xff] }
 0x16b   : > { %v1688_v26 = vld [vmem:[%s4593_s6 + $0x2b40] sm:$0xff]  ;;  %1687 = vst [vmem:[%s4601_s7 + $0xac8] sm:$0xff] %v1686_v25 }
 0x16c   : > { %v1690_v27 = vld [vmem:[%s4593_s6 + $0x2b60] sm:$0xff]  ;;  %1689 = vst [vmem:[%s4601_s7 + $0xad0] sm:$0xff] %v1688_v26 }
 0x16d   : > { %1691 = vst [vmem:[%s4601_s7 + $0xad8] sm:$0xff] %v1690_v27  ;;  %v1692_v28 = vld [vmem:[%s4593_s6 + $0x2b80] sm:$0xff] }
 0x16e   : > { %v1694_v29 = vld [vmem:[%s4593_s6 + $0x2ba0] sm:$0xff]  ;;  %1693 = vst [vmem:[%s4601_s7 + $0xae0] sm:$0xff] %v1692_v28 }
 0x16f   : > { %v1696_v30 = vld [vmem:[%s4593_s6 + $0x2bc0] sm:$0xff]  ;;  %1695 = vst [vmem:[%s4601_s7 + $0xae8] sm:$0xff] %v1694_v29 }
 0x170   : > { %1697 = vst [vmem:[%s4601_s7 + $0xaf0] sm:$0xff] %v1696_v30  ;;  %v1698_v31 = vld [vmem:[%s4593_s6 + $0x2be0] sm:$0xff] }
 0x171   : > { %v1700_v32 = vld [vmem:[%s4593_s6 + $0x2c00] sm:$0xff]  ;;  %1699 = vst [vmem:[%s4601_s7 + $0xaf8] sm:$0xff] %v1698_v31 }
 0x172   : > { %v1702_v33 = vld [vmem:[%s4593_s6 + $0x2c20] sm:$0xff]  ;;  %1701 = vst [vmem:[%s4601_s7 + $0xb00] sm:$0xff] %v1700_v32 }
 0x173   : > { %1703 = vst [vmem:[%s4601_s7 + $0xb08] sm:$0xff] %v1702_v33  ;;  %v1704_v34 = vld [vmem:[%s4593_s6 + $0x2c40] sm:$0xff] }
 0x174   : > { %v1706_v35 = vld [vmem:[%s4593_s6 + $0x2c60] sm:$0xff]  ;;  %1705 = vst [vmem:[%s4601_s7 + $0xb10] sm:$0xff] %v1704_v34 }
 0x175   : > { %v1708_v36 = vld [vmem:[%s4593_s6 + $0x2c80] sm:$0xff]  ;;  %1707 = vst [vmem:[%s4601_s7 + $0xb18] sm:$0xff] %v1706_v35 }
 0x176   : > { %1709 = vst [vmem:[%s4601_s7 + $0xb20] sm:$0xff] %v1708_v36  ;;  %v1710_v37 = vld [vmem:[%s4593_s6 + $0x2ca0] sm:$0xff] }
 0x177   : > { %v1712_v38 = vld [vmem:[%s4593_s6 + $0x2cc0] sm:$0xff]  ;;  %1711 = vst [vmem:[%s4601_s7 + $0xb28] sm:$0xff] %v1710_v37 }
 0x178   : > { %v1714_v39 = vld [vmem:[%s4593_s6 + $0x2ce0] sm:$0xff]  ;;  %1713 = vst [vmem:[%s4601_s7 + $0xb30] sm:$0xff] %v1712_v38 }
 0x179   : > { %1715 = vst [vmem:[%s4601_s7 + $0xb38] sm:$0xff] %v1714_v39  ;;  %v1716_v40 = vld [vmem:[%s4593_s6 + $0x2d00] sm:$0xff] }
 0x17a   : > { %v1718_v41 = vld [vmem:[%s4593_s6 + $0x2d20] sm:$0xff]  ;;  %1717 = vst [vmem:[%s4601_s7 + $0xb40] sm:$0xff] %v1716_v40 }
 0x17b   : > { %v1720_v42 = vld [vmem:[%s4593_s6 + $0x2d40] sm:$0xff]  ;;  %1719 = vst [vmem:[%s4601_s7 + $0xb48] sm:$0xff] %v1718_v41 }
 0x17c   : > { %1721 = vst [vmem:[%s4601_s7 + $0xb50] sm:$0xff] %v1720_v42  ;;  %v1722_v43 = vld [vmem:[%s4593_s6 + $0x2d60] sm:$0xff] }
 0x17d   : > { %v1724_v44 = vld [vmem:[%s4593_s6 + $0x2d80] sm:$0xff]  ;;  %1723 = vst [vmem:[%s4601_s7 + $0xb58] sm:$0xff] %v1722_v43 }
 0x17e   : > { %v1726_v45 = vld [vmem:[%s4593_s6 + $0x2da0] sm:$0xff]  ;;  %1725 = vst [vmem:[%s4601_s7 + $0xb60] sm:$0xff] %v1724_v44 }
 0x17f   : > { %1727 = vst [vmem:[%s4601_s7 + $0xb68] sm:$0xff] %v1726_v45  ;;  %v1728_v46 = vld [vmem:[%s4593_s6 + $0x2dc0] sm:$0xff] }
 0x180   : > { %v1730_v47 = vld [vmem:[%s4593_s6 + $0x2de0] sm:$0xff]  ;;  %1729 = vst [vmem:[%s4601_s7 + $0xb70] sm:$0xff] %v1728_v46 }
 0x181   : > { %v1732_v48 = vld [vmem:[%s4593_s6 + $0x2e00] sm:$0xff]  ;;  %1731 = vst [vmem:[%s4601_s7 + $0xb78] sm:$0xff] %v1730_v47 }
 0x182   : > { %1733 = vst [vmem:[%s4601_s7 + $0xb80] sm:$0xff] %v1732_v48  ;;  %v1734_v49 = vld [vmem:[%s4593_s6 + $0x2e20] sm:$0xff] }
 0x183   : > { %v1736_v50 = vld [vmem:[%s4593_s6 + $0x2e40] sm:$0xff]  ;;  %1735 = vst [vmem:[%s4601_s7 + $0xb88] sm:$0xff] %v1734_v49 }
 0x184   : > { %v1738_v51 = vld [vmem:[%s4593_s6 + $0x2e60] sm:$0xff]  ;;  %1737 = vst [vmem:[%s4601_s7 + $0xb90] sm:$0xff] %v1736_v50 }
 0x185   : > { %1739 = vst [vmem:[%s4601_s7 + $0xb98] sm:$0xff] %v1738_v51  ;;  %v1740_v52 = vld [vmem:[%s4593_s6 + $0x2e80] sm:$0xff] }
 0x186   : > { %v1742_v53 = vld [vmem:[%s4593_s6 + $0x2ea0] sm:$0xff]  ;;  %1741 = vst [vmem:[%s4601_s7 + $0xba0] sm:$0xff] %v1740_v52 }
 0x187   : > { %v1744_v54 = vld [vmem:[%s4593_s6 + $0x2ec0] sm:$0xff]  ;;  %1743 = vst [vmem:[%s4601_s7 + $0xba8] sm:$0xff] %v1742_v53 }
 0x188   : > { %1745 = vst [vmem:[%s4601_s7 + $0xbb0] sm:$0xff] %v1744_v54  ;;  %v1746_v55 = vld [vmem:[%s4593_s6 + $0x2ee0] sm:$0xff] }
 0x189   : > { %v1748_v56 = vld [vmem:[%s4593_s6 + $0x2f00] sm:$0xff]  ;;  %1747 = vst [vmem:[%s4601_s7 + $0xbb8] sm:$0xff] %v1746_v55 }
 0x18a   : > { %v1750_v57 = vld [vmem:[%s4593_s6 + $0x2f20] sm:$0xff]  ;;  %1749 = vst [vmem:[%s4601_s7 + $0xbc0] sm:$0xff] %v1748_v56 }
 0x18b   : > { %1751 = vst [vmem:[%s4601_s7 + $0xbc8] sm:$0xff] %v1750_v57  ;;  %v1752_v58 = vld [vmem:[%s4593_s6 + $0x2f40] sm:$0xff] }
 0x18c   : > { %v1754_v59 = vld [vmem:[%s4593_s6 + $0x2f60] sm:$0xff]  ;;  %1753 = vst [vmem:[%s4601_s7 + $0xbd0] sm:$0xff] %v1752_v58 }
 0x18d   : > { %v1756_v60 = vld [vmem:[%s4593_s6 + $0x2f80] sm:$0xff]  ;;  %1755 = vst [vmem:[%s4601_s7 + $0xbd8] sm:$0xff] %v1754_v59 }
 0x18e   : > { %1757 = vst [vmem:[%s4601_s7 + $0xbe0] sm:$0xff] %v1756_v60  ;;  %v1758_v61 = vld [vmem:[%s4593_s6 + $0x2fa0] sm:$0xff] }
 0x18f   : > { %v1760_v62 = vld [vmem:[%s4593_s6 + $0x2fc0] sm:$0xff]  ;;  %1759 = vst [vmem:[%s4601_s7 + $0xbe8] sm:$0xff] %v1758_v61 }
 0x190   : > { %v1762_v63 = vld [vmem:[%s4593_s6 + $0x2fe0] sm:$0xff]  ;;  %1761 = vst [vmem:[%s4601_s7 + $0xbf0] sm:$0xff] %v1760_v62 }
 0x191   : > { %1763 = vst [vmem:[%s4601_s7 + $0xbf8] sm:$0xff] %v1762_v63  ;;  %v1764_v0 = vld [vmem:[%s4593_s6 + $0x3000] sm:$0xff] }
 0x192   : > { %v1766_v1 = vld [vmem:[%s4593_s6 + $0x3020] sm:$0xff]  ;;  %1765 = vst [vmem:[%s4601_s7 + $0xc00] sm:$0xff] %v1764_v0 }
 0x193   : > { %v1768_v2 = vld [vmem:[%s4593_s6 + $0x3040] sm:$0xff]  ;;  %1767 = vst [vmem:[%s4601_s7 + $0xc08] sm:$0xff] %v1766_v1 }
 0x194   : > { %1769 = vst [vmem:[%s4601_s7 + $0xc10] sm:$0xff] %v1768_v2  ;;  %v1770_v3 = vld [vmem:[%s4593_s6 + $0x3060] sm:$0xff] }
 0x195   : > { %v1772_v4 = vld [vmem:[%s4593_s6 + $0x3080] sm:$0xff]  ;;  %1771 = vst [vmem:[%s4601_s7 + $0xc18] sm:$0xff] %v1770_v3 }
 0x196   : > { %v1774_v5 = vld [vmem:[%s4593_s6 + $0x30a0] sm:$0xff]  ;;  %1773 = vst [vmem:[%s4601_s7 + $0xc20] sm:$0xff] %v1772_v4 }
 0x197   : > { %1775 = vst [vmem:[%s4601_s7 + $0xc28] sm:$0xff] %v1774_v5  ;;  %v1776_v6 = vld [vmem:[%s4593_s6 + $0x30c0] sm:$0xff] }
 0x198   : > { %v1778_v7 = vld [vmem:[%s4593_s6 + $0x30e0] sm:$0xff]  ;;  %1777 = vst [vmem:[%s4601_s7 + $0xc30] sm:$0xff] %v1776_v6 }
 0x199   : > { %1779 = vst [vmem:[%s4601_s7 + $0xc38] sm:$0xff] %v1778_v7 }
 0x19a PF: > { %p3490_p5 = scmp.ge.s32.totalorder %s4519_s20, 1  ;;  %p1799_p6 = scmp.lt.s32.totalorder %s4519_s20, 5 }
 0x19c   : > { %p1800_p7 = pnand %p3490_p5, %p1799_p6 }
 0x19d   : > { %s1806_s8 = sand.u32 (!%p1800_p7), 1, %s4511_s18   ;;  %p1836_p8 = scmp.lt.s32.totalorder (!%p1800_p7), %s4573_s21, 3 }
 0x19e   : > { %1803 = sbr.rel (%p1800_p7) target bundleno = 1106 (0x452), region = 74  ;;  %s3491_s10 = sshll.u32 (!%p1800_p7), %s4573_s21, 4 }
 0x19f   : > { %s4424_s9 = smul.u32 (!%p1800_p7), 3136, %s1806_s8  ;;  %p1840_p9 = scmp.lt.s32.totalorder (!%p1800_p7), %s3491_s10, 63 }
 0x1a0   : > { %p3493_p10 = scmp.ne.s32.totalorder (!%p1800_p7), %s4573_s21, 0 }
 0x1a1   : > { %s5398_s23 = scalar_lea.vmem (!%p1800_p7), [#allocation3], %s4424_s9 }
 0x1a5   : > { %s5387_s11 = scalar_select %p1836_p8, %s4573_s21, 3 }
 0x1a6   : > { %s5958_s10 = smov (!%p1840_p9, %s3491_s10), 63  ;;  %1848 = sbr.rel (%p3493_p10) target bundleno = 429 (0x1ad), region = 82 }
 0x1a7   : > { %s1838_s14 = scalar_lea.vmem %s5950_s2, %s5387_s11  ;;  %s3492_s15 = sshll.u32 %s5958_s10, 3  ;;  %v4521_v8 = vmov (!%p3493_p10), 0.0  }
 0x1a8   : > { %s5396_s20 = scalar_lea.vmem %s5951_s3, %s3492_s15  ;;  %1849 = vst [vmem:[#allocation2] sm:$0x3] (!%p3493_p10), %v4521_v8 }
 0x1ad PF: > { %v1873_v9 = vld [vmem:[%s5398_s23 + $0x80] sm:$0xff]  ;;  %v1874_v10 = vld [vmem:[%s5398_s23 + $0x88] sm:$0xff]  ;;  %v1875_v20 = vld [vmem:[%s5398_s23 + $0x90] sm:$0xff]  ;;  %v4522_v52 = vmov 1983009808   ;;  %v2267_v54 = vlaneseq  ;;  %vm4524_vm0 = vmmov 0  }
 0x1ae   : > { %v1857_v11 = vld [vmem:[%s5398_s23] sm:$0xff]  ;;  %v4003_v12 = vpack.c.bf16 %v1874_v10, %v1873_v9  ;;  %v1858_v13 = vld [vmem:[%s5398_s23 + $0x8] sm:$0xff]  ;;  %v1876_v22 = vld [vmem:[%s5398_s23 + $0x98] sm:$0xff]  ;;  %v2265_v53 = vunpack.c.l.s4 %v4522_v52  ;;  %vm2396_vm1 = vcmask 523264   ;;  %p3497_p11 = scmp.ne.s32.totalorder %s4573_s21, 3 }
 0x1af   : > { %v1905_v14 = vld [vmem:[%s5398_s23 + $0x180] sm:$0xff]  ;;  %v1906_v15 = vld [vmem:[%s5398_s23 + $0x188] sm:$0xff]  ;;  %v4005_v16 = vpack.c.bf16 %v1858_v13, %v1857_v11  ;;  %v1859_v23 = vld [vmem:[%s5398_s23 + $0x10] sm:$0xff]  ;;  %v4007_v25 = vpack.c.bf16 %v1876_v22, %v1875_v20  ;;  %v2268_v5 = vshrl.u32 %v2267_v54, 7 }
 0x1b0   : > { %v4035_v17 = vpack.c.bf16 %v1906_v15, %v1905_v14  ;;  %v1889_v18 = vld [vmem:[%s5398_s23 + $0x100] sm:$0xff]  ;;  %v1890_v19 = vld [vmem:[%s5398_s23 + $0x108] sm:$0xff]  ;;  %4004 = vmatprep.subr.bf16.mxu0 %v4003_v12  ;;  %v1860_v24 = vld [vmem:[%s5398_s23 + $0x18] sm:$0xff]  ;;  %v2266_v4 = vunpack.c.0.s8 %v2265_v53 }
 0x1b1   : > { %v4037_v21 = vpack.c.bf16 %v1890_v19, %v1889_v18  ;;  %4006 = vmatpush3.bf16.msra.mxu0 %v4005_v16  ;;  %v4009_v26 = vpack.c.bf16 %v1860_v24, %v1859_v23  ;;  %v1907_v27 = vld [vmem:[%s5398_s23 + $0x190] sm:$0xff]  ;;  %v1908_v28 = vld [vmem:[%s5398_s23 + $0x198] sm:$0xff]  ;;  %v1877_v32 = vld [vmem:[%s5398_s23 + $0xa0] sm:$0xff] }
 0x1b2   : > { %4036 = vmatprep.subr.bf16.mxu1 %v4035_v17  ;;  %v1891_v29 = vld [vmem:[%s5398_s23 + $0x110] sm:$0xff]  ;;  %v4039_v30 = vpack.c.bf16 %v1908_v28, %v1907_v27  ;;  %v1892_v31 = vld [vmem:[%s5398_s23 + $0x118] sm:$0xff]  ;;  %v1878_v33 = vld [vmem:[%s5398_s23 + $0xa8] sm:$0xff]  ;;  %4008 = vmatprep.subr.bf16.mxu0 %v4007_v25  ;;  %v5449_v19 = vsub.s32 %v2266_v4, %v2268_v5 }
 0x1b3   : > { %4038 = vmatpush3.bf16.msra.mxu1 %v4037_v21  ;;  %v4041_v34 = vpack.c.bf16 %v1892_v31, %v1891_v29  ;;  %v4011_v35 = vpack.c.bf16 %v1878_v33, %v1877_v32  ;;  %v1861_v36 = vld [vmem:[%s5398_s23 + $0x20] sm:$0xff]  ;;  %v1862_v37 = vld [vmem:[%s5398_s23 + $0x28] sm:$0xff]  ;;  %v1879_v44 = vld [vmem:[%s5398_s23 + $0xb0] sm:$0xff] }
 0x1b4   : > { %v1909_v38 = vld [vmem:[%s5398_s23 + $0x1a0] sm:$0xff]  ;;  %4040 = vmatprep.subr.bf16.mxu1 %v4039_v30  ;;  %v1910_v39 = vld [vmem:[%s5398_s23 + $0x1a8] sm:$0xff]  ;;  %v4013_v42 = vpack.c.bf16 %v1862_v37, %v1861_v36  ;;  %v1880_v45 = vld [vmem:[%s5398_s23 + $0xb8] sm:$0xff] }
 0x1b5   : > { %v1893_v40 = vld [vmem:[%s5398_s23 + $0x120] sm:$0xff]  ;;  %v1894_v41 = vld [vmem:[%s5398_s23 + $0x128] sm:$0xff]  ;;  %4010 = vmatpush3.bf16.msra.mxu0 %v4009_v26  ;;  %v4043_v43 = vpack.c.bf16 %v1910_v39, %v1909_v38  ;;  %v1863_v46 = vld [vmem:[%s5398_s23 + $0x30] sm:$0xff]  ;;  %v4015_v48 = vpack.c.bf16 %v1880_v45, %v1879_v44 }
 0x1b6   : > { %4012 = vmatprep.subr.bf16.mxu0 %v4011_v35  ;;  %v4045_v47 = vpack.c.bf16 %v1894_v41, %v1893_v40  ;;  %v1864_v49 = vld [vmem:[%s5398_s23 + $0x38] sm:$0xff]  ;;  %v1911_v50 = vld [vmem:[%s5398_s23 + $0x1b0] sm:$0xff]  ;;  %v1881_v58 = vld [vmem:[%s5398_s23 + $0xc0] sm:$0xff] }
 0x1b7   : > { %4042 = vmatpush3.bf16.msra.mxu1 %v4041_v34  ;;  %v1912_v51 = vld [vmem:[%s5398_s23 + $0x1b8] sm:$0xff]  ;;  %v1895_v56 = vld [vmem:[%s5398_s23 + $0x130] sm:$0xff]  ;;  %v1882_v59 = vld [vmem:[%s5398_s23 + $0xc8] sm:$0xff]  ;;  %v4017_v60 = vpack.c.bf16 %v1864_v49, %v1863_v46 }
 0x1b8   : > { %4044 = vmatprep.subr.bf16.mxu1 %v4043_v43  ;;  %v4047_v55 = vpack.c.bf16 %v1912_v51, %v1911_v50  ;;  %v1896_v57 = vld [vmem:[%s5398_s23 + $0x138] sm:$0xff]  ;;  %v1913_v61 = vld [vmem:[%s5398_s23 + $0x1c0] sm:$0xff]  ;;  %v1914_v62 = vld [vmem:[%s5398_s23 + $0x1c8] sm:$0xff]  ;;  %v4019_v0 = vpack.c.bf16 %v1882_v59, %v1881_v58 }
 0x1b9   : > { %4014 = vmatpush3.bf16.msra.mxu0 %v4013_v42  ;;  %v4049_v63 = vpack.c.bf16 %v1896_v57, %v1895_v56  ;;  %v1865_v1 = vld [vmem:[%s5398_s23 + $0x40] sm:$0xff]  ;;  %v1866_v2 = vld [vmem:[%s5398_s23 + $0x48] sm:$0xff]  ;;  %v4051_v6 = vpack.c.bf16 %v1914_v62, %v1913_v61  ;;  %v1883_v8 = vld [vmem:[%s5398_s23 + $0xd0] sm:$0xff] }
 0x1ba   : > { %4016 = vmatprep.subr.bf16.mxu0 %v4015_v48  ;;  %v1897_v3 = vld [vmem:[%s5398_s23 + $0x140] sm:$0xff]  ;;  %v1898_v7 = vld [vmem:[%s5398_s23 + $0x148] sm:$0xff]  ;;  %v1884_v9 = vld [vmem:[%s5398_s23 + $0xd8] sm:$0xff]  ;;  %v4021_v12 = vpack.c.bf16 %v1866_v2, %v1865_v1 }
 0x1bb   : > { %4046 = vmatpush3.bf16.msra.mxu1 %v4045_v47  ;;  %v1915_v10 = vld [vmem:[%s5398_s23 + $0x1d0] sm:$0xff]  ;;  %v1916_v11 = vld [vmem:[%s5398_s23 + $0x1d8] sm:$0xff]  ;;  %v4053_v14 = vpack.c.bf16 %v1898_v7, %v1897_v3  ;;  %v4023_v15 = vpack.c.bf16 %v1884_v9, %v1883_v8  ;;  %v1885_v21 = vld [vmem:[%s5398_s23 + $0xe0] sm:$0xff] }
 0x1bc   : > { %4048 = vmatprep.subr.bf16.mxu1 %v4047_v55  ;;  %v1867_v13 = vld [vmem:[%s5398_s23 + $0x50] sm:$0xff]  ;;  %v1868_v16 = vld [vmem:[%s5398_s23 + $0x58] sm:$0xff]  ;;  %v4055_v20 = vpack.c.bf16 %v1916_v11, %v1915_v10  ;;  %v1886_v22 = vld [vmem:[%s5398_s23 + $0xe8] sm:$0xff] }
 0x1bd   : > { %4018 = vmatpush3.bf16.msra.mxu0 %v4017_v60  ;;  %v1899_v17 = vld [vmem:[%s5398_s23 + $0x150] sm:$0xff]  ;;  %v1900_v18 = vld [vmem:[%s5398_s23 + $0x158] sm:$0xff]  ;;  %v1917_v23 = vld [vmem:[%s5398_s23 + $0x1e0] sm:$0xff]  ;;  %v4025_v25 = vpack.c.bf16 %v1868_v16, %v1867_v13  ;;  %v4027_v28 = vpack.c.bf16 %v1886_v22, %v1885_v21 }
 0x1be   : > { %4020 = vmatprep.subr.bf16.mxu0 %v4019_v0  ;;  %v1918_v24 = vld [vmem:[%s5398_s23 + $0x1e8] sm:$0xff]  ;;  %v4057_v26 = vpack.c.bf16 %v1900_v18, %v1899_v17  ;;  %v1850_v27 = vld [vmem:[%s5948_s0] sm:$0xff]  ;;  %v1887_v36 = vld [vmem:[%s5398_s23 + $0xf0] sm:$0xff] }
 0x1bf   : > { %4050 = vmatpush3.bf16.msra.mxu1 %v4049_v63  ;;  %v1869_v29 = vld [vmem:[%s5398_s23 + $0x60] sm:$0xff]  ;;  %v1870_v30 = vld [vmem:[%s5398_s23 + $0x68] sm:$0xff]  ;;  %v2270_v32 = vrot.slane %v1850_v27, %v5449_v19  ;;  %v2263_v33 = vcombine.high %v1850_v27, %v1850_v27  ;;  %v4059_v34 = vpack.c.bf16 %v1918_v24, %v1917_v23  ;;  %v1888_v37 = vld [vmem:[%s5398_s23 + $0xf8] sm:$0xff] }
 0x1c0   : > { %4052 = vmatprep.subr.bf16.mxu1 %v4051_v6  ;;  %v1901_v31 = vld [vmem:[%s5398_s23 + $0x160] sm:$0xff]  ;;  %v1902_v35 = vld [vmem:[%s5398_s23 + $0x168] sm:$0xff]  ;;  %v1919_v38 = vld [vmem:[%s5398_s23 + $0x1f0] sm:$0xff]  ;;  %v4029_v42 = vpack.c.bf16 %v1870_v30, %v1869_v29  ;;  %v4031_v44 = vpack.c.bf16 %v1888_v37, %v1887_v36 }
 0x1c1   : > { %4022 = vmatpush3.bf16.msra.mxu0 %v4021_v12  ;;  %v1920_v39 = vld [vmem:[%s5398_s23 + $0x1f8] sm:$0xff]  ;;  %v2278_v40 = vcombine.high %v2270_v32, %v2270_v32  ;;  %v2277_v41 = vrot.slane %v2263_v33, %v5449_v19  ;;  %v4061_v43 = vpack.c.bf16 %v1902_v35, %v1901_v31  ;;  %v1871_v45 = vld [vmem:[%s5398_s23 + $0x70] sm:$0xff]  ;;  %v1937_v51 = vld [vmem:[%s5398_s23 + $0x280] sm:$0xff] }
 0x1c2   : > { %4024 = vmatprep.subr.bf16.mxu0 %v4023_v15  ;;  %v1872_v46 = vld [vmem:[%s5398_s23 + $0x78] sm:$0xff]  ;;  %v1903_v47 = vld [vmem:[%s5398_s23 + $0x170] sm:$0xff]  ;;  %v4063_v49 = vpack.c.bf16 %v1920_v39, %v1919_v38  ;;  %v1938_v52 = vld [vmem:[%s5398_s23 + $0x288] sm:$0xff] }
 0x1c3   : > { %4054 = vmatpush3.bf16.msra.mxu1 %v4053_v14  ;;  %v2279_v48 = vcombine.high %v2277_v41, %v2277_v41  ;;  %2463 = vmatprep.mubr.f32.mxu0 %v2278_v40  ;;  %v1904_v50 = vld [vmem:[%s5398_s23 + $0x178] sm:$0xff]  ;;  %v1969_v53 = vld [vmem:[%s5398_s23 + $0x380] sm:$0xff]  ;;  %v1970_v54 = vld [vmem:[%s5398_s23 + $0x388] sm:$0xff]  ;;  %v4033_v55 = vpack.c.bf16 %v1872_v46, %v1871_v45  ;;  %v4067_v57 = vpack.c.bf16 %v1938_v52, %v1937_v51 }
 0x1c4   : > { %4056 = vmatprep.subr.bf16.mxu1 %v4055_v20  ;;  %v4065_v56 = vpack.c.bf16 %v1904_v50, %v1903_v47  ;;  %v1921_v58 = vld [vmem:[%s5398_s23 + $0x200] sm:$0xff]  ;;  %v1922_v59 = vld [vmem:[%s5398_s23 + $0x208] sm:$0xff]  ;;  %v4099_v61 = vpack.c.bf16 %v1970_v54, %v1969_v53  ;;  %v1939_v63 = vld [vmem:[%s5398_s23 + $0x290] sm:$0xff] }
 0x1c5   : > { %4026 = vmatpush3.bf16.msra.mxu0 %v4025_v25  ;;  %2533 = vmatprep.mubr.f32.mxu1 %v2279_v48  ;;  %v1953_v60 = vld [vmem:[%s5398_s23 + $0x300] sm:$0xff]  ;;  %v1954_v62 = vld [vmem:[%s5398_s23 + $0x308] sm:$0xff]  ;;  %v1940_v0 = vld [vmem:[%s5398_s23 + $0x298] sm:$0xff]  ;;  %v4069_v3 = vpack.c.bf16 %v1922_v59, %v1921_v58 }
 0x1c6   : > { %4028 = vmatprep.subr.bf16.mxu0 %v4027_v28  ;;  %v1971_v1 = vld [vmem:[%s5398_s23 + $0x390] sm:$0xff]  ;;  %v1972_v2 = vld [vmem:[%s5398_s23 + $0x398] sm:$0xff]  ;;  %v4101_v4 = vpack.c.bf16 %v1954_v62, %v1953_v60  ;;  %v4071_v5 = vpack.c.bf16 %v1940_v0, %v1939_v63  ;;  %v1941_v11 = vld [vmem:[%s5398_s23 + $0x2a0] sm:$0xff] }
 0x1c7   : > { %4058 = vmatpush3.bf16.msra.mxu1 %v4057_v26  ;;  %v1923_v6 = vld [vmem:[%s5398_s23 + $0x210] sm:$0xff]  ;;  %v1924_v7 = vld [vmem:[%s5398_s23 + $0x218] sm:$0xff]  ;;  %v4103_v9 = vpack.c.bf16 %v1972_v2, %v1971_v1  ;;  %v1942_v12 = vld [vmem:[%s5398_s23 + $0x2a8] sm:$0xff] }
 0x1c8   : > { %4060 = vmatprep.subr.bf16.mxu1 %v4059_v34  ;;  %v1955_v8 = vld [vmem:[%s5398_s23 + $0x310] sm:$0xff]  ;;  %v1956_v10 = vld [vmem:[%s5398_s23 + $0x318] sm:$0xff]  ;;  %v1973_v13 = vld [vmem:[%s5398_s23 + $0x3a0] sm:$0xff]  ;;  %v4073_v15 = vpack.c.bf16 %v1924_v7, %v1923_v6  ;;  %v4075_v17 = vpack.c.bf16 %v1942_v12, %v1941_v11 }
 0x1c9   : > { %4030 = vmatpush3.bf16.msra.mxu0 %v4029_v42  ;;  %v1974_v14 = vld [vmem:[%s5398_s23 + $0x3a8] sm:$0xff]  ;;  %v4105_v16 = vpack.c.bf16 %v1956_v10, %v1955_v8  ;;  %v1925_v18 = vld [vmem:[%s5398_s23 + $0x220] sm:$0xff]  ;;  %v1943_v24 = vld [vmem:[%s5398_s23 + $0x2b0] sm:$0xff] }
 0x1ca   : > { %4032 = vmatprep.subr.bf16.mxu0 %v4031_v44  ;;  %v1926_v20 = vld [vmem:[%s5398_s23 + $0x228] sm:$0xff]  ;;  %v1957_v21 = vld [vmem:[%s5398_s23 + $0x320] sm:$0xff]  ;;  %v4107_v22 = vpack.c.bf16 %v1974_v14, %v1973_v13  ;;  %v1944_v25 = vld [vmem:[%s5398_s23 + $0x2b8] sm:$0xff] }
 0x1cb   : > { %4062 = vmatpush3.bf16.msra.mxu1 %v4061_v43  ;;  %v1958_v23 = vld [vmem:[%s5398_s23 + $0x328] sm:$0xff]  ;;  %v1975_v26 = vld [vmem:[%s5398_s23 + $0x3b0] sm:$0xff]  ;;  %v1976_v27 = vld [vmem:[%s5398_s23 + $0x3b8] sm:$0xff]  ;;  %v4077_v28 = vpack.c.bf16 %v1926_v20, %v1925_v18  ;;  %v4079_v31 = vpack.c.bf16 %v1944_v25, %v1943_v24 }
 0x1cc   : > { %4064 = vmatprep.subr.bf16.mxu1 %v4063_v49  ;;  %v1927_v29 = vld [vmem:[%s5398_s23 + $0x230] sm:$0xff]  ;;  %v4109_v30 = vpack.c.bf16 %v1958_v23, %v1957_v21  ;;  %v1960_v34 = vld [vmem:[%s5398_s23 + $0x338] sm:$0xff]  ;;  %v4111_v35 = vpack.c.bf16 %v1976_v27, %v1975_v26  ;;  %v1945_v36 = vld [vmem:[%s5398_s23 + $0x2c0] sm:$0xff] }
 0x1cd   : > { %4034 = vmatpush3.bf16.msra.mxu0 %v4033_v55  ;;  %v1959_v33 = vld [vmem:[%s5398_s23 + $0x330] sm:$0xff]  ;;  %v1946_v37 = vld [vmem:[%s5398_s23 + $0x2c8] sm:$0xff]  ;;  %v1977_v39 = vld [vmem:[%s5398_s23 + $0x3c0] sm:$0xff] }
 0x1ce   : > { %4068 = vmatprep.subr.bf16.mxu0 %v4067_v57  ;;  %v1851_v38 = vld [vmem:[%s5948_s0 + $0x8] sm:$0xff]  ;;  %v4113_v44 = vpack.c.bf16 %v1960_v34, %v1959_v33  ;;  %v4083_v45 = vpack.c.bf16 %v1946_v37, %v1945_v36  ;;  %v1947_v53 = vld [vmem:[%s5398_s23 + $0x2d0] sm:$0xff]  ;;  %v1948_v54 = vld [vmem:[%s5398_s23 + $0x2d8] sm:$0xff] }
 0x1cf   : > { %4066 = vmatpush3.bf16.msra.mxu1 %v4065_v56  ;;  %v1978_v40 = vld [vmem:[%s5398_s23 + $0x3c8] sm:$0xff]  ;;  %v2280_v42 = vcombine.high %v1851_v38, %v1851_v38  ;;  %v1929_v46 = vld [vmem:[%s5398_s23 + $0x240] sm:$0xff]  ;;  %v1979_v55 = vld [vmem:[%s5398_s23 + $0x3d0] sm:$0xff]  ;;  %v4087_v60 = vpack.c.bf16 %v1948_v54, %v1947_v53 }
 0x1d0   : > { %4100 = vmatprep.subr.bf16.mxu1 %v4099_v61  ;;  %2464 = vmatmul.mubr.f32.vlgmr.msra.gmra.mrb[0].mxu0 %v2270_v32  ;;  %v1928_v32 = vld [vmem:[%s5398_s23 + $0x238] sm:$0xff]  ;;  %v1930_v47 = vld [vmem:[%s5398_s23 + $0x248] sm:$0xff]  ;;  %v1961_v48 = vld [vmem:[%s5398_s23 + $0x340] sm:$0xff]  ;;  %v4115_v51 = vpack.c.bf16 %v1978_v40, %v1977_v39 }
 0x1d1   : > { %4070 = vmatpush3.bf16.msra.mxu0 %v4069_v3  ;;  %v4081_v43 = vpack.c.bf16 %v1928_v32, %v1927_v29  ;;  %v5520_v50 = vrot.slane %v2280_v42, %v5449_v19  ;;  %v1962_v52 = vld [vmem:[%s5398_s23 + $0x348] sm:$0xff]  ;;  %v1980_v56 = vld [vmem:[%s5398_s23 + $0x3d8] sm:$0xff]  ;;  %v4085_v58 = vpack.c.bf16 %v1930_v47, %v1929_v46  ;;  %v1931_v61 = vld [vmem:[%s5398_s23 + $0x250] sm:$0xff] }
 0x1d2   : > { %2534 = vmatmul.mubr.f32.vlgmr.msra.gmra.mrb[0].mxu1 %v2277_v41  ;;  %4072 = vmatprep.subr.bf16.mxu0 %v4071_v5  ;;  %v5512_v41 = vrot.slane %v1851_v38, %v5449_v19  ;;  %v4117_v59 = vpack.c.bf16 %v1962_v52, %v1961_v48  ;;  %v1932_v62 = vld [vmem:[%s5398_s23 + $0x258] sm:$0xff]  ;;  %v1963_v63 = vld [vmem:[%s5398_s23 + $0x350] sm:$0xff]  ;;  %v4119_v0 = vpack.c.bf16 %v1980_v56, %v1979_v55  ;;  %v1949_v2 = vld [vmem:[%s5398_s23 + $0x2e0] sm:$0xff] }
 0x1d3   : > { %4102 = vmatpush3.bf16.msra.mxu1 %v4101_v4  ;;  %v2296_v57 = vcombine.high %v5520_v50, %v5520_v50  ;;  %v1964_v1 = vld [vmem:[%s5398_s23 + $0x358] sm:$0xff]  ;;  %v1950_v3 = vld [vmem:[%s5398_s23 + $0x2e8] sm:$0xff]  ;;  %v1981_v4 = vld [vmem:[%s5398_s23 + $0x3e0] sm:$0xff]  ;;  %v4089_v6 = vpack.c.bf16 %v1932_v62, %v1931_v61 }
 0x1d4   : > { %4104 = vmatprep.subr.bf16.mxu1 %v4103_v9  ;;  %v2295_v49 = vcombine.high %v5512_v41, %v5512_v41  ;;  %v1982_v5 = vld [vmem:[%s5398_s23 + $0x3e8] sm:$0xff]  ;;  %v4121_v7 = vpack.c.bf16 %v1964_v1, %v1963_v63  ;;  %v4091_v8 = vpack.c.bf16 %v1950_v3, %v1949_v2  ;;  %v1933_v9 = vld [vmem:[%s5398_s23 + $0x260] sm:$0xff]  ;;  %v1951_v14 = vld [vmem:[%s5398_s23 + $0x2f0] sm:$0xff] }
 0x1d5   : > { %4074 = vmatpush3.bf16.msra.mxu0 %v4073_v15  ;;  %2673 = vmatprep.mubr.f32.mxu1 %v2296_v57  ;;  %v1934_v10 = vld [vmem:[%s5398_s23 + $0x268] sm:$0xff]  ;;  %v1965_v11 = vld [vmem:[%s5398_s23 + $0x360] sm:$0xff]  ;;  %v4123_v12 = vpack.c.bf16 %v1982_v5, %v1981_v4  ;;  %v1952_v15 = vld [vmem:[%s5398_s23 + $0x2f8] sm:$0xff] }
 0x1d6   : > { %4076 = vmatprep.subr.bf16.mxu0 %v4075_v17  ;;  %2603 = vmatprep.mubr.f32.mxu0 %v2295_v49  ;;  %v1966_v13 = vld [vmem:[%s5398_s23 + $0x368] sm:$0xff]  ;;  %v1984_v17 = vld [vmem:[%s5398_s23 + $0x3f8] sm:$0xff]  ;;  %v4093_v18 = vpack.c.bf16 %v1934_v10, %v1933_v9  ;;  %v4095_v21 = vpack.c.bf16 %v1952_v15, %v1951_v14  ;;  %v1967_v24 = vld [vmem:[%s5398_s23 + $0x370] sm:$0xff] }
 0x1d7   : > { %4106 = vmatpush3.bf16.msra.mxu1 %v4105_v16  ;;  %v1983_v16 = vld [vmem:[%s5398_s23 + $0x3f0] sm:$0xff]  ;;  %v4125_v20 = vpack.c.bf16 %v1966_v13, %v1965_v11  ;;  %v1936_v23 = vld [vmem:[%s5398_s23 + $0x278] sm:$0xff]  ;;  %v2001_v27 = vld [vmem:[%s5398_s23 + $0x480] sm:$0xff] }
 0x1d8   : > { %4108 = vmatprep.subr.bf16.mxu1 %v4107_v22  ;;  %v1935_v22 = vld [vmem:[%s5398_s23 + $0x270] sm:$0xff]  ;;  %v4127_v25 = vpack.c.bf16 %v1984_v17, %v1983_v16  ;;  %v1968_v26 = vld [vmem:[%s5398_s23 + $0x378] sm:$0xff]  ;;  %v2033_v29 = vld [vmem:[%s5398_s23 + $0x580] sm:$0xff] }
 0x1d9   : > { %4078 = vmatpush3.bf16.msra.mxu0 %v4077_v28  ;;  %v2002_v28 = vld [vmem:[%s5398_s23 + $0x488] sm:$0xff]  ;;  %v1985_v32 = vld [vmem:[%s5398_s23 + $0x400] sm:$0xff]  ;;  %v4129_v33 = vpack.c.bf16 %v1968_v26, %v1967_v24  ;;  %v2003_v39 = vld [vmem:[%s5398_s23 + $0x490] sm:$0xff] }
 0x1da   : > { %4080 = vmatprep.subr.bf16.mxu0 %v4079_v31  ;;  %v4097_v31 = vpack.c.bf16 %v1936_v23, %v1935_v22  ;;  %v4131_v34 = vpack.c.bf16 %v2002_v28, %v2001_v27  ;;  %v2017_v36 = vld [vmem:[%s5398_s23 + $0x500] sm:$0xff]  ;;  %v2018_v37 = vld [vmem:[%s5398_s23 + $0x508] sm:$0xff]  ;;  %v2004_v40 = vld [vmem:[%s5398_s23 + $0x498] sm:$0xff] }
 0x1db   : > { %4110 = vmatpush3.bf16.msra.mxu1 %v4109_v30  ;;  %v2034_v30 = vld [vmem:[%s5398_s23 + $0x588] sm:$0xff]  ;;  %v2035_v42 = vld [vmem:[%s5398_s23 + $0x590] sm:$0xff]  ;;  %v4135_v47 = vpack.c.bf16 %v2004_v40, %v2003_v39  ;;  %v1988_v49 = vld [vmem:[%s5398_s23 + $0x418] sm:$0xff] }
 0x1dc   : > { %4112 = vmatprep.subr.bf16.mxu1 %v4111_v35  ;;  %v1986_v35 = vld [vmem:[%s5398_s23 + $0x408] sm:$0xff]  ;;  %v4163_v38 = vpack.c.bf16 %v2034_v30, %v2033_v29  ;;  %v1987_v48 = vld [vmem:[%s5398_s23 + $0x410] sm:$0xff]  ;;  %v2020_v55 = vld [vmem:[%s5398_s23 + $0x518] sm:$0xff] }
 0x1dd   : > { %4082 = vmatpush3.bf16.msra.mxu0 %v4081_v43  ;;  %v2036_v43 = vld [vmem:[%s5398_s23 + $0x598] sm:$0xff]  ;;  %v1852_v46 = vld [vmem:[%s5948_s0 + $0x10] sm:$0xff]  ;;  %v2005_v56 = vld [vmem:[%s5398_s23 + $0x4a0] sm:$0xff]  ;;  %v4137_v62 = vpack.c.bf16 %v1988_v49, %v1987_v48 }
 0x1de   : > { %4084 = vmatprep.subr.bf16.mxu0 %v4083_v45  ;;  %v4165_v45 = vpack.c.bf16 %v2018_v37, %v2017_v36  ;;  %v5568_v52 = vrot.slane %v1852_v46, %v5449_v19  ;;  %v2297_v53 = vcombine.high %v1852_v46, %v1852_v46  ;;  %v4167_v54 = vpack.c.bf16 %v2036_v43, %v2035_v42  ;;  %v2006_v57 = vld [vmem:[%s5398_s23 + $0x4a8] sm:$0xff]  ;;  %v2021_v2 = vld [vmem:[%s5398_s23 + $0x520] sm:$0xff]  ;;  %v1992_v13 = vld [vmem:[%s5398_s23 + $0x438] sm:$0xff] }
 0x1df   : > { %4114 = vmatpush3.bf16.msra.mxu1 %v4113_v44  ;;  %v4133_v44 = vpack.c.bf16 %v1986_v35, %v1985_v32  ;;  %v4139_v63 = vpack.c.bf16 %v2006_v57, %v2005_v56  ;;  %v1990_v1 = vld [vmem:[%s5398_s23 + $0x428] sm:$0xff]  ;;  %v2023_v14 = vld [vmem:[%s5398_s23 + $0x530] sm:$0xff]  ;;  %v2024_v16 = vld [vmem:[%s5398_s23 + $0x538] sm:$0xff] }
 0x1e0   : > { %4116 = vmatprep.subr.bf16.mxu1 %v4115_v51  ;;  %v2019_v51 = vld [vmem:[%s5398_s23 + $0x510] sm:$0xff]  ;;  %v5579_v61 = vrot.slane %v2297_v53, %v5449_v19  ;;  %v2022_v5 = vld [vmem:[%s5398_s23 + $0x528] sm:$0xff]  ;;  %v2009_v17 = vld [vmem:[%s5398_s23 + $0x4c0] sm:$0xff]  ;;  %v4177_v23 = vpack.c.bf16 %v2024_v16, %v2023_v14 }
 0x1e1   : > { %4086 = vmatpush3.bf16.msra.mxu0 %v4085_v58  ;;  %v2037_v58 = vld [vmem:[%s5398_s23 + $0x5a0] sm:$0xff]  ;;  %v4173_v10 = vpack.c.bf16 %v2022_v5, %v2021_v2  ;;  %v1994_v26 = vld [vmem:[%s5398_s23 + $0x448] sm:$0xff]  ;;  %v2011_v30 = vld [vmem:[%s5398_s23 + $0x4d0] sm:$0xff] }
 0x1e2   : > { %4088 = vmatprep.subr.bf16.mxu0 %v4087_v60  ;;  %v2312_v60 = vcombine.high %v5568_v52, %v5568_v52  ;;  %v2313_v3 = vcombine.high %v5579_v61, %v5579_v61  ;;  %v2025_v27 = vld [vmem:[%s5398_s23 + $0x540] sm:$0xff]  ;;  %v2026_v29 = vld [vmem:[%s5398_s23 + $0x548] sm:$0xff]  ;;  %v2043_v32 = vld [vmem:[%s5398_s23 + $0x5d0] sm:$0xff] }
 0x1e3   : > { %4118 = vmatpush3.bf16.msra.mxu1 %v4117_v59  ;;  %v2038_v59 = vld [vmem:[%s5398_s23 + $0x5a8] sm:$0xff]  ;;  %v4181_v35 = vpack.c.bf16 %v2026_v29, %v2025_v27  ;;  %v1995_v37 = vld [vmem:[%s5398_s23 + $0x450] sm:$0xff]  ;;  %v2028_v42 = vld [vmem:[%s5398_s23 + $0x558] sm:$0xff] }
 0x1e4   : > { %4120 = vmatprep.subr.bf16.mxu1 %v4119_v0  ;;  %v1989_v0 = vld [vmem:[%s5398_s23 + $0x420] sm:$0xff]  ;;  %v4171_v4 = vpack.c.bf16 %v2038_v59, %v2037_v58  ;;  %v2027_v39 = vld [vmem:[%s5398_s23 + $0x550] sm:$0xff]  ;;  %v2046_v46 = vld [vmem:[%s5398_s23 + $0x5e8] sm:$0xff] }
 0x1e5   : > { %4090 = vmatpush3.bf16.msra.mxu0 %v4089_v6  ;;  %v2008_v6 = vld [vmem:[%s5398_s23 + $0x4b8] sm:$0xff]  ;;  %v4141_v9 = vpack.c.bf16 %v1990_v1, %v1989_v0  ;;  %v2013_v43 = vld [vmem:[%s5398_s23 + $0x4e0] sm:$0xff]  ;;  %v4185_v48 = vpack.c.bf16 %v2028_v42, %v2027_v39  ;;  %v1998_v53 = vld [vmem:[%s5398_s23 + $0x468] sm:$0xff] }
 0x1e6   : > { %4092 = vmatprep.subr.bf16.mxu0 %v4091_v8  ;;  %v2040_v8 = vld [vmem:[%s5398_s23 + $0x5b8] sm:$0xff]  ;;  %v2030_v56 = vld [vmem:[%s5398_s23 + $0x568] sm:$0xff]  ;;  %v2015_v57 = vld [vmem:[%s5398_s23 + $0x4f0] sm:$0xff] }
 0x1e7   : > { %4122 = vmatpush3.bf16.msra.mxu1 %v4121_v7  ;;  %v2039_v7 = vld [vmem:[%s5398_s23 + $0x5b0] sm:$0xff]  ;;  %v2016_v58 = vld [vmem:[%s5398_s23 + $0x4f8] sm:$0xff]  ;;  %v2050_v14 = vld [vmem:[%s5398_s23 + $0x608] sm:$0xff] }
 0x1e8   : > { %4124 = vmatprep.subr.bf16.mxu1 %v4123_v12  ;;  %v1991_v12 = vld [vmem:[%s5398_s23 + $0x430] sm:$0xff]  ;;  %v4175_v15 = vpack.c.bf16 %v2040_v8, %v2039_v7  ;;  %v4159_v0 = vpack.c.bf16 %v2016_v58, %v2015_v57  ;;  %v2000_v2 = vld [vmem:[%s5398_s23 + $0x478] sm:$0xff]  ;;  %v2097_v7 = vld [vmem:[%s5398_s23 + $0x780] sm:$0xff] }
 0x1e9   : > { %4094 = vmatpush3.bf16.msra.mxu0 %v4093_v18  ;;  %v2010_v18 = vld [vmem:[%s5398_s23 + $0x4c8] sm:$0xff]  ;;  %v4145_v22 = vpack.c.bf16 %v1992_v13, %v1991_v12  ;;  %v2047_v59 = vld [vmem:[%s5398_s23 + $0x5f0] sm:$0xff]  ;;  %v2032_v5 = vld [vmem:[%s5398_s23 + $0x578] sm:$0xff] }
 0x1ea   : > { %4096 = vmatprep.subr.bf16.mxu0 %v4095_v21  ;;  %v2042_v21 = vld [vmem:[%s5398_s23 + $0x5c8] sm:$0xff]  ;;  %v4147_v24 = vpack.c.bf16 %v2010_v18, %v2009_v17  ;;  %v1999_v1 = vld [vmem:[%s5398_s23 + $0x470] sm:$0xff]  ;;  %v2049_v13 = vld [vmem:[%s5398_s23 + $0x600] sm:$0xff] }
 0x1eb   : > { %4126 = vmatpush3.bf16.msra.mxu1 %v4125_v20  ;;  %v2041_v20 = vld [vmem:[%s5398_s23 + $0x5c0] sm:$0xff]  ;;  %v2098_v8 = vld [vmem:[%s5398_s23 + $0x788] sm:$0xff]  ;;  %v2067_v18 = vld [vmem:[%s5398_s23 + $0x690] sm:$0xff] }
 0x1ec   : > { %4128 = vmatprep.subr.bf16.mxu1 %v4127_v25  ;;  %v1993_v25 = vld [vmem:[%s5398_s23 + $0x440] sm:$0xff]  ;;  %v4179_v28 = vpack.c.bf16 %v2042_v21, %v2041_v20  ;;  %v4227_v16 = vpack.c.bf16 %v2098_v8, %v2097_v7  ;;  %v2082_v17 = vld [vmem:[%s5398_s23 + $0x708] sm:$0xff]  ;;  %v2068_v20 = vld [vmem:[%s5398_s23 + $0x698] sm:$0xff] }
 0x1ed   : > { %4098 = vmatpush3.bf16.msra.mxu0 %v4097_v31  ;;  %v2012_v31 = vld [vmem:[%s5398_s23 + $0x4d8] sm:$0xff]  ;;  %v4199_v27 = vpack.c.bf16 %v2068_v20, %v2067_v18  ;;  %v2087_v57 = vld [vmem:[%s5398_s23 + $0x730] sm:$0xff]  ;;  %v2077_v20 = vld [vmem:[%s5398_s23 + $0x6e0] sm:$0xff] }
 0x1ee   : > { %4132 = vmatprep.subr.bf16.mxu0 %v4131_v34  ;;  %v4149_v34 = vpack.c.bf16 %v1994_v26, %v1993_v25  ;;  %v4151_v36 = vpack.c.bf16 %v2012_v31, %v2011_v30  ;;  %v4197_v25 = vpack.c.bf16 %v2050_v14, %v2049_v13  ;;  %v2052_v29 = vld [vmem:[%s5398_s23 + $0x618] sm:$0xff]  ;;  %v2083_v30 = vld [vmem:[%s5398_s23 + $0x710] sm:$0xff] }
 0x1ef   : > { %4130 = vmatpush3.bf16.msra.mxu1 %v4129_v33  ;;  %v2044_v33 = vld [vmem:[%s5398_s23 + $0x5d8] sm:$0xff]  ;;  %v2075_v7 = vld [vmem:[%s5398_s23 + $0x6d0] sm:$0xff] }
 0x1f0   : > { %4164 = vmatprep.subr.bf16.mxu1 %v4163_v38  ;;  %2604 = vmatmul.mubr.f32.vlgmr.msra.gmra.mrb[2].mxu0 %v5512_v41  ;;  %v4169_v41 = vpack.c.bf16 %v2020_v55, %v2019_v51  ;;  %v1996_v38 = vld [vmem:[%s5398_s23 + $0x458] sm:$0xff]  ;;  %v4183_v40 = vpack.c.bf16 %v2044_v33, %v2043_v32  ;;  %v1997_v51 = vld [vmem:[%s5398_s23 + $0x460] sm:$0xff]  ;;  %v2059_v14 = vld [vmem:[%s5398_s23 + $0x650] sm:$0xff] }
 0x1f1   : > { %4134 = vmatpush3.bf16.msra.mxu0 %v4133_v44  ;;  %2743 = vmatprep.mubr.f32.mxu0 %v2312_v60  ;;  %v2014_v44 = vld [vmem:[%s5398_s23 + $0x4e8] sm:$0xff]  ;;  %v2048_v60 = vld [vmem:[%s5398_s23 + $0x5f8] sm:$0xff]  ;;  %v2069_v33 = vld [vmem:[%s5398_s23 + $0x6a0] sm:$0xff] }
 0x1f2   : > { %2674 = vmatmul.mubr.f32.vlgmr.msra.gmra.mrb[2].mxu1 %v5520_v50  ;;  %4136 = vmatprep.subr.bf16.mxu0 %v4135_v47  ;;  %v2007_v50 = vld [vmem:[%s5398_s23 + $0x4b0] sm:$0xff]  ;;  %v4153_v47 = vpack.c.bf16 %v1996_v38, %v1995_v37  ;;  %v4155_v49 = vpack.c.bf16 %v2014_v44, %v2013_v43  ;;  %v2084_v32 = vld [vmem:[%s5398_s23 + $0x718] sm:$0xff]  ;;  %v2102_v37 = vld [vmem:[%s5398_s23 + $0x7a8] sm:$0xff] }
 0x1f3   : > { %4166 = vmatpush3.bf16.msra.mxu1 %v4165_v45  ;;  %2813 = vmatprep.mubr.f32.mxu1 %v2313_v3  ;;  %v4143_v11 = vpack.c.bf16 %v2008_v6, %v2007_v50  ;;  %v2045_v45 = vld [vmem:[%s5398_s23 + $0x5e0] sm:$0xff]  ;;  %v2031_v3 = vld [vmem:[%s5398_s23 + $0x570] sm:$0xff]  ;;  %v2066_v6 = vld [vmem:[%s5398_s23 + $0x688] sm:$0xff] }
 0x1f4   : > { %4168 = vmatprep.subr.bf16.mxu1 %v4167_v54  ;;  %v2029_v54 = vld [vmem:[%s5398_s23 + $0x560] sm:$0xff]  ;;  %v4187_v55 = vpack.c.bf16 %v2046_v46, %v2045_v45  ;;  %v2086_v46 = vld [vmem:[%s5398_s23 + $0x728] sm:$0xff]  ;;  %v2076_v8 = vld [vmem:[%s5398_s23 + $0x6d8] sm:$0xff] }
 0x1f5   : > { %4138 = vmatpush3.bf16.msra.mxu0 %v4137_v62  ;;  %v4157_v62 = vpack.c.bf16 %v1998_v53, %v1997_v51  ;;  %v2065_v50 = vld [vmem:[%s5398_s23 + $0x680] sm:$0xff]  ;;  %v4215_v13 = vpack.c.bf16 %v2076_v8, %v2075_v7  ;;  %v2092_v18 = vld [vmem:[%s5398_s23 + $0x758] sm:$0xff]  ;;  %v2147_v7 = vld [vmem:[%s5398_s23 + $0x910] sm:$0xff] }
 0x1f6   : > { %4140 = vmatprep.subr.bf16.mxu0 %v4139_v63  ;;  %v4189_v63 = vpack.c.bf16 %v2030_v56, %v2029_v54  ;;  %v4195_v12 = vpack.c.bf16 %v2066_v6, %v2065_v50  ;;  %v2053_v43 = vld [vmem:[%s5398_s23 + $0x620] sm:$0xff]  ;;  %v2056_v56 = vld [vmem:[%s5398_s23 + $0x638] sm:$0xff]  ;;  %v2090_v6 = vld [vmem:[%s5398_s23 + $0x748] sm:$0xff] }
 0x1f7   : > { %4170 = vmatpush3.bf16.msra.mxu1 %v4169_v41  ;;  %v1853_v41 = vld [vmem:[%s5948_s0 + $0x18] sm:$0xff]  ;;  %v2085_v44 = vld [vmem:[%s5398_s23 + $0x720] sm:$0xff] }
 0x1f8   : > { %4172 = vmatprep.subr.bf16.mxu1 %v4171_v4  ;;  %v4191_v4 = vpack.c.bf16 %v2048_v60, %v2047_v59  ;;  %v5642_v21 = vrot.slane %v1853_v41, %v5449_v19  ;;  %v4237_v53 = vpack.c.bf16 %v2086_v46, %v2085_v44  ;;  %v2088_v59 = vld [vmem:[%s5398_s23 + $0x738] sm:$0xff]  ;;  %v2073_v60 = vld [vmem:[%s5398_s23 + $0x6c0] sm:$0xff]  ;;  %v2095_v44 = vld [vmem:[%s5398_s23 + $0x770] sm:$0xff] }
 0x1f9   : > { %4142 = vmatpush3.bf16.msra.mxu0 %v4141_v9  ;;  %v2314_v9 = vcombine.high %v1853_v41, %v1853_v41  ;;  %v2105_v41 = vld [vmem:[%s5398_s23 + $0x7c0] sm:$0xff]  ;;  %v2096_v46 = vld [vmem:[%s5398_s23 + $0x778] sm:$0xff] }
 0x1fa   : > { %4144 = vmatprep.subr.bf16.mxu0 %v4143_v11  ;;  %v4193_v11 = vpack.c.bf16 %v2032_v5, %v2031_v3  ;;  %v2057_v3 = vld [vmem:[%s5398_s23 + $0x640] sm:$0xff] }
 0x1fb   : > { %4174 = vmatpush3.bf16.msra.mxu1 %v4173_v10  ;;  %v4161_v10 = vpack.c.bf16 %v2000_v2, %v1999_v1  ;;  %v4241_v1 = vpack.c.bf16 %v2088_v59, %v2087_v57  ;;  %v2089_v5 = vld [vmem:[%s5398_s23 + $0x740] sm:$0xff]  ;;  %v2114_v57 = vld [vmem:[%s5398_s23 + $0x808] sm:$0xff] }
 0x1fc   : > { %4176 = vmatprep.subr.bf16.mxu1 %v4175_v15  ;;  %v2081_v15 = vld [vmem:[%s5398_s23 + $0x700] sm:$0xff] }
 0x1fd   : > { %4146 = vmatpush3.bf16.msra.mxu0 %v4145_v22  ;;  %v2099_v22 = vld [vmem:[%s5398_s23 + $0x790] sm:$0xff]  ;;  %v4229_v26 = vpack.c.bf16 %v2082_v17, %v2081_v15  ;;  %v2060_v15 = vld [vmem:[%s5398_s23 + $0x658] sm:$0xff] }
 0x1fe   : > { %4148 = vmatprep.subr.bf16.mxu0 %v4147_v24  ;;  %v5647_v24 = vrot.slane %v2314_v9, %v5449_v19  ;;  %v2107_v9 = vld [vmem:[%s5398_s23 + $0x7d0] sm:$0xff] }
 0x1ff   : > { %4178 = vmatpush3.bf16.msra.mxu1 %v4177_v23  ;;  %v2100_v23 = vld [vmem:[%s5398_s23 + $0x798] sm:$0xff] }
 0x200   : > { %4180 = vmatprep.subr.bf16.mxu1 %v4179_v28  ;;  %v2051_v28 = vld [vmem:[%s5398_s23 + $0x610] sm:$0xff]  ;;  %v4231_v31 = vpack.c.bf16 %v2100_v23, %v2099_v22  ;;  %v2330_v38 = vcombine.high %v5647_v24, %v5647_v24  ;;  %v2078_v22 = vld [vmem:[%s5398_s23 + $0x6e8] sm:$0xff]  ;;  %v2109_v23 = vld [vmem:[%s5398_s23 + $0x7e0] sm:$0xff] }
 0x201   : > { %4150 = vmatpush3.bf16.msra.mxu0 %v4149_v34  ;;  %v2070_v34 = vld [vmem:[%s5398_s23 + $0x6a8] sm:$0xff]  ;;  %v4201_v39 = vpack.c.bf16 %v2052_v29, %v2051_v28  ;;  %v4219_v28 = vpack.c.bf16 %v2078_v22, %v2077_v20  ;;  %v2061_v29 = vld [vmem:[%s5398_s23 + $0x660] sm:$0xff] }
 0x202   : > { %4152 = vmatprep.subr.bf16.mxu0 %v4151_v36  ;;  %v2101_v36 = vld [vmem:[%s5398_s23 + $0x7a0] sm:$0xff]  ;;  %v4203_v42 = vpack.c.bf16 %v2070_v34, %v2069_v33  ;;  %v2094_v33 = vld [vmem:[%s5398_s23 + $0x768] sm:$0xff]  ;;  %v2079_v34 = vld [vmem:[%s5398_s23 + $0x6f0] sm:$0xff] }
 0x203   : > { %4182 = vmatpush3.bf16.msra.mxu1 %v4181_v35  ;;  %v2329_v35 = vcombine.high %v5642_v21, %v5642_v21  ;;  %v4235_v45 = vpack.c.bf16 %v2102_v37, %v2101_v36  ;;  %v2111_v36 = vld [vmem:[%s5398_s23 + $0x7f0] sm:$0xff]  ;;  %v2112_v37 = vld [vmem:[%s5398_s23 + $0x7f8] sm:$0xff]  ;;  %v2117_v20 = vld [vmem:[%s5398_s23 + $0x820] sm:$0xff] }
 0x204   : > { %4184 = vmatprep.subr.bf16.mxu1 %v4183_v40  ;;  %v4233_v40 = vpack.c.bf16 %v2084_v32, %v2083_v30  ;;  %v2062_v30 = vld [vmem:[%s5398_s23 + $0x668] sm:$0xff]  ;;  %v2149_v22 = vld [vmem:[%s5398_s23 + $0x920] sm:$0xff] }
 0x205   : > { %4154 = vmatpush3.bf16.msra.mxu0 %v4153_v47  ;;  %v2071_v47 = vld [vmem:[%s5398_s23 + $0x6b0] sm:$0xff] }
 0x206   : > { %4156 = vmatprep.subr.bf16.mxu0 %v4155_v49  ;;  %v2104_v49 = vld [vmem:[%s5398_s23 + $0x7b8] sm:$0xff] }
 0x207   : > { %4186 = vmatpush3.bf16.msra.mxu1 %v4185_v48  ;;  %v2072_v48 = vld [vmem:[%s5398_s23 + $0x6b8] sm:$0xff] }
 0x208   : > { %4188 = vmatprep.subr.bf16.mxu1 %v4187_v55  ;;  %v4207_v54 = vpack.c.bf16 %v2072_v48, %v2071_v47  ;;  %v2055_v55 = vld [vmem:[%s5398_s23 + $0x630] sm:$0xff]  ;;  %v2129_v47 = vld [vmem:[%s5398_s23 + $0x880] sm:$0xff]  ;;  %v2130_v48 = vld [vmem:[%s5398_s23 + $0x888] sm:$0xff] }
 0x209   : > { %4158 = vmatpush3.bf16.msra.mxu0 %v4157_v62  ;;  %v2074_v62 = vld [vmem:[%s5398_s23 + $0x6c8] sm:$0xff] }
 0x20a   : > { %4160 = vmatprep.subr.bf16.mxu0 %v4159_v0  ;;  %v4209_v0 = vpack.c.bf16 %v2056_v56, %v2055_v55  ;;  %v4211_v2 = vpack.c.bf16 %v2074_v62, %v2073_v60  ;;  %v4259_v55 = vpack.c.bf16 %v2130_v48, %v2129_v47  ;;  %v2113_v56 = vld [vmem:[%s5398_s23 + $0x800] sm:$0xff]  ;;  %v2146_v60 = vld [vmem:[%s5398_s23 + $0x908] sm:$0xff]  ;;  %v2131_v62 = vld [vmem:[%s5398_s23 + $0x890] sm:$0xff] }
 0x20b   : > { %4190 = vmatpush3.bf16.msra.mxu1 %v4189_v63  ;;  %v2106_v63 = vld [vmem:[%s5398_s23 + $0x7c8] sm:$0xff] }
 0x20c   : > { %4192 = vmatprep.subr.bf16.mxu1 %v4191_v4  ;;  %v2058_v4 = vld [vmem:[%s5398_s23 + $0x648] sm:$0xff]  ;;  %v4243_v50 = vpack.c.bf16 %v2106_v63, %v2105_v41  ;;  %v2132_v41 = vld [vmem:[%s5398_s23 + $0x898] sm:$0xff] }
 0x20d   : > { %4162 = vmatpush3.bf16.msra.mxu0 %v4161_v10  ;;  %v2108_v10 = vld [vmem:[%s5398_s23 + $0x7d8] sm:$0xff]  ;;  %v2154_v48 = vld [vmem:[%s5398_s23 + $0x948] sm:$0xff] }
 0x20e   : > { %4196 = vmatprep.subr.bf16.mxu0 %v4195_v12  ;;  %v4245_v12 = vpack.c.bf16 %v2090_v6, %v2089_v5  ;;  %v4247_v17 = vpack.c.bf16 %v2108_v10, %v2107_v9  ;;  %v4263_v5 = vpack.c.bf16 %v2132_v41, %v2131_v62  ;;  %v2116_v6 = vld [vmem:[%s5398_s23 + $0x818] sm:$0xff]  ;;  %v2133_v10 = vld [vmem:[%s5398_s23 + $0x8a0] sm:$0xff] }
 0x20f   : > { %4194 = vmatpush3.bf16.msra.mxu1 %v4193_v11  ;;  %v4213_v11 = vpack.c.bf16 %v2058_v4, %v2057_v3  ;;  %v4261_v3 = vpack.c.bf16 %v2114_v57, %v2113_v56  ;;  %v2148_v9 = vld [vmem:[%s5398_s23 + $0x918] sm:$0xff]  ;;  %v2123_v57 = vld [vmem:[%s5398_s23 + $0x850] sm:$0xff]  ;;  %v2141_v41 = vld [vmem:[%s5398_s23 + $0x8e0] sm:$0xff] }
 0x210   : > { %4228 = vmatprep.subr.bf16.mxu1 %v4227_v16  ;;  %2744 = vmatmul.mubr.f32.vlgmr.msra.gmra.mrb[4].mxu0 %v5568_v52  ;;  %v2054_v52 = vld [vmem:[%s5398_s23 + $0x628] sm:$0xff]  ;;  %v2091_v16 = vld [vmem:[%s5398_s23 + $0x750] sm:$0xff]  ;;  %v2156_v62 = vld [vmem:[%s5398_s23 + $0x958] sm:$0xff] }
 0x211   : > { %4198 = vmatpush3.bf16.msra.mxu0 %v4197_v25  ;;  %2883 = vmatprep.mubr.f32.mxu0 %v2329_v35  ;;  %v4205_v51 = vpack.c.bf16 %v2054_v52, %v2053_v43  ;;  %v2110_v25 = vld [vmem:[%s5398_s23 + $0x7e8] sm:$0xff]  ;;  %v2080_v35 = vld [vmem:[%s5398_s23 + $0x6f8] sm:$0xff]  ;;  %v2063_v43 = vld [vmem:[%s5398_s23 + $0x670] sm:$0xff] }
 0x212   : > { %2814 = vmatmul.mubr.f32.vlgmr.msra.gmra.mrb[4].mxu1 %v5579_v61  ;;  %4200 = vmatprep.subr.bf16.mxu0 %v4199_v27  ;;  %v2103_v61 = vld [vmem:[%s5398_s23 + $0x7b0] sm:$0xff]  ;;  %v4249_v27 = vpack.c.bf16 %v2092_v18, %v2091_v16  ;;  %v4251_v32 = vpack.c.bf16 %v2110_v25, %v2109_v23  ;;  %v2064_v52 = vld [vmem:[%s5398_s23 + $0x678] sm:$0xff]  ;;  %v2150_v25 = vld [vmem:[%s5398_s23 + $0x928] sm:$0xff] }
 0x213   : > { %4230 = vmatpush3.bf16.msra.mxu1 %v4229_v26  ;;  %2953 = vmatprep.mubr.f32.mxu1 %v2330_v38  ;;  %v4239_v58 = vpack.c.bf16 %v2104_v49, %v2103_v61  ;;  %v4217_v26 = vpack.c.bf16 %v2060_v15, %v2059_v14  ;;  %v4221_v38 = vpack.c.bf16 %v2062_v30, %v2061_v29  ;;  %v2161_v61 = vld [vmem:[%s5398_s23 + $0x980] sm:$0xff]  ;;  %v2162_v49 = vld [vmem:[%s5398_s23 + $0x988] sm:$0xff] }
 0x214   : > { %4232 = vmatprep.subr.bf16.mxu1 %v4231_v31  ;;  %v2093_v31 = vld [vmem:[%s5398_s23 + $0x760] sm:$0xff]  ;;  %v4291_v59 = vpack.c.bf16 %v2162_v49, %v2161_v61  ;;  %v2166_v14 = vld [vmem:[%s5398_s23 + $0x9a8] sm:$0xff]  ;;  %v4301_v30 = vpack.c.bf16 %v2150_v25, %v2149_v22  ;;  %v2139_v61 = vld [vmem:[%s5398_s23 + $0x8d0] sm:$0xff] }
 0x215   : > { %4202 = vmatpush3.bf16.msra.mxu0 %v4201_v39  ;;  %v1854_v39 = vld [vmem:[%s5948_s0 + $0x20] sm:$0xff]  ;;  %v2159_v22 = vld [vmem:[%s5398_s23 + $0x970] sm:$0xff] }
 0x216   : > { %4204 = vmatprep.subr.bf16.mxu0 %v4203_v42  ;;  %v4223_v42 = vpack.c.bf16 %v2080_v35, %v2079_v34  ;;  %v5721_v63 = vrot.slane %v1854_v39, %v5449_v19  ;;  %v2151_v34 = vld [vmem:[%s5398_s23 + $0x930] sm:$0xff]  ;;  %v2140_v49 = vld [vmem:[%s5398_s23 + $0x8d8] sm:$0xff] }
 0x217   : > { %4234 = vmatpush3.bf16.msra.mxu1 %v4233_v40  ;;  %v4253_v40 = vpack.c.bf16 %v2094_v33, %v2093_v31  ;;  %v2120_v33 = vld [vmem:[%s5398_s23 + $0x838] sm:$0xff]  ;;  %v4279_v56 = vpack.c.bf16 %v2140_v49, %v2139_v61  ;;  %v2211_v61 = vld [vmem:[%s5398_s23 + $0xb10] sm:$0xff] }
 0x218   : > { %4236 = vmatprep.subr.bf16.mxu1 %v4235_v45  ;;  %v4255_v45 = vpack.c.bf16 %v2112_v37, %v2111_v36  ;;  %v2152_v36 = vld [vmem:[%s5398_s23 + $0x938] sm:$0xff]  ;;  %v2137_v37 = vld [vmem:[%s5398_s23 + $0x8c0] sm:$0xff] }
 0x219   : > { %4206 = vmatpush3.bf16.msra.mxu0 %v4205_v51  ;;  %v2331_v51 = vcombine.high %v1854_v39, %v1854_v39  ;;  %v2169_v39 = vld [vmem:[%s5398_s23 + $0x9c0] sm:$0xff]  ;;  %v2160_v25 = vld [vmem:[%s5398_s23 + $0x978] sm:$0xff] }
 0x21a   : > { %4208 = vmatprep.subr.bf16.mxu0 %v4207_v54  ;;  %v4257_v54 = vpack.c.bf16 %v2096_v46, %v2095_v44  ;;  %v2121_v44 = vld [vmem:[%s5398_s23 + $0x840] sm:$0xff] }
 0x21b   : > { %4238 = vmatpush3.bf16.msra.mxu1 %v4237_v53  ;;  %v4225_v53 = vpack.c.bf16 %v2064_v52, %v2063_v43  ;;  %v4305_v43 = vpack.c.bf16 %v2152_v36, %v2151_v34  ;;  %v2153_v46 = vld [vmem:[%s5398_s23 + $0x940] sm:$0xff]  ;;  %v2178_v34 = vld [vmem:[%s5398_s23 + $0xa08] sm:$0xff] }
 0x21c   : > { %4240 = vmatprep.subr.bf16.mxu1 %v4239_v58  ;;  %v2145_v58 = vld [vmem:[%s5398_s23 + $0x900] sm:$0xff] }
 0x21d   : > { %4210 = vmatpush3.bf16.msra.mxu0 %v4209_v0  ;;  %v2163_v0 = vld [vmem:[%s5398_s23 + $0x990] sm:$0xff]  ;;  %v4293_v4 = vpack.c.bf16 %v2146_v60, %v2145_v58  ;;  %v2124_v58 = vld [vmem:[%s5398_s23 + $0x858] sm:$0xff] }
 0x21e   : > { %4212 = vmatprep.subr.bf16.mxu0 %v4211_v2  ;;  %v5726_v2 = vrot.slane %v2331_v51, %v5449_v19  ;;  %v2171_v51 = vld [vmem:[%s5398_s23 + $0x9d0] sm:$0xff] }
 0x21f   : > { %4242 = vmatpush3.bf16.msra.mxu1 %v4241_v1  ;;  %v2164_v1 = vld [vmem:[%s5398_s23 + $0x998] sm:$0xff] }
 0x220   : > { %4244 = vmatprep.subr.bf16.mxu1 %v4243_v50  ;;  %v2115_v50 = vld [vmem:[%s5398_s23 + $0x810] sm:$0xff]  ;;  %v4295_v8 = vpack.c.bf16 %v2164_v1, %v2163_v0  ;;  %v2347_v15 = vcombine.high %v5726_v2, %v5726_v2  ;;  %v2142_v0 = vld [vmem:[%s5398_s23 + $0x8e8] sm:$0xff]  ;;  %v2173_v1 = vld [vmem:[%s5398_s23 + $0x9e0] sm:$0xff] }
 0x221   : > { %4214 = vmatpush3.bf16.msra.mxu0 %v4213_v11  ;;  %v2134_v11 = vld [vmem:[%s5398_s23 + $0x8a8] sm:$0xff]  ;;  %v4265_v16 = vpack.c.bf16 %v2116_v6, %v2115_v50  ;;  %v4283_v50 = vpack.c.bf16 %v2142_v0, %v2141_v41  ;;  %v2125_v6 = vld [vmem:[%s5398_s23 + $0x860] sm:$0xff] }
 0x222   : > { %4216 = vmatprep.subr.bf16.mxu0 %v4215_v13  ;;  %v2165_v13 = vld [vmem:[%s5398_s23 + $0x9a0] sm:$0xff]  ;;  %v4267_v18 = vpack.c.bf16 %v2134_v11, %v2133_v10  ;;  %v2158_v10 = vld [vmem:[%s5398_s23 + $0x968] sm:$0xff]  ;;  %v2143_v11 = vld [vmem:[%s5398_s23 + $0x8f0] sm:$0xff] }
 0x223   : > { %4246 = vmatpush3.bf16.msra.mxu1 %v4245_v12  ;;  %v2346_v12 = vcombine.high %v5721_v63, %v5721_v63  ;;  %v4299_v23 = vpack.c.bf16 %v2166_v14, %v2165_v13  ;;  %v2175_v13 = vld [vmem:[%s5398_s23 + $0x9f0] sm:$0xff]  ;;  %v2176_v14 = vld [vmem:[%s5398_s23 + $0x9f8] sm:$0xff]  ;;  %v2213_v41 = vld [vmem:[%s5398_s23 + $0xb20] sm:$0xff] }
 0x224   : > { %4248 = vmatprep.subr.bf16.mxu1 %v4247_v17  ;;  %v4297_v17 = vpack.c.bf16 %v2148_v9, %v2147_v7  ;;  %v2126_v7 = vld [vmem:[%s5398_s23 + $0x868] sm:$0xff] }
 0x225   : > { %4218 = vmatpush3.bf16.msra.mxu0 %v4217_v26  ;;  %v2135_v26 = vld [vmem:[%s5398_s23 + $0x8b0] sm:$0xff] }
 0x226   : > { %4220 = vmatprep.subr.bf16.mxu0 %v4219_v28  ;;  %v2168_v28 = vld [vmem:[%s5398_s23 + $0x9b8] sm:$0xff] }
 0x227   : > { %4250 = vmatpush3.bf16.msra.mxu1 %v4249_v27  ;;  %v2136_v27 = vld [vmem:[%s5398_s23 + $0x8b8] sm:$0xff] }
 0x228   : > { %4252 = vmatprep.subr.bf16.mxu1 %v4251_v32  ;;  %v4271_v31 = vpack.c.bf16 %v2136_v27, %v2135_v26  ;;  %v2119_v32 = vld [vmem:[%s5398_s23 + $0x830] sm:$0xff]  ;;  %v2193_v26 = vld [vmem:[%s5398_s23 + $0xa80] sm:$0xff]  ;;  %v2194_v27 = vld [vmem:[%s5398_s23 + $0xa88] sm:$0xff] }
 0x229   : > { %4222 = vmatpush3.bf16.msra.mxu0 %v4221_v38  ;;  %v2138_v38 = vld [vmem:[%s5398_s23 + $0x8c8] sm:$0xff] }
 0x22a   : > { %4224 = vmatprep.subr.bf16.mxu0 %v4223_v42  ;;  %v4273_v42 = vpack.c.bf16 %v2120_v33, %v2119_v32  ;;  %v4275_v52 = vpack.c.bf16 %v2138_v38, %v2137_v37  ;;  %v4323_v32 = vpack.c.bf16 %v2194_v27, %v2193_v26  ;;  %v2177_v33 = vld [vmem:[%s5398_s23 + $0xa00] sm:$0xff]  ;;  %v2210_v37 = vld [vmem:[%s5398_s23 + $0xb08] sm:$0xff]  ;;  %v2195_v38 = vld [vmem:[%s5398_s23 + $0xa90] sm:$0xff] }
 0x22b   : > { %4254 = vmatpush3.bf16.msra.mxu1 %v4253_v40  ;;  %v2170_v40 = vld [vmem:[%s5398_s23 + $0x9c8] sm:$0xff]  ;;  %v2203_v27 = vld [vmem:[%s5398_s23 + $0xad0] sm:$0xff] }
 0x22c   : > { %4256 = vmatprep.subr.bf16.mxu1 %v4255_v45  ;;  %v2122_v45 = vld [vmem:[%s5398_s23 + $0x848] sm:$0xff]  ;;  %v4307_v47 = vpack.c.bf16 %v2170_v40, %v2169_v39  ;;  %v2196_v39 = vld [vmem:[%s5398_s23 + $0xa98] sm:$0xff] }
 0x22d   : > { %4226 = vmatpush3.bf16.msra.mxu0 %v4225_v53  ;;  %v2172_v53 = vld [vmem:[%s5398_s23 + $0x9d8] sm:$0xff]  ;;  %v2218_v26 = vld [vmem:[%s5398_s23 + $0xb48] sm:$0xff] }
 0x22e   : > { %4260 = vmatprep.subr.bf16.mxu0 %v4259_v55  ;;  %v4309_v55 = vpack.c.bf16 %v2154_v48, %v2153_v46  ;;  %v4311_v60 = vpack.c.bf16 %v2172_v53, %v2171_v51  ;;  %v4327_v46 = vpack.c.bf16 %v2196_v39, %v2195_v38  ;;  %v2180_v48 = vld [vmem:[%s5398_s23 + $0xa18] sm:$0xff]  ;;  %v2197_v53 = vld [vmem:[%s5398_s23 + $0xaa0] sm:$0xff]  ;;  %v2206_v39 = vld [vmem:[%s5398_s23 + $0xae8] sm:$0xff] }
 0x22f   : > { %4258 = vmatpush3.bf16.msra.mxu1 %v4257_v54  ;;  %v4277_v54 = vpack.c.bf16 %v2122_v45, %v2121_v44  ;;  %v4325_v44 = vpack.c.bf16 %v2178_v34, %v2177_v33  ;;  %v2212_v51 = vld [vmem:[%s5398_s23 + $0xb18] sm:$0xff]  ;;  %v2187_v33 = vld [vmem:[%s5398_s23 + $0xa50] sm:$0xff]  ;;  %v2205_v38 = vld [vmem:[%s5398_s23 + $0xae0] sm:$0xff] }
 0x230   : > { %4292 = vmatprep.subr.bf16.mxu1 %v4291_v59  ;;  %2884 = vmatmul.mubr.f32.vlgmr.msra.gmra.mrb[6].mxu0 %v5642_v21  ;;  %v2118_v21 = vld [vmem:[%s5398_s23 + $0x828] sm:$0xff]  ;;  %v2155_v59 = vld [vmem:[%s5398_s23 + $0x950] sm:$0xff]  ;;  %v2188_v34 = vld [vmem:[%s5398_s23 + $0xa58] sm:$0xff] }
 0x231   : > { %4262 = vmatpush3.bf16.msra.mxu0 %v4261_v3  ;;  %3023 = vmatprep.mubr.f32.mxu0 %v2346_v12  ;;  %v4269_v29 = vpack.c.bf16 %v2118_v21, %v2117_v20  ;;  %v2174_v3 = vld [vmem:[%s5398_s23 + $0x9e8] sm:$0xff]  ;;  %v2144_v12 = vld [vmem:[%s5398_s23 + $0x8f8] sm:$0xff]  ;;  %v2127_v20 = vld [vmem:[%s5398_s23 + $0x870] sm:$0xff] }
 0x232   : > { %2954 = vmatmul.mubr.f32.vlgmr.msra.gmra.mrb[6].mxu1 %v5647_v24  ;;  %4264 = vmatprep.subr.bf16.mxu0 %v4263_v5  ;;  %v2167_v24 = vld [vmem:[%s5398_s23 + $0x9b0] sm:$0xff]  ;;  %v4313_v5 = vpack.c.bf16 %v2156_v62, %v2155_v59  ;;  %v4315_v9 = vpack.c.bf16 %v2174_v3, %v2173_v1  ;;  %v2128_v21 = vld [vmem:[%s5398_s23 + $0x878] sm:$0xff]  ;;  %v4361_v59 = vpack.c.bf16 %v2212_v51, %v2211_v61  ;;  %v2181_v62 = vld [vmem:[%s5398_s23 + $0xa20] sm:$0xff] }
 0x233   : > { %4294 = vmatpush3.bf16.msra.mxu1 %v4293_v4  ;;  %3093 = vmatprep.mubr.f32.mxu1 %v2347_v15  ;;  %v4303_v35 = vpack.c.bf16 %v2168_v28, %v2167_v24  ;;  %v4281_v4 = vpack.c.bf16 %v2124_v58, %v2123_v57  ;;  %v4285_v15 = vpack.c.bf16 %v2126_v7, %v2125_v6  ;;  %v2225_v24 = vld [vmem:[%s5398_s23 + $0xb80] sm:$0xff]  ;;  %v2226_v28 = vld [vmem:[%s5398_s23 + $0xb88] sm:$0xff]  ;;  %v2199_v3 = vld [vmem:[%s5398_s23 + $0xab0] sm:$0xff] }
 0x234   : > { %4296 = vmatprep.subr.bf16.mxu1 %v4295_v8  ;;  %v2157_v8 = vld [vmem:[%s5398_s23 + $0x960] sm:$0xff]  ;;  %v4355_v36 = vpack.c.bf16 %v2226_v28, %v2225_v24  ;;  %v2214_v1 = vld [vmem:[%s5398_s23 + $0xb28] sm:$0xff]  ;;  %v2204_v24 = vld [vmem:[%s5398_s23 + $0xad8] sm:$0xff] }
 0x235   : > { %4266 = vmatpush3.bf16.msra.mxu0 %v4265_v16  ;;  %v1855_v16 = vld [vmem:[%s5948_s0 + $0x28] sm:$0xff]  ;;  %v4365_v6 = vpack.c.bf16 %v2214_v1, %v2213_v41  ;;  %v2235_v28 = vld [vmem:[%s5398_s23 + $0xbd0] sm:$0xff]  ;;  %v2224_v41 = vld [vmem:[%s5398_s23 + $0xb78] sm:$0xff] }
 0x236   : > { %4268 = vmatprep.subr.bf16.mxu0 %v4267_v18  ;;  %v4287_v18 = vpack.c.bf16 %v2144_v12, %v2143_v11  ;;  %v5800_v40 = vrot.slane %v1855_v16, %v5449_v19  ;;  %v2216_v12 = vld [vmem:[%s5398_s23 + $0xb38] sm:$0xff]  ;;  %v2221_v61 = vld [vmem:[%s5398_s23 + $0xb60] sm:$0xff]  ;;  %v2222_v51 = vld [vmem:[%s5398_s23 + $0xb68] sm:$0xff] }
 0x237   : > { %4298 = vmatpush3.bf16.msra.mxu1 %v4297_v17  ;;  %v4317_v17 = vpack.c.bf16 %v2158_v10, %v2157_v8  ;;  %v2183_v8 = vld [vmem:[%s5398_s23 + $0xa30] sm:$0xff] }
 0x238   : > { %4300 = vmatprep.subr.bf16.mxu1 %v4299_v23  ;;  %v4319_v23 = vpack.c.bf16 %v2176_v14, %v2175_v13  ;;  %v2215_v10 = vld [vmem:[%s5398_s23 + $0xb30] sm:$0xff]  ;;  %v2201_v13 = vld [vmem:[%s5398_s23 + $0xac0] sm:$0xff]  ;;  %v2202_v14 = vld [vmem:[%s5398_s23 + $0xac8] sm:$0xff] }
 0x239   : > { %4270 = vmatpush3.bf16.msra.mxu0 %v4269_v29  ;;  %v2348_v29 = vcombine.high %v1855_v16, %v1855_v16  ;;  %v2234_v16 = vld [vmem:[%s5398_s23 + $0xbc8] sm:$0xff] }
 0x23a   : > { %4272 = vmatprep.subr.bf16.mxu0 %v4271_v31  ;;  %v4321_v31 = vpack.c.bf16 %v2160_v25, %v2159_v22  ;;  %v2186_v22 = vld [vmem:[%s5398_s23 + $0xa48] sm:$0xff] }
 0x23b   : > { %4302 = vmatpush3.bf16.msra.mxu1 %v4301_v30  ;;  %v4289_v30 = vpack.c.bf16 %v2128_v21, %v2127_v20  ;;  %v4339_v20 = vpack.c.bf16 %v2202_v14, %v2201_v13  ;;  %v2185_v21 = vld [vmem:[%s5398_s23 + $0xa40] sm:$0xff]  ;;  %v2248_v13 = vld [vmem:[%s5398_s23 + $0xc38] sm:$0xff] }
 0x23c   : > { %4304 = vmatprep.subr.bf16.mxu1 %v4303_v35  ;;  %v2209_v35 = vld [vmem:[%s5398_s23 + $0xb00] sm:$0xff] }
 0x23d   : > { %4274 = vmatpush3.bf16.msra.mxu0 %v4273_v42  ;;  %v2227_v42 = vld [vmem:[%s5398_s23 + $0xb90] sm:$0xff]  ;;  %v4357_v45 = vpack.c.bf16 %v2210_v37, %v2209_v35  ;;  %v2220_v37 = vld [vmem:[%s5398_s23 + $0xb58] sm:$0xff] }
 0x23e   : > { %4276 = vmatprep.subr.bf16.mxu0 %v4275_v52  ;;  %v5805_v52 = vrot.slane %v2348_v29, %v5449_v19  ;;  %v2198_v19 = vld [vmem:[%s5398_s23 + $0xaa8] sm:$0xff]  ;;  %v2236_v29 = vld [vmem:[%s5398_s23 + $0xbd8] sm:$0xff]  ;;  %v2219_v35 = vld [vmem:[%s5398_s23 + $0xb50] sm:$0xff] }
 0x23f   : > { %4306 = vmatpush3.bf16.msra.mxu1 %v4305_v43  ;;  %v2228_v43 = vld [vmem:[%s5398_s23 + $0xb98] sm:$0xff] }
 0x240   : > { %4308 = vmatprep.subr.bf16.mxu1 %v4307_v47  ;;  %v2179_v47 = vld [vmem:[%s5398_s23 + $0xa10] sm:$0xff]  ;;  %v4359_v49 = vpack.c.bf16 %v2228_v43, %v2227_v42  ;;  %v2364_v57 = vcombine.high %v5805_v52, %v5805_v52  ;;  %v2237_v42 = vld [vmem:[%s5398_s23 + $0xbe0] sm:$0xff]  ;;  %v2238_v43 = vld [vmem:[%s5398_s23 + $0xbe8] sm:$0xff] }
 0x241   : > { %4278 = vmatpush3.bf16.msra.mxu0 %v4277_v54  ;;  %v2363_v54 = vcombine.high %v5800_v40, %v5800_v40  ;;  %v4329_v58 = vpack.c.bf16 %v2180_v48, %v2179_v47  ;;  %v2189_v47 = vld [vmem:[%s5398_s23 + $0xa60] sm:$0xff]  ;;  %v2190_v48 = vld [vmem:[%s5398_s23 + $0xa68] sm:$0xff] }
 0x242   : > { %4280 = vmatprep.subr.bf16.mxu0 %v4279_v56  ;;  %v2230_v56 = vld [vmem:[%s5398_s23 + $0xba8] sm:$0xff] }
 0x243   : > { %4310 = vmatpush3.bf16.msra.mxu1 %v4309_v55  ;;  %v2229_v55 = vld [vmem:[%s5398_s23 + $0xba0] sm:$0xff] }
 0x244   : > { %4312 = vmatprep.subr.bf16.mxu1 %v4311_v60  ;;  %v4331_v60 = vpack.c.bf16 %v2198_v19, %v2197_v53  ;;  %v4363_v0 = vpack.c.bf16 %v2230_v56, %v2229_v55  ;;  %v2207_v53 = vld [vmem:[%s5398_s23 + $0xaf0] sm:$0xff]  ;;  %v2208_v19 = vld [vmem:[%s5398_s23 + $0xaf8] sm:$0xff]  ;;  %v4349_v56 = vpack.c.bf16 %v2190_v48, %v2189_v47 }
 0x245   : > { %4282 = vmatpush3.bf16.msra.mxu0 %v4281_v4  ;;  %v2200_v4 = vld [vmem:[%s5398_s23 + $0xab8] sm:$0xff]  ;;  %v3321_v48 = vld [vmem:[%s5396_s20 + $0x50] sm:$0xff] }
 0x246   : > { %4284 = vmatprep.subr.bf16.mxu0 %v4283_v50  ;;  %v4335_v7 = vpack.c.bf16 %v2200_v4, %v2199_v3  ;;  %v2240_v55 = vld [vmem:[%s5398_s23 + $0xbf8] sm:$0xff]  ;;  %v2241_v3 = vld [vmem:[%s5398_s23 + $0xc00] sm:$0xff]  ;;  %v2242_v4 = vld [vmem:[%s5398_s23 + $0xc08] sm:$0xff] }
 0x247   : > { %4314 = vmatpush3.bf16.msra.mxu1 %v4313_v5  ;;  %v2232_v5 = vld [vmem:[%s5398_s23 + $0xbb8] sm:$0xff] }
 0x248   : > { %4316 = vmatprep.subr.bf16.mxu1 %v4315_v9  ;;  %v2184_v9 = vld [vmem:[%s5398_s23 + $0xa38] sm:$0xff] }
 0x249   : > { %4286 = vmatpush3.bf16.msra.mxu0 %v4285_v15  ;;  %v2233_v15 = vld [vmem:[%s5398_s23 + $0xbc0] sm:$0xff] }
 0x24a   : > { %4288 = vmatprep.subr.bf16.mxu0 %v4287_v18  ;;  %v4369_v18 = vpack.c.bf16 %v2216_v12, %v2215_v10  ;;  %v4371_v25 = vpack.c.bf16 %v2234_v16, %v2233_v15  ;;  %v4525_v10 = vmov 0.0   ;;  %v2247_v12 = vld [vmem:[%s5398_s23 + $0xc30] sm:$0xff]  ;;  %v3494_v15 = vld [vmem:[%s1838_s14] ss:$0 sm:$0xff] }
 0x24b   : > { %4318 = vmatpush3.bf16.msra.mxu1 %v4317_v17  ;;  %v4337_v17 = vpack.c.bf16 %v2184_v9, %v2183_v8  ;;  %v2245_v8 = vld [vmem:[%s5398_s23 + $0xc20] sm:$0xff]  ;;  %v2246_v9 = vld [vmem:[%s5398_s23 + $0xc28] sm:$0xff] }
 0x24c   : > { %4320 = vmatprep.subr.bf16.mxu1 %v4319_v23  ;;  %v2217_v23 = vld [vmem:[%s5398_s23 + $0xb40] sm:$0xff] }
 0x24d   : > { %4290 = vmatpush3.bf16.msra.mxu0 %v4289_v30  ;;  %v4341_v30 = vpack.c.bf16 %v2186_v22, %v2185_v21 }
 0x24e   : > { %4324 = vmatprep.subr.bf16.mxu0 %v4323_v32  ;;  %v4343_v32 = vpack.c.bf16 %v2204_v24, %v2203_v27  ;;  %v3313_v27 = vld [vmem:[%s5396_s20 + $0x10] sm:$0xff] }
 0x24f   : > { %4322 = vmatpush3.bf16.msra.mxu1 %v4321_v31  ;;  %v4373_v31 = vpack.c.bf16 %v2218_v26, %v2217_v23  ;;  %v3312_v26 = vld [vmem:[%s5396_s20 + $0x8] sm:$0xff] }
 0x250   : > { %4356 = vmatprep.subr.bf16.mxu1 %v4355_v36  ;;  %3024 = vmatmul.mubr.f32.vlgmr.msra.gmra.mrb[8].mxu0 %v5721_v63  ;;  %v2182_v63 = vld [vmem:[%s5398_s23 + $0xa28] sm:$0xff]  ;;  %v4375_v36 = vpack.c.bf16 %v2236_v29, %v2235_v28  ;;  %v3314_v28 = vld [vmem:[%s5396_s20 + $0x18] sm:$0xff] }
 0x251   : > { %4326 = vmatpush3.bf16.msra.mxu0 %v4325_v44  ;;  %3163 = vmatprep.mubr.f32.mxu0 %v2363_v54  ;;  %v4333_v50 = vpack.c.bf16 %v2182_v63, %v2181_v62  ;;  %v4345_v44 = vpack.c.bf16 %v2188_v34, %v2187_v33  ;;  %v2239_v54 = vld [vmem:[%s5398_s23 + $0xbf0] sm:$0xff]  ;;  %v4403_v29 = vpack.c.bf16 %v3314_v28, %v3313_v27  ;;  %v3310_v28 = vld [vmem:[#allocation2] sm:$0x3] }
 0x252   : > { %3094 = vmatmul.mubr.f32.vlgmr.msra.gmra.mrb[8].mxu1 %v5726_v2  ;;  %4328 = vmatprep.subr.bf16.mxu0 %v4327_v46  ;;  %v2231_v2 = vld [vmem:[%s5398_s23 + $0xbb0] sm:$0xff]  ;;  %v4347_v46 = vpack.c.bf16 %v2206_v39, %v2205_v38  ;;  %v4383_v62 = vpack.c.bf16 %v2240_v55, %v2239_v54 }
 0x253   : > { %4358 = vmatpush3.bf16.msra.mxu1 %v4357_v45  ;;  %3233 = vmatprep.mubr.f32.mxu1 %v2364_v57  ;;  %v4367_v11 = vpack.c.bf16 %v2232_v5, %v2231_v2  ;;  %v4377_v45 = vpack.c.bf16 %v2220_v37, %v2219_v35  ;;  %v4381_v57 = vpack.c.bf16 %v2222_v51, %v2221_v61  ;;  %v2223_v63 = vld [vmem:[%s5398_s23 + $0xb70] sm:$0xff]  ;;  %v4523_v5 = vmov 0.0|0.0  }
 0x254   : > { %4360 = vmatprep.subr.bf16.mxu1 %v4359_v49  ;;  %v4379_v49 = vpack.c.bf16 %v2238_v43, %v2237_v42  ;;  %v4385_v1 = vpack.c.bf16 %v2224_v41, %v2223_v63  ;;  %v4388_v2 = vpack.c.bf16 %v2242_v4, %v2241_v3  ;;  %v3317_v33 = vld [vmem:[%s5396_s20 + $0x30] sm:$0xff]  ;;  %v3318_v34 = vld [vmem:[%s5396_s20 + $0x38] sm:$0xff] }
 0x255   : > { %4330 = vmatpush3.bf16.msra.mxu0 %v4329_v58  ;;  %v4351_v58 = vpack.c.bf16 %v2208_v19, %v2207_v53  ;;  %v3322_v61 = vld [vmem:[%s5396_s20 + $0x58] sm:$0xff]  ;;  %v3323_v53 = vld [vmem:[%s5396_s20 + $0x60] sm:$0xff]  ;;  %v3324_v19 = vld [vmem:[%s5396_s20 + $0x68] sm:$0xff] }
 0x256   : > { %4332 = vmatprep.subr.bf16.mxu0 %v4331_v60  ;;  %v2192_v60 = vld [vmem:[%s5398_s23 + $0xa78] sm:$0xff]  ;;  %v4415_v51 = vpack.c.bf16 %v3322_v61, %v3321_v48  ;;  %v4418_v54 = vpack.c.bf16 %v3324_v19, %v3323_v53  ;;  %v3325_v55 = vld [vmem:[%s5396_s20 + $0x70] sm:$0xff] }
 0x257   : > { %4362 = vmatpush3.bf16.msra.mxu1 %v4361_v59  ;;  %v2191_v59 = vld [vmem:[%s5398_s23 + $0xa70] sm:$0xff] }
 0x258   : > { %4364 = vmatprep.subr.bf16.mxu1 %v4363_v0  ;;  %v4353_v0 = vpack.c.bf16 %v2192_v60, %v2191_v59 }
 0x259   : > { %4334 = vmatpush3.bf16.msra.mxu0 %v4333_v50  ;;  %v2243_v50 = vld [vmem:[%s5398_s23 + $0xc10] sm:$0xff] }
 0x25a   : > { %4336 = vmatprep.subr.bf16.mxu0 %v4335_v7 }
 0x25b   : > { %4366 = vmatpush3.bf16.msra.mxu1 %v4365_v6  ;;  %v2244_v6 = vld [vmem:[%s5398_s23 + $0xc18] sm:$0xff] }
 0x25c   : > { %4368 = vmatprep.subr.bf16.mxu1 %v4367_v11  ;;  %v4391_v7 = vpack.c.bf16 %v2244_v6, %v2243_v50  ;;  %v4394_v11 = vpack.c.bf16 %v2246_v9, %v2245_v8 }
 0x25d   : > { %4338 = vmatpush3.bf16.msra.mxu0 %v4337_v17 }
 0x25e   : > { %4340 = vmatprep.subr.bf16.mxu0 %v4339_v20 }
 0x25f   : > { %4370 = vmatpush3.bf16.msra.mxu1 %v4369_v18 }
 0x260   : > { %4372 = vmatprep.subr.bf16.mxu1 %v4371_v25  ;;  %v3311_v25 = vld [vmem:[%s5396_s20] sm:$0xff] }
 0x261   : > { %4342 = vmatpush3.bf16.msra.mxu0 %v4341_v30  ;;  %v4400_v24 = vpack.c.bf16 %v3312_v26, %v3311_v25  ;;  %v3315_v30 = vld [vmem:[%s5396_s20 + $0x20] sm:$0xff] }
 0x262   : > { %4344 = vmatprep.subr.bf16.mxu0 %v4343_v32 }
 0x263   : > { %4374 = vmatpush3.bf16.msra.mxu1 %v4373_v31  ;;  %v3316_v31 = vld [vmem:[%s5396_s20 + $0x28] sm:$0xff] }
 0x264   : > { %4376 = vmatprep.subr.bf16.mxu1 %v4375_v36  ;;  %v4406_v32 = vpack.c.bf16 %v3316_v31, %v3315_v30  ;;  %v4409_v36 = vpack.c.bf16 %v3318_v34, %v3317_v33  ;;  %v3498_v33 = vld [vmem:[%s5952_s4] ss:$0 sm:$0xff] (!%p3497_p11) }
 0x265   : > { %4346 = vmatpush3.bf16.msra.mxu0 %v4345_v44  ;;  %v3319_v44 = vld [vmem:[%s5396_s20 + $0x40] sm:$0xff] }
 0x266   : > { %4348 = vmatprep.subr.bf16.mxu0 %v4347_v46 }
 0x267   : > { %4378 = vmatpush3.bf16.msra.mxu1 %v4377_v45  ;;  %v3320_v45 = vld [vmem:[%s5396_s20 + $0x48] sm:$0xff] }
 0x268   : > { %4380 = vmatprep.subr.bf16.mxu1 %v4379_v49  ;;  %v4412_v47 = vpack.c.bf16 %v3320_v45, %v3319_v44 }
 0x269   : > { %4350 = vmatpush3.bf16.msra.mxu0 %v4349_v56  ;;  %v3326_v56 = vld [vmem:[%s5396_s20 + $0x78] sm:$0xff] }
 0x26a   : > { %4352 = vmatprep.subr.bf16.mxu0 %v4351_v58 }
 0x26b   : > { %4382 = vmatpush3.bf16.msra.mxu1 %v4381_v57  ;;  %v4421_v57 = vpack.c.bf16 %v3326_v56, %v3325_v55 }
 0x26c   : > { %4384 = vmatprep.subr.bf16.mxu1 %v4383_v62 }
 0x26d   : > { %4354 = vmatpush3.bf16.msra.mxu0 %v4353_v0 }
 0x26e   : > { %4387 = vmatprep.subr.bf16.mxu0 %v4523_v5 }
 0x26f   : > { %4386 = vmatpush3.bf16.msra.mxu1 %v4385_v1 }
 0x270   : > { %4399 = vmatprep.subr.bf16.mxu1 %v4523_v5  ;;  %3164 = vmatmul.mubr.f32.vlgmr.msra.gmra.mrb[10].mxu0 %v5800_v40  ;;  %v4397_v40 = vpack.c.bf16 %v2248_v13, %v2247_v12 }
 0x271   : > { %4389 = vmatpush3.bf16.msra.mxu0 %v4388_v2  ;;  %3965 = vmatprep.mubr.msk.f32.mxu0 %vm4524_vm0, %v4525_v10 }
 0x272   : > { %3234 = vmatmul.mubr.f32.vlgmr.msra.gmra.mrb[10].mxu1 %v5805_v52  ;;  %4390 = vmatprep.subr.bf16.mxu0 %v4523_v5  ;;  %v3495_v52 = vld.sshfl [vmem:[%s5948_s0 + $0x30] sm:$0x3 pattern:$0x76325410] }
 0x273   : > { %4000 = vmatprep.mubr.msk.f32.mxu1 %vm4524_vm0, %v4525_v10  ;;  %4401 = vmatpush3.bf16.msra.mxu1 %v4400_v24 }
 0x274   : > { %4402 = vmatprep.subr.bf16.mxu1 %v4523_v5 }
 0x275   : > { %4392 = vmatpush3.bf16.msra.mxu0 %v4391_v7 }
 0x276   : > { %4393 = vmatprep.subr.bf16.mxu0 %v4523_v5 }
 0x277   : > { %4404 = vmatpush3.bf16.msra.mxu1 %v4403_v29 }
 0x278   : > { %4405 = vmatprep.subr.bf16.mxu1 %v4523_v5 }
 0x279   : > { %4395 = vmatpush3.bf16.msra.mxu0 %v4394_v11 }
 0x27a   : > { %4396 = vmatprep.subr.bf16.mxu0 %v4523_v5 }
 0x27b   : > { %4407 = vmatpush3.bf16.msra.mxu1 %v4406_v32 }
 0x27c   : > { %4408 = vmatprep.subr.bf16.mxu1 %v4523_v5 }
 0x27d   : > { %4398 = vmatpush3.bf16.msra.mxu0 %v4397_v40 }
 0x27f   : > { %4410 = vmatpush3.bf16.msra.mxu1 %v4409_v36 }
 0x280   : > { %3966 = vmatmul.mubr.msk.f32.vlgmr.msra.gmra.mrb[12].mxu0 %vm2396_vm1, %v3495_v52  ;;  %4411 = vmatprep.subr.bf16.mxu1 %v4523_v5 }
 0x283   : > { %4413 = vmatpush3.bf16.msra.mxu1 %v4412_v47 }
 0x284   : > { %4414 = vmatprep.subr.bf16.mxu1 %v4523_v5 }
 0x287   : > { %4416 = vmatpush3.bf16.msra.mxu1 %v4415_v51 }
 0x288   : > { %4417 = vmatprep.subr.bf16.mxu1 %v4523_v5 }
 0x28b   : > { %4419 = vmatpush3.bf16.msra.mxu1 %v4418_v54 }
 0x28c   : > { %4420 = vmatprep.subr.bf16.mxu1 %v4523_v5 }
 0x28f   : > { %4422 = vmatpush3.bf16.msra.mxu1 %v4421_v57 }
 0x2a3   : > { %v3535_v14 = vpop.f32.mrb[0].mxu0 }
 0x2a4   : > { %v3536_v16 = vpop.f32.mrb[1].mxu0 }
 0x2a5   : > { %v3570_v17 = vpop.f32.mrb[0].mxu1  ;;  %v3537_v18 = vadd.f32 %v3536_v16, %v3535_v14 }
 0x2a6   : > { %v3571_v20 = vpop.f32.mrb[1].mxu1 }
 0x2a7   : > { %v3572_v21 = vadd.f32 %v3571_v20, %v3570_v17  ;;  %v2466_v22 = vadd.f32 %v3537_v18, %v3494_v15 }
 0x2a9   : > { %v2536_v23 = vadd.f32 %v3572_v21, %v2466_v22 }
 0x2c3   : > { %v3605_v35 = vpop.f32.mrb[2].mxu0 }
 0x2c4   : > { %v3606_v37 = vpop.f32.mrb[3].mxu0 }
 0x2c5   : > { %v3640_v38 = vpop.f32.mrb[2].mxu1  ;;  %v3607_v39 = vadd.f32 %v3606_v37, %v3605_v35 }
 0x2c6   : > { %v3641_v42 = vpop.f32.mrb[3].mxu1 }
 0x2c7   : > { %v3642_v43 = vadd.f32 %v3641_v42, %v3640_v38  ;;  %v2606_v46 = vadd.f32 %v3607_v39, %v2536_v23 }
 0x2c9   : > { %v2676_v49 = vadd.f32 %v3642_v43, %v2606_v46 }
 0x2e3   : > { %v3675_v58 = vpop.f32.mrb[4].mxu0 }
 0x2e4   : > { %v3676_v59 = vpop.f32.mrb[5].mxu0 }
 0x2e5   : > { %v3710_v60 = vpop.f32.mrb[4].mxu1  ;;  %v3677_v62 = vadd.f32 %v3676_v59, %v3675_v58 }
 0x2e6   : > { %v3711_v63 = vpop.f32.mrb[5].mxu1 }
 0x2e7   : > { %v3712_v41 = vadd.f32 %v3711_v63, %v3710_v60  ;;  %v2746_v0 = vadd.f32 %v3677_v62, %v2676_v49 }
 0x2e9   : > { %v2816_v1 = vadd.f32 %v3712_v41, %v2746_v0 }
 0x303   : > { %v3745_v3 = vpop.f32.mrb[6].mxu0 }
 0x304   : > { %v3746_v4 = vpop.f32.mrb[7].mxu0 }
 0x305   : > { %v3780_v2 = vpop.f32.mrb[6].mxu1  ;;  %v3747_v50 = vadd.f32 %v3746_v4, %v3745_v3 }
 0x306   : > { %v3781_v6 = vpop.f32.mrb[7].mxu1 }
 0x307   : > { %v3782_v7 = vadd.f32 %v3781_v6, %v3780_v2  ;;  %v2886_v8 = vadd.f32 %v3747_v50, %v2816_v1 }
 0x309   : > { %v2956_v5 = vadd.f32 %v3782_v7, %v2886_v8 }
 0x323   : > { %v3815_v9 = vpop.f32.mrb[8].mxu0 }
 0x324   : > { %v3816_v10 = vpop.f32.mrb[9].mxu0 }
 0x325   : > { %v3850_v11 = vpop.f32.mrb[8].mxu1  ;;  %v3817_v12 = vadd.f32 %v3816_v10, %v3815_v9 }
 0x326   : > { %v3851_v13 = vpop.f32.mrb[9].mxu1 }
 0x327   : > { %v3852_v40 = vadd.f32 %v3851_v13, %v3850_v11  ;;  %v3026_v52 = vadd.f32 %v3817_v12, %v2956_v5 }
 0x329   : > { %v3096_v14 = vadd.f32 %v3852_v40, %v3026_v52 }
 0x343   : > { %v3885_v15 = vpop.f32.mrb[10].mxu0 }
 0x344   : > { %v3886_v16 = vpop.f32.mrb[11].mxu0 }
 0x345   : > { %v3920_v17 = vpop.f32.mrb[10].mxu1  ;;  %v3887_v18 = vadd.f32 %v3886_v16, %v3885_v15 }
 0x346   : > { %v3921_v20 = vpop.f32.mrb[11].mxu1 }
 0x347   : > { %v3922_v21 = vadd.f32 %v3921_v20, %v3920_v17  ;;  %v3166_v22 = vadd.f32 %v3887_v18, %v3096_v14 }
 0x349   : > { %v3236_v23 = vadd.f32 %v3922_v21, %v3166_v22 }
 0x353   : > { %v3305_v25 = vpop.f32.mrb[12].mxu0 }
 0x354   : > { %v3306_v26 = vadd.f32 %v3305_v25, %v3236_v23  ;;  %v3967_v27 = vpop.f32.mrb[13].mxu0 }
 0x356   : > { %v3309_v24 = vmax.f32 %v3306_v26, 0.0 }
 0x358   : > { %4001 = vmatmul.mubr.f32.vlgmr.msra.gmra.mrb[12].mxu1 %v3309_v24 }
 0x428   : > { %3402 = sbr.rel (%p3497_p11) target bundleno = 1081 (0x439), region = 86 }
 0x42b   : > { %v3393_v29 = vpop.f32.mrb[12].mxu1 }
 0x42c   : > { %v3397_v30 = vadd.f32 %v3393_v29, %v3310_v28  ;;  %v4002_v31 = vpop.f32.mrb[13].mxu1 }
 0x42e   : > { %3398 = vst [vmem:[#allocation2] sm:$0x3] %v3397_v30 }
 0x435   : > { %v3403_v32 = vld [vmem:[#allocation2] sm:$0x3] }
 0x436   : > { %v3411_v34 = vadd.f32 %v3498_v33, %v3403_v32 }
 0x438   : > { %3412 = vst [vmem:[#allocation4] sm:$0x3] %v3411_v34 }
 0x439 PF: > { %p4429_p12 = scmp.eq.s32.totalorder %s4573_s21, 3  ;;  %s4526_s17 = smov [#allocation4]  }
 0x43a   : > { %s3420_s20 = sshll.u32 %s4526_s17, 4  ;;  %s3421_s20 = int_to_ptr.vmem [resolvable:$true] %s3420_s20 }
 0x43b   : > { %s4467_s23 = scalar_lea.vmem %s3421_s20, 32  ;;  %p4474_p2 = scmp.lt.s32.totalorder %s3421_s20, %s3421_s20 }
 0x43c   : > { %p4468_p13 = scmp.ne.s32.totalorder %s3421_s20, %s4467_s23  ;;  %p4475_p3 = scmp.lt.s32.totalorder %s4467_s23, %s4467_s23 }
 0x43e   : > { %p4469_p0 = pnand %p4468_p13, %p4429_p12  ;;  %p4476_p4 = por %p4475_p3, %p4474_p2 }
 0x440   : > { %p4470_p1 = pneg %p4469_p0 }
 0x442   : > { %p4477_p5 = pnand %p4476_p4, %p4470_p1 }
 0x444   : > { %4480 = shalt.err (!%p4477_p5)
}
 0x445   : > { %s4481_s26 = scalar_lea.hbm %s5953_s5, 32 }
 0x446   : > { %p4482_p6 = scmp.ne.s32.totalorder %s5953_s5, %s4481_s26  ;;  %p4487_p9 = scmp.lt.u32.totalorder %s4481_s26, %s5953_s5 }
 0x448   : > { %p4483_p7 = pnand %p4482_p6, %p4429_p12 }
 0x44a   : > { %p4484_p8 = pneg %p4483_p7 }
 0x44c   : > { %p4489_p10 = pnand %p4487_p9, %p4484_p8 }
 0x44e   : > { %4492 = shalt.err (!%p4489_p10)
}
 0x44f   : > { %4426 = dma.vmem_to_hbm [thread:$0]  (%p4429_p12), %s3421_s20, 32, %s5953_s5, [#allocation5]  }
 0x450   : > { %4506 = dma.done.wait (%p4429_p12), [#allocation5], 32  }
 0x451   : > { %4508 = vsyncadd (%p4429_p12), [#allocation5], 4294967264 }
 0x452 PF: > { %p13_p11 = scmp.ge.s32.totalorder %s4576_s22, 6   ;;  %s5954_s18 = smov %s4515_s19 }
 0x453   : > { %s5955_s19 = smov %s4585_s25  ;;  %s5956_s20 = smov %s4576_s22 }
 0x454   :  { %15 = sbr.rel (!%p13_p11) target bundleno = 2 (0x2), region = 124 }
 0x45b   :  { %3433 = vsyncpa [#allocation5], 1 }
 0x45c   :  { %3435 = vsyncpa [#allocation5 + $0x1], 1 }

</bundles_post_ra>
